<compile_context>
chip_gen: v6e
topology: v6e:2x2x1
jax: 0.10.0
libtpu: 0.0.40
codegen_flags: <defaults>
</compile_context>

<pallas_src>
import functools

import jax
import jax.numpy as jnp
from jax.experimental import pallas as pl
from jax.experimental.pallas import tpu as pltpu


# -----------------------------------------------------------------------------
# Fused kernel: SICModel + InterpretationModel + output heads, one batch / step.
# -----------------------------------------------------------------------------
def _fused_kernel(ci_ref, cd_ref,                          # scalar prefetch (SMEM, (K,) int32 each)
                  citing_ref, cited_ref, w2_ref,           # (1,N,S,Hd) x2, (Hd,Hd)
                  h1w_ref, h1b_ref,                        # (1,Hd), (1,1)
                  h2w_ref, h2b_ref, idx_ref,               # (1,S), (1,1), (K,1)
                  opw_ref, opb_ref,                        # (1,Hd), (1,1)
                  outw_ref, outb_ref,                      # (2,S), (2,1)
                  out_ref, a_ref,                          # (1,2,1), (1,K,1)
                  proj_c, proj_d):                         # VMEM scratch (N,S,Hd) x2
    N, S, Hd = proj_c.shape
    K = a_ref.shape[1]

    # --- SICModel, project-then-gather: one stacked (N*S,Hd)@(Hd,Hd) MXU push per
    #     side (dedupes repeated indices).  W_2 bias cancels in the span diff.
    proj_c[...] = jnp.dot(citing_ref[0].reshape(N * S, Hd), w2_ref[...],
                          preferred_element_type=jnp.float32).reshape(N, S, Hd)
    proj_d[...] = jnp.dot(cited_ref[0].reshape(N * S, Hd), w2_ref[...],
                          preferred_element_type=jnp.float32).reshape(N, S, Hd)

    # Gather the K spans with the scalar-prefetched indices and apply tanh.
    h = jnp.stack(
        [jnp.tanh(proj_c[ci_ref[k]] - proj_d[cd_ref[k]]) for k in range(K)],
        axis=0)                                                       # (K, S, Hd)

    # Hidden-dim reductions first (h1_t row and output_pre row), so the span
    # pooling below works on (K, S) rows — no (S, Hd) / (K, S, Hd) weighted copies.
    o = jnp.sum(h * h1w_ref[...], axis=-1) + h1b_ref[...]             # (K, S)
    hw = jnp.sum(h * opw_ref[...], axis=-1)                           # (K, S)

    # --- InterpretationModel: h2_t, index shift, softmax over the K spans.
    o2 = jnp.sum(o * h2w_ref[...], axis=-1, keepdims=True) + h2b_ref[...]   # (K, 1)
    o2 = o2 - idx_ref[...]
    m = jnp.max(o2, axis=0, keepdims=True)
    e = jnp.exp(o2 - m)
    a = e * pl.reciprocal(jnp.sum(e, axis=0, keepdims=True), approx=True)   # (K, 1)

    # --- Output heads: pool the hidden-reduced rows over spans, then Linear(S, 2).
    op_row = jnp.sum(a * hw, axis=0, keepdims=True) + opb_ref[...]          # (1, S)
    out = jnp.sum(op_row * outw_ref[...], axis=-1, keepdims=True) + outb_ref[...]  # (2, 1)

    out_ref[...] = out[None]                                          # (1, 2, 1)
    a_ref[...] = a[None]                                              # (1, K, 1)


def explainable_pallas(params, citing_emb, cited_emb, citing_cs_idx, cited_cs_idx):
    B, N, S, Hd = citing_emb.shape
    K = citing_cs_idx.shape[0]
    idx_col = citing_cs_idx.astype(jnp.float32).reshape(K, 1)

    grid_spec = pltpu.PrefetchScalarGridSpec(
        num_scalar_prefetch=2,
        grid=(B,),
        in_specs=[
            pl.BlockSpec((1, N, S, Hd), lambda b, ci, cd: (b, 0, 0, 0)),  # citing_emb
            pl.BlockSpec((1, N, S, Hd), lambda b, ci, cd: (b, 0, 0, 0)),  # cited_emb
            pl.BlockSpec((Hd, Hd), lambda b, ci, cd: (0, 0)),             # W_2^T
            pl.BlockSpec((1, Hd), lambda b, ci, cd: (0, 0)),              # h1_t weight row
            pl.BlockSpec((1, 1), lambda b, ci, cd: (0, 0)),               # h1_t bias
            pl.BlockSpec((1, S), lambda b, ci, cd: (0, 0)),               # h2_t weight row
            pl.BlockSpec((1, 1), lambda b, ci, cd: (0, 0)),               # h2_t bias
            pl.BlockSpec((K, 1), lambda b, ci, cd: (0, 0)),               # citing idx (float)
            pl.BlockSpec((1, Hd), lambda b, ci, cd: (0, 0)),              # output_pre weight row
            pl.BlockSpec((1, 1), lambda b, ci, cd: (0, 0)),               # output_pre bias
            pl.BlockSpec((2, S), lambda b, ci, cd: (0, 0)),               # output weight
            pl.BlockSpec((2, 1), lambda b, ci, cd: (0, 0)),               # output bias
        ],
        out_specs=(pl.BlockSpec((1, 2, 1), lambda b, ci, cd: (b, 0, 0)),
                   pl.BlockSpec((1, K, 1), lambda b, ci, cd: (b, 0, 0))),
        scratch_shapes=[pltpu.VMEM((N, S, Hd), jnp.float32),
                        pltpu.VMEM((N, S, Hd), jnp.float32)],
    )
    out3, a3 = pl.pallas_call(
        _fused_kernel,
        out_shape=(jax.ShapeDtypeStruct((B, 2, 1), jnp.float32),
                   jax.ShapeDtypeStruct((B, K, 1), jnp.float32)),
        grid_spec=grid_spec,
        compiler_params=pltpu.CompilerParams(
            dimension_semantics=("parallel",)),
    )(citing_cs_idx, cited_cs_idx,
      citing_emb, cited_emb, params["w2_t"],
      params["h1_w_row"], params["h1_b"],
      params["h2_w_row"], params["h2_b"], idx_col,
      params["op_w_row"], params["op_b"],
      params["out_w"], params["out_b_col"])
    return out3[:, :, 0], a3[:, :, 0]


# -----------------------------------------------------------------------------
# Full forward (glue + fused kernel)
# -----------------------------------------------------------------------------
def explainable_forward(params, citing_tok_ids, cited_tok_ids,
                        citing_cs_idx, cited_cs_idx):
    B, N, S = citing_tok_ids.shape
    Hd = params["emb_table"].shape[1]

    # TODO(synk): the pretrained RoBERTa encoder (`self.intermediate`) has no clean
    # Pallas one-liner; replaced by a deterministic embedding lookup with the
    # attention mask (tok_id != 1) zeroing pad positions, preserving shapes/dtypes.
    def toy_encoder(tok_ids_2d):
        mask = (tok_ids_2d != 1).astype(jnp.float32)
        emb = jnp.take(params["emb_table"], tok_ids_2d, axis=0)
        return emb * mask[..., None]

    citing_emb = toy_encoder(citing_tok_ids.reshape(-1, S)).reshape(B, N, S, Hd)
    cited_emb = toy_encoder(cited_tok_ids.reshape(-1, S)).reshape(B, N, S, Hd)

    return explainable_pallas(params, citing_emb, cited_emb,
                              citing_cs_idx, cited_cs_idx)


# -----------------------------------------------------------------------------
# Pure-JAX reference (same semantics as the PyTorch forward, for verification)
# -----------------------------------------------------------------------------
def reference_forward(params, citing_tok_ids, cited_tok_ids,
                      citing_cs_idx, cited_cs_idx):
    B, N, S = citing_tok_ids.shape
    Hd = params["emb_table"].shape[1]

    def toy_encoder(tok_ids_2d):
        mask = (tok_ids_2d != 1).astype(jnp.float32)
        emb = jnp.take(params["emb_table"], tok_ids_2d, axis=0)
        return emb * mask[..., None]

    citing_emb = toy_encoder(citing_tok_ids.reshape(-1, S)).reshape(B, N, S, Hd)
    cited_emb = toy_encoder(cited_tok_ids.reshape(-1, S)).reshape(B, N, S, Hd)

    W2c = citing_emb @ params["w2_t"] + params["b2_row"][0]
    W2d = cited_emb @ params["w2_t"] + params["b2_row"][0]
    h_ij = jnp.tanh(W2c[:, citing_cs_idx] - W2d[:, cited_cs_idx])          # (B,K,S,Hd)

    o = jnp.sum(h_ij * params["h1_w_row"][0], axis=-1) + params["h1_b"][0, 0]   # (B,K,S)
    o2 = jnp.sum(o * params["h2_w_row"][0], axis=-1) + params["h2_b"][0, 0]     # (B,K)
    o2 = o2 - citing_cs_idx.astype(jnp.float32)
    a_ij = jax.nn.softmax(o2, axis=1)                                           # (B,K)
    H = jnp.sum(a_ij[..., None, None] * h_ij, axis=1)                           # (B,S,Hd)
    op = jnp.sum(H * params["op_w_row"][0], axis=-1) + params["op_b"][0, 0]     # (B,S)
    out = op @ params["out_w"].T + params["out_b_col"][:, 0]                    # (B,2)
    return out, a_ij


# -----------------------------------------------------------------------------
# Main
# -----------------------------------------------------------------------------
if __name__ == "__main__":
    # sizes: tok_size is hardcoded to 512/2 = 256 in the module, so S must be 256.
    B, N, S, Hd, K, VOCAB = 2, 3, 256, 32, 4, 64

    key = jax.random.PRNGKey(0)
    keys = jax.random.split(key, 12)

    params = {
        "emb_table": 0.02 * jax.random.normal(keys[0], (VOCAB, Hd), jnp.float32),
        # SICModel.W_2: Linear(Hd, Hd)  (W_1 is defined in __init__ but unused in forward)
        "w2_t": 0.1 * jax.random.normal(keys[1], (Hd, Hd), jnp.float32),      # = W_2.weight.T
        "b2_row": 0.1 * jax.random.normal(keys[2], (1, Hd), jnp.float32),     # cancels in span diff
        # InterpretationModel.h1_t: Linear(Hd, 1)
        "h1_w_row": 0.1 * jax.random.normal(keys[3], (1, Hd), jnp.float32),
        "h1_b": 0.1 * jax.random.normal(keys[4], (1, 1), jnp.float32),
        # InterpretationModel.h2_t: Linear(256, 1)   (weight stored as (1, S) row)
        "h2_w_row": 0.1 * jax.random.normal(keys[5], (1, S), jnp.float32),
        "h2_b": 0.1 * jax.random.normal(keys[6], (1, 1), jnp.float32),
        # output_pre: Linear(Hd, 1)
        "op_w_row": 0.1 * jax.random.normal(keys[7], (1, Hd), jnp.float32),
        "op_b": 0.1 * jax.random.normal(keys[8], (1, 1), jnp.float32),
        # output: Linear(256, 2)   (weight stored as (2, S) = output.weight, bias as (2, 1))
        "out_w": 0.1 * jax.random.normal(keys[9], (2, S), jnp.float32),
        "out_b_col": 0.1 * jax.random.normal(keys[10], (2, 1), jnp.float32),
    }

    ik = jax.random.split(keys[11], 4)
    citing_tok_ids = jax.random.randint(ik[0], (B, N, S), 0, VOCAB, jnp.int32)
    cited_tok_ids = jax.random.randint(ik[1], (B, N, S), 0, VOCAB, jnp.int32)
    citing_cs_idx = jax.random.randint(ik[2], (K,), 0, N, jnp.int32)
    cited_cs_idx = jax.random.randint(ik[3], (K,), 0, N, jnp.int32)

    fwd = jax.jit(functools.partial(explainable_forward, params))
    out, a_ij = fwd(citing_tok_ids, cited_tok_ids, citing_cs_idx, cited_cs_idx)
    out = jax.block_until_ready(out)
    a_ij = jax.block_until_ready(a_ij)

    ref_out, ref_a = reference_forward(params, citing_tok_ids, cited_tok_ids,
                                       citing_cs_idx, cited_cs_idx)

    assert out.shape == (B, 2) and a_ij.shape == (B, K)
    assert jnp.allclose(out, ref_out, atol=2e-3, rtol=2e-3)
    assert jnp.allclose(a_ij, ref_a, atol=2e-3, rtol=2e-3)

    print("KERNEL_OK")
</pallas_src>

<mosaic_0001>
module attributes {stable_mosaic.version = 11 : i64} {
  func.func @_fused_kernel(%arg0: i32, %arg1: memref<4xi32, #tpu.memory_space<smem>>, %arg2: memref<4xi32, #tpu.memory_space<smem>>, %arg3: memref<1x3x256x32xf32, #tpu.memory_space<vmem>>, %arg4: memref<1x3x256x32xf32, #tpu.memory_space<vmem>>, %arg5: memref<32x32xf32, #tpu.memory_space<vmem>>, %arg6: memref<1x32xf32, #tpu.memory_space<vmem>>, %arg7: memref<1x1xf32, #tpu.memory_space<vmem>>, %arg8: memref<1x256xf32, #tpu.memory_space<vmem>>, %arg9: memref<1x1xf32, #tpu.memory_space<vmem>>, %arg10: memref<4x1xf32, #tpu.memory_space<vmem>>, %arg11: memref<1x32xf32, #tpu.memory_space<vmem>>, %arg12: memref<1x1xf32, #tpu.memory_space<vmem>>, %arg13: memref<2x256xf32, #tpu.memory_space<vmem>>, %arg14: memref<2x1xf32, #tpu.memory_space<vmem>>, %arg15: memref<1x2x1xf32, #tpu.memory_space<vmem>>, %arg16: memref<1x4x1xf32, #tpu.memory_space<vmem>>, %arg17: memref<3x256x32xf32, #tpu.memory_space<vmem>>, %arg18: memref<3x256x32xf32, #tpu.memory_space<vmem>>) attributes {dimension_semantics = [#tpu.dimension_semantics<parallel>], iteration_bounds = array<i64: 2>, scalar_prefetch = 2 : i64, scratch_operands = 2 : i64, tpu.core_type = #tpu.core_type<tc>, window_params = [{transform_indices = @transform_0, window_bounds = array<i64: 1, 3, 256, 32>}, {transform_indices = @transform_1, window_bounds = array<i64: 1, 3, 256, 32>}, {pipeline_mode = #tpu.pipeline_mode<synchronous>, transform_indices = @transform_2, window_bounds = array<i64: 32, 32>}, {pipeline_mode = #tpu.pipeline_mode<synchronous>, transform_indices = @transform_3, window_bounds = array<i64: 1, 32>}, {pipeline_mode = #tpu.pipeline_mode<synchronous>, transform_indices = @transform_4, window_bounds = array<i64: 1, 1>}, {pipeline_mode = #tpu.pipeline_mode<synchronous>, transform_indices = @transform_5, window_bounds = array<i64: 1, 256>}, {pipeline_mode = #tpu.pipeline_mode<synchronous>, transform_indices = @transform_6, window_bounds = array<i64: 1, 1>}, {pipeline_mode = #tpu.pipeline_mode<synchronous>, transform_indices = @transform_7, window_bounds = array<i64: 4, 1>}, {pipeline_mode = #tpu.pipeline_mode<synchronous>, transform_indices = @transform_8, window_bounds = array<i64: 1, 32>}, {pipeline_mode = #tpu.pipeline_mode<synchronous>, transform_indices = @transform_9, window_bounds = array<i64: 1, 1>}, {pipeline_mode = #tpu.pipeline_mode<synchronous>, transform_indices = @transform_10, window_bounds = array<i64: 2, 256>}, {pipeline_mode = #tpu.pipeline_mode<synchronous>, transform_indices = @transform_11, window_bounds = array<i64: 2, 1>}, {transform_indices = @transform_12, window_bounds = array<i64: 1, 2, 1>}, {transform_indices = @transform_13, window_bounds = array<i64: 1, 4, 1>}]} {
    %c0 = arith.constant 0 : index
    %c0_0 = arith.constant 0 : index
    %c0_1 = arith.constant 0 : index
    %c0_2 = arith.constant 0 : index
    %0 = vector.load %arg3[%c0, %c0_0, %c0_1, %c0_2] : memref<1x3x256x32xf32, #tpu.memory_space<vmem>>, vector<1x3x256x32xf32>
    %1 = vector.shape_cast %0 : vector<1x3x256x32xf32> to vector<3x256x32xf32>
    %2 = vector.shape_cast %1 : vector<3x256x32xf32> to vector<768x32xf32>
    %c0_3 = arith.constant 0 : index
    %c0_4 = arith.constant 0 : index
    %3 = vector.load %arg5[%c0_3, %c0_4] : memref<32x32xf32, #tpu.memory_space<vmem>>, vector<32x32xf32>
    %cst = arith.constant dense<0.000000e+00> : vector<768x32xf32>
    %4 = tpu.matmul %2, %3, %cst {dimension_numbers = #tpu.dot_dimension_numbers<[1], [0], [0], [1], [0, 0, 1, 1], [], []>} : vector<768x32xf32>, vector<32x32xf32>, vector<768x32xf32> -> vector<768x32xf32>
    %5 = vector.shape_cast %4 : vector<768x32xf32> to vector<3x256x32xf32>
    %c0_5 = arith.constant 0 : index
    %c0_6 = arith.constant 0 : index
    %c0_7 = arith.constant 0 : index
    %6 = vector.load %arg17[%c0_5, %c0_6, %c0_7] : memref<3x256x32xf32, #tpu.memory_space<vmem>>, vector<3x256x32xf32>
    tpu.vector_store %arg17[%c0_5, %c0_6, %c0_7], %5 {strides = array<i32>} : memref<3x256x32xf32, #tpu.memory_space<vmem>>, vector<3x256x32xf32>,
    %c0_8 = arith.constant 0 : index
    %c0_9 = arith.constant 0 : index
    %c0_10 = arith.constant 0 : index
    %c0_11 = arith.constant 0 : index
    %7 = vector.load %arg4[%c0_8, %c0_9, %c0_10, %c0_11] : memref<1x3x256x32xf32, #tpu.memory_space<vmem>>, vector<1x3x256x32xf32>
    %8 = vector.shape_cast %7 : vector<1x3x256x32xf32> to vector<3x256x32xf32>
    %9 = vector.shape_cast %8 : vector<3x256x32xf32> to vector<768x32xf32>
    %c0_12 = arith.constant 0 : index
    %c0_13 = arith.constant 0 : index
    %10 = vector.load %arg5[%c0_12, %c0_13] : memref<32x32xf32, #tpu.memory_space<vmem>>, vector<32x32xf32>
    %cst_14 = arith.constant dense<0.000000e+00> : vector<768x32xf32>
    %11 = tpu.matmul %9, %10, %cst_14 {dimension_numbers = #tpu.dot_dimension_numbers<[1], [0], [0], [1], [0, 0, 1, 1], [], []>} : vector<768x32xf32>, vector<32x32xf32>, vector<768x32xf32> -> vector<768x32xf32>
    %12 = vector.shape_cast %11 : vector<768x32xf32> to vector<3x256x32xf32>
    %c0_15 = arith.constant 0 : index
    %c0_16 = arith.constant 0 : index
    %c0_17 = arith.constant 0 : index
    %13 = vector.load %arg18[%c0_15, %c0_16, %c0_17] : memref<3x256x32xf32, #tpu.memory_space<vmem>>, vector<3x256x32xf32>
    tpu.vector_store %arg18[%c0_15, %c0_16, %c0_17], %12 {strides = array<i32>} : memref<3x256x32xf32, #tpu.memory_space<vmem>>, vector<3x256x32xf32>,
    %c0_18 = arith.constant 0 : index
    %14 = memref.load %arg1[%c0_18] : memref<4xi32, #tpu.memory_space<smem>>
    %15 = arith.index_cast %14 : i32 to index
    %c0_19 = arith.constant 0 : index
    %c0_20 = arith.constant 0 : index
    %16 = vector.load %arg17[%15, %c0_19, %c0_20] : memref<3x256x32xf32, #tpu.memory_space<vmem>>, vector<1x256x32xf32>
    %17 = vector.shape_cast %16 : vector<1x256x32xf32> to vector<256x32xf32>
    %c0_21 = arith.constant 0 : index
    %18 = memref.load %arg2[%c0_21] : memref<4xi32, #tpu.memory_space<smem>>
    %19 = arith.index_cast %18 : i32 to index
    %c0_22 = arith.constant 0 : index
    %c0_23 = arith.constant 0 : index
    %20 = vector.load %arg18[%19, %c0_22, %c0_23] : memref<3x256x32xf32, #tpu.memory_space<vmem>>, vector<1x256x32xf32>
    %21 = vector.shape_cast %20 : vector<1x256x32xf32> to vector<256x32xf32>
    %22 = arith.subf %17, %21 : vector<256x32xf32>
    %23 = math.tanh %22 : vector<256x32xf32>
    %c1 = arith.constant 1 : index
    %24 = memref.load %arg1[%c1] : memref<4xi32, #tpu.memory_space<smem>>
    %25 = arith.index_cast %24 : i32 to index
    %c0_24 = arith.constant 0 : index
    %c0_25 = arith.constant 0 : index
    %26 = vector.load %arg17[%25, %c0_24, %c0_25] : memref<3x256x32xf32, #tpu.memory_space<vmem>>, vector<1x256x32xf32>
    %27 = vector.shape_cast %26 : vector<1x256x32xf32> to vector<256x32xf32>
    %c1_26 = arith.constant 1 : index
    %28 = memref.load %arg2[%c1_26] : memref<4xi32, #tpu.memory_space<smem>>
    %29 = arith.index_cast %28 : i32 to index
    %c0_27 = arith.constant 0 : index
    %c0_28 = arith.constant 0 : index
    %30 = vector.load %arg18[%29, %c0_27, %c0_28] : memref<3x256x32xf32, #tpu.memory_space<vmem>>, vector<1x256x32xf32>
    %31 = vector.shape_cast %30 : vector<1x256x32xf32> to vector<256x32xf32>
    %32 = arith.subf %27, %31 : vector<256x32xf32>
    %33 = math.tanh %32 : vector<256x32xf32>
    %c2 = arith.constant 2 : index
    %34 = memref.load %arg1[%c2] : memref<4xi32, #tpu.memory_space<smem>>
    %35 = arith.index_cast %34 : i32 to index
    %c0_29 = arith.constant 0 : index
    %c0_30 = arith.constant 0 : index
    %36 = vector.load %arg17[%35, %c0_29, %c0_30] : memref<3x256x32xf32, #tpu.memory_space<vmem>>, vector<1x256x32xf32>
    %37 = vector.shape_cast %36 : vector<1x256x32xf32> to vector<256x32xf32>
    %c2_31 = arith.constant 2 : index
    %38 = memref.load %arg2[%c2_31] : memref<4xi32, #tpu.memory_space<smem>>
    %39 = arith.index_cast %38 : i32 to index
    %c0_32 = arith.constant 0 : index
    %c0_33 = arith.constant 0 : index
    %40 = vector.load %arg18[%39, %c0_32, %c0_33] : memref<3x256x32xf32, #tpu.memory_space<vmem>>, vector<1x256x32xf32>
    %41 = vector.shape_cast %40 : vector<1x256x32xf32> to vector<256x32xf32>
    %42 = arith.subf %37, %41 : vector<256x32xf32>
    %43 = math.tanh %42 : vector<256x32xf32>
    %c3 = arith.constant 3 : index
    %44 = memref.load %arg1[%c3] : memref<4xi32, #tpu.memory_space<smem>>
    %45 = arith.index_cast %44 : i32 to index
    %c0_34 = arith.constant 0 : index
    %c0_35 = arith.constant 0 : index
    %46 = vector.load %arg17[%45, %c0_34, %c0_35] : memref<3x256x32xf32, #tpu.memory_space<vmem>>, vector<1x256x32xf32>
    %47 = vector.shape_cast %46 : vector<1x256x32xf32> to vector<256x32xf32>
    %c3_36 = arith.constant 3 : index
    %48 = memref.load %arg2[%c3_36] : memref<4xi32, #tpu.memory_space<smem>>
    %49 = arith.index_cast %48 : i32 to index
    %c0_37 = arith.constant 0 : index
    %c0_38 = arith.constant 0 : index
    %50 = vector.load %arg18[%49, %c0_37, %c0_38] : memref<3x256x32xf32, #tpu.memory_space<vmem>>, vector<1x256x32xf32>
    %51 = vector.shape_cast %50 : vector<1x256x32xf32> to vector<256x32xf32>
    %52 = arith.subf %47, %51 : vector<256x32xf32>
    %53 = math.tanh %52 : vector<256x32xf32>
    %54 = vector.shape_cast %23 : vector<256x32xf32> to vector<1x256x32xf32>
    %55 = vector.shape_cast %33 : vector<256x32xf32> to vector<1x256x32xf32>
    %56 = vector.shape_cast %43 : vector<256x32xf32> to vector<1x256x32xf32>
    %57 = vector.shape_cast %53 : vector<256x32xf32> to vector<1x256x32xf32>
    %58 = tpu.concatenate %54, %55, %56, %57 in 0 : vector<1x256x32xf32>, vector<1x256x32xf32>, vector<1x256x32xf32>, vector<1x256x32xf32> -> vector<4x256x32xf32>
    %c0_39 = arith.constant 0 : index
    %c0_40 = arith.constant 0 : index
    %59 = vector.load %arg6[%c0_39, %c0_40] : memref<1x32xf32, #tpu.memory_space<vmem>>, vector<1x32xf32>
    %60 = vector.shape_cast %59 : vector<1x32xf32> to vector<1x1x32xf32>
    %61 = vector.broadcast %60 : vector<1x1x32xf32> to vector<4x256x32xf32>
    %62 = arith.mulf %58, %61 : vector<4x256x32xf32>
    %cst_41 = arith.constant dense<0.000000e+00> : vector<4x256xf32>
    %63 = vector.multi_reduction <add>, %62, %cst_41 [2] : vector<4x256x32xf32> to vector<4x256xf32>
    %c0_42 = arith.constant 0 : index
    %c0_43 = arith.constant 0 : index
    %64 = vector.load %arg7[%c0_42, %c0_43] : memref<1x1xf32, #tpu.memory_space<vmem>>, vector<1x1xf32>
    %65 = vector.broadcast %64 : vector<1x1xf32> to vector<4x256xf32>
    %66 = arith.addf %63, %65 : vector<4x256xf32>
    %c0_44 = arith.constant 0 : index
    %c0_45 = arith.constant 0 : index
    %67 = vector.load %arg11[%c0_44, %c0_45] : memref<1x32xf32, #tpu.memory_space<vmem>>, vector<1x32xf32>
    %68 = vector.shape_cast %67 : vector<1x32xf32> to vector<1x1x32xf32>
    %69 = vector.broadcast %68 : vector<1x1x32xf32> to vector<4x256x32xf32>
    %70 = arith.mulf %58, %69 : vector<4x256x32xf32>
    %cst_46 = arith.constant dense<0.000000e+00> : vector<4x256xf32>
    %71 = vector.multi_reduction <add>, %70, %cst_46 [2] : vector<4x256x32xf32> to vector<4x256xf32>
    %c0_47 = arith.constant 0 : index
    %c0_48 = arith.constant 0 : index
    %72 = vector.load %arg8[%c0_47, %c0_48] : memref<1x256xf32, #tpu.memory_space<vmem>>, vector<1x256xf32>
    %73 = vector.broadcast %72 : vector<1x256xf32> to vector<4x256xf32>
    %74 = arith.mulf %66, %73 : vector<4x256xf32>
    %cst_49 = arith.constant dense<0.000000e+00> : vector<4xf32>
    %75 = vector.multi_reduction <add>, %74, %cst_49 [1] : vector<4x256xf32> to vector<4xf32>
    %76 = vector.shape_cast %75 : vector<4xf32> to vector<4x1xf32>
    %c0_50 = arith.constant 0 : index
    %c0_51 = arith.constant 0 : index
    %77 = vector.load %arg9[%c0_50, %c0_51] : memref<1x1xf32, #tpu.memory_space<vmem>>, vector<1x1xf32>
    %78 = vector.broadcast %77 : vector<1x1xf32> to vector<4x1xf32>
    %79 = arith.addf %76, %78 : vector<4x1xf32>
    %c0_52 = arith.constant 0 : index
    %c0_53 = arith.constant 0 : index
    %80 = vector.load %arg10[%c0_52, %c0_53] : memref<4x1xf32, #tpu.memory_space<vmem>>, vector<4x1xf32>
    %81 = arith.subf %79, %80 : vector<4x1xf32>
    %cst_54 = arith.constant dense<0xFF800000> : vector<1xf32>
    %82 = vector.multi_reduction <maximumf>, %81, %cst_54 [0] : vector<4x1xf32> to vector<1xf32>
    %83 = vector.shape_cast %82 : vector<1xf32> to vector<1x1xf32>
    %84 = vector.broadcast %83 : vector<1x1xf32> to vector<4x1xf32>
    %85 = arith.subf %81, %84 : vector<4x1xf32>
    %86 = math.exp %85 : vector<4x1xf32>
    %cst_55 = arith.constant dense<0.000000e+00> : vector<1xf32>
    %87 = vector.multi_reduction <add>, %86, %cst_55 [0] : vector<4x1xf32> to vector<1xf32>
    %88 = vector.shape_cast %87 : vector<1xf32> to vector<1x1xf32>
    %89 = tpu.reciprocal %88 {approx = true} : vector<1x1xf32> -> vector<1x1xf32>
    %90 = vector.broadcast %89 : vector<1x1xf32> to vector<4x1xf32>
    %91 = arith.mulf %86, %90 : vector<4x1xf32>
    %92 = vector.broadcast %91 : vector<4x1xf32> to vector<4x256xf32>
    %93 = arith.mulf %92, %71 : vector<4x256xf32>
    %cst_56 = arith.constant dense<0.000000e+00> : vector<256xf32>
    %94 = vector.multi_reduction <add>, %93, %cst_56 [0] : vector<4x256xf32> to vector<256xf32>
    %95 = vector.shape_cast %94 : vector<256xf32> to vector<1x256xf32>
    %c0_57 = arith.constant 0 : index
    %c0_58 = arith.constant 0 : index
    %96 = vector.load %arg12[%c0_57, %c0_58] : memref<1x1xf32, #tpu.memory_space<vmem>>, vector<1x1xf32>
    %97 = vector.broadcast %96 : vector<1x1xf32> to vector<1x256xf32>
    %98 = arith.addf %95, %97 : vector<1x256xf32>
    %c0_59 = arith.constant 0 : index
    %c0_60 = arith.constant 0 : index
    %99 = vector.load %arg13[%c0_59, %c0_60] : memref<2x256xf32, #tpu.memory_space<vmem>>, vector<2x256xf32>
    %100 = vector.broadcast %98 : vector<1x256xf32> to vector<2x256xf32>
    %101 = arith.mulf %100, %99 : vector<2x256xf32>
    %cst_61 = arith.constant dense<0.000000e+00> : vector<2xf32>
    %102 = vector.multi_reduction <add>, %101, %cst_61 [1] : vector<2x256xf32> to vector<2xf32>
    %103 = vector.shape_cast %102 : vector<2xf32> to vector<2x1xf32>
    %c0_62 = arith.constant 0 : index
    %c0_63 = arith.constant 0 : index
    %104 = vector.load %arg14[%c0_62, %c0_63] : memref<2x1xf32, #tpu.memory_space<vmem>>, vector<2x1xf32>
    %105 = arith.addf %103, %104 : vector<2x1xf32>
    %106 = vector.shape_cast %105 : vector<2x1xf32> to vector<1x2x1xf32>
    %c0_64 = arith.constant 0 : index
    %c0_65 = arith.constant 0 : index
    %c0_66 = arith.constant 0 : index
    %107 = vector.load %arg15[%c0_64, %c0_65, %c0_66] : memref<1x2x1xf32, #tpu.memory_space<vmem>>, vector<1x2x1xf32>
    tpu.vector_store %arg15[%c0_64, %c0_65, %c0_66], %106 {strides = array<i32>} : memref<1x2x1xf32, #tpu.memory_space<vmem>>, vector<1x2x1xf32>,
    %108 = vector.shape_cast %91 : vector<4x1xf32> to vector<1x4x1xf32>
    %c0_67 = arith.constant 0 : index
    %c0_68 = arith.constant 0 : index
    %c0_69 = arith.constant 0 : index
    %109 = vector.load %arg16[%c0_67, %c0_68, %c0_69] : memref<1x4x1xf32, #tpu.memory_space<vmem>>, vector<1x4x1xf32>
    tpu.vector_store %arg16[%c0_67, %c0_68, %c0_69], %108 {strides = array<i32>} : memref<1x4x1xf32, #tpu.memory_space<vmem>>, vector<1x4x1xf32>,
    return
  }
  func.func @transform_0(%arg0: i32, %arg1: memref<4xi32, #tpu.memory_space<smem>>, %arg2: memref<4xi32, #tpu.memory_space<smem>>) -> (i32, i32, i32, i32) {
    %c0_i32 = arith.constant 0 : i32
    %c0_i32_0 = arith.constant 0 : i32
    %c0_i32_1 = arith.constant 0 : i32
    %c0_i32_2 = arith.constant 0 : i32
    return %arg0, %c0_i32, %c0_i32_0, %c0_i32_1 : i32, i32, i32, i32
  }
  func.func @transform_1(%arg0: i32, %arg1: memref<4xi32, #tpu.memory_space<smem>>, %arg2: memref<4xi32, #tpu.memory_space<smem>>) -> (i32, i32, i32, i32) {
    %c0_i32 = arith.constant 0 : i32
    %c0_i32_0 = arith.constant 0 : i32
    %c0_i32_1 = arith.constant 0 : i32
    %c0_i32_2 = arith.constant 0 : i32
    return %arg0, %c0_i32, %c0_i32_0, %c0_i32_1 : i32, i32, i32, i32
  }
  func.func @transform_2(%arg0: i32, %arg1: memref<4xi32, #tpu.memory_space<smem>>, %arg2: memref<4xi32, #tpu.memory_space<smem>>) -> (i32, i32) {
    %c0_i32 = arith.constant 0 : i32
    %c0_i32_0 = arith.constant 0 : i32
    %c0_i32_1 = arith.constant 0 : i32
    return %c0_i32, %c0_i32_0 : i32, i32
  }
  func.func @transform_3(%arg0: i32, %arg1: memref<4xi32, #tpu.memory_space<smem>>, %arg2: memref<4xi32, #tpu.memory_space<smem>>) -> (i32, i32) {
    %c0_i32 = arith.constant 0 : i32
    %c0_i32_0 = arith.constant 0 : i32
    %c0_i32_1 = arith.constant 0 : i32
    return %c0_i32, %c0_i32_0 : i32, i32
  }
  func.func @transform_4(%arg0: i32, %arg1: memref<4xi32, #tpu.memory_space<smem>>, %arg2: memref<4xi32, #tpu.memory_space<smem>>) -> (i32, i32) {
    %c0_i32 = arith.constant 0 : i32
    %c0_i32_0 = arith.constant 0 : i32
    %c0_i32_1 = arith.constant 0 : i32
    return %c0_i32, %c0_i32_0 : i32, i32
  }
  func.func @transform_5(%arg0: i32, %arg1: memref<4xi32, #tpu.memory_space<smem>>, %arg2: memref<4xi32, #tpu.memory_space<smem>>) -> (i32, i32) {
    %c0_i32 = arith.constant 0 : i32
    %c0_i32_0 = arith.constant 0 : i32
    %c0_i32_1 = arith.constant 0 : i32
    return %c0_i32, %c0_i32_0 : i32, i32
  }
  func.func @transform_6(%arg0: i32, %arg1: memref<4xi32, #tpu.memory_space<smem>>, %arg2: memref<4xi32, #tpu.memory_space<smem>>) -> (i32, i32) {
    %c0_i32 = arith.constant 0 : i32
    %c0_i32_0 = arith.constant 0 : i32
    %c0_i32_1 = arith.constant 0 : i32
    return %c0_i32, %c0_i32_0 : i32, i32
  }
  func.func @transform_7(%arg0: i32, %arg1: memref<4xi32, #tpu.memory_space<smem>>, %arg2: memref<4xi32, #tpu.memory_space<smem>>) -> (i32, i32) {
    %c0_i32 = arith.constant 0 : i32
    %c0_i32_0 = arith.constant 0 : i32
    %c0_i32_1 = arith.constant 0 : i32
    return %c0_i32, %c0_i32_0 : i32, i32
  }
  func.func @transform_8(%arg0: i32, %arg1: memref<4xi32, #tpu.memory_space<smem>>, %arg2: memref<4xi32, #tpu.memory_space<smem>>) -> (i32, i32) {
    %c0_i32 = arith.constant 0 : i32
    %c0_i32_0 = arith.constant 0 : i32
    %c0_i32_1 = arith.constant 0 : i32
    return %c0_i32, %c0_i32_0 : i32, i32
  }
  func.func @transform_9(%arg0: i32, %arg1: memref<4xi32, #tpu.memory_space<smem>>, %arg2: memref<4xi32, #tpu.memory_space<smem>>) -> (i32, i32) {
    %c0_i32 = arith.constant 0 : i32
    %c0_i32_0 = arith.constant 0 : i32
    %c0_i32_1 = arith.constant 0 : i32
    return %c0_i32, %c0_i32_0 : i32, i32
  }
  func.func @transform_10(%arg0: i32, %arg1: memref<4xi32, #tpu.memory_space<smem>>, %arg2: memref<4xi32, #tpu.memory_space<smem>>) -> (i32, i32) {
    %c0_i32 = arith.constant 0 : i32
    %c0_i32_0 = arith.constant 0 : i32
    %c0_i32_1 = arith.constant 0 : i32
    return %c0_i32, %c0_i32_0 : i32, i32
  }
  func.func @transform_11(%arg0: i32, %arg1: memref<4xi32, #tpu.memory_space<smem>>, %arg2: memref<4xi32, #tpu.memory_space<smem>>) -> (i32, i32) {
    %c0_i32 = arith.constant 0 : i32
    %c0_i32_0 = arith.constant 0 : i32
    %c0_i32_1 = arith.constant 0 : i32
    return %c0_i32, %c0_i32_0 : i32, i32
  }
  func.func @transform_12(%arg0: i32, %arg1: memref<4xi32, #tpu.memory_space<smem>>, %arg2: memref<4xi32, #tpu.memory_space<smem>>) -> (i32, i32, i32) {
    %c0_i32 = arith.constant 0 : i32
    %c0_i32_0 = arith.constant 0 : i32
    %c0_i32_1 = arith.constant 0 : i32
    return %arg0, %c0_i32, %c0_i32_0 : i32, i32, i32
  }
  func.func @transform_13(%arg0: i32, %arg1: memref<4xi32, #tpu.memory_space<smem>>, %arg2: memref<4xi32, #tpu.memory_space<smem>>) -> (i32, i32, i32) {
    %c0_i32 = arith.constant 0 : i32
    %c0_i32_0 = arith.constant 0 : i32
    %c0_i32_1 = arith.constant 0 : i32
    return %arg0, %c0_i32, %c0_i32_0 : i32, i32, i32
  }
}

</mosaic_0001>

<bundles_post_ra>
// kernel: explainable_forward.1
= control target key start
LH: loop header
LB: loop body
LE: loop exit
PB: predicated region body
PF: predicated region fallthrough
CT: control target
= control target key end

     0   :  { %s11702_s0 = inlined_call_operand.vmem [shape: s32[4], index: 0, kind: input, shape index: {}]   ;;  %s11703_s2 = inlined_call_operand.vmem [shape: f32[2,3,256,32], index: 2, kind: input, shape index: {}]   ;;  %s11704_s3 = inlined_call_operand.vmem [shape: f32[2,3,256,32], index: 3, kind: input, shape index: {}]   ;;  %s11705_s4 = inlined_call_operand.vmem [shape: f32[32,32], index: 4, kind: input, shape index: {}]   ;;  %s11706_s5 = inlined_call_operand.vmem [shape: f32[1,32], index: 5, kind: input, shape index: {}]   ;;  %s11707_s7 = inlined_call_operand.vmem [shape: f32[1,256], index: 7, kind: input, shape index: {}]   ;;  %s11708_s9 = inlined_call_operand.vmem [shape: f32[4,1], index: 9, kind: input, shape index: {}]   ;;  %s11709_s10 = inlined_call_operand.vmem [shape: f32[1,32], index: 10, kind: input, shape index: {}]   ;;  %s11710_s12 = inlined_call_operand.vmem [shape: f32[2,256], index: 12, kind: input, shape index: {}]   ;;  %s11711_s13 = inlined_call_operand.vmem [shape: f32[2,1], index: 13, kind: input, shape index: {}]   ;;  %s11712_s14 = inlined_call_operand.vmem [shape: f32[2,2,1], index: 14, kind: output, shape index: {0}]   ;;  %s11713_s15 = inlined_call_operand.vmem [shape: f32[2,4,1], index: 15, kind: output, shape index: {1}]   ;;  %s11714_s1 = inlined_call_operand.vmem [shape: s32[4], index: 1, kind: input, shape index: {}]   ;;  %s11715_s6 = inlined_call_operand.<no memory space> [shape: f32[1,1], index: 6, kind: input, shape index: {}]   ;;  %s11716_s8 = inlined_call_operand.<no memory space> [shape: f32[1,1], index: 8, kind: input, shape index: {}]   ;;  %s11717_s11 = inlined_call_operand.<no memory space> [shape: f32[1,1], index: 11, kind: input, shape index: {}]  }
   0x1   :  { %11842 = sst [smem:[#allocation234_spill]] %s11712_s14  ;;  %s21_s20 = sshll.u32 %s11702_s0, 4  ;;  %v29_v0 = vstv %s11715_s6  ;;  %v31_v1 = vstv %s11716_s8  ;;  %v33_v2 = vstv %s11717_s11  ;;  %s22_s20 = int_to_ptr.vmem [resolvable:$true] %s21_s20 }
   0x2   :  { %s25_s23 = sshll.u32 %s11714_s1, 4  ;;  %30 = vst [vmem:[#allocation7] sm:$0x1] %v29_v0  ;;  %32 = vst [vmem:[#allocation8] sm:$0x1] %v31_v1  ;;  %s7719_s0 = scalar_lea.vmem %s22_s20, 16  ;;  %s26_s23 = int_to_ptr.vmem [resolvable:$true] %s25_s23 }
   0x3   :  { %34 = vst [vmem:[#allocation9] sm:$0x1] %v33_v2  ;;  %p7720_p0 = scmp.ne.s32.totalorder %s22_s20, %s7719_s0  ;;  %p7724_p1 = scmp.lt.s32.totalorder %s22_s20, %s22_s20 }
   0x4   :  { %p7725_p2 = scmp.lt.s32.totalorder %s7719_s0, %s7719_s0 }
   0x6   :  { %p7726_p3 = por %p7725_p2, %p7724_p1 }
   0x8   :  { %p7727_p4 = pnand %p7726_p3, %p7720_p0 }
   0xa   :  { %7730 = shalt.err (!%p7727_p4)  }
   0xb   :  { %s7753_s1 = smov [#allocation5]   ;;  %s7731_s6 = scalar_lea.vmem %s26_s23, 16 }
   0xc   :  { %24 = dma.vmem_to_smem %s22_s20, 16, %s7753_s1, [#allocation4] }
   0xd   :  { %p7732_p5 = scmp.ne.s32.totalorder %s26_s23, %s7731_s6  ;;  %p7736_p6 = scmp.lt.s32.totalorder %s26_s23, %s26_s23 }
   0xe   :  { %p7737_p7 = scmp.lt.s32.totalorder %s7731_s6, %s7731_s6 }
  0x10   :  { %p7738_p8 = por %p7737_p7, %p7736_p6 }
  0x12   :  { %p7739_p9 = pnand %p7738_p8, %p7732_p5 }
  0x14   :  { %7742 = shalt.err (!%p7739_p9)  }
  0x15   :  { %s7754_s8 = smov [#allocation6]  }
  0x16   :  { %28 = dma.vmem_to_smem %s26_s23, 16, %s7754_s8, [#allocation4] }
  0x17   :  { %7747 = dma.done.wait [#allocation4], 32 }
  0x18   :  { %7748 = vsyncadd [#allocation4], 4294967264 }
  0x19   :  { %36 = sfence }
  0x1a   :  { %s7851_s11 = smov 0  }
  0x1b LB: > { %s6716_s14 = sadd.s32 4294967295, %s7751_s11   ;;  %p6720_p10 = scmp.ge.s32.totalorder %s7751_s11, 1  ;;  %s7751_s11 = sphi %s7851_s11, %s42_s11  }
  0x1c   : > { %p418_p11 = scmp.lt.s32.totalorder %s7751_s11, 3 }
  0x1e   : > { %p419_p12 = pnand %p6720_p10, %p418_p11 }
  0x20   : > { %422 = sbr.rel (%p419_p12) target bundleno = 2018 (0x7e2), region = 68 }
  0x25   : > { %v587_v3 = vld [vmem:[%s11705_s4 + $0x18] sm:$0xff]  ;;  %v586_v4 = vld [vmem:[%s11705_s4 + $0x10] sm:$0xff]  ;;  %p470_p13 = scmp.lt.s32.totalorder %s6716_s14, 1  ;;  %v585_v5 = vld [vmem:[%s11705_s4 + $0x8] sm:$0xff]  ;;  %vm588_vm0 = vcmask 261120   ;;  %s2547_s0 = sld [smem:[#allocation5]] }
  0x26   : > { %7138 = vmatprep.subr.mxu0 %v587_v3  ;;  %7290 = vmatprep.subr.mxu1 %v587_v3  ;;  %v584_v6 = vld [vmem:[%s11705_s4] sm:$0xff]  ;;  %s2582_s1 = sld [smem:[#allocation6]]  ;;  %vm5078_vm1 = vcmask 130112   ;;  %vm5085_vm2 = vcmask 195712   ;;  %vm5092_vm3 = vcmask 261312   ;;  %vm5099_vm4 = vcmask 326912  }
  0x27   : > { %7139 = vmatpush3.msra.mxu0 %v587_v3  ;;  %7291 = vmatpush3.msra.mxu1 %v587_v3  ;;  %s12493_s14 = smov (!%p470_p13, %s6716_s14), 1  ;;  %s8593_s18 = sld [smem:[#allocation5 + $0x1]]  ;;  %vm5106_vm5 = vcmask 392512   ;;  %vm5113_vm6 = vcmask 458112   ;;  %vm11838_vm7 = vcmask 523712   ;;  %vm5127_vm8 = vcmask 589312  }
  0x28   : > { %7140 = vmatprep.subr.mxu0 %v586_v4  ;;  %7292 = vmatprep.subr.mxu1 %v586_v4  ;;  %s7442_s22 = smul.u32 768, %s12493_s14  ;;  %s8595_s19 = sld [smem:[#allocation6 + $0x1]]  ;;  %vm5134_vm9 = vcmask 654912   ;;  %vm5141_vm10 = vcmask 720512   ;;  %vm5148_vm11 = vcmask 786112   ;;  %vm5155_vm12 = vcmask 851712  }
  0x29   : > { %7141 = vmatpush3.msra.mxu0 %v586_v4  ;;  %7293 = vmatpush3.msra.mxu1 %v586_v4  ;;  %s8827_s24 = sld [smem:[#allocation5 + $0x2]]  ;;  %vm11841_vm13 = vcmask 917312   ;;  %vm5169_vm14 = vcmask 982912   ;;  %vm5176_vm15 = vcmask 1048512  }
  0x2a   : > { %7142 = vmatprep.subr.mxu0 %v585_v5  ;;  %7294 = vmatprep.subr.mxu1 %v585_v5  ;;  %s7877_s25 = scalar_lea.vmem %s11703_s2, %s7442_s22  ;;  %s7882_s28 = scalar_lea.vmem %s11704_s3, %s7442_s22 }
  0x2b   : > { %7143 = vmatpush3.msra.mxu0 %v585_v5  ;;  %7295 = vmatpush3.msra.mxu1 %v585_v5  ;;  %v488_v7 = vld [vmem:[%s7877_s25] sm:$0xff]  ;;  %v489_v9 = vld [vmem:[%s7877_s25 + $0x8] sm:$0xff]  ;;  %v490_v11 = vld [vmem:[%s7877_s25 + $0x10] sm:$0xff]  ;;  %s6917_s6 = sshll.u32 %s2547_s0, 8 }
  0x2c   : > { %7144 = vmatprep.subr.mxu0 %v584_v6  ;;  %7296 = vmatprep.subr.mxu1 %v584_v6  ;;  %v1518_v8 = vld [vmem:[%s7882_s28] sm:$0xff]  ;;  %v1519_v10 = vld [vmem:[%s7882_s28 + $0x8] sm:$0xff]  ;;  %v1520_v12 = vld [vmem:[%s7882_s28 + $0x10] sm:$0xff]  ;;  %s6918_s8 = sshll.u32 %s2582_s1, 8  ;;  %s8460_s29 = scalar_lea.vmem [#allocation2], %s6917_s6 }
  0x2d   : > { %7145 = vmatpush3.msra.mxu0 %v584_v6  ;;  %7146 = vmatprep.mubr.msk.f32.mxu0 %vm588_vm0, %v488_v7  ;;  %v491_v13 = vld [vmem:[%s7877_s25 + $0x18] sm:$0xff]  ;;  %v492_v15 = vld [vmem:[%s7877_s25 + $0x20] sm:$0xff]  ;;  %v493_v17 = vld [vmem:[%s7877_s25 + $0x28] sm:$0xff]  ;;  %s8463_s30 = scalar_lea.vmem [#allocation3], %s6918_s8  ;;  %s6920_s20 = sshll.u32 %s8593_s18, 8 }
  0x2e   : > { %7297 = vmatpush3.msra.mxu1 %v584_v6  ;;  %7298 = vmatprep.mubr.msk.f32.mxu1 %vm588_vm0, %v1518_v8  ;;  %v1521_v14 = vld [vmem:[%s7882_s28 + $0x18] sm:$0xff]  ;;  %v1522_v16 = vld [vmem:[%s7882_s28 + $0x20] sm:$0xff]  ;;  %v1523_v18 = vld [vmem:[%s7882_s28 + $0x28] sm:$0xff]  ;;  %s6922_s21 = sshll.u32 %s8595_s19, 8  ;;  %s8649_s22 = scalar_lea.vmem [#allocation2], %s6920_s20 }
  0x2f   : > { %7147 = vmatmul.mubr.msk.f32.vlgmr.msra.gmra.mxu0 %vm588_vm0, %v489_v9  ;;  %7299 = vmatmul.mubr.msk.f32.vlgmr.msra.gmra.mxu1 %vm588_vm0, %v1519_v10  ;;  %v494_v19 = vld [vmem:[%s7877_s25 + $0x30] sm:$0xff]  ;;  %v495_v21 = vld [vmem:[%s7877_s25 + $0x38] sm:$0xff]  ;;  %v496_v23 = vld [vmem:[%s7877_s25 + $0x40] sm:$0xff]  ;;  %s8652_s23 = scalar_lea.vmem [#allocation3], %s6922_s21  ;;  %s6924_s26 = sshll.u32 %s8827_s24, 8 }
  0x30   : > { %7149 = vmatprep.mubr.msk.f32.mxu0 %vm588_vm0, %v490_v11  ;;  %7301 = vmatprep.mubr.msk.f32.mxu1 %vm588_vm0, %v1520_v12  ;;  %v1524_v20 = vld [vmem:[%s7882_s28 + $0x30] sm:$0xff]  ;;  %v1525_v22 = vld [vmem:[%s7882_s28 + $0x38] sm:$0xff]  ;;  %v1526_v24 = vld [vmem:[%s7882_s28 + $0x40] sm:$0xff]  ;;  %s9080_s8 = sld [smem:[#allocation5 + $0x3]] }
  0x31   : > { %v497_v25 = vld [vmem:[%s7877_s25 + $0x48] sm:$0xff]  ;;  %v498_v27 = vld [vmem:[%s7877_s25 + $0x50] sm:$0xff]  ;;  %v499_v29 = vld [vmem:[%s7877_s25 + $0x58] sm:$0xff]  ;;  %s12491_s21 = sld [smem:[#allocation234_spill]] }
  0x32   : > { %v1527_v26 = vld [vmem:[%s7882_s28 + $0x48] sm:$0xff]  ;;  %v1528_v28 = vld [vmem:[%s7882_s28 + $0x50] sm:$0xff]  ;;  %v1529_v30 = vld [vmem:[%s7882_s28 + $0x58] sm:$0xff] }
  0x33   : > { %7150 = vmatmul.mubr.msk.f32.gmra.mxu0 %vm588_vm0, %v491_v13  ;;  %7302 = vmatmul.mubr.msk.f32.gmra.mxu1 %vm588_vm0, %v1521_v14  ;;  %v500_v31 = vld [vmem:[%s7877_s25 + $0x60] sm:$0xff]  ;;  %v501_v33 = vld [vmem:[%s7877_s25 + $0x68] sm:$0xff]  ;;  %v502_v35 = vld [vmem:[%s7877_s25 + $0x70] sm:$0xff] }
  0x34   : > { %7152 = vmatprep.mubr.msk.f32.mxu0 %vm588_vm0, %v492_v15  ;;  %7304 = vmatprep.mubr.msk.f32.mxu1 %vm588_vm0, %v1522_v16  ;;  %v1530_v32 = vld [vmem:[%s7882_s28 + $0x60] sm:$0xff]  ;;  %v1531_v34 = vld [vmem:[%s7882_s28 + $0x68] sm:$0xff]  ;;  %v1532_v36 = vld [vmem:[%s7882_s28 + $0x70] sm:$0xff] }
  0x35   : > { %v503_v37 = vld [vmem:[%s7877_s25 + $0x78] sm:$0xff]  ;;  %v504_v39 = vld [vmem:[%s7877_s25 + $0x80] sm:$0xff]  ;;  %v505_v41 = vld [vmem:[%s7877_s25 + $0x88] sm:$0xff] }
  0x36   : > { %v1533_v38 = vld [vmem:[%s7882_s28 + $0x78] sm:$0xff]  ;;  %v1534_v40 = vld [vmem:[%s7882_s28 + $0x80] sm:$0xff]  ;;  %v1535_v42 = vld [vmem:[%s7882_s28 + $0x88] sm:$0xff] }
  0x37   : > { %7153 = vmatmul.mubr.msk.f32.gmra.mxu0 %vm588_vm0, %v493_v17  ;;  %7305 = vmatmul.mubr.msk.f32.gmra.mxu1 %vm588_vm0, %v1523_v18  ;;  %v506_v43 = vld [vmem:[%s7877_s25 + $0x90] sm:$0xff]  ;;  %v507_v45 = vld [vmem:[%s7877_s25 + $0x98] sm:$0xff]  ;;  %v508_v47 = vld [vmem:[%s7877_s25 + $0xa0] sm:$0xff] }
  0x38   : > { %7155 = vmatprep.mubr.msk.f32.mxu0 %vm588_vm0, %v494_v19  ;;  %7307 = vmatprep.mubr.msk.f32.mxu1 %vm588_vm0, %v1524_v20  ;;  %v1536_v44 = vld [vmem:[%s7882_s28 + $0x90] sm:$0xff]  ;;  %v1537_v46 = vld [vmem:[%s7882_s28 + $0x98] sm:$0xff]  ;;  %v1538_v48 = vld [vmem:[%s7882_s28 + $0xa0] sm:$0xff] }
  0x39   : > { %v509_v49 = vld [vmem:[%s7877_s25 + $0xa8] sm:$0xff]  ;;  %v510_v51 = vld [vmem:[%s7877_s25 + $0xb0] sm:$0xff]  ;;  %v511_v53 = vld [vmem:[%s7877_s25 + $0xb8] sm:$0xff] }
  0x3a   : > { %v1539_v50 = vld [vmem:[%s7882_s28 + $0xa8] sm:$0xff]  ;;  %v1540_v52 = vld [vmem:[%s7882_s28 + $0xb0] sm:$0xff]  ;;  %v1541_v54 = vld [vmem:[%s7882_s28 + $0xb8] sm:$0xff] }
  0x3b   : > { %7156 = vmatmul.mubr.msk.f32.gmra.mxu0 %vm588_vm0, %v495_v21  ;;  %7308 = vmatmul.mubr.msk.f32.gmra.mxu1 %vm588_vm0, %v1525_v22  ;;  %v512_v55 = vld [vmem:[%s7877_s25 + $0xc0] sm:$0xff]  ;;  %v513_v57 = vld [vmem:[%s7877_s25 + $0xc8] sm:$0xff]  ;;  %v514_v59 = vld [vmem:[%s7877_s25 + $0xd0] sm:$0xff] }
  0x3c   : > { %7158 = vmatprep.mubr.msk.f32.mxu0 %vm588_vm0, %v496_v23  ;;  %7310 = vmatprep.mubr.msk.f32.mxu1 %vm588_vm0, %v1526_v24  ;;  %v1542_v56 = vld [vmem:[%s7882_s28 + $0xc0] sm:$0xff]  ;;  %v1543_v58 = vld [vmem:[%s7882_s28 + $0xc8] sm:$0xff]  ;;  %v1544_v60 = vld [vmem:[%s7882_s28 + $0xd0] sm:$0xff] }
  0x3d   : > { %v515_v61 = vld [vmem:[%s7877_s25 + $0xd8] sm:$0xff]  ;;  %v516_v63 = vld [vmem:[%s7877_s25 + $0xe0] sm:$0xff]  ;;  %v517_v1 = vld [vmem:[%s7877_s25 + $0xe8] sm:$0xff] }
  0x3e   : > { %v1545_v62 = vld [vmem:[%s7882_s28 + $0xd8] sm:$0xff]  ;;  %v1546_v0 = vld [vmem:[%s7882_s28 + $0xe0] sm:$0xff]  ;;  %v1547_v2 = vld [vmem:[%s7882_s28 + $0xe8] sm:$0xff] }
  0x3f   : > { %7159 = vmatmul.mubr.msk.f32.gmra.mxu0 %vm588_vm0, %v497_v25  ;;  %7311 = vmatmul.mubr.msk.f32.gmra.mxu1 %vm588_vm0, %v1527_v26  ;;  %v518_v3 = vld [vmem:[%s7877_s25 + $0xf0] sm:$0xff]  ;;  %v519_v5 = vld [vmem:[%s7877_s25 + $0xf8] sm:$0xff]  ;;  %v520_v7 = vld [vmem:[%s7877_s25 + $0x100] sm:$0xff] }
  0x40   : > { %7161 = vmatprep.mubr.msk.f32.mxu0 %vm588_vm0, %v498_v27  ;;  %7313 = vmatprep.mubr.msk.f32.mxu1 %vm588_vm0, %v1528_v28  ;;  %v1548_v4 = vld [vmem:[%s7882_s28 + $0xf0] sm:$0xff]  ;;  %v1549_v6 = vld [vmem:[%s7882_s28 + $0xf8] sm:$0xff]  ;;  %v1550_v8 = vld [vmem:[%s7882_s28 + $0x100] sm:$0xff] }
  0x41   : > { %v521_v9 = vld [vmem:[%s7877_s25 + $0x108] sm:$0xff]  ;;  %v522_v11 = vld [vmem:[%s7877_s25 + $0x110] sm:$0xff]  ;;  %v523_v13 = vld [vmem:[%s7877_s25 + $0x118] sm:$0xff] }
  0x42   : > { %v1551_v10 = vld [vmem:[%s7882_s28 + $0x108] sm:$0xff]  ;;  %v1552_v12 = vld [vmem:[%s7882_s28 + $0x110] sm:$0xff]  ;;  %v1553_v14 = vld [vmem:[%s7882_s28 + $0x118] sm:$0xff] }
  0x43   : > { %7162 = vmatmul.mubr.msk.f32.gmra.mxu0 %vm588_vm0, %v499_v29  ;;  %7314 = vmatmul.mubr.msk.f32.gmra.mxu1 %vm588_vm0, %v1529_v30  ;;  %v524_v15 = vld [vmem:[%s7877_s25 + $0x120] sm:$0xff]  ;;  %v525_v17 = vld [vmem:[%s7877_s25 + $0x128] sm:$0xff]  ;;  %v526_v19 = vld [vmem:[%s7877_s25 + $0x130] sm:$0xff] }
  0x44   : > { %7164 = vmatprep.mubr.msk.f32.mxu0 %vm588_vm0, %v500_v31  ;;  %7316 = vmatprep.mubr.msk.f32.mxu1 %vm588_vm0, %v1530_v32  ;;  %v1554_v16 = vld [vmem:[%s7882_s28 + $0x120] sm:$0xff]  ;;  %v1555_v18 = vld [vmem:[%s7882_s28 + $0x128] sm:$0xff]  ;;  %v1556_v20 = vld [vmem:[%s7882_s28 + $0x130] sm:$0xff] }
  0x45   : > { %v527_v21 = vld [vmem:[%s7877_s25 + $0x138] sm:$0xff]  ;;  %v528_v23 = vld [vmem:[%s7877_s25 + $0x140] sm:$0xff]  ;;  %v529_v25 = vld [vmem:[%s7877_s25 + $0x148] sm:$0xff] }
  0x46   : > { %v1557_v22 = vld [vmem:[%s7882_s28 + $0x138] sm:$0xff]  ;;  %v1558_v24 = vld [vmem:[%s7882_s28 + $0x140] sm:$0xff]  ;;  %v1559_v26 = vld [vmem:[%s7882_s28 + $0x148] sm:$0xff] }
  0x47   : > { %7165 = vmatmul.mubr.msk.f32.gmra.mxu0 %vm588_vm0, %v501_v33  ;;  %7317 = vmatmul.mubr.msk.f32.gmra.mxu1 %vm588_vm0, %v1531_v34  ;;  %v530_v27 = vld [vmem:[%s7877_s25 + $0x150] sm:$0xff]  ;;  %v531_v29 = vld [vmem:[%s7877_s25 + $0x158] sm:$0xff]  ;;  %v532_v31 = vld [vmem:[%s7877_s25 + $0x160] sm:$0xff] }
  0x48   : > { %7167 = vmatprep.mubr.msk.f32.mxu0 %vm588_vm0, %v502_v35  ;;  %7319 = vmatprep.mubr.msk.f32.mxu1 %vm588_vm0, %v1532_v36  ;;  %v1560_v28 = vld [vmem:[%s7882_s28 + $0x150] sm:$0xff]  ;;  %v1561_v30 = vld [vmem:[%s7882_s28 + $0x158] sm:$0xff]  ;;  %v1562_v32 = vld [vmem:[%s7882_s28 + $0x160] sm:$0xff] }
  0x49   : > { %v533_v33 = vld [vmem:[%s7877_s25 + $0x168] sm:$0xff]  ;;  %v534_v35 = vld [vmem:[%s7877_s25 + $0x170] sm:$0xff] }
  0x4a   : > { %v1563_v34 = vld [vmem:[%s7882_s28 + $0x168] sm:$0xff]  ;;  %v1564_v36 = vld [vmem:[%s7882_s28 + $0x170] sm:$0xff] }
  0x4b   : > { %7168 = vmatmul.mubr.msk.f32.gmra.mxu0 %vm588_vm0, %v503_v37  ;;  %7320 = vmatmul.mubr.msk.f32.gmra.mxu1 %vm588_vm0, %v1533_v38  ;;  %v535_v37 = vld [vmem:[%s7877_s25 + $0x178] sm:$0xff] }
  0x4c   : > { %7170 = vmatprep.mubr.msk.f32.mxu0 %vm588_vm0, %v504_v39  ;;  %7322 = vmatprep.mubr.msk.f32.mxu1 %vm588_vm0, %v1534_v40  ;;  %v1565_v38 = vld [vmem:[%s7882_s28 + $0x178] sm:$0xff]  ;;  %v536_v39 = vld [vmem:[%s7877_s25 + $0x180] sm:$0xff] }
  0x4d   : > { %v1566_v40 = vld [vmem:[%s7882_s28 + $0x180] sm:$0xff] }
  0x4f   : > { %7171 = vmatmul.mubr.msk.f32.gmra.mxu0 %vm588_vm0, %v505_v41  ;;  %7323 = vmatmul.mubr.msk.f32.gmra.mxu1 %vm588_vm0, %v1535_v42  ;;  %v537_v41 = vld [vmem:[%s7877_s25 + $0x188] sm:$0xff] }
  0x50   : > { %7173 = vmatprep.mubr.msk.f32.mxu0 %vm588_vm0, %v506_v43  ;;  %7325 = vmatprep.mubr.msk.f32.mxu1 %vm588_vm0, %v1536_v44  ;;  %v1567_v42 = vld [vmem:[%s7882_s28 + $0x188] sm:$0xff]  ;;  %v538_v43 = vld [vmem:[%s7877_s25 + $0x190] sm:$0xff] }
  0x51   : > { %v1568_v44 = vld [vmem:[%s7882_s28 + $0x190] sm:$0xff] }
  0x53   : > { %7174 = vmatmul.mubr.msk.f32.gmra.mxu0 %vm588_vm0, %v507_v45  ;;  %7326 = vmatmul.mubr.msk.f32.gmra.mxu1 %vm588_vm0, %v1537_v46  ;;  %v539_v45 = vld [vmem:[%s7877_s25 + $0x198] sm:$0xff] }
  0x54   : > { %7176 = vmatprep.mubr.msk.f32.mxu0 %vm588_vm0, %v508_v47  ;;  %7328 = vmatprep.mubr.msk.f32.mxu1 %vm588_vm0, %v1538_v48  ;;  %v1569_v46 = vld [vmem:[%s7882_s28 + $0x198] sm:$0xff]  ;;  %v540_v47 = vld [vmem:[%s7877_s25 + $0x1a0] sm:$0xff] }
  0x55   : > { %v1570_v48 = vld [vmem:[%s7882_s28 + $0x1a0] sm:$0xff] }
  0x57   : > { %7177 = vmatmul.mubr.msk.f32.gmra.mxu0 %vm588_vm0, %v509_v49  ;;  %7329 = vmatmul.mubr.msk.f32.gmra.mxu1 %vm588_vm0, %v1539_v50  ;;  %v541_v49 = vld [vmem:[%s7877_s25 + $0x1a8] sm:$0xff] }
  0x58   : > { %7179 = vmatprep.mubr.msk.f32.mxu0 %vm588_vm0, %v510_v51  ;;  %7331 = vmatprep.mubr.msk.f32.mxu1 %vm588_vm0, %v1540_v52  ;;  %v1571_v50 = vld [vmem:[%s7882_s28 + $0x1a8] sm:$0xff]  ;;  %v542_v51 = vld [vmem:[%s7877_s25 + $0x1b0] sm:$0xff] }
  0x59   : > { %v1572_v52 = vld [vmem:[%s7882_s28 + $0x1b0] sm:$0xff] }
  0x5b   : > { %7180 = vmatmul.mubr.msk.f32.gmra.mxu0 %vm588_vm0, %v511_v53  ;;  %7332 = vmatmul.mubr.msk.f32.gmra.mxu1 %vm588_vm0, %v1541_v54  ;;  %v543_v53 = vld [vmem:[%s7877_s25 + $0x1b8] sm:$0xff] }
  0x5c   : > { %7182 = vmatprep.mubr.msk.f32.mxu0 %vm588_vm0, %v512_v55  ;;  %7334 = vmatprep.mubr.msk.f32.mxu1 %vm588_vm0, %v1542_v56  ;;  %v1573_v54 = vld [vmem:[%s7882_s28 + $0x1b8] sm:$0xff]  ;;  %v544_v55 = vld [vmem:[%s7877_s25 + $0x1c0] sm:$0xff] }
  0x5d   : > { %v1574_v56 = vld [vmem:[%s7882_s28 + $0x1c0] sm:$0xff] }
  0x5f   : > { %7183 = vmatmul.mubr.msk.f32.gmra.mxu0 %vm588_vm0, %v513_v57  ;;  %7335 = vmatmul.mubr.msk.f32.gmra.mxu1 %vm588_vm0, %v1543_v58  ;;  %v545_v57 = vld [vmem:[%s7877_s25 + $0x1c8] sm:$0xff] }
  0x60   : > { %7185 = vmatprep.mubr.msk.f32.mxu0 %vm588_vm0, %v514_v59  ;;  %7337 = vmatprep.mubr.msk.f32.mxu1 %vm588_vm0, %v1544_v60  ;;  %v1575_v58 = vld [vmem:[%s7882_s28 + $0x1c8] sm:$0xff]  ;;  %v546_v59 = vld [vmem:[%s7877_s25 + $0x1d0] sm:$0xff] }
  0x61   : > { %v1576_v60 = vld [vmem:[%s7882_s28 + $0x1d0] sm:$0xff] }
  0x63   : > { %7186 = vmatmul.mubr.msk.f32.gmra.mxu0 %vm588_vm0, %v515_v61  ;;  %7338 = vmatmul.mubr.msk.f32.gmra.mxu1 %vm588_vm0, %v1545_v62  ;;  %v547_v61 = vld [vmem:[%s7877_s25 + $0x1d8] sm:$0xff] }
  0x64   : > { %7188 = vmatprep.mubr.msk.f32.mxu0 %vm588_vm0, %v516_v63  ;;  %7340 = vmatprep.mubr.msk.f32.mxu1 %vm588_vm0, %v1546_v0  ;;  %v1577_v62 = vld [vmem:[%s7882_s28 + $0x1d8] sm:$0xff]  ;;  %v548_v63 = vld [vmem:[%s7877_s25 + $0x1e0] sm:$0xff] }
  0x65   : > { %v1578_v0 = vld [vmem:[%s7882_s28 + $0x1e0] sm:$0xff] }
  0x67   : > { %7189 = vmatmul.mubr.msk.f32.gmra.mxu0 %vm588_vm0, %v517_v1  ;;  %7341 = vmatmul.mubr.msk.f32.gmra.mxu1 %vm588_vm0, %v1547_v2  ;;  %v549_v1 = vld [vmem:[%s7877_s25 + $0x1e8] sm:$0xff] }
  0x68   : > { %7191 = vmatprep.mubr.msk.f32.mxu0 %vm588_vm0, %v518_v3  ;;  %7343 = vmatprep.mubr.msk.f32.mxu1 %vm588_vm0, %v1548_v4  ;;  %v1579_v2 = vld [vmem:[%s7882_s28 + $0x1e8] sm:$0xff]  ;;  %v550_v3 = vld [vmem:[%s7877_s25 + $0x1f0] sm:$0xff] }
  0x69   : > { %v1580_v4 = vld [vmem:[%s7882_s28 + $0x1f0] sm:$0xff] }
  0x6b   : > { %7192 = vmatmul.mubr.msk.f32.gmra.mxu0 %vm588_vm0, %v519_v5  ;;  %7344 = vmatmul.mubr.msk.f32.gmra.mxu1 %vm588_vm0, %v1549_v6  ;;  %v551_v5 = vld [vmem:[%s7877_s25 + $0x1f8] sm:$0xff] }
  0x6c   : > { %7194 = vmatprep.mubr.msk.f32.mxu0 %vm588_vm0, %v520_v7  ;;  %7346 = vmatprep.mubr.msk.f32.mxu1 %vm588_vm0, %v1550_v8  ;;  %v1581_v6 = vld [vmem:[%s7882_s28 + $0x1f8] sm:$0xff]  ;;  %v552_v7 = vld [vmem:[%s7877_s25 + $0x200] sm:$0xff] }
  0x6d   : > { %v1582_v8 = vld [vmem:[%s7882_s28 + $0x200] sm:$0xff] }
  0x6f   : > { %7195 = vmatmul.mubr.msk.f32.gmra.mxu0 %vm588_vm0, %v521_v9  ;;  %7347 = vmatmul.mubr.msk.f32.gmra.mxu1 %vm588_vm0, %v1551_v10  ;;  %v553_v9 = vld [vmem:[%s7877_s25 + $0x208] sm:$0xff] }
  0x70   : > { %7197 = vmatprep.mubr.msk.f32.mxu0 %vm588_vm0, %v522_v11  ;;  %7349 = vmatprep.mubr.msk.f32.mxu1 %vm588_vm0, %v1552_v12  ;;  %v1583_v10 = vld [vmem:[%s7882_s28 + $0x208] sm:$0xff]  ;;  %v554_v11 = vld [vmem:[%s7877_s25 + $0x210] sm:$0xff] }
  0x71   : > { %v1584_v12 = vld [vmem:[%s7882_s28 + $0x210] sm:$0xff] }
  0x73   : > { %7198 = vmatmul.mubr.msk.f32.gmra.mxu0 %vm588_vm0, %v523_v13  ;;  %7350 = vmatmul.mubr.msk.f32.gmra.mxu1 %vm588_vm0, %v1553_v14  ;;  %v555_v13 = vld [vmem:[%s7877_s25 + $0x218] sm:$0xff] }
  0x74   : > { %7200 = vmatprep.mubr.msk.f32.mxu0 %vm588_vm0, %v524_v15  ;;  %7352 = vmatprep.mubr.msk.f32.mxu1 %vm588_vm0, %v1554_v16  ;;  %v1585_v14 = vld [vmem:[%s7882_s28 + $0x218] sm:$0xff]  ;;  %v556_v15 = vld [vmem:[%s7877_s25 + $0x220] sm:$0xff] }
  0x75   : > { %v1586_v16 = vld [vmem:[%s7882_s28 + $0x220] sm:$0xff] }
  0x77   : > { %7201 = vmatmul.mubr.msk.f32.gmra.mxu0 %vm588_vm0, %v525_v17  ;;  %7353 = vmatmul.mubr.msk.f32.gmra.mxu1 %vm588_vm0, %v1555_v18  ;;  %v557_v17 = vld [vmem:[%s7877_s25 + $0x228] sm:$0xff] }
  0x78   : > { %7203 = vmatprep.mubr.msk.f32.mxu0 %vm588_vm0, %v526_v19  ;;  %7355 = vmatprep.mubr.msk.f32.mxu1 %vm588_vm0, %v1556_v20  ;;  %v1587_v18 = vld [vmem:[%s7882_s28 + $0x228] sm:$0xff]  ;;  %v558_v19 = vld [vmem:[%s7877_s25 + $0x230] sm:$0xff] }
  0x79   : > { %v1588_v20 = vld [vmem:[%s7882_s28 + $0x230] sm:$0xff] }
  0x7b   : > { %7204 = vmatmul.mubr.msk.f32.gmra.mxu0 %vm588_vm0, %v527_v21  ;;  %7356 = vmatmul.mubr.msk.f32.gmra.mxu1 %vm588_vm0, %v1557_v22  ;;  %v559_v21 = vld [vmem:[%s7877_s25 + $0x238] sm:$0xff] }
  0x7c   : > { %7206 = vmatprep.mubr.msk.f32.mxu0 %vm588_vm0, %v528_v23  ;;  %7358 = vmatprep.mubr.msk.f32.mxu1 %vm588_vm0, %v1558_v24  ;;  %v1589_v22 = vld [vmem:[%s7882_s28 + $0x238] sm:$0xff]  ;;  %v560_v23 = vld [vmem:[%s7877_s25 + $0x240] sm:$0xff] }
  0x7d   : > { %v1590_v24 = vld [vmem:[%s7882_s28 + $0x240] sm:$0xff] }
  0x7f   : > { %7207 = vmatmul.mubr.msk.f32.gmra.mxu0 %vm588_vm0, %v529_v25  ;;  %7359 = vmatmul.mubr.msk.f32.gmra.mxu1 %vm588_vm0, %v1559_v26  ;;  %v561_v25 = vld [vmem:[%s7877_s25 + $0x248] sm:$0xff] }
  0x80   : > { %7209 = vmatprep.mubr.msk.f32.mxu0 %vm588_vm0, %v530_v27  ;;  %7361 = vmatprep.mubr.msk.f32.mxu1 %vm588_vm0, %v1560_v28  ;;  %v1591_v26 = vld [vmem:[%s7882_s28 + $0x248] sm:$0xff]  ;;  %v562_v27 = vld [vmem:[%s7877_s25 + $0x250] sm:$0xff] }
  0x81   : > { %v1592_v28 = vld [vmem:[%s7882_s28 + $0x250] sm:$0xff] }
  0x83   : > { %7210 = vmatmul.mubr.msk.f32.gmra.mxu0 %vm588_vm0, %v531_v29  ;;  %7362 = vmatmul.mubr.msk.f32.gmra.mxu1 %vm588_vm0, %v1561_v30  ;;  %v563_v29 = vld [vmem:[%s7877_s25 + $0x258] sm:$0xff] }
  0x84   : > { %7212 = vmatprep.mubr.msk.f32.mxu0 %vm588_vm0, %v532_v31  ;;  %7364 = vmatprep.mubr.msk.f32.mxu1 %vm588_vm0, %v1562_v32  ;;  %v1593_v30 = vld [vmem:[%s7882_s28 + $0x258] sm:$0xff]  ;;  %v564_v31 = vld [vmem:[%s7877_s25 + $0x260] sm:$0xff] }
  0x85   : > { %v1594_v32 = vld [vmem:[%s7882_s28 + $0x260] sm:$0xff] }
  0x87   : > { %7213 = vmatmul.mubr.msk.f32.gmra.mxu0 %vm588_vm0, %v533_v33  ;;  %7365 = vmatmul.mubr.msk.f32.gmra.mxu1 %vm588_vm0, %v1563_v34  ;;  %v565_v33 = vld [vmem:[%s7877_s25 + $0x268] sm:$0xff] }
  0x88   : > { %7215 = vmatprep.mubr.msk.f32.mxu0 %vm588_vm0, %v534_v35  ;;  %7367 = vmatprep.mubr.msk.f32.mxu1 %vm588_vm0, %v1564_v36  ;;  %v1595_v34 = vld [vmem:[%s7882_s28 + $0x268] sm:$0xff]  ;;  %v566_v35 = vld [vmem:[%s7877_s25 + $0x270] sm:$0xff] }
  0x89   : > { %v1596_v36 = vld [vmem:[%s7882_s28 + $0x270] sm:$0xff] }
  0x8b   : > { %7216 = vmatmul.mubr.msk.f32.gmra.mxu0 %vm588_vm0, %v535_v37  ;;  %7368 = vmatmul.mubr.msk.f32.gmra.mxu1 %vm588_vm0, %v1565_v38  ;;  %v567_v37 = vld [vmem:[%s7877_s25 + $0x278] sm:$0xff] }
  0x8c   : > { %7218 = vmatprep.mubr.msk.f32.mxu0 %vm588_vm0, %v536_v39  ;;  %7370 = vmatprep.mubr.msk.f32.mxu1 %vm588_vm0, %v1566_v40  ;;  %v1597_v38 = vld [vmem:[%s7882_s28 + $0x278] sm:$0xff]  ;;  %v568_v39 = vld [vmem:[%s7877_s25 + $0x280] sm:$0xff] }
  0x8d   : > { %v1598_v40 = vld [vmem:[%s7882_s28 + $0x280] sm:$0xff] }
  0x8f   : > { %7219 = vmatmul.mubr.msk.f32.gmra.mxu0 %vm588_vm0, %v537_v41  ;;  %7371 = vmatmul.mubr.msk.f32.gmra.mxu1 %vm588_vm0, %v1567_v42  ;;  %v569_v41 = vld [vmem:[%s7877_s25 + $0x288] sm:$0xff] }
  0x90   : > { %7221 = vmatprep.mubr.msk.f32.mxu0 %vm588_vm0, %v538_v43  ;;  %7373 = vmatprep.mubr.msk.f32.mxu1 %vm588_vm0, %v1568_v44  ;;  %v1599_v42 = vld [vmem:[%s7882_s28 + $0x288] sm:$0xff]  ;;  %v570_v43 = vld [vmem:[%s7877_s25 + $0x290] sm:$0xff] }
  0x91   : > { %v1600_v44 = vld [vmem:[%s7882_s28 + $0x290] sm:$0xff] }
  0x93   : > { %7222 = vmatmul.mubr.msk.f32.gmra.mxu0 %vm588_vm0, %v539_v45  ;;  %7374 = vmatmul.mubr.msk.f32.gmra.mxu1 %vm588_vm0, %v1569_v46  ;;  %v571_v45 = vld [vmem:[%s7877_s25 + $0x298] sm:$0xff] }
  0x94   : > { %7224 = vmatprep.mubr.msk.f32.mxu0 %vm588_vm0, %v540_v47  ;;  %7376 = vmatprep.mubr.msk.f32.mxu1 %vm588_vm0, %v1570_v48  ;;  %v1601_v46 = vld [vmem:[%s7882_s28 + $0x298] sm:$0xff]  ;;  %v572_v47 = vld [vmem:[%s7877_s25 + $0x2a0] sm:$0xff] }
  0x95   : > { %v1602_v48 = vld [vmem:[%s7882_s28 + $0x2a0] sm:$0xff] }
  0x97   : > { %7225 = vmatmul.mubr.msk.f32.gmra.mxu0 %vm588_vm0, %v541_v49  ;;  %7377 = vmatmul.mubr.msk.f32.gmra.mxu1 %vm588_vm0, %v1571_v50  ;;  %v573_v49 = vld [vmem:[%s7877_s25 + $0x2a8] sm:$0xff] }
  0x98   : > { %7227 = vmatprep.mubr.msk.f32.mxu0 %vm588_vm0, %v542_v51  ;;  %7379 = vmatprep.mubr.msk.f32.mxu1 %vm588_vm0, %v1572_v52  ;;  %v1603_v50 = vld [vmem:[%s7882_s28 + $0x2a8] sm:$0xff]  ;;  %v574_v51 = vld [vmem:[%s7877_s25 + $0x2b0] sm:$0xff] }
  0x99   : > { %v1604_v52 = vld [vmem:[%s7882_s28 + $0x2b0] sm:$0xff] }
  0x9b   : > { %7228 = vmatmul.mubr.msk.f32.gmra.mxu0 %vm588_vm0, %v543_v53  ;;  %7380 = vmatmul.mubr.msk.f32.gmra.mxu1 %vm588_vm0, %v1573_v54  ;;  %v575_v53 = vld [vmem:[%s7877_s25 + $0x2b8] sm:$0xff] }
  0x9c   : > { %7230 = vmatprep.mubr.msk.f32.mxu0 %vm588_vm0, %v544_v55  ;;  %7382 = vmatprep.mubr.msk.f32.mxu1 %vm588_vm0, %v1574_v56  ;;  %v1605_v54 = vld [vmem:[%s7882_s28 + $0x2b8] sm:$0xff]  ;;  %v576_v55 = vld [vmem:[%s7877_s25 + $0x2c0] sm:$0xff] }
  0x9d   : > { %v1606_v56 = vld [vmem:[%s7882_s28 + $0x2c0] sm:$0xff] }
  0x9f   : > { %7231 = vmatmul.mubr.msk.f32.gmra.mxu0 %vm588_vm0, %v545_v57  ;;  %7383 = vmatmul.mubr.msk.f32.gmra.mxu1 %vm588_vm0, %v1575_v58  ;;  %v577_v57 = vld [vmem:[%s7877_s25 + $0x2c8] sm:$0xff] }
  0xa0   : > { %7233 = vmatprep.mubr.msk.f32.mxu0 %vm588_vm0, %v546_v59  ;;  %7385 = vmatprep.mubr.msk.f32.mxu1 %vm588_vm0, %v1576_v60  ;;  %v1607_v58 = vld [vmem:[%s7882_s28 + $0x2c8] sm:$0xff]  ;;  %v578_v59 = vld [vmem:[%s7877_s25 + $0x2d0] sm:$0xff] }
  0xa1   : > { %v1608_v60 = vld [vmem:[%s7882_s28 + $0x2d0] sm:$0xff] }
  0xa3   : > { %7234 = vmatmul.mubr.msk.f32.gmra.mxu0 %vm588_vm0, %v547_v61  ;;  %7386 = vmatmul.mubr.msk.f32.gmra.mxu1 %vm588_vm0, %v1577_v62  ;;  %v579_v61 = vld [vmem:[%s7877_s25 + $0x2d8] sm:$0xff] }
  0xa4   : > { %7236 = vmatprep.mubr.msk.f32.mxu0 %vm588_vm0, %v548_v63  ;;  %7388 = vmatprep.mubr.msk.f32.mxu1 %vm588_vm0, %v1578_v0  ;;  %v1609_v62 = vld [vmem:[%s7882_s28 + $0x2d8] sm:$0xff]  ;;  %v580_v63 = vld [vmem:[%s7877_s25 + $0x2e0] sm:$0xff] }
  0xa5   : > { %v1610_v0 = vld [vmem:[%s7882_s28 + $0x2e0] sm:$0xff] }
  0xa7   : > { %7237 = vmatmul.mubr.msk.f32.gmra.mxu0 %vm588_vm0, %v549_v1  ;;  %7389 = vmatmul.mubr.msk.f32.gmra.mxu1 %vm588_vm0, %v1579_v2  ;;  %v581_v1 = vld [vmem:[%s7877_s25 + $0x2e8] sm:$0xff] }
  0xa8   : > { %7239 = vmatprep.mubr.msk.f32.mxu0 %vm588_vm0, %v550_v3  ;;  %7391 = vmatprep.mubr.msk.f32.mxu1 %vm588_vm0, %v1580_v4  ;;  %v1611_v2 = vld [vmem:[%s7882_s28 + $0x2e8] sm:$0xff]  ;;  %v582_v3 = vld [vmem:[%s7877_s25 + $0x2f0] sm:$0xff] }
  0xa9   : > { %v1612_v4 = vld [vmem:[%s7882_s28 + $0x2f0] sm:$0xff] }
  0xab   : > { %7240 = vmatmul.mubr.msk.f32.gmra.mxu0 %vm588_vm0, %v551_v5  ;;  %7392 = vmatmul.mubr.msk.f32.gmra.mxu1 %vm588_vm0, %v1581_v6  ;;  %v583_v5 = vld [vmem:[%s7877_s25 + $0x2f8] sm:$0xff]  ;;  %s8829_s25 = sld [smem:[#allocation6 + $0x2]] }
  0xac   : > { %7242 = vmatprep.mubr.msk.f32.mxu0 %vm588_vm0, %v552_v7  ;;  %7394 = vmatprep.mubr.msk.f32.mxu1 %vm588_vm0, %v1582_v8  ;;  %v1613_v6 = vld [vmem:[%s7882_s28 + $0x2f8] sm:$0xff]  ;;  %s8883_s28 = scalar_lea.vmem [#allocation2], %s6924_s26 }
  0xaf   : > { %7243 = vmatmul.mubr.msk.f32.gmra.mxu0 %vm588_vm0, %v553_v9  ;;  %7395 = vmatmul.mubr.msk.f32.gmra.mxu1 %vm588_vm0, %v1583_v10 }
  0xb0   : > { %7245 = vmatprep.mubr.msk.f32.mxu0 %vm588_vm0, %v554_v11  ;;  %7397 = vmatprep.mubr.msk.f32.mxu1 %vm588_vm0, %v1584_v12 }
  0xb1   : > { %s6926_s27 = sshll.u32 %s8829_s25, 8 }
  0xb2   : > { %s8886_s0 = scalar_lea.vmem [#allocation3], %s6926_s27 }
  0xb3   : > { %7246 = vmatmul.mubr.msk.f32.gmra.mxu0 %vm588_vm0, %v555_v13  ;;  %7398 = vmatmul.mubr.msk.f32.gmra.mxu1 %vm588_vm0, %v1585_v14 }
  0xb4   : > { %7248 = vmatprep.mubr.msk.f32.mxu0 %vm588_vm0, %v556_v15  ;;  %7400 = vmatprep.mubr.msk.f32.mxu1 %vm588_vm0, %v1586_v16 }
  0xb7   : > { %7249 = vmatmul.mubr.msk.f32.gmra.mxu0 %vm588_vm0, %v557_v17  ;;  %7401 = vmatmul.mubr.msk.f32.gmra.mxu1 %vm588_vm0, %v1587_v18 }
  0xb8   : > { %7251 = vmatprep.mubr.msk.f32.mxu0 %vm588_vm0, %v558_v19  ;;  %7403 = vmatprep.mubr.msk.f32.mxu1 %vm588_vm0, %v1588_v20 }
  0xbb   : > { %7252 = vmatmul.mubr.msk.f32.gmra.mxu0 %vm588_vm0, %v559_v21  ;;  %7404 = vmatmul.mubr.msk.f32.gmra.mxu1 %vm588_vm0, %v1589_v22 }
  0xbc   : > { %7254 = vmatprep.mubr.msk.f32.mxu0 %vm588_vm0, %v560_v23  ;;  %7406 = vmatprep.mubr.msk.f32.mxu1 %vm588_vm0, %v1590_v24 }
  0xbf   : > { %7255 = vmatmul.mubr.msk.f32.gmra.mxu0 %vm588_vm0, %v561_v25  ;;  %7407 = vmatmul.mubr.msk.f32.gmra.mxu1 %vm588_vm0, %v1591_v26 }
  0xc0   : > { %7257 = vmatprep.mubr.msk.f32.mxu0 %vm588_vm0, %v562_v27  ;;  %7409 = vmatprep.mubr.msk.f32.mxu1 %vm588_vm0, %v1592_v28 }
  0xc3   : > { %7258 = vmatmul.mubr.msk.f32.gmra.mxu0 %vm588_vm0, %v563_v29  ;;  %7410 = vmatmul.mubr.msk.f32.gmra.mxu1 %vm588_vm0, %v1593_v30 }
  0xc4   : > { %7260 = vmatprep.mubr.msk.f32.mxu0 %vm588_vm0, %v564_v31  ;;  %7412 = vmatprep.mubr.msk.f32.mxu1 %vm588_vm0, %v1594_v32 }
  0xc7   : > { %7261 = vmatmul.mubr.msk.f32.gmra.mxu0 %vm588_vm0, %v565_v33  ;;  %7413 = vmatmul.mubr.msk.f32.gmra.mxu1 %vm588_vm0, %v1595_v34 }
  0xc8   : > { %7263 = vmatprep.mubr.msk.f32.mxu0 %vm588_vm0, %v566_v35  ;;  %7415 = vmatprep.mubr.msk.f32.mxu1 %vm588_vm0, %v1596_v36 }
  0xcb   : > { %7264 = vmatmul.mubr.msk.f32.gmra.mxu0 %vm588_vm0, %v567_v37  ;;  %7416 = vmatmul.mubr.msk.f32.gmra.mxu1 %vm588_vm0, %v1597_v38 }
  0xcc   : > { %7266 = vmatprep.mubr.msk.f32.mxu0 %vm588_vm0, %v568_v39  ;;  %7418 = vmatprep.mubr.msk.f32.mxu1 %vm588_vm0, %v1598_v40 }
  0xcf   : > { %7267 = vmatmul.mubr.msk.f32.gmra.mxu0 %vm588_vm0, %v569_v41  ;;  %7419 = vmatmul.mubr.msk.f32.gmra.mxu1 %vm588_vm0, %v1599_v42 }
  0xd0   : > { %7269 = vmatprep.mubr.msk.f32.mxu0 %vm588_vm0, %v570_v43  ;;  %7421 = vmatprep.mubr.msk.f32.mxu1 %vm588_vm0, %v1600_v44 }
  0xd3   : > { %7270 = vmatmul.mubr.msk.f32.gmra.mxu0 %vm588_vm0, %v571_v45  ;;  %7422 = vmatmul.mubr.msk.f32.gmra.mxu1 %vm588_vm0, %v1601_v46 }
  0xd4   : > { %7272 = vmatprep.mubr.msk.f32.mxu0 %vm588_vm0, %v572_v47  ;;  %7424 = vmatprep.mubr.msk.f32.mxu1 %vm588_vm0, %v1602_v48 }
  0xd7   : > { %7273 = vmatmul.mubr.msk.f32.gmra.mxu0 %vm588_vm0, %v573_v49  ;;  %7425 = vmatmul.mubr.msk.f32.gmra.mxu1 %vm588_vm0, %v1603_v50 }
  0xd8   : > { %7275 = vmatprep.mubr.msk.f32.mxu0 %vm588_vm0, %v574_v51  ;;  %7427 = vmatprep.mubr.msk.f32.mxu1 %vm588_vm0, %v1604_v52 }
  0xdb   : > { %7276 = vmatmul.mubr.msk.f32.gmra.mxu0 %vm588_vm0, %v575_v53  ;;  %7428 = vmatmul.mubr.msk.f32.gmra.mxu1 %vm588_vm0, %v1605_v54 }
  0xdc   : > { %7278 = vmatprep.mubr.msk.f32.mxu0 %vm588_vm0, %v576_v55  ;;  %7430 = vmatprep.mubr.msk.f32.mxu1 %vm588_vm0, %v1606_v56 }
  0xdf   : > { %7279 = vmatmul.mubr.msk.f32.gmra.mxu0 %vm588_vm0, %v577_v57  ;;  %7431 = vmatmul.mubr.msk.f32.gmra.mxu1 %vm588_vm0, %v1607_v58 }
  0xe0   : > { %7281 = vmatprep.mubr.msk.f32.mxu0 %vm588_vm0, %v578_v59  ;;  %7433 = vmatprep.mubr.msk.f32.mxu1 %vm588_vm0, %v1608_v60 }
  0xe3   : > { %7282 = vmatmul.mubr.msk.f32.gmra.mxu0 %vm588_vm0, %v579_v61  ;;  %7434 = vmatmul.mubr.msk.f32.gmra.mxu1 %vm588_vm0, %v1609_v62 }
  0xe4   : > { %7284 = vmatprep.mubr.msk.f32.mxu0 %vm588_vm0, %v580_v63  ;;  %7436 = vmatprep.mubr.msk.f32.mxu1 %vm588_vm0, %v1610_v0 }
  0xe7   : > { %7285 = vmatmul.mubr.msk.f32.gmra.mxu0 %vm588_vm0, %v581_v1  ;;  %7437 = vmatmul.mubr.msk.f32.gmra.mxu1 %vm588_vm0, %v1611_v2 }
  0xe8   : > { %7287 = vmatprep.mubr.msk.f32.mxu0 %vm588_vm0, %v582_v3  ;;  %7439 = vmatprep.mubr.msk.f32.mxu1 %vm588_vm0, %v1612_v4 }
  0xeb   : > { %7288 = vmatmul.mubr.msk.f32.gmra.mxu0 %vm588_vm0, %v583_v5  ;;  %7440 = vmatmul.mubr.msk.f32.gmra.mxu1 %vm588_vm0, %v1613_v6 }
  0xef   : > { %v7148_v7 = vpop.f32.mrf.mxu0  ;;  %v7300_v8 = vpop.f32.mrf.mxu1 }
  0xf0   : > { %1423 = vst.msk [vmem:[#allocation2 + $0x8] sm:$0xff] %vm588_vm0, %v7148_v7  ;;  %2452 = vst.msk [vmem:[#allocation3 + $0x8] sm:$0xff] %vm588_vm0, %v7300_v8 }
  0xf1   : > { %v943_v9 = vpop.f32.mrf.mxu0  ;;  %v1972_v10 = vpop.f32.mrf.mxu1 }
  0xf2   : > { %1422 = vst.msk [vmem:[#allocation2] sm:$0xff] %vm588_vm0, %v943_v9  ;;  %2451 = vst.msk [vmem:[#allocation3] sm:$0xff] %vm588_vm0, %v1972_v10 }
  0xf3   : > { %v7151_v11 = vpop.f32.mrf.mxu0  ;;  %v7303_v12 = vpop.f32.mrf.mxu1 }
  0xf4   : > { %1425 = vst.msk [vmem:[#allocation2 + $0x18] sm:$0xff] %vm588_vm0, %v7151_v11  ;;  %2454 = vst.msk [vmem:[#allocation3 + $0x18] sm:$0xff] %vm588_vm0, %v7303_v12 }
  0xf5   : > { %v953_v13 = vpop.f32.mrf.mxu0  ;;  %v1982_v14 = vpop.f32.mrf.mxu1 }
  0xf6   : > { %1424 = vst.msk [vmem:[#allocation2 + $0x10] sm:$0xff] %vm588_vm0, %v953_v13  ;;  %2453 = vst.msk [vmem:[#allocation3 + $0x10] sm:$0xff] %vm588_vm0, %v1982_v14 }
  0xf7   : > { %v7154_v15 = vpop.f32.mrf.mxu0  ;;  %v7306_v16 = vpop.f32.mrf.mxu1 }
  0xf8   : > { %1427 = vst.msk [vmem:[#allocation2 + $0x28] sm:$0xff] %vm588_vm0, %v7154_v15  ;;  %2456 = vst.msk [vmem:[#allocation3 + $0x28] sm:$0xff] %vm588_vm0, %v7306_v16 }
  0xf9   : > { %v963_v17 = vpop.f32.mrf.mxu0  ;;  %v1992_v18 = vpop.f32.mrf.mxu1 }
  0xfa   : > { %1426 = vst.msk [vmem:[#allocation2 + $0x20] sm:$0xff] %vm588_vm0, %v963_v17  ;;  %2455 = vst.msk [vmem:[#allocation3 + $0x20] sm:$0xff] %vm588_vm0, %v1992_v18 }
  0xfb   : > { %v7157_v19 = vpop.f32.mrf.mxu0  ;;  %v7309_v20 = vpop.f32.mrf.mxu1 }
  0xfc   : > { %1429 = vst.msk [vmem:[#allocation2 + $0x38] sm:$0xff] %vm588_vm0, %v7157_v19  ;;  %2458 = vst.msk [vmem:[#allocation3 + $0x38] sm:$0xff] %vm588_vm0, %v7309_v20 }
  0xfd   : > { %v973_v21 = vpop.f32.mrf.mxu0  ;;  %v2002_v22 = vpop.f32.mrf.mxu1 }
  0xfe   : > { %1428 = vst.msk [vmem:[#allocation2 + $0x30] sm:$0xff] %vm588_vm0, %v973_v21  ;;  %2457 = vst.msk [vmem:[#allocation3 + $0x30] sm:$0xff] %vm588_vm0, %v2002_v22 }
  0xff   : > { %v7160_v23 = vpop.f32.mrf.mxu0  ;;  %v7312_v24 = vpop.f32.mrf.mxu1 }
 0x100   : > { %1431 = vst.msk [vmem:[#allocation2 + $0x48] sm:$0xff] %vm588_vm0, %v7160_v23  ;;  %2460 = vst.msk [vmem:[#allocation3 + $0x48] sm:$0xff] %vm588_vm0, %v7312_v24 }
 0x101   : > { %v983_v25 = vpop.f32.mrf.mxu0  ;;  %v2012_v26 = vpop.f32.mrf.mxu1 }
 0x102   : > { %1430 = vst.msk [vmem:[#allocation2 + $0x40] sm:$0xff] %vm588_vm0, %v983_v25  ;;  %2459 = vst.msk [vmem:[#allocation3 + $0x40] sm:$0xff] %vm588_vm0, %v2012_v26 }
 0x103   : > { %v7163_v27 = vpop.f32.mrf.mxu0  ;;  %v7315_v28 = vpop.f32.mrf.mxu1 }
 0x104   : > { %1433 = vst.msk [vmem:[#allocation2 + $0x58] sm:$0xff] %vm588_vm0, %v7163_v27  ;;  %2462 = vst.msk [vmem:[#allocation3 + $0x58] sm:$0xff] %vm588_vm0, %v7315_v28 }
 0x105   : > { %v993_v29 = vpop.f32.mrf.mxu0  ;;  %v2022_v30 = vpop.f32.mrf.mxu1 }
 0x106   : > { %1432 = vst.msk [vmem:[#allocation2 + $0x50] sm:$0xff] %vm588_vm0, %v993_v29  ;;  %2461 = vst.msk [vmem:[#allocation3 + $0x50] sm:$0xff] %vm588_vm0, %v2022_v30 }
 0x107   : > { %v7166_v31 = vpop.f32.mrf.mxu0  ;;  %v7318_v32 = vpop.f32.mrf.mxu1 }
 0x108   : > { %1435 = vst.msk [vmem:[#allocation2 + $0x68] sm:$0xff] %vm588_vm0, %v7166_v31  ;;  %2464 = vst.msk [vmem:[#allocation3 + $0x68] sm:$0xff] %vm588_vm0, %v7318_v32 }
 0x109   : > { %v1003_v33 = vpop.f32.mrf.mxu0  ;;  %v2032_v34 = vpop.f32.mrf.mxu1 }
 0x10a   : > { %1434 = vst.msk [vmem:[#allocation2 + $0x60] sm:$0xff] %vm588_vm0, %v1003_v33  ;;  %2463 = vst.msk [vmem:[#allocation3 + $0x60] sm:$0xff] %vm588_vm0, %v2032_v34 }
 0x10b   : > { %v7169_v35 = vpop.f32.mrf.mxu0  ;;  %v7321_v36 = vpop.f32.mrf.mxu1 }
 0x10c   : > { %1437 = vst.msk [vmem:[#allocation2 + $0x78] sm:$0xff] %vm588_vm0, %v7169_v35  ;;  %2466 = vst.msk [vmem:[#allocation3 + $0x78] sm:$0xff] %vm588_vm0, %v7321_v36 }
 0x10d   : > { %v1013_v37 = vpop.f32.mrf.mxu0  ;;  %v2042_v38 = vpop.f32.mrf.mxu1 }
 0x10e   : > { %1436 = vst.msk [vmem:[#allocation2 + $0x70] sm:$0xff] %vm588_vm0, %v1013_v37  ;;  %2465 = vst.msk [vmem:[#allocation3 + $0x70] sm:$0xff] %vm588_vm0, %v2042_v38 }
 0x10f   : > { %v7172_v39 = vpop.f32.mrf.mxu0  ;;  %v7324_v40 = vpop.f32.mrf.mxu1 }
 0x110   : > { %1439 = vst.msk [vmem:[#allocation2 + $0x88] sm:$0xff] %vm588_vm0, %v7172_v39  ;;  %2468 = vst.msk [vmem:[#allocation3 + $0x88] sm:$0xff] %vm588_vm0, %v7324_v40 }
 0x111   : > { %v1023_v41 = vpop.f32.mrf.mxu0  ;;  %v2052_v42 = vpop.f32.mrf.mxu1 }
 0x112   : > { %1438 = vst.msk [vmem:[#allocation2 + $0x80] sm:$0xff] %vm588_vm0, %v1023_v41  ;;  %2467 = vst.msk [vmem:[#allocation3 + $0x80] sm:$0xff] %vm588_vm0, %v2052_v42 }
 0x113   : > { %v7175_v43 = vpop.f32.mrf.mxu0  ;;  %v7327_v44 = vpop.f32.mrf.mxu1 }
 0x114   : > { %1441 = vst.msk [vmem:[#allocation2 + $0x98] sm:$0xff] %vm588_vm0, %v7175_v43  ;;  %2470 = vst.msk [vmem:[#allocation3 + $0x98] sm:$0xff] %vm588_vm0, %v7327_v44 }
 0x115   : > { %v1033_v45 = vpop.f32.mrf.mxu0  ;;  %v2062_v46 = vpop.f32.mrf.mxu1 }
 0x116   : > { %1440 = vst.msk [vmem:[#allocation2 + $0x90] sm:$0xff] %vm588_vm0, %v1033_v45  ;;  %2469 = vst.msk [vmem:[#allocation3 + $0x90] sm:$0xff] %vm588_vm0, %v2062_v46 }
 0x117   : > { %v7178_v47 = vpop.f32.mrf.mxu0  ;;  %v7330_v48 = vpop.f32.mrf.mxu1 }
 0x118   : > { %1443 = vst.msk [vmem:[#allocation2 + $0xa8] sm:$0xff] %vm588_vm0, %v7178_v47  ;;  %2472 = vst.msk [vmem:[#allocation3 + $0xa8] sm:$0xff] %vm588_vm0, %v7330_v48 }
 0x119   : > { %v1043_v49 = vpop.f32.mrf.mxu0  ;;  %v2072_v50 = vpop.f32.mrf.mxu1 }
 0x11a   : > { %1442 = vst.msk [vmem:[#allocation2 + $0xa0] sm:$0xff] %vm588_vm0, %v1043_v49  ;;  %2471 = vst.msk [vmem:[#allocation3 + $0xa0] sm:$0xff] %vm588_vm0, %v2072_v50 }
 0x11b   : > { %v7181_v51 = vpop.f32.mrf.mxu0  ;;  %v7333_v52 = vpop.f32.mrf.mxu1 }
 0x11c   : > { %1445 = vst.msk [vmem:[#allocation2 + $0xb8] sm:$0xff] %vm588_vm0, %v7181_v51  ;;  %2474 = vst.msk [vmem:[#allocation3 + $0xb8] sm:$0xff] %vm588_vm0, %v7333_v52 }
 0x11d   : > { %v1053_v53 = vpop.f32.mrf.mxu0  ;;  %v2082_v54 = vpop.f32.mrf.mxu1 }
 0x11e   : > { %1444 = vst.msk [vmem:[#allocation2 + $0xb0] sm:$0xff] %vm588_vm0, %v1053_v53  ;;  %2473 = vst.msk [vmem:[#allocation3 + $0xb0] sm:$0xff] %vm588_vm0, %v2082_v54 }
 0x11f   : > { %v7184_v55 = vpop.f32.mrf.mxu0  ;;  %v7336_v56 = vpop.f32.mrf.mxu1 }
 0x120   : > { %1447 = vst.msk [vmem:[#allocation2 + $0xc8] sm:$0xff] %vm588_vm0, %v7184_v55  ;;  %2476 = vst.msk [vmem:[#allocation3 + $0xc8] sm:$0xff] %vm588_vm0, %v7336_v56 }
 0x121   : > { %v1063_v57 = vpop.f32.mrf.mxu0  ;;  %v2092_v58 = vpop.f32.mrf.mxu1 }
 0x122   : > { %1446 = vst.msk [vmem:[#allocation2 + $0xc0] sm:$0xff] %vm588_vm0, %v1063_v57  ;;  %2475 = vst.msk [vmem:[#allocation3 + $0xc0] sm:$0xff] %vm588_vm0, %v2092_v58 }
 0x123   : > { %v7187_v59 = vpop.f32.mrf.mxu0  ;;  %v7339_v60 = vpop.f32.mrf.mxu1 }
 0x124   : > { %1449 = vst.msk [vmem:[#allocation2 + $0xd8] sm:$0xff] %vm588_vm0, %v7187_v59  ;;  %2478 = vst.msk [vmem:[#allocation3 + $0xd8] sm:$0xff] %vm588_vm0, %v7339_v60 }
 0x125   : > { %v1073_v61 = vpop.f32.mrf.mxu0  ;;  %v2102_v62 = vpop.f32.mrf.mxu1 }
 0x126   : > { %1448 = vst.msk [vmem:[#allocation2 + $0xd0] sm:$0xff] %vm588_vm0, %v1073_v61  ;;  %2477 = vst.msk [vmem:[#allocation3 + $0xd0] sm:$0xff] %vm588_vm0, %v2102_v62 }
 0x127   : > { %v7190_v63 = vpop.f32.mrf.mxu0  ;;  %v7342_v0 = vpop.f32.mrf.mxu1 }
 0x128   : > { %1451 = vst.msk [vmem:[#allocation2 + $0xe8] sm:$0xff] %vm588_vm0, %v7190_v63  ;;  %2480 = vst.msk [vmem:[#allocation3 + $0xe8] sm:$0xff] %vm588_vm0, %v7342_v0 }
 0x129   : > { %v1083_v1 = vpop.f32.mrf.mxu0  ;;  %v2112_v2 = vpop.f32.mrf.mxu1 }
 0x12a   : > { %1450 = vst.msk [vmem:[#allocation2 + $0xe0] sm:$0xff] %vm588_vm0, %v1083_v1  ;;  %2479 = vst.msk [vmem:[#allocation3 + $0xe0] sm:$0xff] %vm588_vm0, %v2112_v2 }
 0x12b   : > { %v7193_v3 = vpop.f32.mrf.mxu0  ;;  %v7345_v4 = vpop.f32.mrf.mxu1 }
 0x12c   : > { %1453 = vst.msk [vmem:[#allocation2 + $0xf8] sm:$0xff] %vm588_vm0, %v7193_v3  ;;  %2482 = vst.msk [vmem:[#allocation3 + $0xf8] sm:$0xff] %vm588_vm0, %v7345_v4 }
 0x12d   : > { %v1093_v5 = vpop.f32.mrf.mxu0  ;;  %v2122_v6 = vpop.f32.mrf.mxu1 }
 0x12e   : > { %1452 = vst.msk [vmem:[#allocation2 + $0xf0] sm:$0xff] %vm588_vm0, %v1093_v5  ;;  %2481 = vst.msk [vmem:[#allocation3 + $0xf0] sm:$0xff] %vm588_vm0, %v2122_v6 }
 0x12f   : > { %v7196_v7 = vpop.f32.mrf.mxu0  ;;  %v7348_v8 = vpop.f32.mrf.mxu1 }
 0x130   : > { %1455 = vst.msk [vmem:[#allocation2 + $0x108] sm:$0xff] %vm588_vm0, %v7196_v7  ;;  %2484 = vst.msk [vmem:[#allocation3 + $0x108] sm:$0xff] %vm588_vm0, %v7348_v8 }
 0x131   : > { %v1103_v9 = vpop.f32.mrf.mxu0  ;;  %v2132_v10 = vpop.f32.mrf.mxu1 }
 0x132   : > { %1454 = vst.msk [vmem:[#allocation2 + $0x100] sm:$0xff] %vm588_vm0, %v1103_v9  ;;  %2483 = vst.msk [vmem:[#allocation3 + $0x100] sm:$0xff] %vm588_vm0, %v2132_v10 }
 0x133   : > { %v7199_v11 = vpop.f32.mrf.mxu0  ;;  %v7351_v12 = vpop.f32.mrf.mxu1 }
 0x134   : > { %1457 = vst.msk [vmem:[#allocation2 + $0x118] sm:$0xff] %vm588_vm0, %v7199_v11  ;;  %2486 = vst.msk [vmem:[#allocation3 + $0x118] sm:$0xff] %vm588_vm0, %v7351_v12 }
 0x135   : > { %v1113_v13 = vpop.f32.mrf.mxu0  ;;  %v2142_v14 = vpop.f32.mrf.mxu1 }
 0x136   : > { %1456 = vst.msk [vmem:[#allocation2 + $0x110] sm:$0xff] %vm588_vm0, %v1113_v13  ;;  %2485 = vst.msk [vmem:[#allocation3 + $0x110] sm:$0xff] %vm588_vm0, %v2142_v14 }
 0x137   : > { %v7202_v15 = vpop.f32.mrf.mxu0  ;;  %v7354_v16 = vpop.f32.mrf.mxu1 }
 0x138   : > { %1459 = vst.msk [vmem:[#allocation2 + $0x128] sm:$0xff] %vm588_vm0, %v7202_v15  ;;  %2488 = vst.msk [vmem:[#allocation3 + $0x128] sm:$0xff] %vm588_vm0, %v7354_v16 }
 0x139   : > { %v1123_v17 = vpop.f32.mrf.mxu0  ;;  %v2152_v18 = vpop.f32.mrf.mxu1 }
 0x13a   : > { %1458 = vst.msk [vmem:[#allocation2 + $0x120] sm:$0xff] %vm588_vm0, %v1123_v17  ;;  %2487 = vst.msk [vmem:[#allocation3 + $0x120] sm:$0xff] %vm588_vm0, %v2152_v18 }
 0x13b   : > { %v7205_v19 = vpop.f32.mrf.mxu0  ;;  %v7357_v20 = vpop.f32.mrf.mxu1 }
 0x13c   : > { %1461 = vst.msk [vmem:[#allocation2 + $0x138] sm:$0xff] %vm588_vm0, %v7205_v19  ;;  %2490 = vst.msk [vmem:[#allocation3 + $0x138] sm:$0xff] %vm588_vm0, %v7357_v20 }
 0x13d   : > { %v1133_v21 = vpop.f32.mrf.mxu0  ;;  %v2162_v22 = vpop.f32.mrf.mxu1 }
 0x13e   : > { %1460 = vst.msk [vmem:[#allocation2 + $0x130] sm:$0xff] %vm588_vm0, %v1133_v21  ;;  %2489 = vst.msk [vmem:[#allocation3 + $0x130] sm:$0xff] %vm588_vm0, %v2162_v22 }
 0x13f   : > { %v7208_v23 = vpop.f32.mrf.mxu0  ;;  %v7360_v24 = vpop.f32.mrf.mxu1 }
 0x140   : > { %1463 = vst.msk [vmem:[#allocation2 + $0x148] sm:$0xff] %vm588_vm0, %v7208_v23  ;;  %2492 = vst.msk [vmem:[#allocation3 + $0x148] sm:$0xff] %vm588_vm0, %v7360_v24 }
 0x141   : > { %v1143_v25 = vpop.f32.mrf.mxu0  ;;  %v2172_v26 = vpop.f32.mrf.mxu1 }
 0x142   : > { %1462 = vst.msk [vmem:[#allocation2 + $0x140] sm:$0xff] %vm588_vm0, %v1143_v25  ;;  %2491 = vst.msk [vmem:[#allocation3 + $0x140] sm:$0xff] %vm588_vm0, %v2172_v26 }
 0x143   : > { %v7211_v27 = vpop.f32.mrf.mxu0  ;;  %v7363_v28 = vpop.f32.mrf.mxu1 }
 0x144   : > { %1465 = vst.msk [vmem:[#allocation2 + $0x158] sm:$0xff] %vm588_vm0, %v7211_v27  ;;  %2494 = vst.msk [vmem:[#allocation3 + $0x158] sm:$0xff] %vm588_vm0, %v7363_v28 }
 0x145   : > { %v1153_v29 = vpop.f32.mrf.mxu0  ;;  %v2182_v30 = vpop.f32.mrf.mxu1 }
 0x146   : > { %1464 = vst.msk [vmem:[#allocation2 + $0x150] sm:$0xff] %vm588_vm0, %v1153_v29  ;;  %2493 = vst.msk [vmem:[#allocation3 + $0x150] sm:$0xff] %vm588_vm0, %v2182_v30 }
 0x147   : > { %v7214_v31 = vpop.f32.mrf.mxu0  ;;  %v7366_v32 = vpop.f32.mrf.mxu1 }
 0x148   : > { %1467 = vst.msk [vmem:[#allocation2 + $0x168] sm:$0xff] %vm588_vm0, %v7214_v31  ;;  %2496 = vst.msk [vmem:[#allocation3 + $0x168] sm:$0xff] %vm588_vm0, %v7366_v32 }
 0x149   : > { %v1163_v33 = vpop.f32.mrf.mxu0  ;;  %v2192_v34 = vpop.f32.mrf.mxu1 }
 0x14a   : > { %1466 = vst.msk [vmem:[#allocation2 + $0x160] sm:$0xff] %vm588_vm0, %v1163_v33  ;;  %2495 = vst.msk [vmem:[#allocation3 + $0x160] sm:$0xff] %vm588_vm0, %v2192_v34 }
 0x14b   : > { %v7217_v35 = vpop.f32.mrf.mxu0  ;;  %v7369_v36 = vpop.f32.mrf.mxu1 }
 0x14c   : > { %1469 = vst.msk [vmem:[#allocation2 + $0x178] sm:$0xff] %vm588_vm0, %v7217_v35  ;;  %2498 = vst.msk [vmem:[#allocation3 + $0x178] sm:$0xff] %vm588_vm0, %v7369_v36 }
 0x14d   : > { %v1173_v37 = vpop.f32.mrf.mxu0  ;;  %v2202_v38 = vpop.f32.mrf.mxu1 }
 0x14e   : > { %1468 = vst.msk [vmem:[#allocation2 + $0x170] sm:$0xff] %vm588_vm0, %v1173_v37  ;;  %2497 = vst.msk [vmem:[#allocation3 + $0x170] sm:$0xff] %vm588_vm0, %v2202_v38 }
 0x14f   : > { %v7220_v39 = vpop.f32.mrf.mxu0  ;;  %v7372_v40 = vpop.f32.mrf.mxu1 }
 0x150   : > { %1471 = vst.msk [vmem:[#allocation2 + $0x188] sm:$0xff] %vm588_vm0, %v7220_v39  ;;  %2500 = vst.msk [vmem:[#allocation3 + $0x188] sm:$0xff] %vm588_vm0, %v7372_v40 }
 0x151   : > { %v1183_v41 = vpop.f32.mrf.mxu0  ;;  %v2212_v42 = vpop.f32.mrf.mxu1 }
 0x152   : > { %1470 = vst.msk [vmem:[#allocation2 + $0x180] sm:$0xff] %vm588_vm0, %v1183_v41  ;;  %2499 = vst.msk [vmem:[#allocation3 + $0x180] sm:$0xff] %vm588_vm0, %v2212_v42 }
 0x153   : > { %v7223_v43 = vpop.f32.mrf.mxu0  ;;  %v7375_v44 = vpop.f32.mrf.mxu1 }
 0x154   : > { %1473 = vst.msk [vmem:[#allocation2 + $0x198] sm:$0xff] %vm588_vm0, %v7223_v43  ;;  %2502 = vst.msk [vmem:[#allocation3 + $0x198] sm:$0xff] %vm588_vm0, %v7375_v44 }
 0x155   : > { %v1193_v45 = vpop.f32.mrf.mxu0  ;;  %v2222_v46 = vpop.f32.mrf.mxu1 }
 0x156   : > { %1472 = vst.msk [vmem:[#allocation2 + $0x190] sm:$0xff] %vm588_vm0, %v1193_v45  ;;  %2501 = vst.msk [vmem:[#allocation3 + $0x190] sm:$0xff] %vm588_vm0, %v2222_v46 }
 0x157   : > { %v7226_v47 = vpop.f32.mrf.mxu0  ;;  %v7378_v48 = vpop.f32.mrf.mxu1 }
 0x158   : > { %1475 = vst.msk [vmem:[#allocation2 + $0x1a8] sm:$0xff] %vm588_vm0, %v7226_v47  ;;  %2504 = vst.msk [vmem:[#allocation3 + $0x1a8] sm:$0xff] %vm588_vm0, %v7378_v48 }
 0x159   : > { %v1203_v49 = vpop.f32.mrf.mxu0  ;;  %v2232_v50 = vpop.f32.mrf.mxu1 }
 0x15a   : > { %1474 = vst.msk [vmem:[#allocation2 + $0x1a0] sm:$0xff] %vm588_vm0, %v1203_v49  ;;  %2503 = vst.msk [vmem:[#allocation3 + $0x1a0] sm:$0xff] %vm588_vm0, %v2232_v50 }
 0x15b   : > { %v7229_v51 = vpop.f32.mrf.mxu0  ;;  %v7381_v52 = vpop.f32.mrf.mxu1 }
 0x15c   : > { %1477 = vst.msk [vmem:[#allocation2 + $0x1b8] sm:$0xff] %vm588_vm0, %v7229_v51  ;;  %2506 = vst.msk [vmem:[#allocation3 + $0x1b8] sm:$0xff] %vm588_vm0, %v7381_v52 }
 0x15d   : > { %v1213_v53 = vpop.f32.mrf.mxu0  ;;  %v2242_v54 = vpop.f32.mrf.mxu1 }
 0x15e   : > { %1476 = vst.msk [vmem:[#allocation2 + $0x1b0] sm:$0xff] %vm588_vm0, %v1213_v53  ;;  %2505 = vst.msk [vmem:[#allocation3 + $0x1b0] sm:$0xff] %vm588_vm0, %v2242_v54 }
 0x15f   : > { %v7232_v55 = vpop.f32.mrf.mxu0  ;;  %v7384_v56 = vpop.f32.mrf.mxu1 }
 0x160   : > { %1479 = vst.msk [vmem:[#allocation2 + $0x1c8] sm:$0xff] %vm588_vm0, %v7232_v55  ;;  %2508 = vst.msk [vmem:[#allocation3 + $0x1c8] sm:$0xff] %vm588_vm0, %v7384_v56 }
 0x161   : > { %v1223_v57 = vpop.f32.mrf.mxu0  ;;  %v2252_v58 = vpop.f32.mrf.mxu1 }
 0x162   : > { %1478 = vst.msk [vmem:[#allocation2 + $0x1c0] sm:$0xff] %vm588_vm0, %v1223_v57  ;;  %2507 = vst.msk [vmem:[#allocation3 + $0x1c0] sm:$0xff] %vm588_vm0, %v2252_v58 }
 0x163   : > { %v7235_v59 = vpop.f32.mrf.mxu0  ;;  %v7387_v60 = vpop.f32.mrf.mxu1 }
 0x164   : > { %1481 = vst.msk [vmem:[#allocation2 + $0x1d8] sm:$0xff] %vm588_vm0, %v7235_v59  ;;  %2510 = vst.msk [vmem:[#allocation3 + $0x1d8] sm:$0xff] %vm588_vm0, %v7387_v60 }
 0x165   : > { %v1233_v61 = vpop.f32.mrf.mxu0  ;;  %v2262_v62 = vpop.f32.mrf.mxu1 }
 0x166   : > { %1480 = vst.msk [vmem:[#allocation2 + $0x1d0] sm:$0xff] %vm588_vm0, %v1233_v61  ;;  %2509 = vst.msk [vmem:[#allocation3 + $0x1d0] sm:$0xff] %vm588_vm0, %v2262_v62 }
 0x167   : > { %v7238_v63 = vpop.f32.mrf.mxu0  ;;  %v7390_v0 = vpop.f32.mrf.mxu1 }
 0x168   : > { %1483 = vst.msk [vmem:[#allocation2 + $0x1e8] sm:$0xff] %vm588_vm0, %v7238_v63  ;;  %2512 = vst.msk [vmem:[#allocation3 + $0x1e8] sm:$0xff] %vm588_vm0, %v7390_v0 }
 0x169   : > { %v1243_v1 = vpop.f32.mrf.mxu0  ;;  %v2272_v2 = vpop.f32.mrf.mxu1 }
 0x16a   : > { %1482 = vst.msk [vmem:[#allocation2 + $0x1e0] sm:$0xff] %vm588_vm0, %v1243_v1  ;;  %2511 = vst.msk [vmem:[#allocation3 + $0x1e0] sm:$0xff] %vm588_vm0, %v2272_v2 }
 0x16b   : > { %v7241_v3 = vpop.f32.mrf.mxu0  ;;  %v7393_v4 = vpop.f32.mrf.mxu1 }
 0x16c   : > { %1485 = vst.msk [vmem:[#allocation2 + $0x1f8] sm:$0xff] %vm588_vm0, %v7241_v3  ;;  %2514 = vst.msk [vmem:[#allocation3 + $0x1f8] sm:$0xff] %vm588_vm0, %v7393_v4 }
 0x16d   : > { %v1253_v5 = vpop.f32.mrf.mxu0  ;;  %v2282_v6 = vpop.f32.mrf.mxu1 }
 0x16e   : > { %1484 = vst.msk [vmem:[#allocation2 + $0x1f0] sm:$0xff] %vm588_vm0, %v1253_v5  ;;  %2513 = vst.msk [vmem:[#allocation3 + $0x1f0] sm:$0xff] %vm588_vm0, %v2282_v6 }
 0x16f   : > { %v7244_v7 = vpop.f32.mrf.mxu0  ;;  %v7396_v8 = vpop.f32.mrf.mxu1 }
 0x170   : > { %1487 = vst.msk [vmem:[#allocation2 + $0x208] sm:$0xff] %vm588_vm0, %v7244_v7  ;;  %2516 = vst.msk [vmem:[#allocation3 + $0x208] sm:$0xff] %vm588_vm0, %v7396_v8 }
 0x171   : > { %v1263_v9 = vpop.f32.mrf.mxu0  ;;  %v2292_v10 = vpop.f32.mrf.mxu1 }
 0x172   : > { %1486 = vst.msk [vmem:[#allocation2 + $0x200] sm:$0xff] %vm588_vm0, %v1263_v9  ;;  %2515 = vst.msk [vmem:[#allocation3 + $0x200] sm:$0xff] %vm588_vm0, %v2292_v10 }
 0x173   : > { %v7247_v11 = vpop.f32.mrf.mxu0  ;;  %v7399_v12 = vpop.f32.mrf.mxu1 }
 0x174   : > { %1489 = vst.msk [vmem:[#allocation2 + $0x218] sm:$0xff] %vm588_vm0, %v7247_v11  ;;  %2518 = vst.msk [vmem:[#allocation3 + $0x218] sm:$0xff] %vm588_vm0, %v7399_v12 }
 0x175   : > { %v1273_v13 = vpop.f32.mrf.mxu0  ;;  %v2302_v14 = vpop.f32.mrf.mxu1 }
 0x176   : > { %1488 = vst.msk [vmem:[#allocation2 + $0x210] sm:$0xff] %vm588_vm0, %v1273_v13  ;;  %2517 = vst.msk [vmem:[#allocation3 + $0x210] sm:$0xff] %vm588_vm0, %v2302_v14 }
 0x177   : > { %v7250_v15 = vpop.f32.mrf.mxu0  ;;  %v7402_v16 = vpop.f32.mrf.mxu1 }
 0x178   : > { %1491 = vst.msk [vmem:[#allocation2 + $0x228] sm:$0xff] %vm588_vm0, %v7250_v15  ;;  %2520 = vst.msk [vmem:[#allocation3 + $0x228] sm:$0xff] %vm588_vm0, %v7402_v16 }
 0x179   : > { %v1283_v17 = vpop.f32.mrf.mxu0  ;;  %v2312_v18 = vpop.f32.mrf.mxu1 }
 0x17a   : > { %1490 = vst.msk [vmem:[#allocation2 + $0x220] sm:$0xff] %vm588_vm0, %v1283_v17  ;;  %2519 = vst.msk [vmem:[#allocation3 + $0x220] sm:$0xff] %vm588_vm0, %v2312_v18 }
 0x17b   : > { %v7253_v19 = vpop.f32.mrf.mxu0  ;;  %v7405_v20 = vpop.f32.mrf.mxu1 }
 0x17c   : > { %1493 = vst.msk [vmem:[#allocation2 + $0x238] sm:$0xff] %vm588_vm0, %v7253_v19  ;;  %2522 = vst.msk [vmem:[#allocation3 + $0x238] sm:$0xff] %vm588_vm0, %v7405_v20 }
 0x17d   : > { %v1293_v21 = vpop.f32.mrf.mxu0  ;;  %v2322_v22 = vpop.f32.mrf.mxu1 }
 0x17e   : > { %1492 = vst.msk [vmem:[#allocation2 + $0x230] sm:$0xff] %vm588_vm0, %v1293_v21  ;;  %2521 = vst.msk [vmem:[#allocation3 + $0x230] sm:$0xff] %vm588_vm0, %v2322_v22 }
 0x17f   : > { %v7256_v23 = vpop.f32.mrf.mxu0  ;;  %v7408_v24 = vpop.f32.mrf.mxu1 }
 0x180   : > { %1495 = vst.msk [vmem:[#allocation2 + $0x248] sm:$0xff] %vm588_vm0, %v7256_v23  ;;  %2524 = vst.msk [vmem:[#allocation3 + $0x248] sm:$0xff] %vm588_vm0, %v7408_v24 }
 0x181   : > { %v1303_v25 = vpop.f32.mrf.mxu0  ;;  %v2332_v26 = vpop.f32.mrf.mxu1 }
 0x182   : > { %1494 = vst.msk [vmem:[#allocation2 + $0x240] sm:$0xff] %vm588_vm0, %v1303_v25  ;;  %2523 = vst.msk [vmem:[#allocation3 + $0x240] sm:$0xff] %vm588_vm0, %v2332_v26 }
 0x183   : > { %v7259_v27 = vpop.f32.mrf.mxu0  ;;  %v7411_v28 = vpop.f32.mrf.mxu1 }
 0x184   : > { %1497 = vst.msk [vmem:[#allocation2 + $0x258] sm:$0xff] %vm588_vm0, %v7259_v27  ;;  %2526 = vst.msk [vmem:[#allocation3 + $0x258] sm:$0xff] %vm588_vm0, %v7411_v28 }
 0x185   : > { %v1313_v29 = vpop.f32.mrf.mxu0  ;;  %v2342_v30 = vpop.f32.mrf.mxu1 }
 0x186   : > { %1496 = vst.msk [vmem:[#allocation2 + $0x250] sm:$0xff] %vm588_vm0, %v1313_v29  ;;  %2525 = vst.msk [vmem:[#allocation3 + $0x250] sm:$0xff] %vm588_vm0, %v2342_v30 }
 0x187   : > { %v7262_v31 = vpop.f32.mrf.mxu0  ;;  %v7414_v32 = vpop.f32.mrf.mxu1 }
 0x188   : > { %1499 = vst.msk [vmem:[#allocation2 + $0x268] sm:$0xff] %vm588_vm0, %v7262_v31  ;;  %2528 = vst.msk [vmem:[#allocation3 + $0x268] sm:$0xff] %vm588_vm0, %v7414_v32 }
 0x189   : > { %v1323_v33 = vpop.f32.mrf.mxu0  ;;  %v2352_v34 = vpop.f32.mrf.mxu1 }
 0x18a   : > { %1498 = vst.msk [vmem:[#allocation2 + $0x260] sm:$0xff] %vm588_vm0, %v1323_v33  ;;  %2527 = vst.msk [vmem:[#allocation3 + $0x260] sm:$0xff] %vm588_vm0, %v2352_v34 }
 0x18b   : > { %v7265_v35 = vpop.f32.mrf.mxu0  ;;  %v7417_v36 = vpop.f32.mrf.mxu1 }
 0x18c   : > { %1501 = vst.msk [vmem:[#allocation2 + $0x278] sm:$0xff] %vm588_vm0, %v7265_v35  ;;  %2530 = vst.msk [vmem:[#allocation3 + $0x278] sm:$0xff] %vm588_vm0, %v7417_v36 }
 0x18d   : > { %v1333_v37 = vpop.f32.mrf.mxu0  ;;  %v2362_v38 = vpop.f32.mrf.mxu1 }
 0x18e   : > { %1500 = vst.msk [vmem:[#allocation2 + $0x270] sm:$0xff] %vm588_vm0, %v1333_v37  ;;  %2529 = vst.msk [vmem:[#allocation3 + $0x270] sm:$0xff] %vm588_vm0, %v2362_v38 }
 0x18f   : > { %v7268_v39 = vpop.f32.mrf.mxu0  ;;  %v7420_v40 = vpop.f32.mrf.mxu1 }
 0x190   : > { %1503 = vst.msk [vmem:[#allocation2 + $0x288] sm:$0xff] %vm588_vm0, %v7268_v39  ;;  %2532 = vst.msk [vmem:[#allocation3 + $0x288] sm:$0xff] %vm588_vm0, %v7420_v40 }
 0x191   : > { %v1343_v41 = vpop.f32.mrf.mxu0  ;;  %v2372_v42 = vpop.f32.mrf.mxu1 }
 0x192   : > { %1502 = vst.msk [vmem:[#allocation2 + $0x280] sm:$0xff] %vm588_vm0, %v1343_v41  ;;  %2531 = vst.msk [vmem:[#allocation3 + $0x280] sm:$0xff] %vm588_vm0, %v2372_v42  ;;  %v8491_v41 = vld [vmem:[%s11706_s5] ss:$0 sm:$0xff] }
 0x193   : > { %v7271_v43 = vpop.f32.mrf.mxu0  ;;  %v7423_v44 = vpop.f32.mrf.mxu1 }
 0x194   : > { %1505 = vst.msk [vmem:[#allocation2 + $0x298] sm:$0xff] %vm588_vm0, %v7271_v43  ;;  %2534 = vst.msk [vmem:[#allocation3 + $0x298] sm:$0xff] %vm588_vm0, %v7423_v44 }
 0x195   : > { %v1353_v45 = vpop.f32.mrf.mxu0  ;;  %v2382_v46 = vpop.f32.mrf.mxu1 }
 0x196   : > { %1504 = vst.msk [vmem:[#allocation2 + $0x290] sm:$0xff] %vm588_vm0, %v1353_v45  ;;  %2533 = vst.msk [vmem:[#allocation3 + $0x290] sm:$0xff] %vm588_vm0, %v2382_v46 }
 0x197   : > { %v7274_v47 = vpop.f32.mrf.mxu0  ;;  %v7426_v48 = vpop.f32.mrf.mxu1 }
 0x198   : > { %1507 = vst.msk [vmem:[#allocation2 + $0x2a8] sm:$0xff] %vm588_vm0, %v7274_v47  ;;  %2536 = vst.msk [vmem:[#allocation3 + $0x2a8] sm:$0xff] %vm588_vm0, %v7426_v48 }
 0x199   : > { %v1363_v49 = vpop.f32.mrf.mxu0  ;;  %v2392_v50 = vpop.f32.mrf.mxu1 }
 0x19a   : > { %1506 = vst.msk [vmem:[#allocation2 + $0x2a0] sm:$0xff] %vm588_vm0, %v1363_v49  ;;  %2535 = vst.msk [vmem:[#allocation3 + $0x2a0] sm:$0xff] %vm588_vm0, %v2392_v50 }
 0x19b   : > { %v7277_v51 = vpop.f32.mrf.mxu0  ;;  %v7429_v52 = vpop.f32.mrf.mxu1 }
 0x19c   : > { %1509 = vst.msk [vmem:[#allocation2 + $0x2b8] sm:$0xff] %vm588_vm0, %v7277_v51  ;;  %2538 = vst.msk [vmem:[#allocation3 + $0x2b8] sm:$0xff] %vm588_vm0, %v7429_v52 }
 0x19d   : > { %v1373_v53 = vpop.f32.mrf.mxu0  ;;  %v2402_v54 = vpop.f32.mrf.mxu1 }
 0x19e   : > { %1508 = vst.msk [vmem:[#allocation2 + $0x2b0] sm:$0xff] %vm588_vm0, %v1373_v53  ;;  %2537 = vst.msk [vmem:[#allocation3 + $0x2b0] sm:$0xff] %vm588_vm0, %v2402_v54 }
 0x19f   : > { %v7280_v55 = vpop.f32.mrf.mxu0  ;;  %v7432_v56 = vpop.f32.mrf.mxu1 }
 0x1a0   : > { %1511 = vst.msk [vmem:[#allocation2 + $0x2c8] sm:$0xff] %vm588_vm0, %v7280_v55  ;;  %2540 = vst.msk [vmem:[#allocation3 + $0x2c8] sm:$0xff] %vm588_vm0, %v7432_v56 }
 0x1a1   : > { %v1383_v57 = vpop.f32.mrf.mxu0  ;;  %v2412_v58 = vpop.f32.mrf.mxu1 }
 0x1a2   : > { %1510 = vst.msk [vmem:[#allocation2 + $0x2c0] sm:$0xff] %vm588_vm0, %v1383_v57  ;;  %2539 = vst.msk [vmem:[#allocation3 + $0x2c0] sm:$0xff] %vm588_vm0, %v2412_v58 }
 0x1a3   : > { %v7283_v59 = vpop.f32.mrf.mxu0  ;;  %v7435_v60 = vpop.f32.mrf.mxu1 }
 0x1a4   : > { %1513 = vst.msk [vmem:[#allocation2 + $0x2d8] sm:$0xff] %vm588_vm0, %v7283_v59  ;;  %2542 = vst.msk [vmem:[#allocation3 + $0x2d8] sm:$0xff] %vm588_vm0, %v7435_v60 }
 0x1a5   : > { %v1393_v61 = vpop.f32.mrf.mxu0  ;;  %v2422_v62 = vpop.f32.mrf.mxu1 }
 0x1a6   : > { %1512 = vst.msk [vmem:[#allocation2 + $0x2d0] sm:$0xff] %vm588_vm0, %v1393_v61  ;;  %2541 = vst.msk [vmem:[#allocation3 + $0x2d0] sm:$0xff] %vm588_vm0, %v2422_v62 }
 0x1a7   : > { %v7286_v63 = vpop.f32.mrf.mxu0  ;;  %v7438_v0 = vpop.f32.mrf.mxu1 }
 0x1a8   : > { %1515 = vst.msk [vmem:[#allocation2 + $0x2e8] sm:$0xff] %vm588_vm0, %v7286_v63  ;;  %2544 = vst.msk [vmem:[#allocation3 + $0x2e8] sm:$0xff] %vm588_vm0, %v7438_v0 }
 0x1a9   : > { %v1403_v1 = vpop.f32.mrf.mxu0  ;;  %v2432_v2 = vpop.f32.mrf.mxu1 }
 0x1aa   : > { %1514 = vst.msk [vmem:[#allocation2 + $0x2e0] sm:$0xff] %vm588_vm0, %v1403_v1  ;;  %2543 = vst.msk [vmem:[#allocation3 + $0x2e0] sm:$0xff] %vm588_vm0, %v2432_v2 }
 0x1ab   : > { %v7289_v3 = vpop.f32.mrf.mxu0  ;;  %v7441_v4 = vpop.f32.mrf.mxu1 }
 0x1ac   : > { %1517 = vst.msk [vmem:[#allocation2 + $0x2f8] sm:$0xff] %vm588_vm0, %v7289_v3  ;;  %2546 = vst.msk [vmem:[#allocation3 + $0x2f8] sm:$0xff] %vm588_vm0, %v7441_v4 }
 0x1ad   : > { %v1413_v5 = vpop.f32.mrf.mxu0  ;;  %v2442_v6 = vpop.f32.mrf.mxu1 }
 0x1ae   : > { %1516 = vst.msk [vmem:[#allocation2 + $0x2f0] sm:$0xff] %vm588_vm0, %v1413_v5  ;;  %2545 = vst.msk [vmem:[#allocation3 + $0x2f0] sm:$0xff] %vm588_vm0, %v2442_v6 }
 0x1b5   : > { %v2552_v7 = vld [vmem:[%s8460_s29 + $0x10] sm:$0xff]  ;;  %v2550_v9 = vld [vmem:[%s8460_s29] sm:$0xff]  ;;  %v2553_v12 = vld [vmem:[%s8460_s29 + $0x18] sm:$0xff] }
 0x1b6   : > { %v2587_v8 = vld [vmem:[%s8463_s30 + $0x10] sm:$0xff]  ;;  %v2585_v11 = vld [vmem:[%s8463_s30] sm:$0xff]  ;;  %v2588_v13 = vld [vmem:[%s8463_s30 + $0x18] sm:$0xff] }
 0x1b7   : > { %v2619_v10 = vsub.f32 %v2552_v7, %v2587_v8  ;;  %v2617_v14 = vsub.f32 %v2550_v9, %v2585_v11  ;;  %v2620_v15 = vsub.f32 %v2553_v12, %v2588_v13  ;;  %v2551_v16 = vld [vmem:[%s8460_s29 + $0x8] sm:$0xff]  ;;  %v2554_v21 = vld [vmem:[%s8460_s29 + $0x20] sm:$0xff]  ;;  %v2557_v25 = vld [vmem:[%s8460_s29 + $0x38] sm:$0xff] }
 0x1b8   : > { %v2586_v17 = vld [vmem:[%s8463_s30 + $0x8] sm:$0xff]  ;;  %v2589_v22 = vld [vmem:[%s8463_s30 + $0x20] sm:$0xff]  ;;  %v2592_v26 = vld [vmem:[%s8463_s30 + $0x38] sm:$0xff] }
 0x1b9   : > { %v2555_v18 = vld [vmem:[%s8460_s29 + $0x28] sm:$0xff]  ;;  %7456 = vtanh.f32 %v2619_v10  ;;  %v2618_v19 = vsub.f32 %v2551_v16, %v2586_v17  ;;  %v2621_v24 = vsub.f32 %v2554_v21, %v2589_v22  ;;  %v2556_v27 = vld [vmem:[%s8460_s29 + $0x30] sm:$0xff]  ;;  %v2624_v29 = vsub.f32 %v2557_v25, %v2592_v26  ;;  %v2558_v33 = vld [vmem:[%s8460_s29 + $0x40] sm:$0xff] }
 0x1ba   : > { %v2590_v20 = vld [vmem:[%s8463_s30 + $0x28] sm:$0xff]  ;;  %7458 = vtanh.f32 %v2617_v14  ;;  %v2591_v28 = vld [vmem:[%s8463_s30 + $0x30] sm:$0xff]  ;;  %v2593_v34 = vld [vmem:[%s8463_s30 + $0x40] sm:$0xff] }
 0x1bb   : > { %v2622_v23 = vsub.f32 %v2555_v18, %v2590_v20  ;;  %7460 = vtanh.f32 %v2620_v15  ;;  %v2623_v30 = vsub.f32 %v2556_v27, %v2591_v28  ;;  %v2559_v31 = vld [vmem:[%s8460_s29 + $0x48] sm:$0xff]  ;;  %v2625_v36 = vsub.f32 %v2558_v33, %v2593_v34  ;;  %v2561_v37 = vld [vmem:[%s8460_s29 + $0x58] sm:$0xff]  ;;  %v2560_v39 = vld [vmem:[%s8460_s29 + $0x50] sm:$0xff] }
 0x1bc   : > { %7462 = vtanh.f32 %v2618_v19  ;;  %v2594_v32 = vld [vmem:[%s8463_s30 + $0x48] sm:$0xff]  ;;  %v2596_v38 = vld [vmem:[%s8463_s30 + $0x58] sm:$0xff]  ;;  %v2595_v40 = vld [vmem:[%s8463_s30 + $0x50] sm:$0xff] }
 0x1bd   : > { %7464 = vtanh.f32 %v2622_v23  ;;  %v2626_v35 = vsub.f32 %v2559_v31, %v2594_v32  ;;  %v2628_v42 = vsub.f32 %v2561_v37, %v2596_v38  ;;  %v2627_v44 = vsub.f32 %v2560_v39, %v2595_v40  ;;  %v2563_v45 = vld [vmem:[%s8460_s29 + $0x68] sm:$0xff]  ;;  %v2562_v49 = vld [vmem:[%s8460_s29 + $0x60] sm:$0xff]  ;;  %v2565_v61 = vld [vmem:[%s8460_s29 + $0x78] sm:$0xff] }
 0x1be   : > { %7466 = vtanh.f32 %v2621_v24  ;;  %v2598_v46 = vld [vmem:[%s8463_s30 + $0x68] sm:$0xff]  ;;  %v2597_v50 = vld [vmem:[%s8463_s30 + $0x60] sm:$0xff]  ;;  %v2600_v62 = vld [vmem:[%s8463_s30 + $0x78] sm:$0xff] }
 0x1bf   : > { %7468 = vtanh.f32 %v2624_v29  ;;  %v2630_v56 = vsub.f32 %v2563_v45, %v2598_v46  ;;  %v2629_v60 = vsub.f32 %v2562_v49, %v2597_v50  ;;  %v2564_v0 = vld [vmem:[%s8460_s29 + $0x70] sm:$0xff]  ;;  %v2632_v4 = vsub.f32 %v2565_v61, %v2600_v62  ;;  %v2567_v9 = vld [vmem:[%s8460_s29 + $0x88] sm:$0xff]  ;;  %v2566_v12 = vld [vmem:[%s8460_s29 + $0x80] sm:$0xff] }
 0x1c0   : > { %7470 = vtanh.f32 %v2623_v30  ;;  %v2599_v1 = vld [vmem:[%s8463_s30 + $0x70] sm:$0xff]  ;;  %v2602_v10 = vld [vmem:[%s8463_s30 + $0x88] sm:$0xff]  ;;  %v2601_v13 = vld [vmem:[%s8463_s30 + $0x80] sm:$0xff] }
 0x1c1   : > { %7472 = vtanh.f32 %v2626_v35  ;;  %v2631_v8 = vsub.f32 %v2564_v0, %v2599_v1  ;;  %v2634_v16 = vsub.f32 %v2567_v9, %v2602_v10  ;;  %v2633_v20 = vsub.f32 %v2566_v12, %v2601_v13  ;;  %v2569_v21 = vld [vmem:[%s8460_s29 + $0x98] sm:$0xff]  ;;  %v2568_v24 = vld [vmem:[%s8460_s29 + $0x90] sm:$0xff]  ;;  %v2571_v33 = vld [vmem:[%s8460_s29 + $0xa8] sm:$0xff] }
 0x1c2   : > { %7474 = vtanh.f32 %v2625_v36  ;;  %v2604_v22 = vld [vmem:[%s8463_s30 + $0x98] sm:$0xff]  ;;  %v2603_v25 = vld [vmem:[%s8463_s30 + $0x90] sm:$0xff]  ;;  %v2606_v34 = vld [vmem:[%s8463_s30 + $0xa8] sm:$0xff] }
 0x1c3   : > { %7476 = vtanh.f32 %v2628_v42  ;;  %v2636_v28 = vsub.f32 %v2569_v21, %v2604_v22  ;;  %v2635_v32 = vsub.f32 %v2568_v24, %v2603_v25  ;;  %v2570_v36 = vld [vmem:[%s8460_s29 + $0xa0] sm:$0xff]  ;;  %v2638_v40 = vsub.f32 %v2571_v33, %v2606_v34  ;;  %v2608_v49 = vld [vmem:[%s8463_s30 + $0xb8] sm:$0xff]  ;;  %v2575_v0 = vld [vmem:[%s8460_s29 + $0xc8] sm:$0xff] }
 0x1c4   : > { %7478 = vtanh.f32 %v2627_v44  ;;  %v2605_v37 = vld [vmem:[%s8463_s30 + $0xa0] sm:$0xff]  ;;  %v2610_v1 = vld [vmem:[%s8463_s30 + $0xc8] sm:$0xff] }
 0x1c5   : > { %7480 = vtanh.f32 %v2630_v56  ;;  %v2637_v46 = vsub.f32 %v2570_v36, %v2605_v37  ;;  %v2613_v33 = vld [vmem:[%s8463_s30 + $0xe0] sm:$0xff] }
 0x1c6   : > { %v8493_v43 = vpop.eup %7456  ;;  %7482 = vtanh.f32 %v2629_v60 }
 0x1c7   : > { %v8497_v47 = vpop.eup %7458  ;;  %v3092_v48 = vmul.f32 %v8493_v43, %v8491_v41  ;;  %7484 = vtanh.f32 %v2632_v4  ;;  %v2609_v4 = vld [vmem:[%s8463_s30 + $0xc0] sm:$0xff] }
 0x1c8   : > { %v8503_v51 = vpop.eup %7460  ;;  %v3090_v52 = vmul.f32 %v8497_v47, %v8491_v41  ;;  %7486 = vtanh.f32 %v2631_v8  ;;  %v2642_v8 = vsub.f32 %v2575_v0, %v2610_v1  ;;  %v2685_v0 = vld [vmem:[%s8649_s22 + $0x8] sm:$0xff] }
 0x1c9   : > { %v8507_v53 = vpop.eup %7462  ;;  %v3224_v54 = vsel %vm588_vm0, %v3092_v48, 0.0  ;;  %v3093_v55 = vmul.f32 %v8503_v51, %v8491_v41  ;;  %7488 = vtanh.f32 %v2634_v16  ;;  %v2573_v48 = vld [vmem:[%s8460_s29 + $0xb8] sm:$0xff]  ;;  %v2720_v1 = vld [vmem:[%s8652_s23 + $0x8] sm:$0xff] }
 0x1ca   : > { %v8512_v57 = vpop.eup %7464  ;;  %3225 = vadd.xlane.f32.xlu1 %v3224_v54  ;;  %v3218_v58 = vsel %vm588_vm0, %v3090_v52, 0.0  ;;  %v3091_v59 = vmul.f32 %v8507_v53, %v8491_v41  ;;  %7490 = vtanh.f32 %v2633_v20  ;;  %v2572_v52 = vld [vmem:[%s8460_s29 + $0xb0] sm:$0xff] }
 0x1cb   : > { %v8519_v63 = vpop.eup %7466  ;;  %3219 = vadd.xlane.f32.xlu0 %v3218_v58  ;;  %v3227_v2 = vsel %vm588_vm0, %v3093_v55, 0.0  ;;  %v3095_v3 = vmul.f32 %v8512_v57, %v8491_v41  ;;  %7492 = vtanh.f32 %v2636_v28  ;;  %v2607_v54 = vld [vmem:[%s8463_s30 + $0xb0] sm:$0xff]  ;;  %v2640_v58 = vsub.f32 %v2573_v48, %v2608_v49  ;;  %v2579_v28 = vld [vmem:[%s8460_s29 + $0xe8] sm:$0xff] }
 0x1cc   : > { %v8526_v5 = vpop.eup %7468  ;;  %v3221_v6 = vsel %vm588_vm0, %v3091_v59, 0.0  ;;  %v3094_v7 = vmul.f32 %v8519_v63, %v8491_v41  ;;  %7494 = vtanh.f32 %v2635_v32  ;;  %v2639_v62 = vsub.f32 %v2572_v52, %v2607_v54  ;;  %v2578_v32 = vld [vmem:[%s8460_s29 + $0xe0] sm:$0xff]  ;;  %v2580_v49 = vld [vmem:[%s8460_s29 + $0xf0] sm:$0xff] }
 0x1cd   : > { %v8533_v11 = vpop.eup %7470  ;;  %v3233_v14 = vsel %vm588_vm0, %v3095_v3, 0.0  ;;  %v3097_v15 = vmul.f32 %v8526_v5, %v8491_v41  ;;  %7496 = vtanh.f32 %v2638_v40  ;;  %v2574_v3 = vld [vmem:[%s8460_s29 + $0xc0] sm:$0xff]  ;;  %v2615_v52 = vld [vmem:[%s8463_s30 + $0xf0] sm:$0xff] }
 0x1ce   : > { %3228 = vadd.xlane.f32.xlu1 %v3227_v2  ;;  %v8540_v17 = vpop.eup %7472  ;;  %v3230_v18 = vsel %vm588_vm0, %v3094_v7, 0.0  ;;  %v3096_v19 = vmul.f32 %v8533_v11, %v8491_v41  ;;  %7498 = vtanh.f32 %v2637_v46  ;;  %v2641_v13 = vsub.f32 %v2574_v3, %v2609_v4  ;;  %v2616_v46 = vld [vmem:[%s8463_s30 + $0xf8] sm:$0xff]  ;;  %v2684_v4 = vld [vmem:[%s8649_s22] sm:$0xff] }
 0x1cf   : > { %3222 = vadd.xlane.f32.xlu0 %v3221_v6  ;;  %v8547_v23 = vpop.eup %7474  ;;  %v3239_v26 = vsel %vm588_vm0, %v3097_v15, 0.0  ;;  %v3099_v27 = vmul.f32 %v8540_v17, %v8491_v41  ;;  %7500 = vtanh.f32 %v2640_v58  ;;  %v2612_v15 = vld [vmem:[%s8463_s30 + $0xd8] sm:$0xff] }
 0x1d0   : > { %v8554_v29 = vpop.eup %7476  ;;  %v3236_v30 = vsel %vm588_vm0, %v3096_v19, 0.0  ;;  %v3098_v31 = vmul.f32 %v8547_v23, %v8491_v41  ;;  %7502 = vtanh.f32 %v2639_v62  ;;  %v2611_v19 = vld [vmem:[%s8463_s30 + $0xd0] sm:$0xff]  ;;  %v2647_v62 = vsub.f32 %v2580_v49, %v2615_v52 }
 0x1d1   : > { %v8561_v35 = vpop.eup %7478  ;;  %v3245_v38 = vsel %vm588_vm0, %v3099_v27, 0.0  ;;  %v3101_v39 = vmul.f32 %v8554_v29, %v8491_v41  ;;  %7504 = vtanh.f32 %v2642_v8 }
 0x1d2   : > { %3234 = vadd.xlane.f32.xlu1 %v3233_v14  ;;  %v8568_v42 = vpop.eup %7480  ;;  %v3242_v44 = vsel %vm588_vm0, %v3098_v31, 0.0  ;;  %v3100_v45 = vmul.f32 %v8561_v35, %v8491_v41  ;;  %v2577_v14 = vld [vmem:[%s8460_s29 + $0xd8] sm:$0xff]  ;;  %7506 = vtanh.f32 %v2641_v13 }
 0x1d3   : > { %3231 = vadd.xlane.f32.xlu0 %v3230_v18  ;;  %v8575_v50 = vpop.eup %7482  ;;  %v3251_v55 = vsel %vm588_vm0, %v3101_v39, 0.0  ;;  %v3103_v56 = vmul.f32 %v8568_v42, %v8491_v41  ;;  %v2576_v18 = vld [vmem:[%s8460_s29 + $0xd0] sm:$0xff]  ;;  %v2644_v22 = vsub.f32 %v2577_v14, %v2612_v15 }
 0x1d4   : > { %v8582_v59 = vpop.eup %7484  ;;  %v3248_v60 = vsel %vm588_vm0, %v3100_v45, 0.0  ;;  %v3102_v61 = vmul.f32 %v8575_v50, %v8491_v41  ;;  %v2643_v27 = vsub.f32 %v2576_v18, %v2611_v19  ;;  %v2581_v45 = vld [vmem:[%s8460_s29 + $0xf8] sm:$0xff]  ;;  %s9084_s29 = sld [smem:[#allocation6 + $0x3]] }
 0x1d5   : > { %v8589_v2 = vpop.eup %7486  ;;  %v3257_v6 = vsel %vm588_vm0, %v3103_v56, 0.0  ;;  %v3105_v7 = vmul.f32 %v8582_v59, %v8491_v41  ;;  %7508 = vtanh.f32 %v2644_v22  ;;  %v2648_v56 = vsub.f32 %v2581_v45, %v2616_v46  ;;  %v2687_v18 = vld [vmem:[%s8649_s22 + $0x18] sm:$0xff]  ;;  %v2721_v22 = vld [vmem:[%s8652_s23 + $0x10] sm:$0xff] }
 0x1d6   : > { %3240 = vadd.xlane.f32.xlu1 %v3239_v26  ;;  %v8600_v9 = vpop.eup %7488  ;;  %v3254_v10 = vsel %vm588_vm0, %v3102_v61, 0.0  ;;  %v3104_v12 = vmul.f32 %v8589_v2, %v8491_v41  ;;  %7510 = vtanh.f32 %v2643_v27  ;;  %v2722_v19 = vld [vmem:[%s8652_s23 + $0x18] sm:$0xff] }
 0x1d7   : > { %3237 = vadd.xlane.f32.xlu0 %v3236_v30  ;;  %v8607_v16 = vpop.eup %7490  ;;  %v3263_v20 = vsel %vm588_vm0, %v3105_v7, 0.0  ;;  %v3107_v21 = vmul.f32 %v8600_v9, %v8491_v41  ;;  %v2614_v30 = vld [vmem:[%s8463_s30 + $0xe8] sm:$0xff]  ;;  %v2754_v27 = vsub.f32 %v2687_v18, %v2722_v19  ;;  %v2692_v19 = vld [vmem:[%s8649_s22 + $0x40] sm:$0xff]  ;;  %s6928_s30 = sshll.u32 %s9080_s8, 8 }
 0x1d8   : > { %v8614_v24 = vpop.eup %7492  ;;  %v3260_v25 = vsel %vm588_vm0, %v3104_v12, 0.0  ;;  %v3106_v26 = vmul.f32 %v8607_v16, %v8491_v41  ;;  %v2646_v37 = vsub.f32 %v2579_v28, %v2614_v30  ;;  %s9150_s17 = scalar_lea.vmem [#allocation2], %s6928_s30 }
 0x1d9   : > { %v8621_v31 = vpop.eup %7494  ;;  %v3269_v34 = vsel %vm588_vm0, %v3107_v21, 0.0  ;;  %v3109_v36 = vmul.f32 %v8614_v24, %v8491_v41  ;;  %v2686_v21 = vld [vmem:[%s8649_s22 + $0x10] sm:$0xff] }
 0x1da   : > { %3246 = vadd.xlane.f32.xlu1 %v3245_v38  ;;  %v8630_v38 = vpop.eup %7496  ;;  %v3266_v39 = vsel %vm588_vm0, %v3106_v26, 0.0  ;;  %v3108_v40 = vmul.f32 %v8621_v31, %v8491_v41  ;;  %7512 = vtanh.f32 %v2646_v37  ;;  %s6930_s16 = sshll.u32 %s9084_s29, 8 }
 0x1db   : > { %3243 = vadd.xlane.f32.xlu0 %v3242_v44  ;;  %v2645_v44 = vsub.f32 %v2578_v32, %v2613_v33  ;;  %v8637_v48 = vpop.eup %7498  ;;  %v3275_v54 = vsel %vm588_vm0, %v3109_v36, 0.0  ;;  %v2753_v33 = vsub.f32 %v2686_v21, %v2721_v22  ;;  %v2724_v36 = vld [vmem:[%s8652_s23 + $0x28] sm:$0xff]  ;;  %v2727_v21 = vld [vmem:[%s8652_s23 + $0x40] sm:$0xff]  ;;  %s9155_s18 = scalar_lea.vmem [#allocation3], %s6930_s16  ;;  %s6723_s16 = sshll.u32 %s12493_s14, 1 }
 0x1dc   : > { %v8644_v58 = vpop.eup %7500  ;;  %v3110_v61 = vmul.f32 %v8637_v48, %v8491_v41 }
 0x1dd   : > { %7514 = vtanh.f32 %v2645_v44  ;;  %v8655_v3 = vpop.eup %7502  ;;  %v3113_v8 = vmul.f32 %v8644_v58, %v8491_v41 }
 0x1de   : > { %3252 = vadd.xlane.f32.xlu1 %v3251_v55  ;;  %v3111_v55 = vmul.f32 %v8630_v38, %v8491_v41  ;;  %7516 = vtanh.f32 %v2648_v56  ;;  %v8662_v12 = vpop.eup %7504  ;;  %v3278_v13 = vsel %vm588_vm0, %v3110_v61, 0.0  ;;  %v3112_v14 = vmul.f32 %v8655_v3, %v8491_v41  ;;  %v2691_v56 = vld [vmem:[%s8649_s22 + $0x38] sm:$0xff] }
 0x1df   : > { %3249 = vadd.xlane.f32.xlu0 %v3248_v60  ;;  %v3272_v60 = vsel %vm588_vm0, %v3108_v40, 0.0  ;;  %7518 = vtanh.f32 %v2647_v62  ;;  %v3115_v26 = vmul.f32 %v8662_v12, %v8491_v41  ;;  %v2723_v40 = vld [vmem:[%s8652_s23 + $0x20] sm:$0xff]  ;;  %v2690_v62 = vld [vmem:[%s8649_s22 + $0x30] sm:$0xff] }
 0x1e0   : > { %v3281_v7 = vsel %vm588_vm0, %v3111_v55, 0.0  ;;  %v3284_v30 = vsel %vm588_vm0, %v3112_v14, 0.0  ;;  %v2693_v14 = vld [vmem:[%s8649_s22 + $0x48] sm:$0xff] }
 0x1e1   : > { %v3293_v44 = vsel %vm588_vm0, %v3115_v26, 0.0 }
 0x1e2   : > { %3258 = vadd.xlane.f32.xlu1 %v3257_v6  ;;  %v2719_v6 = vld [vmem:[%s8652_s23] sm:$0xff] }
 0x1e3   : > { %3255 = vadd.xlane.f32.xlu0 %v3254_v10  ;;  %v2752_v10 = vsub.f32 %v2685_v0, %v2720_v1  ;;  %v2751_v15 = vsub.f32 %v2684_v4, %v2719_v6  ;;  %v2725_v0 = vld [vmem:[%s8652_s23 + $0x30] sm:$0xff] }
 0x1e5   : > { %7520 = vtanh.f32 %v2752_v10 }
 0x1e6   : > { %3264 = vadd.xlane.f32.xlu1 %v3263_v20  ;;  %v8669_v20 = vpop.eup %7506  ;;  %7522 = vtanh.f32 %v2751_v15  ;;  %v2728_v15 = vld [vmem:[%s8652_s23 + $0x48] sm:$0xff] }
 0x1e7   : > { %3261 = vadd.xlane.f32.xlu0 %v3260_v25  ;;  %v3287_v25 = vsel %vm588_vm0, %v3113_v8, 0.0  ;;  %v8676_v28 = vpop.eup %7508  ;;  %v3114_v32 = vmul.f32 %v8669_v20, %v8491_v41  ;;  %7524 = vtanh.f32 %v2754_v27  ;;  %v2760_v26 = vsub.f32 %v2693_v14, %v2728_v15 }
 0x1e8   : > { %11843 = vst [vmem:[#allocation11_spill] sm:$0xff] %v8676_v28  ;;  %v8683_v37 = vpop.eup %7510  ;;  %v3117_v45 = vmul.f32 %v8676_v28, %v8491_v41  ;;  %7526 = vtanh.f32 %v2753_v33  ;;  %v2759_v33 = vsub.f32 %v2692_v19, %v2727_v21 }
 0x1e9   : > { %v8690_v49 = vpop.eup %7512  ;;  %v3290_v52 = vsel %vm588_vm0, %v3114_v32, 0.0 }
 0x1ea   : > { %3270 = vadd.xlane.f32.xlu1 %v3269_v34  ;;  %v2689_v34 = vld [vmem:[%s8649_s22 + $0x28] sm:$0xff]  ;;  %11844 = vst [vmem:[#allocation12_spill] sm:$0xff] %v8690_v49  ;;  %v8697_v61 = vpop.eup %7514  ;;  %v3299_v1 = vsel %vm588_vm0, %v3117_v45, 0.0  ;;  %v3119_v4 = vmul.f32 %v8690_v49, %v8491_v41 }
 0x1eb   : > { %3267 = vadd.xlane.f32.xlu0 %v3266_v39  ;;  %v2688_v39 = vld [vmem:[%s8649_s22 + $0x20] sm:$0xff]  ;;  %v2756_v46 = vsub.f32 %v2689_v34, %v2724_v36  ;;  %v3118_v10 = vmul.f32 %v8697_v61, %v8491_v41  ;;  %v2695_v34 = vld [vmem:[%s8649_s22 + $0x58] sm:$0xff]  ;;  %v2862_v49 = vld [vmem:[%s8886_s0 + $0x48] sm:$0xff] }
 0x1ec   : > { %v2755_v55 = vsub.f32 %v2688_v39, %v2723_v40  ;;  %v3305_v22 = vsel %vm588_vm0, %v3119_v4, 0.0  ;;  %v2730_v36 = vld [vmem:[%s8652_s23 + $0x58] sm:$0xff]  ;;  %v2694_v40 = vld [vmem:[%s8649_s22 + $0x50] sm:$0xff]  ;;  %v2696_v4 = vld [vmem:[%s8649_s22 + $0x60] sm:$0xff] }
 0x1ed   : > { %7528 = vtanh.f32 %v2756_v46 }
 0x1ee   : > { %3276 = vadd.xlane.f32.xlu1 %v3275_v54  ;;  %v3116_v54 = vmul.f32 %v8683_v37, %v8491_v41  ;;  %7530 = vtanh.f32 %v2755_v55 }
 0x1ef   : > { %3273 = vadd.xlane.f32.xlu0 %v3272_v60  ;;  %v2726_v60 = vld [vmem:[%s8652_s23 + $0x38] sm:$0xff] }
 0x1f0   : > { %v2758_v6 = vsub.f32 %v2691_v56, %v2726_v60  ;;  %v3296_v8 = vsel %vm588_vm0, %v3116_v54, 0.0 }
 0x1f2   : > { %3282 = vadd.xlane.f32.xlu1 %v3281_v7  ;;  %v8704_v7 = vpop.eup %7516  ;;  %7532 = vtanh.f32 %v2758_v6  ;;  %v2731_v6 = vld [vmem:[%s8652_s23 + $0x60] sm:$0xff] }
 0x1f3   : > { %3279 = vadd.xlane.f32.xlu0 %v3278_v13  ;;  %11845 = vst [vmem:[#allocation13_spill] sm:$0xff] %v8704_v7  ;;  %v2757_v13 = vsub.f32 %v2690_v62, %v2725_v0  ;;  %v8711_v18 = vpop.eup %7518  ;;  %v2697_v62 = vld [vmem:[%s8649_s22 + $0x68] sm:$0xff]  ;;  %v2763_v21 = vsub.f32 %v2696_v4, %v2731_v6 }
 0x1f4   : > { %v8718_v27 = vpop.eup %7520  ;;  %v3120_v32 = vmul.f32 %v8711_v18, %v8491_v41  ;;  %v2732_v0 = vld [vmem:[%s8652_s23 + $0x68] sm:$0xff] }
 0x1f5   : > { %11846 = vst [vmem:[#allocation14_spill] sm:$0xff] %v8718_v27  ;;  %7534 = vtanh.f32 %v2757_v13  ;;  %v8725_v39 = vpop.eup %7522  ;;  %v3123_v46 = vmul.f32 %v8718_v27, %v8491_v41  ;;  %v2764_v13 = vsub.f32 %v2697_v62, %v2732_v0  ;;  %v2735_v62 = vld [vmem:[%s8652_s23 + $0x80] sm:$0xff]  ;;  %v2858_v27 = vld [vmem:[%s8886_s0 + $0x28] sm:$0xff] }
 0x1f6   : > { %3288 = vadd.xlane.f32.xlu1 %v3287_v25  ;;  %v3121_v25 = vmul.f32 %v8704_v7, %v8491_v41  ;;  %7536 = vtanh.f32 %v2760_v26  ;;  %v8732_v54 = vpop.eup %7524  ;;  %v3308_v55 = vsel %vm588_vm0, %v3120_v32, 0.0  ;;  %v3122_v56 = vmul.f32 %v8725_v39, %v8491_v41  ;;  %v2733_v32 = vld [vmem:[%s8652_s23 + $0x70] sm:$0xff]  ;;  %v2860_v7 = vld [vmem:[%s8886_s0 + $0x38] sm:$0xff] }
 0x1f7   : > { %3285 = vadd.xlane.f32.xlu0 %v3284_v30  ;;  %v3302_v30 = vsel %vm588_vm0, %v3118_v10, 0.0  ;;  %11847 = vst [vmem:[#allocation15_spill] sm:$0xff] %v8732_v54  ;;  %7538 = vtanh.f32 %v2759_v33  ;;  %v3125_v10 = vmul.f32 %v8732_v54, %v8491_v41  ;;  %v2749_v54 = vld [vmem:[%s8652_s23 + $0xf0] sm:$0xff] }
 0x1f8   : > { %v3311_v45 = vsel %vm588_vm0, %v3121_v25, 0.0  ;;  %v3314_v15 = vsel %vm588_vm0, %v3122_v56, 0.0  ;;  %v2734_v25 = vld [vmem:[%s8652_s23 + $0x78] sm:$0xff] }
 0x1f9   : > { %v3323_v33 = vsel %vm588_vm0, %v3125_v10, 0.0 }
 0x1fa   : > { %3294 = vadd.xlane.f32.xlu1 %v3293_v44  ;;  %v2729_v44 = vld [vmem:[%s8652_s23 + $0x50] sm:$0xff] }
 0x1fb   : > { %3291 = vadd.xlane.f32.xlu0 %v3290_v52  ;;  %v2762_v52 = vsub.f32 %v2695_v34, %v2730_v36  ;;  %v2761_v60 = vsub.f32 %v2694_v40, %v2729_v44 }
 0x1fd   : > { %7540 = vtanh.f32 %v2762_v52  ;;  %v2701_v52 = vld [vmem:[%s8649_s22 + $0x88] sm:$0xff] }
 0x1fe   : > { %3300 = vadd.xlane.f32.xlu1 %v3299_v1  ;;  %v8739_v1 = vpop.eup %7526  ;;  %7542 = vtanh.f32 %v2761_v60  ;;  %v2700_v60 = vld [vmem:[%s8649_s22 + $0x80] sm:$0xff] }
 0x1ff   : > { %3297 = vadd.xlane.f32.xlu0 %v3296_v8  ;;  %v3317_v8 = vsel %vm588_vm0, %v3123_v46, 0.0  ;;  %v8746_v14 = vpop.eup %7528  ;;  %v3124_v19 = vmul.f32 %v8739_v1, %v8491_v41  ;;  %7544 = vtanh.f32 %v2764_v13 }
 0x200   : > { %11848 = vst [vmem:[#allocation16_spill] sm:$0xff] %v8746_v14  ;;  %v8753_v26 = vpop.eup %7530  ;;  %v3127_v34 = vmul.f32 %v8746_v14, %v8491_v41  ;;  %7546 = vtanh.f32 %v2763_v21  ;;  %v2738_v21 = vld [vmem:[%s8652_s23 + $0x98] sm:$0xff] }
 0x201   : > { %v8760_v40 = vpop.eup %7532  ;;  %v3320_v44 = vsel %vm588_vm0, %v3124_v19, 0.0  ;;  %v2703_v19 = vld [vmem:[%s8649_s22 + $0x98] sm:$0xff] }
 0x202   : > { %3306 = vadd.xlane.f32.xlu1 %v3305_v22  ;;  %v2699_v22 = vld [vmem:[%s8649_s22 + $0x78] sm:$0xff]  ;;  %11849 = vst [vmem:[#allocation17_spill] sm:$0xff] %v8760_v40  ;;  %v8767_v56 = vpop.eup %7534  ;;  %v3329_v0 = vsel %vm588_vm0, %v3127_v34, 0.0  ;;  %v3129_v4 = vmul.f32 %v8760_v40, %v8491_v41  ;;  %v2770_v34 = vsub.f32 %v2703_v19, %v2738_v21 }
 0x203   : > { %3303 = vadd.xlane.f32.xlu0 %v3302_v30  ;;  %v2698_v30 = vld [vmem:[%s8649_s22 + $0x70] sm:$0xff]  ;;  %v2766_v36 = vsub.f32 %v2699_v22, %v2734_v25  ;;  %v3128_v13 = vmul.f32 %v8767_v56, %v8491_v41  ;;  %v2750_v40 = vld [vmem:[%s8652_s23 + $0xf8] sm:$0xff] }
 0x204   : > { %v2765_v46 = vsub.f32 %v2698_v30, %v2733_v32  ;;  %v2702_v25 = vld [vmem:[%s8649_s22 + $0x90] sm:$0xff]  ;;  %v3335_v32 = vsel %vm588_vm0, %v3129_v4, 0.0 }
 0x205   : > { %7548 = vtanh.f32 %v2766_v36  ;;  %v2737_v30 = vld [vmem:[%s8652_s23 + $0x90] sm:$0xff] }
 0x206   : > { %3312 = vadd.xlane.f32.xlu1 %v3311_v45  ;;  %v3126_v45 = vmul.f32 %v8753_v26, %v8491_v41  ;;  %7550 = vtanh.f32 %v2765_v46  ;;  %v2769_v46 = vsub.f32 %v2702_v25, %v2737_v30  ;;  %v2707_v25 = vld [vmem:[%s8649_s22 + $0xb8] sm:$0xff] }
 0x207   : > { %3309 = vadd.xlane.f32.xlu0 %v3308_v55  ;;  %v2736_v55 = vld [vmem:[%s8652_s23 + $0x88] sm:$0xff]  ;;  %v2742_v30 = vld [vmem:[%s8652_s23 + $0xb8] sm:$0xff] }
 0x208   : > { %v2768_v6 = vsub.f32 %v2701_v52, %v2736_v55  ;;  %v3326_v10 = vsel %vm588_vm0, %v3126_v45, 0.0  ;;  %v2705_v52 = vld [vmem:[%s8649_s22 + $0xa8] sm:$0xff] }
 0x209   : > { %v2740_v55 = vld [vmem:[%s8652_s23 + $0xa8] sm:$0xff] }
 0x20a   : > { %3318 = vadd.xlane.f32.xlu1 %v3317_v8  ;;  %v8774_v8 = vpop.eup %7536  ;;  %7552 = vtanh.f32 %v2768_v6 }
 0x20b   : > { %3315 = vadd.xlane.f32.xlu0 %v3314_v15  ;;  %11850 = vst [vmem:[#allocation18_spill] sm:$0xff] %v8774_v8  ;;  %v2767_v15 = vsub.f32 %v2700_v60, %v2735_v62  ;;  %v8781_v22 = vpop.eup %7538  ;;  %v2704_v62 = vld [vmem:[%s8649_s22 + $0xa0] sm:$0xff] }
 0x20c   : > { %v8788_v36 = vpop.eup %7540  ;;  %v3130_v45 = vmul.f32 %v8781_v22, %v8491_v41 }
 0x20d   : > { %11851 = vst [vmem:[#allocation19_spill] sm:$0xff] %v8788_v36  ;;  %7554 = vtanh.f32 %v2767_v15  ;;  %v8795_v60 = vpop.eup %7542  ;;  %v3133_v6 = vmul.f32 %v8788_v36, %v8491_v41 }
 0x20e   : > { %3324 = vadd.xlane.f32.xlu1 %v3323_v33  ;;  %v3131_v33 = vmul.f32 %v8774_v8, %v8491_v41  ;;  %7556 = vtanh.f32 %v2770_v34  ;;  %v3338_v15 = vsel %vm588_vm0, %v3130_v45, 0.0  ;;  %v3132_v19 = vmul.f32 %v8795_v60, %v8491_v41  ;;  %v2741_v34 = vld [vmem:[%s8652_s23 + $0xb0] sm:$0xff]  ;;  %v2748_v8 = vld [vmem:[%s8652_s23 + $0xe8] sm:$0xff] }
 0x20f   : > { %3321 = vadd.xlane.f32.xlu0 %v3320_v44  ;;  %v3332_v44 = vsel %vm588_vm0, %v3128_v13, 0.0  ;;  %v8802_v13 = vpop.eup %7544  ;;  %7558 = vtanh.f32 %v2769_v46 }
 0x210   : > { %v3341_v4 = vsel %vm588_vm0, %v3131_v33, 0.0  ;;  %11852 = vst [vmem:[#allocation20_spill] sm:$0xff] %v8802_v13  ;;  %v2706_v33 = vld [vmem:[%s8649_s22 + $0xb0] sm:$0xff]  ;;  %v3135_v45 = vmul.f32 %v8802_v13, %v8491_v41  ;;  %v2746_v13 = vld [vmem:[%s8652_s23 + $0xd8] sm:$0xff] }
 0x212   : > { %3330 = vadd.xlane.f32.xlu1 %v3329_v0  ;;  %v2739_v0 = vld [vmem:[%s8652_s23 + $0xa0] sm:$0xff] }
 0x213   : > { %3327 = vadd.xlane.f32.xlu0 %v3326_v10  ;;  %v2772_v10 = vsub.f32 %v2705_v52, %v2740_v55  ;;  %v2771_v21 = vsub.f32 %v2704_v62, %v2739_v0  ;;  %v2774_v52 = vsub.f32 %v2707_v25, %v2742_v30  ;;  %v3344_v55 = vsel %vm588_vm0, %v3132_v19, 0.0 }
 0x214   : > { %v2773_v0 = vsub.f32 %v2706_v33, %v2741_v34  ;;  %v3353_v19 = vsel %vm588_vm0, %v3135_v45, 0.0 }
 0x215   : > { %7560 = vtanh.f32 %v2772_v10  ;;  %v2743_v10 = vld [vmem:[%s8652_s23 + $0xc0] sm:$0xff] }
 0x216   : > { %3336 = vadd.xlane.f32.xlu1 %v3335_v32  ;;  %v8809_v32 = vpop.eup %7546  ;;  %7562 = vtanh.f32 %v2771_v21 }
 0x217   : > { %3333 = vadd.xlane.f32.xlu0 %v3332_v44  ;;  %v3347_v44 = vsel %vm588_vm0, %v3133_v6, 0.0  ;;  %v8816_v46 = vpop.eup %7548  ;;  %v3134_v62 = vmul.f32 %v8809_v32, %v8491_v41  ;;  %v2708_v6 = vld [vmem:[%s8649_s22 + $0xc0] sm:$0xff]  ;;  %7564 = vtanh.f32 %v2774_v52  ;;  %v2745_v52 = vld [vmem:[%s8652_s23 + $0xd0] sm:$0xff] }
 0x218   : > { %11853 = vst [vmem:[#allocation21_spill] sm:$0xff] %v8816_v46  ;;  %v8823_v36 = vpop.eup %7550  ;;  %v3137_v21 = vmul.f32 %v8816_v46, %v8491_v41  ;;  %7566 = vtanh.f32 %v2773_v0  ;;  %v2710_v46 = vld [vmem:[%s8649_s22 + $0xd0] sm:$0xff] }
 0x219   : > { %v8834_v30 = vpop.eup %7552  ;;  %v3350_v33 = vsel %vm588_vm0, %v3134_v62, 0.0  ;;  %v3136_v34 = vmul.f32 %v8823_v36, %v8491_v41 }
 0x21a   : > { %3342 = vadd.xlane.f32.xlu1 %v3341_v4  ;;  %v2709_v4 = vld [vmem:[%s8649_s22 + $0xc8] sm:$0xff]  ;;  %11854 = vst [vmem:[#allocation22_spill] sm:$0xff] %v8834_v30  ;;  %v8841_v45 = vpop.eup %7554  ;;  %v3139_v62 = vmul.f32 %v8834_v30, %v8491_v41  ;;  %v2712_v30 = vld [vmem:[%s8649_s22 + $0xe0] sm:$0xff] }
 0x21b   : > { %3339 = vadd.xlane.f32.xlu0 %v3338_v15  ;;  %v2744_v15 = vld [vmem:[%s8652_s23 + $0xc8] sm:$0xff] }
 0x21c   : > { %v2776_v25 = vsub.f32 %v2709_v4, %v2744_v15  ;;  %v3359_v4 = vsel %vm588_vm0, %v3137_v21, 0.0  ;;  %v8848_v15 = vpop.eup %7556 }
 0x21d   : > { %11855 = vst [vmem:[#allocation23_spill] sm:$0xff] %v8848_v15  ;;  %v8855_v21 = vpop.eup %7558 }
 0x21e   : > { %3348 = vadd.xlane.f32.xlu1 %v3347_v44  ;;  %v2775_v44 = vsub.f32 %v2708_v6, %v2743_v10  ;;  %7568 = vtanh.f32 %v2776_v25  ;;  %v3356_v6 = vsel %vm588_vm0, %v3136_v34, 0.0  ;;  %v3138_v10 = vmul.f32 %v8841_v45, %v8491_v41  ;;  %v2747_v25 = vld [vmem:[%s8652_s23 + $0xe0] sm:$0xff] }
 0x21f   : > { %3345 = vadd.xlane.f32.xlu0 %v3344_v55  ;;  %v2711_v55 = vld [vmem:[%s8649_s22 + $0xd8] sm:$0xff]  ;;  %v3141_v34 = vmul.f32 %v8848_v15, %v8491_v41 }
 0x220   : > { %v2778_v0 = vsub.f32 %v2711_v55, %v2746_v13  ;;  %7570 = vtanh.f32 %v2775_v44  ;;  %v3365_v13 = vsel %vm588_vm0, %v3139_v62, 0.0  ;;  %v3362_v55 = vsel %vm588_vm0, %v3138_v10, 0.0  ;;  %v2714_v62 = vld [vmem:[%s8649_s22 + $0xf0] sm:$0xff]  ;;  %v2856_v15 = vld [vmem:[%s8886_s0 + $0x18] sm:$0xff] }
 0x222   : > { %3354 = vadd.xlane.f32.xlu1 %v3353_v19  ;;  %v2777_v19 = vsub.f32 %v2710_v46, %v2745_v52  ;;  %7572 = vtanh.f32 %v2778_v0  ;;  %v8864_v44 = vpop.eup %7560  ;;  %v3140_v52 = vmul.f32 %v8855_v21, %v8491_v41  ;;  %v3371_v0 = vsel %vm588_vm0, %v3141_v34, 0.0 }
 0x223   : > { %3351 = vadd.xlane.f32.xlu0 %v3350_v33  ;;  %v2713_v33 = vld [vmem:[%s8649_s22 + $0xe8] sm:$0xff]  ;;  %11856 = vst [vmem:[#allocation24_spill] sm:$0xff] %v8864_v44  ;;  %v8871_v14 = vpop.eup %7562 }
 0x224   : > { %v2780_v46 = vsub.f32 %v2713_v33, %v2748_v8  ;;  %7574 = vtanh.f32 %v2777_v19  ;;  %v3143_v8 = vmul.f32 %v8864_v44, %v8491_v41  ;;  %v8878_v10 = vpop.eup %7564  ;;  %v3368_v19 = vsel %vm588_vm0, %v3140_v52, 0.0  ;;  %v2821_v44 = vld [vmem:[%s8883_s28 + $0x18] sm:$0xff] }
 0x225   : > { %11857 = vst [vmem:[#allocation25_spill] sm:$0xff] %v8878_v10  ;;  %v8889_v34 = vpop.eup %7566  ;;  %v3145_v52 = vmul.f32 %v8878_v10, %v8491_v41  ;;  %v2820_v10 = vld [vmem:[%s8883_s28 + $0x10] sm:$0xff] }
 0x226   : > { %3360 = vadd.xlane.f32.xlu1 %v3359_v4  ;;  %v2779_v4 = vsub.f32 %v2712_v30, %v2747_v25  ;;  %7576 = vtanh.f32 %v2780_v46  ;;  %v3142_v30 = vmul.f32 %v8871_v14, %v8491_v41  ;;  %v2781_v25 = vsub.f32 %v2714_v62, %v2749_v54  ;;  %v2818_v46 = vld [vmem:[%s8883_s28] sm:$0xff] }
 0x227   : > { %3357 = vadd.xlane.f32.xlu0 %v3356_v6  ;;  %v2715_v6 = vld [vmem:[%s8649_s22 + $0xf8] sm:$0xff]  ;;  %v3377_v54 = vsel %vm588_vm0, %v3143_v8, 0.0  ;;  %s483_s22 = scalar_lea.vmem %s12491_s21, %s6723_s16 }
 0x228   : > { %v2782_v33 = vsub.f32 %v2715_v6, %v2750_v40  ;;  %7578 = vtanh.f32 %v2779_v4  ;;  %v2854_v40 = vld [vmem:[%s8886_s0 + $0x8] sm:$0xff]  ;;  %v3374_v62 = vsel %vm588_vm0, %v3142_v30, 0.0 }
 0x22a   : > { %3366 = vadd.xlane.f32.xlu1 %v3365_v13  ;;  %v2819_v13 = vld [vmem:[%s8883_s28 + $0x8] sm:$0xff]  ;;  %7580 = vtanh.f32 %v2782_v33  ;;  %v2855_v33 = vld [vmem:[%s8886_s0 + $0x10] sm:$0xff] }
 0x22b   : > { %3363 = vadd.xlane.f32.xlu0 %v3362_v55  ;;  %v2853_v55 = vld [vmem:[%s8886_s0] sm:$0xff]  ;;  %v2886_v4 = vsub.f32 %v2819_v13, %v2854_v40  ;;  %v8896_v6 = vpop.eup %7568  ;;  %7582 = vtanh.f32 %v2781_v25  ;;  %v3383_v13 = vsel %vm588_vm0, %v3145_v52, 0.0  ;;  %v2888_v40 = vsub.f32 %v2821_v44, %v2856_v15 }
 0x22c   : > { %11858 = vst [vmem:[#allocation26_spill] sm:$0xff] %v8896_v6  ;;  %v3147_v30 = vmul.f32 %v8896_v6, %v8491_v41  ;;  %v2822_v6 = vld [vmem:[%s8883_s28 + $0x20] sm:$0xff] }
 0x22d   : > { %v8903_v8 = vpop.eup %7570  ;;  %7584 = vtanh.f32 %v2886_v4  ;;  %v2857_v15 = vld [vmem:[%s8886_s0 + $0x20] sm:$0xff] }
 0x22e   : > { %3372 = vadd.xlane.f32.xlu1 %v3371_v0  ;;  %v3144_v0 = vmul.f32 %v8889_v34, %v8491_v41  ;;  %v3389_v44 = vsel %vm588_vm0, %v3147_v30, 0.0 }
 0x22f   : > { %3369 = vadd.xlane.f32.xlu0 %v3368_v19  ;;  %v2885_v19 = vsub.f32 %v2818_v46, %v2853_v55  ;;  %v8910_v25 = vpop.eup %7572  ;;  %v3146_v55 = vmul.f32 %v8903_v8, %v8491_v41 }
 0x230   : > { %11859 = vst [vmem:[#allocation27_spill] sm:$0xff] %v8910_v25  ;;  %v3380_v46 = vsel %vm588_vm0, %v3144_v0, 0.0  ;;  %v3149_v4 = vmul.f32 %v8910_v25, %v8491_v41  ;;  %v2824_v25 = vld [vmem:[%s8883_s28 + $0x30] sm:$0xff] }
 0x231   : > { %7586 = vtanh.f32 %v2885_v19  ;;  %v8917_v52 = vpop.eup %7574 }
 0x232   : > { %3378 = vadd.xlane.f32.xlu1 %v3377_v54  ;;  %v2887_v54 = vsub.f32 %v2820_v10, %v2855_v33  ;;  %7588 = vtanh.f32 %v2888_v40  ;;  %v3386_v10 = vsel %vm588_vm0, %v3146_v55, 0.0  ;;  %v3148_v33 = vmul.f32 %v8917_v52, %v8491_v41 }
 0x233   : > { %3375 = vadd.xlane.f32.xlu0 %v3374_v62  ;;  %v2823_v62 = vld [vmem:[%s8883_s28 + $0x28] sm:$0xff]  ;;  %v8924_v19 = vpop.eup %7576  ;;  %v3395_v40 = vsel %vm588_vm0, %v3149_v4, 0.0  ;;  %v2826_v4 = vld [vmem:[%s8883_s28 + $0x40] sm:$0xff] }
 0x234   : > { %v2890_v0 = vsub.f32 %v2823_v62, %v2858_v27  ;;  %11860 = vst [vmem:[#allocation28_spill] sm:$0xff] %v8924_v19  ;;  %7590 = vtanh.f32 %v2887_v54  ;;  %v2859_v27 = vld [vmem:[%s8886_s0 + $0x30] sm:$0xff]  ;;  %v3151_v55 = vmul.f32 %v8924_v19, %v8491_v41  ;;  %v2831_v19 = vld [vmem:[%s8883_s28 + $0x68] sm:$0xff] }
 0x235   : > { %v8931_v30 = vpop.eup %7578 }
 0x236   : > { %3384 = vadd.xlane.f32.xlu1 %v3383_v13  ;;  %v2889_v13 = vsub.f32 %v2822_v6, %v2857_v15  ;;  %11861 = vst [vmem:[#allocation29_spill] sm:$0xff] %v8931_v30  ;;  %7592 = vtanh.f32 %v2890_v0  ;;  %v3392_v6 = vsel %vm588_vm0, %v3148_v33, 0.0  ;;  %v3150_v15 = vmul.f32 %v8931_v30, %v8491_v41  ;;  %v2861_v0 = vld [vmem:[%s8886_s0 + $0x40] sm:$0xff] }
 0x237   : > { %3381 = vadd.xlane.f32.xlu0 %v3380_v46  ;;  %v2825_v46 = vld [vmem:[%s8883_s28 + $0x38] sm:$0xff]  ;;  %v8938_v54 = vpop.eup %7580 }
 0x238   : > { %v2892_v62 = vsub.f32 %v2825_v46, %v2860_v7  ;;  %11862 = vst [vmem:[#allocation30_spill] sm:$0xff] %v8938_v54  ;;  %7594 = vtanh.f32 %v2889_v13  ;;  %v8945_v28 = vpop.eup %7582  ;;  %v3401_v7 = vsel %vm588_vm0, %v3151_v55, 0.0  ;;  %v3153_v33 = vmul.f32 %v8938_v54, %v8491_v41  ;;  %v2864_v41 = vld [vmem:[%s8886_s0 + $0x58] sm:$0xff] }
 0x239   : > { %11863 = vst [vmem:[#allocation31_spill] sm:$0xff] %v8945_v28  ;;  %v2893_v55 = vsub.f32 %v2826_v4, %v2861_v0 }
 0x23a   : > { %3390 = vadd.xlane.f32.xlu1 %v3389_v44  ;;  %v2891_v44 = vsub.f32 %v2824_v25, %v2859_v27  ;;  %7596 = vtanh.f32 %v2892_v62  ;;  %v8952_v13 = vpop.eup %7584  ;;  %v3398_v25 = vsel %vm588_vm0, %v3150_v15, 0.0  ;;  %v8958_v27 = vld [vmem:[%s11706_s5] ss:$0 sm:$0xff]  ;;  %v2828_v62 = vld [vmem:[%s8883_s28 + $0x50] sm:$0xff] }
 0x23b   : > { %3387 = vadd.xlane.f32.xlu0 %v3386_v10  ;;  %v2827_v10 = vld [vmem:[%s8883_s28 + $0x48] sm:$0xff]  ;;  %11864 = vst [vmem:[#allocation32_spill] sm:$0xff] %v8952_v13  ;;  %v2863_v15 = vld [vmem:[%s8886_s0 + $0x50] sm:$0xff] }
 0x23c   : > { %v2894_v46 = vsub.f32 %v2827_v10, %v2862_v49  ;;  %7598 = vtanh.f32 %v2891_v44  ;;  %v3407_v10 = vsel %vm588_vm0, %v3153_v33, 0.0 }
 0x23e   : > { %3396 = vadd.xlane.f32.xlu1 %v3395_v40  ;;  %v3152_v40 = vmul.f32 %v8958_v27, %v8945_v28  ;;  %v8964_v49 = vpop.eup %7586  ;;  %7600 = vtanh.f32 %v2894_v46  ;;  %v2866_v28 = vld [vmem:[%s8886_s0 + $0x68] sm:$0xff]  ;;  %v2865_v46 = vld [vmem:[%s8886_s0 + $0x60] sm:$0xff] }
 0x23f   : > { %3393 = vadd.xlane.f32.xlu0 %v3392_v6  ;;  %v2829_v6 = vld [vmem:[%s8883_s28 + $0x58] sm:$0xff]  ;;  %11865 = vst [vmem:[#allocation33_spill] sm:$0xff] %v8964_v49  ;;  %v8971_v44 = vpop.eup %7588  ;;  %v3154_v0 = vmul.f32 %v8958_v27, %v8964_v49  ;;  %7602 = vtanh.f32 %v2893_v55 }
 0x240   : > { %v2896_v54 = vsub.f32 %v2829_v6, %v2864_v41  ;;  %11866 = vst [vmem:[#allocation34_spill] sm:$0xff] %v8971_v44  ;;  %v3404_v4 = vsel %vm588_vm0, %v3152_v40, 0.0  ;;  %v3157_v40 = vmul.f32 %v8958_v27, %v8971_v44  ;;  %v2898_v41 = vsub.f32 %v2831_v19, %v2866_v28  ;;  %v2868_v49 = vld [vmem:[%s8886_s0 + $0x78] sm:$0xff]  ;;  %v2832_v44 = vld [vmem:[%s8883_s28 + $0x70] sm:$0xff] }
 0x241   : > { %v8978_v33 = vpop.eup %7590  ;;  %v2867_v28 = vld [vmem:[%s8886_s0 + $0x70] sm:$0xff] }
 0x242   : > { %3402 = vadd.xlane.f32.xlu1 %v3401_v7  ;;  %v3155_v7 = vmul.f32 %v8958_v27, %v8952_v13  ;;  %11867 = vst [vmem:[#allocation35_spill] sm:$0xff] %v8978_v33  ;;  %v2830_v13 = vld [vmem:[%s8883_s28 + $0x60] sm:$0xff]  ;;  %7604 = vtanh.f32 %v2896_v54  ;;  %v3419_v19 = vsel %vm588_vm0, %v3157_v40, 0.0 }
 0x243   : > { %3399 = vadd.xlane.f32.xlu0 %v3398_v25  ;;  %v2895_v25 = vsub.f32 %v2828_v62, %v2863_v15  ;;  %v8985_v55 = vpop.eup %7592  ;;  %v3410_v62 = vsel %vm588_vm0, %v3154_v0, 0.0  ;;  %v3156_v15 = vmul.f32 %v8958_v27, %v8978_v33  ;;  %v2870_v33 = vld [vmem:[%s8886_s0 + $0x88] sm:$0xff] }
 0x244   : > { %v3413_v6 = vsel %vm588_vm0, %v3155_v7, 0.0  ;;  %11868 = vst [vmem:[#allocation36_spill] sm:$0xff] %v8985_v55  ;;  %v3159_v54 = vmul.f32 %v8958_v27, %v8985_v55  ;;  %v2834_v55 = vld [vmem:[%s8883_s28 + $0x80] sm:$0xff] }
 0x245   : > { %7606 = vtanh.f32 %v2895_v25  ;;  %v8992_v7 = vpop.eup %7594 }
 0x246   : > { %3408 = vadd.xlane.f32.xlu1 %v3407_v10  ;;  %v2897_v10 = vsub.f32 %v2830_v13, %v2865_v46  ;;  %11869 = vst [vmem:[#allocation37_spill] sm:$0xff] %v8992_v7  ;;  %7608 = vtanh.f32 %v2898_v41  ;;  %v3416_v13 = vsel %vm588_vm0, %v3156_v15, 0.0  ;;  %v3158_v46 = vmul.f32 %v8958_v27, %v8992_v7  ;;  %v2869_v41 = vld [vmem:[%s8886_s0 + $0x80] sm:$0xff]  ;;  %v2872_v7 = vld [vmem:[%s8886_s0 + $0x98] sm:$0xff] }
 0x247   : > { %3405 = vadd.xlane.f32.xlu0 %v3404_v4  ;;  %v2833_v4 = vld [vmem:[%s8883_s28 + $0x78] sm:$0xff]  ;;  %v8999_v25 = vpop.eup %7596 }
 0x248   : > { %v2900_v0 = vsub.f32 %v2833_v4, %v2868_v49  ;;  %11870 = vst [vmem:[#allocation38_spill] sm:$0xff] %v8999_v25  ;;  %7610 = vtanh.f32 %v2897_v10  ;;  %v3425_v49 = vsel %vm588_vm0, %v3159_v54, 0.0  ;;  %v3161_v15 = vmul.f32 %v8958_v27, %v8999_v25  ;;  %v2874_v25 = vld [vmem:[%s8886_s0 + $0xa8] sm:$0xff] }
 0x249   : > { %v9006_v40 = vpop.eup %7598 }
 0x24a   : > { %3414 = vadd.xlane.f32.xlu1 %v3413_v6  ;;  %v2899_v6 = vsub.f32 %v2832_v44, %v2867_v28  ;;  %11871 = vst [vmem:[#allocation39_spill] sm:$0xff] %v9006_v40  ;;  %7612 = vtanh.f32 %v2900_v0  ;;  %v3422_v44 = vsel %vm588_vm0, %v3158_v46, 0.0  ;;  %v3160_v28 = vmul.f32 %v8958_v27, %v9006_v40  ;;  %v2871_v0 = vld [vmem:[%s8886_s0 + $0x90] sm:$0xff] }
 0x24b   : > { %3411 = vadd.xlane.f32.xlu0 %v3410_v62  ;;  %v2835_v62 = vld [vmem:[%s8883_s28 + $0x88] sm:$0xff]  ;;  %v9013_v10 = vpop.eup %7600  ;;  %v3431_v46 = vsel %vm588_vm0, %v3161_v15, 0.0 }
 0x24c   : > { %v2902_v4 = vsub.f32 %v2835_v62, %v2870_v33  ;;  %11872 = vst [vmem:[#allocation40_spill] sm:$0xff] %v9013_v10  ;;  %7614 = vtanh.f32 %v2899_v6  ;;  %v9020_v30 = vpop.eup %7602  ;;  %v2836_v33 = vld [vmem:[%s8883_s28 + $0x90] sm:$0xff] }
 0x24d   : > { %11873 = vst [vmem:[#allocation41_spill] sm:$0xff] %v9020_v30 }
 0x24e   : > { %3420 = vadd.xlane.f32.xlu1 %v3419_v19  ;;  %v2901_v19 = vsub.f32 %v2834_v55, %v2869_v41  ;;  %v3163_v55 = vmul.f32 %v8958_v27, %v9013_v10  ;;  %7616 = vtanh.f32 %v2902_v4  ;;  %v2873_v4 = vld [vmem:[%s8886_s0 + $0xa0] sm:$0xff]  ;;  %v2876_v10 = vld [vmem:[%s8886_s0 + $0xb8] sm:$0xff] }
 0x24f   : > { %3417 = vadd.xlane.f32.xlu0 %v3416_v13  ;;  %v2837_v13 = vld [vmem:[%s8883_s28 + $0x98] sm:$0xff]  ;;  %v9031_v41 = vpop.eup %7604 }
 0x250   : > { %v2904_v6 = vsub.f32 %v2837_v13, %v2872_v7  ;;  %11876 = vst [vmem:[#allocation44_spill] sm:$0xff] %v9031_v41  ;;  %7618 = vtanh.f32 %v2901_v19  ;;  %v2838_v7 = vld [vmem:[%s8883_s28 + $0xa0] sm:$0xff]  ;;  %v3165_v19 = vmul.f32 %v8958_v27, %v9031_v41  ;;  %v2878_v41 = vld [vmem:[%s8886_s0 + $0xc8] sm:$0xff] }
 0x252   : > { %3426 = vadd.xlane.f32.xlu1 %v3425_v49  ;;  %v3428_v49 = vsel %vm588_vm0, %v3160_v28, 0.0  ;;  %v9038_v40 = vpop.eup %7606  ;;  %v3437_v28 = vsel %vm588_vm0, %v3163_v55, 0.0  ;;  %7620 = vtanh.f32 %v2904_v6 }
 0x253   : > { %3423 = vadd.xlane.f32.xlu0 %v3422_v44  ;;  %v9022_v54 = vpop.xlane.xlu1 %3225  ;;  %v3162_v44 = vmul.f32 %v8958_v27, %v9020_v30  ;;  %11877 = vst [vmem:[#allocation45_spill] sm:$0xff] %v9038_v40 }
 0x254   : > { %11874 = vst [vmem:[#allocation42_spill] sm:$0xff] %v9022_v54  ;;  %v9026_v62 = vpop.xlane.xlu0 %3219  ;;  %v2903_v54 = vsub.f32 %v2836_v33, %v2871_v0  ;;  %v9049_v0 = vpop.eup %7608 }
 0x255   : > { %11875 = vst [vmem:[#allocation43_spill] sm:$0xff] %v9026_v62  ;;  %v2839_v62 = vld [vmem:[%s8883_s28 + $0xa8] sm:$0xff]  ;;  %11880 = vst [vmem:[#allocation48_spill] sm:$0xff] %v9049_v0  ;;  %v9056_v30 = vpop.eup %7610 }
 0x256   : > { %3432 = vadd.xlane.f32.xlu1 %v3431_v46  ;;  %v2906_v33 = vsub.f32 %v2839_v62, %v2874_v25  ;;  %v3434_v46 = vsel %vm588_vm0, %v3162_v44, 0.0  ;;  %7622 = vtanh.f32 %v2903_v54  ;;  %11881 = vst [vmem:[#allocation49_spill] sm:$0xff] %v9056_v30  ;;  %v2840_v25 = vld [vmem:[%s8883_s28 + $0xb0] sm:$0xff]  ;;  %v3443_v44 = vsel %vm588_vm0, %v3165_v19, 0.0 }
 0x257   : > { %3429 = vadd.xlane.f32.xlu0 %v3428_v49  ;;  %v9040_v15 = vpop.xlane.xlu1 %3228  ;;  %v3164_v49 = vmul.f32 %v8958_v27, %v9038_v40  ;;  %v2875_v62 = vld [vmem:[%s8886_s0 + $0xb0] sm:$0xff]  ;;  %v3167_v54 = vmul.f32 %v8958_v27, %v9049_v0  ;;  %v2880_v0 = vld [vmem:[%s8886_s0 + $0xd8] sm:$0xff] }
 0x258   : > { %11878 = vst [vmem:[#allocation46_spill] sm:$0xff] %v9040_v15  ;;  %v9044_v13 = vpop.xlane.xlu0 %3222  ;;  %v2905_v15 = vsub.f32 %v2838_v7, %v2873_v4  ;;  %7624 = vtanh.f32 %v2906_v33  ;;  %v9067_v4 = vpop.eup %7612  ;;  %v2842_v33 = vld [vmem:[%s8883_s28 + $0xc0] sm:$0xff] }
 0x259   : > { %11879 = vst [vmem:[#allocation47_spill] sm:$0xff] %v9044_v13  ;;  %v2841_v13 = vld [vmem:[%s8883_s28 + $0xb8] sm:$0xff]  ;;  %11884 = vst [vmem:[#allocation52_spill] sm:$0xff] %v9067_v4  ;;  %v9074_v40 = vpop.eup %7614 }
 0x25a   : > { %3438 = vadd.xlane.f32.xlu1 %v3437_v28  ;;  %v2908_v7 = vsub.f32 %v2841_v13, %v2876_v10  ;;  %v3440_v28 = vsel %vm588_vm0, %v3164_v49, 0.0  ;;  %7626 = vtanh.f32 %v2905_v15  ;;  %11885 = vst [vmem:[#allocation53_spill] sm:$0xff] %v9074_v40  ;;  %v2877_v10 = vld [vmem:[%s8886_s0 + $0xc0] sm:$0xff]  ;;  %v3449_v15 = vsel %vm588_vm0, %v3167_v54, 0.0 }
 0x25b   : > { %3435 = vadd.xlane.f32.xlu0 %v3434_v46  ;;  %v9058_v55 = vpop.xlane.xlu1 %3234  ;;  %v3166_v46 = vmul.f32 %v8958_v27, %v9056_v30  ;;  %v3169_v49 = vmul.f32 %v8958_v27, %v9067_v4 }
 0x25c   : > { %11882 = vst [vmem:[#allocation50_spill] sm:$0xff] %v9058_v55  ;;  %v9062_v6 = vpop.xlane.xlu0 %3231  ;;  %v2907_v55 = vsub.f32 %v2840_v25, %v2875_v62  ;;  %7628 = vtanh.f32 %v2908_v7  ;;  %v9089_v62 = vpop.eup %7616 }
 0x25d   : > { %11883 = vst [vmem:[#allocation51_spill] sm:$0xff] %v9062_v6  ;;  %v2843_v6 = vld [vmem:[%s8883_s28 + $0xc8] sm:$0xff]  ;;  %11888 = vst [vmem:[#allocation56_spill] sm:$0xff] %v9089_v62  ;;  %v9096_v30 = vpop.eup %7618 }
 0x25e   : > { %3444 = vadd.xlane.f32.xlu1 %v3443_v44  ;;  %v2910_v25 = vsub.f32 %v2843_v6, %v2878_v41  ;;  %v3446_v44 = vsel %vm588_vm0, %v3166_v46, 0.0  ;;  %7630 = vtanh.f32 %v2907_v55  ;;  %11889 = vst [vmem:[#allocation57_spill] sm:$0xff] %v9096_v30  ;;  %v2844_v41 = vld [vmem:[%s8883_s28 + $0xd0] sm:$0xff]  ;;  %v3455_v46 = vsel %vm588_vm0, %v3169_v49, 0.0  ;;  %v2882_v49 = vld [vmem:[%s8886_s0 + $0xe8] sm:$0xff] }
 0x25f   : > { %3441 = vadd.xlane.f32.xlu0 %v3440_v28  ;;  %v9076_v19 = vpop.xlane.xlu1 %3240  ;;  %v3168_v28 = vmul.f32 %v8958_v27, %v9074_v40  ;;  %v2879_v6 = vld [vmem:[%s8886_s0 + $0xd0] sm:$0xff]  ;;  %v3171_v55 = vmul.f32 %v8958_v27, %v9089_v62 }
 0x260   : > { %11886 = vst [vmem:[#allocation54_spill] sm:$0xff] %v9076_v19  ;;  %v9082_v13 = vpop.xlane.xlu0 %3237  ;;  %v2909_v19 = vsub.f32 %v2842_v33, %v2877_v10  ;;  %7632 = vtanh.f32 %v2910_v25  ;;  %v9107_v10 = vpop.eup %7620 }
 0x261   : > { %11887 = vst [vmem:[#allocation55_spill] sm:$0xff] %v9082_v13  ;;  %v2845_v13 = vld [vmem:[%s8883_s28 + $0xd8] sm:$0xff]  ;;  %11892 = vst [vmem:[#allocation60_spill] sm:$0xff] %v9107_v10 }
 0x262   : > { %3450 = vadd.xlane.f32.xlu1 %v3449_v15  ;;  %v2912_v33 = vsub.f32 %v2845_v13, %v2880_v0  ;;  %v3452_v15 = vsel %vm588_vm0, %v3168_v28, 0.0  ;;  %7634 = vtanh.f32 %v2909_v19  ;;  %v2846_v0 = vld [vmem:[%s8883_s28 + $0xe0] sm:$0xff]  ;;  %v3461_v28 = vsel %vm588_vm0, %v3171_v55, 0.0 }
 0x263   : > { %3447 = vadd.xlane.f32.xlu0 %v3446_v44  ;;  %v9098_v54 = vpop.xlane.xlu1 %3246  ;;  %v3170_v44 = vmul.f32 %v8958_v27, %v9096_v30  ;;  %v9114_v4 = vpop.eup %7622  ;;  %v2881_v13 = vld [vmem:[%s8886_s0 + $0xe0] sm:$0xff]  ;;  %v3173_v19 = vmul.f32 %v8958_v27, %v9107_v10  ;;  %v2884_v30 = vld [vmem:[%s8886_s0 + $0xf8] sm:$0xff] }
 0x264   : > { %11890 = vst [vmem:[#allocation58_spill] sm:$0xff] %v9098_v54  ;;  %v9102_v7 = vpop.xlane.xlu0 %3243  ;;  %v2911_v54 = vsub.f32 %v2844_v41, %v2879_v6  ;;  %11893 = vst [vmem:[#allocation61_spill] sm:$0xff] %v9114_v4  ;;  %7636 = vtanh.f32 %v2912_v33  ;;  %v2848_v33 = vld [vmem:[%s8883_s28 + $0xf0] sm:$0xff] }
 0x265   : > { %11891 = vst [vmem:[#allocation59_spill] sm:$0xff] %v9102_v7  ;;  %v2847_v7 = vld [vmem:[%s8883_s28 + $0xe8] sm:$0xff]  ;;  %v9127_v6 = vpop.eup %7624 }
 0x266   : > { %3456 = vadd.xlane.f32.xlu1 %v3455_v46  ;;  %v2914_v41 = vsub.f32 %v2847_v7, %v2882_v49  ;;  %11896 = vst [vmem:[#allocation64_spill] sm:$0xff] %v9127_v6  ;;  %v3458_v46 = vsel %vm588_vm0, %v3170_v44, 0.0  ;;  %7638 = vtanh.f32 %v2911_v54  ;;  %v2883_v7 = vld [vmem:[%s8886_s0 + $0xf0] sm:$0xff]  ;;  %v3175_v44 = vmul.f32 %v8958_v27, %v9127_v6  ;;  %s6724_s0 = sshll.u32 %s12493_s14, 2 }
 0x267   : > { %3453 = vadd.xlane.f32.xlu0 %v3452_v15  ;;  %v9116_v62 = vpop.xlane.xlu1 %3252  ;;  %v3172_v15 = vmul.f32 %v8958_v27, %v9114_v4  ;;  %v9134_v40 = vpop.eup %7626  ;;  %s487_s8 = scalar_lea.vmem %s11713_s15, %s6724_s0 }
 0x268   : > { %11894 = vst [vmem:[#allocation62_spill] sm:$0xff] %v9116_v62  ;;  %v9120_v25 = vpop.xlane.xlu0 %3249  ;;  %v2913_v62 = vsub.f32 %v2846_v0, %v2881_v13  ;;  %11897 = vst [vmem:[#allocation65_spill] sm:$0xff] %v9134_v40  ;;  %7640 = vtanh.f32 %v2914_v41 }
 0x269   : > { %11895 = vst [vmem:[#allocation63_spill] sm:$0xff] %v9120_v25  ;;  %v2849_v25 = vld [vmem:[%s8883_s28 + $0xf8] sm:$0xff]  ;;  %v9145_v0 = vpop.eup %7628  ;;  %v3464_v13 = vsel %vm588_vm0, %v3172_v15, 0.0  ;;  %v2987_v15 = vld [vmem:[%s9155_s18] sm:$0xff] }
 0x26a   : > { %3462 = vadd.xlane.f32.xlu1 %v3461_v28  ;;  %v3467_v28 = vsel %vm588_vm0, %v3173_v19, 0.0  ;;  %v2916_v54 = vsub.f32 %v2849_v25, %v2884_v30  ;;  %11900 = vst [vmem:[#allocation68_spill] sm:$0xff] %v9145_v0  ;;  %7642 = vtanh.f32 %v2913_v62  ;;  %v2953_v19 = vld [vmem:[%s9150_s17 + $0x8] sm:$0xff]  ;;  %v2952_v62 = vld [vmem:[%s9150_s17] sm:$0xff] }
 0x26b   : > { %3459 = vadd.xlane.f32.xlu0 %v3458_v46  ;;  %v9136_v55 = vpop.xlane.xlu1 %3258  ;;  %v3174_v46 = vmul.f32 %v8958_v27, %v9134_v40  ;;  %v2988_v30 = vld [vmem:[%s9155_s18 + $0x8] sm:$0xff]  ;;  %v9158_v25 = vpop.eup %7630  ;;  %v3019_v10 = vsub.f32 %v2952_v62, %v2987_v15  ;;  %v2990_v40 = vld [vmem:[%s9155_s18 + $0x18] sm:$0xff] }
 0x26c   : > { %11898 = vst [vmem:[#allocation66_spill] sm:$0xff] %v9136_v55  ;;  %v9140_v49 = vpop.xlane.xlu0 %3255  ;;  %v2915_v55 = vsub.f32 %v2848_v33, %v2883_v7  ;;  %11901 = vst [vmem:[#allocation69_spill] sm:$0xff] %v9158_v25  ;;  %v3473_v7 = vsel %vm588_vm0, %v3175_v44, 0.0  ;;  %7644 = vtanh.f32 %v2916_v54  ;;  %v2954_v54 = vld [vmem:[%s9150_s17 + $0x10] sm:$0xff] }
 0x26d   : > { %11899 = vst [vmem:[#allocation67_spill] sm:$0xff] %v9140_v49  ;;  %v3020_v49 = vsub.f32 %v2953_v19, %v2988_v30  ;;  %v9169_v6 = vpop.eup %7632  ;;  %v2989_v19 = vld [vmem:[%s9155_s18 + $0x10] sm:$0xff] }
 0x26e   : > { %3468 = vadd.xlane.f32.xlu1 %v3467_v28  ;;  %v3177_v28 = vmul.f32 %v8958_v27, %v9145_v0  ;;  %11904 = vst [vmem:[#allocation72_spill] sm:$0xff] %v9169_v6  ;;  %7646 = vtanh.f32 %v2915_v55  ;;  %v3179_v55 = vmul.f32 %v8958_v27, %v9169_v6  ;;  %v2992_v0 = vld [vmem:[%s9155_s18 + $0x28] sm:$0xff]  ;;  %v2994_v6 = vld [vmem:[%s9155_s18 + $0x38] sm:$0xff] }
 0x26f   : > { %3465 = vadd.xlane.f32.xlu0 %v3464_v13  ;;  %v9160_v41 = vpop.xlane.xlu1 %3264  ;;  %v3470_v13 = vsel %vm588_vm0, %v3174_v46, 0.0  ;;  %v9176_v4 = vpop.eup %7634  ;;  %7648 = vtanh.f32 %v3020_v49  ;;  %v2991_v49 = vld [vmem:[%s9155_s18 + $0x20] sm:$0xff] }
 0x270   : > { %11902 = vst [vmem:[#allocation70_spill] sm:$0xff] %v9160_v41  ;;  %v9164_v33 = vpop.xlane.xlu0 %3261  ;;  %v3176_v41 = vmul.f32 %v8958_v27, %v9158_v25  ;;  %11905 = vst [vmem:[#allocation73_spill] sm:$0xff] %v9176_v4  ;;  %v3479_v46 = vsel %vm588_vm0, %v3177_v28, 0.0  ;;  %7650 = vtanh.f32 %v3019_v10 }
 0x271   : > { %11903 = vst [vmem:[#allocation71_spill] sm:$0xff] %v9164_v33  ;;  %v2955_v33 = vld [vmem:[%s9150_s17 + $0x18] sm:$0xff]  ;;  %v9187_v15 = vpop.eup %7636 }
 0x272   : > { %3474 = vadd.xlane.f32.xlu1 %v3473_v7  ;;  %v3022_v62 = vsub.f32 %v2955_v33, %v2990_v40  ;;  %11908 = vst [vmem:[#allocation76_spill] sm:$0xff] %v9187_v15  ;;  %v3476_v7 = vsel %vm588_vm0, %v3176_v41, 0.0  ;;  %v2956_v40 = vld [vmem:[%s9150_s17 + $0x20] sm:$0xff]  ;;  %v3485_v41 = vsel %vm588_vm0, %v3179_v55, 0.0  ;;  %v3181_v10 = vmul.f32 %v8958_v27, %v9187_v15  ;;  %v2996_v15 = vld [vmem:[%s9155_s18 + $0x48] sm:$0xff] }
 0x273   : > { %3471 = vadd.xlane.f32.xlu0 %v3470_v13  ;;  %v9178_v44 = vpop.xlane.xlu1 %3270  ;;  %v3178_v13 = vmul.f32 %v8958_v27, %v9176_v4  ;;  %v9194_v25 = vpop.eup %7638 }
 0x274   : > { %11906 = vst [vmem:[#allocation74_spill] sm:$0xff] %v9178_v44  ;;  %v9182_v30 = vpop.xlane.xlu0 %3267  ;;  %v3021_v44 = vsub.f32 %v2954_v54, %v2989_v19  ;;  %11909 = vst [vmem:[#allocation77_spill] sm:$0xff] %v9194_v25  ;;  %7652 = vtanh.f32 %v3022_v62 }
 0x275   : > { %11907 = vst [vmem:[#allocation75_spill] sm:$0xff] %v9182_v30  ;;  %v2957_v30 = vld [vmem:[%s9150_s17 + $0x28] sm:$0xff]  ;;  %v9205_v19 = vpop.eup %7640 }
 0x276   : > { %3480 = vadd.xlane.f32.xlu1 %v3479_v46  ;;  %v3024_v54 = vsub.f32 %v2957_v30, %v2992_v0  ;;  %11912 = vst [vmem:[#allocation80_spill] sm:$0xff] %v9205_v19  ;;  %v3482_v46 = vsel %vm588_vm0, %v3178_v13, 0.0  ;;  %7654 = vtanh.f32 %v3021_v44  ;;  %v2958_v0 = vld [vmem:[%s9150_s17 + $0x30] sm:$0xff]  ;;  %v3491_v13 = vsel %vm588_vm0, %v3181_v10, 0.0 }
 0x277   : > { %3477 = vadd.xlane.f32.xlu0 %v3476_v7  ;;  %v9196_v28 = vpop.xlane.xlu1 %3276  ;;  %v3180_v7 = vmul.f32 %v8958_v27, %v9194_v25  ;;  %v9212_v4 = vpop.eup %7642  ;;  %v2993_v30 = vld [vmem:[%s9155_s18 + $0x30] sm:$0xff]  ;;  %v3183_v44 = vmul.f32 %v8958_v27, %v9205_v19  ;;  %v2998_v19 = vld [vmem:[%s9155_s18 + $0x58] sm:$0xff] }
 0x278   : > { %11910 = vst [vmem:[#allocation78_spill] sm:$0xff] %v9196_v28  ;;  %v9200_v33 = vpop.xlane.xlu0 %3273  ;;  %v3023_v28 = vsub.f32 %v2956_v40, %v2991_v49  ;;  %11913 = vst [vmem:[#allocation81_spill] sm:$0xff] %v9212_v4  ;;  %7656 = vtanh.f32 %v3024_v54 }
 0x279   : > { %11911 = vst [vmem:[#allocation79_spill] sm:$0xff] %v9200_v33  ;;  %v2959_v33 = vld [vmem:[%s9150_s17 + $0x38] sm:$0xff]  ;;  %v9223_v49 = vpop.eup %7644 }
 0x27a   : > { %3486 = vadd.xlane.f32.xlu1 %v3485_v41  ;;  %v3026_v40 = vsub.f32 %v2959_v33, %v2994_v6  ;;  %11916 = vst [vmem:[#allocation84_spill] sm:$0xff] %v9223_v49  ;;  %v3488_v41 = vsel %vm588_vm0, %v3180_v7, 0.0  ;;  %7658 = vtanh.f32 %v3023_v28  ;;  %v2960_v6 = vld [vmem:[%s9150_s17 + $0x40] sm:$0xff]  ;;  %v3497_v7 = vsel %vm588_vm0, %v3183_v44, 0.0 }
 0x27b   : > { %3483 = vadd.xlane.f32.xlu0 %v3482_v46  ;;  %v9214_v55 = vpop.xlane.xlu1 %3282  ;;  %v3182_v46 = vmul.f32 %v8958_v27, %v9212_v4  ;;  %v9230_v25 = vpop.eup %7646  ;;  %v2995_v33 = vld [vmem:[%s9155_s18 + $0x40] sm:$0xff]  ;;  %v3185_v28 = vmul.f32 %v8958_v27, %v9223_v49  ;;  %v3000_v49 = vld [vmem:[%s9155_s18 + $0x68] sm:$0xff] }
 0x27c   : > { %11914 = vst [vmem:[#allocation82_spill] sm:$0xff] %v9214_v55  ;;  %v9218_v62 = vpop.xlane.xlu0 %3279  ;;  %v3025_v55 = vsub.f32 %v2958_v0, %v2993_v30  ;;  %11917 = vst [vmem:[#allocation85_spill] sm:$0xff] %v9230_v25  ;;  %7660 = vtanh.f32 %v3026_v40  ;;  %v9241_v30 = vpop.eup %7648 }
 0x27d   : > { %11915 = vst [vmem:[#allocation83_spill] sm:$0xff] %v9218_v62  ;;  %v2961_v62 = vld [vmem:[%s9150_s17 + $0x48] sm:$0xff]  ;;  %11920 = vst [vmem:[#allocation88_spill] sm:$0xff] %v9241_v30  ;;  %v9248_v4 = vpop.eup %7650 }
 0x27e   : > { %3492 = vadd.xlane.f32.xlu1 %v3491_v13  ;;  %v3028_v0 = vsub.f32 %v2961_v62, %v2996_v15  ;;  %v3494_v13 = vsel %vm588_vm0, %v3182_v46, 0.0  ;;  %7662 = vtanh.f32 %v3025_v55  ;;  %11921 = vst [vmem:[#allocation89_spill] sm:$0xff] %v9248_v4  ;;  %v2962_v15 = vld [vmem:[%s9150_s17 + $0x50] sm:$0xff]  ;;  %v3503_v46 = vsel %vm588_vm0, %v3185_v28, 0.0 }
 0x27f   : > { %3489 = vadd.xlane.f32.xlu0 %v3488_v41  ;;  %v9232_v10 = vpop.xlane.xlu1 %3288  ;;  %v3184_v41 = vmul.f32 %v8958_v27, %v9230_v25  ;;  %v2997_v62 = vld [vmem:[%s9155_s18 + $0x50] sm:$0xff]  ;;  %v3187_v55 = vmul.f32 %v8958_v27, %v9241_v30  ;;  %v3002_v30 = vld [vmem:[%s9155_s18 + $0x78] sm:$0xff] }
 0x280   : > { %11918 = vst [vmem:[#allocation86_spill] sm:$0xff] %v9232_v10  ;;  %v9236_v54 = vpop.xlane.xlu0 %3285  ;;  %v3027_v10 = vsub.f32 %v2960_v6, %v2995_v33  ;;  %7664 = vtanh.f32 %v3028_v0 }
 0x281   : > { %11919 = vst [vmem:[#allocation87_spill] sm:$0xff] %v9236_v54  ;;  %v2963_v54 = vld [vmem:[%s9150_s17 + $0x58] sm:$0xff]  ;;  %v9259_v33 = vpop.eup %7652 }
 0x282   : > { %3498 = vadd.xlane.f32.xlu1 %v3497_v7  ;;  %v3030_v6 = vsub.f32 %v2963_v54, %v2998_v19  ;;  %11924 = vst [vmem:[#allocation92_spill] sm:$0xff] %v9259_v33  ;;  %v3500_v7 = vsel %vm588_vm0, %v3184_v41, 0.0  ;;  %7666 = vtanh.f32 %v3027_v10  ;;  %v2964_v19 = vld [vmem:[%s9150_s17 + $0x60] sm:$0xff]  ;;  %v3509_v41 = vsel %vm588_vm0, %v3187_v55, 0.0 }
 0x283   : > { %3495 = vadd.xlane.f32.xlu0 %v3494_v13  ;;  %v9250_v44 = vpop.xlane.xlu1 %3294  ;;  %v3186_v13 = vmul.f32 %v8958_v27, %v9248_v4  ;;  %v9266_v25 = vpop.eup %7654  ;;  %v2999_v54 = vld [vmem:[%s9155_s18 + $0x60] sm:$0xff]  ;;  %v3189_v10 = vmul.f32 %v8958_v27, %v9259_v33  ;;  %v3004_v33 = vld [vmem:[%s9155_s18 + $0x88] sm:$0xff] }
 0x284   : > { %11922 = vst [vmem:[#allocation90_spill] sm:$0xff] %v9250_v44  ;;  %v9254_v40 = vpop.xlane.xlu0 %3291  ;;  %v3029_v44 = vsub.f32 %v2962_v15, %v2997_v62  ;;  %11925 = vst [vmem:[#allocation93_spill] sm:$0xff] %v9266_v25  ;;  %7668 = vtanh.f32 %v3030_v6 }
 0x285   : > { %11923 = vst [vmem:[#allocation91_spill] sm:$0xff] %v9254_v40  ;;  %v2965_v40 = vld [vmem:[%s9150_s17 + $0x68] sm:$0xff]  ;;  %v9277_v62 = vpop.eup %7656 }
 0x286   : > { %3504 = vadd.xlane.f32.xlu1 %v3503_v46  ;;  %v3032_v15 = vsub.f32 %v2965_v40, %v3000_v49  ;;  %11928 = vst [vmem:[#allocation96_spill] sm:$0xff] %v9277_v62  ;;  %v3506_v46 = vsel %vm588_vm0, %v3186_v13, 0.0  ;;  %7670 = vtanh.f32 %v3029_v44  ;;  %v2966_v49 = vld [vmem:[%s9150_s17 + $0x70] sm:$0xff]  ;;  %v3515_v13 = vsel %vm588_vm0, %v3189_v10, 0.0 }
 0x287   : > { %3501 = vadd.xlane.f32.xlu0 %v3500_v7  ;;  %v9268_v28 = vpop.xlane.xlu1 %3300  ;;  %v3188_v7 = vmul.f32 %v8958_v27, %v9266_v25  ;;  %v9284_v4 = vpop.eup %7658  ;;  %v3001_v40 = vld [vmem:[%s9155_s18 + $0x70] sm:$0xff]  ;;  %v3191_v44 = vmul.f32 %v8958_v27, %v9277_v62  ;;  %v3006_v62 = vld [vmem:[%s9155_s18 + $0x98] sm:$0xff] }
 0x288   : > { %11926 = vst [vmem:[#allocation94_spill] sm:$0xff] %v9268_v28  ;;  %v9272_v0 = vpop.xlane.xlu0 %3297  ;;  %v3031_v28 = vsub.f32 %v2964_v19, %v2999_v54  ;;  %11929 = vst [vmem:[#allocation97_spill] sm:$0xff] %v9284_v4  ;;  %7672 = vtanh.f32 %v3032_v15 }
 0x289   : > { %11927 = vst [vmem:[#allocation95_spill] sm:$0xff] %v9272_v0  ;;  %v2967_v0 = vld [vmem:[%s9150_s17 + $0x78] sm:$0xff]  ;;  %v9295_v54 = vpop.eup %7660 }
 0x28a   : > { %3510 = vadd.xlane.f32.xlu1 %v3509_v41  ;;  %v3034_v19 = vsub.f32 %v2967_v0, %v3002_v30  ;;  %11932 = vst [vmem:[#allocation100_spill] sm:$0xff] %v9295_v54  ;;  %v3512_v41 = vsel %vm588_vm0, %v3188_v7, 0.0  ;;  %7674 = vtanh.f32 %v3031_v28  ;;  %v2968_v30 = vld [vmem:[%s9150_s17 + $0x80] sm:$0xff]  ;;  %v3521_v7 = vsel %vm588_vm0, %v3191_v44, 0.0 }
 0x28b   : > { %3507 = vadd.xlane.f32.xlu0 %v3506_v46  ;;  %v9286_v55 = vpop.xlane.xlu1 %3306  ;;  %v3190_v46 = vmul.f32 %v8958_v27, %v9284_v4  ;;  %v9302_v25 = vpop.eup %7662  ;;  %v3003_v0 = vld [vmem:[%s9155_s18 + $0x80] sm:$0xff]  ;;  %v3193_v28 = vmul.f32 %v8958_v27, %v9295_v54  ;;  %v3008_v54 = vld [vmem:[%s9155_s18 + $0xa8] sm:$0xff] }
 0x28c   : > { %11930 = vst [vmem:[#allocation98_spill] sm:$0xff] %v9286_v55  ;;  %v9290_v6 = vpop.xlane.xlu0 %3303  ;;  %v3033_v55 = vsub.f32 %v2966_v49, %v3001_v40  ;;  %11933 = vst [vmem:[#allocation101_spill] sm:$0xff] %v9302_v25  ;;  %7676 = vtanh.f32 %v3034_v19 }
 0x28d   : > { %11931 = vst [vmem:[#allocation99_spill] sm:$0xff] %v9290_v6  ;;  %v2969_v6 = vld [vmem:[%s9150_s17 + $0x88] sm:$0xff]  ;;  %v9313_v40 = vpop.eup %7664 }
 0x28e   : > { %3516 = vadd.xlane.f32.xlu1 %v3515_v13  ;;  %v3036_v49 = vsub.f32 %v2969_v6, %v3004_v33  ;;  %11936 = vst [vmem:[#allocation104_spill] sm:$0xff] %v9313_v40  ;;  %v3518_v13 = vsel %vm588_vm0, %v3190_v46, 0.0  ;;  %7678 = vtanh.f32 %v3033_v55  ;;  %v2970_v33 = vld [vmem:[%s9150_s17 + $0x90] sm:$0xff]  ;;  %v3527_v46 = vsel %vm588_vm0, %v3193_v28, 0.0 }
 0x28f   : > { %3513 = vadd.xlane.f32.xlu0 %v3512_v41  ;;  %v9304_v10 = vpop.xlane.xlu1 %3312  ;;  %v3192_v41 = vmul.f32 %v8958_v27, %v9302_v25  ;;  %v9320_v4 = vpop.eup %7666  ;;  %v3005_v6 = vld [vmem:[%s9155_s18 + $0x90] sm:$0xff]  ;;  %v3195_v55 = vmul.f32 %v8958_v27, %v9313_v40  ;;  %v3010_v40 = vld [vmem:[%s9155_s18 + $0xb8] sm:$0xff] }
 0x290   : > { %11934 = vst [vmem:[#allocation102_spill] sm:$0xff] %v9304_v10  ;;  %v9308_v15 = vpop.xlane.xlu0 %3309  ;;  %v3035_v10 = vsub.f32 %v2968_v30, %v3003_v0  ;;  %11937 = vst [vmem:[#allocation105_spill] sm:$0xff] %v9320_v4  ;;  %7680 = vtanh.f32 %v3036_v49 }
 0x291   : > { %11935 = vst [vmem:[#allocation103_spill] sm:$0xff] %v9308_v15  ;;  %v2971_v15 = vld [vmem:[%s9150_s17 + $0x98] sm:$0xff]  ;;  %v9331_v0 = vpop.eup %7668 }
 0x292   : > { %3522 = vadd.xlane.f32.xlu1 %v3521_v7  ;;  %v3038_v30 = vsub.f32 %v2971_v15, %v3006_v62  ;;  %11940 = vst [vmem:[#allocation108_spill] sm:$0xff] %v9331_v0  ;;  %v3524_v7 = vsel %vm588_vm0, %v3192_v41, 0.0  ;;  %7682 = vtanh.f32 %v3035_v10  ;;  %v2972_v62 = vld [vmem:[%s9150_s17 + $0xa0] sm:$0xff]  ;;  %v3533_v41 = vsel %vm588_vm0, %v3195_v55, 0.0 }
 0x293   : > { %3519 = vadd.xlane.f32.xlu0 %v3518_v13  ;;  %v9322_v44 = vpop.xlane.xlu1 %3318  ;;  %v3194_v13 = vmul.f32 %v8958_v27, %v9320_v4  ;;  %v9338_v25 = vpop.eup %7670  ;;  %v3007_v15 = vld [vmem:[%s9155_s18 + $0xa0] sm:$0xff]  ;;  %v3197_v10 = vmul.f32 %v8958_v27, %v9331_v0  ;;  %v3012_v0 = vld [vmem:[%s9155_s18 + $0xc8] sm:$0xff] }
 0x294   : > { %11938 = vst [vmem:[#allocation106_spill] sm:$0xff] %v9322_v44  ;;  %v9326_v19 = vpop.xlane.xlu0 %3315  ;;  %v3037_v44 = vsub.f32 %v2970_v33, %v3005_v6  ;;  %11941 = vst [vmem:[#allocation109_spill] sm:$0xff] %v9338_v25  ;;  %7684 = vtanh.f32 %v3038_v30 }
 0x295   : > { %11939 = vst [vmem:[#allocation107_spill] sm:$0xff] %v9326_v19  ;;  %v2973_v19 = vld [vmem:[%s9150_s17 + $0xa8] sm:$0xff]  ;;  %v9349_v6 = vpop.eup %7672 }
 0x296   : > { %3528 = vadd.xlane.f32.xlu1 %v3527_v46  ;;  %v3040_v33 = vsub.f32 %v2973_v19, %v3008_v54  ;;  %11944 = vst [vmem:[#allocation112_spill] sm:$0xff] %v9349_v6  ;;  %v3530_v46 = vsel %vm588_vm0, %v3194_v13, 0.0  ;;  %7686 = vtanh.f32 %v3037_v44  ;;  %v2974_v54 = vld [vmem:[%s9150_s17 + $0xb0] sm:$0xff]  ;;  %v3539_v13 = vsel %vm588_vm0, %v3197_v10, 0.0 }
 0x297   : > { %3525 = vadd.xlane.f32.xlu0 %v3524_v7  ;;  %v9340_v28 = vpop.xlane.xlu1 %3324  ;;  %v3196_v7 = vmul.f32 %v8958_v27, %v9338_v25  ;;  %v9356_v4 = vpop.eup %7674  ;;  %v3009_v19 = vld [vmem:[%s9155_s18 + $0xb0] sm:$0xff]  ;;  %v3199_v44 = vmul.f32 %v8958_v27, %v9349_v6  ;;  %v3014_v6 = vld [vmem:[%s9155_s18 + $0xd8] sm:$0xff] }
 0x298   : > { %11942 = vst [vmem:[#allocation110_spill] sm:$0xff] %v9340_v28  ;;  %v9344_v49 = vpop.xlane.xlu0 %3321  ;;  %v3039_v28 = vsub.f32 %v2972_v62, %v3007_v15  ;;  %11945 = vst [vmem:[#allocation113_spill] sm:$0xff] %v9356_v4  ;;  %7688 = vtanh.f32 %v3040_v33 }
 0x299   : > { %11943 = vst [vmem:[#allocation111_spill] sm:$0xff] %v9344_v49  ;;  %v2975_v49 = vld [vmem:[%s9150_s17 + $0xb8] sm:$0xff]  ;;  %v9367_v15 = vpop.eup %7676 }
 0x29a   : > { %3534 = vadd.xlane.f32.xlu1 %v3533_v41  ;;  %v3042_v62 = vsub.f32 %v2975_v49, %v3010_v40  ;;  %11948 = vst [vmem:[#allocation116_spill] sm:$0xff] %v9367_v15  ;;  %v3536_v41 = vsel %vm588_vm0, %v3196_v7, 0.0  ;;  %7690 = vtanh.f32 %v3039_v28  ;;  %v2976_v40 = vld [vmem:[%s9150_s17 + $0xc0] sm:$0xff]  ;;  %v3545_v7 = vsel %vm588_vm0, %v3199_v44, 0.0 }
 0x29b   : > { %3531 = vadd.xlane.f32.xlu0 %v3530_v46  ;;  %v9358_v55 = vpop.xlane.xlu1 %3330  ;;  %v3198_v46 = vmul.f32 %v8958_v27, %v9356_v4  ;;  %v9374_v25 = vpop.eup %7678  ;;  %v3011_v49 = vld [vmem:[%s9155_s18 + $0xc0] sm:$0xff]  ;;  %v3201_v28 = vmul.f32 %v8958_v27, %v9367_v15  ;;  %v3016_v15 = vld [vmem:[%s9155_s18 + $0xe8] sm:$0xff] }
 0x29c   : > { %11946 = vst [vmem:[#allocation114_spill] sm:$0xff] %v9358_v55  ;;  %v9362_v30 = vpop.xlane.xlu0 %3327  ;;  %v3041_v55 = vsub.f32 %v2974_v54, %v3009_v19  ;;  %11949 = vst [vmem:[#allocation117_spill] sm:$0xff] %v9374_v25  ;;  %7692 = vtanh.f32 %v3042_v62 }
 0x29d   : > { %11947 = vst [vmem:[#allocation115_spill] sm:$0xff] %v9362_v30  ;;  %v2977_v30 = vld [vmem:[%s9150_s17 + $0xc8] sm:$0xff]  ;;  %v9385_v19 = vpop.eup %7680 }
 0x29e   : > { %3540 = vadd.xlane.f32.xlu1 %v3539_v13  ;;  %v3044_v54 = vsub.f32 %v2977_v30, %v3012_v0  ;;  %11952 = vst [vmem:[#allocation120_spill] sm:$0xff] %v9385_v19  ;;  %v3542_v13 = vsel %vm588_vm0, %v3198_v46, 0.0  ;;  %7694 = vtanh.f32 %v3041_v55  ;;  %v2978_v0 = vld [vmem:[%s9150_s17 + $0xd0] sm:$0xff]  ;;  %v3551_v46 = vsel %vm588_vm0, %v3201_v28, 0.0 }
 0x29f   : > { %3537 = vadd.xlane.f32.xlu0 %v3536_v41  ;;  %v9376_v10 = vpop.xlane.xlu1 %3336  ;;  %v3200_v41 = vmul.f32 %v8958_v27, %v9374_v25  ;;  %v9392_v4 = vpop.eup %7682  ;;  %v3013_v30 = vld [vmem:[%s9155_s18 + $0xd0] sm:$0xff]  ;;  %v3203_v55 = vmul.f32 %v8958_v27, %v9385_v19  ;;  %v3018_v19 = vld [vmem:[%s9155_s18 + $0xf8] sm:$0xff] }
 0x2a0   : > { %11950 = vst [vmem:[#allocation118_spill] sm:$0xff] %v9376_v10  ;;  %v9380_v33 = vpop.xlane.xlu0 %3333  ;;  %v3043_v10 = vsub.f32 %v2976_v40, %v3011_v49  ;;  %11953 = vst [vmem:[#allocation121_spill] sm:$0xff] %v9392_v4  ;;  %7696 = vtanh.f32 %v3044_v54 }
 0x2a1   : > { %11951 = vst [vmem:[#allocation119_spill] sm:$0xff] %v9380_v33  ;;  %v2979_v33 = vld [vmem:[%s9150_s17 + $0xd8] sm:$0xff]  ;;  %v9403_v49 = vpop.eup %7684 }
 0x2a2   : > { %3546 = vadd.xlane.f32.xlu1 %v3545_v7  ;;  %v3046_v40 = vsub.f32 %v2979_v33, %v3014_v6  ;;  %11956 = vst [vmem:[#allocation124_spill] sm:$0xff] %v9403_v49  ;;  %v3548_v7 = vsel %vm588_vm0, %v3200_v41, 0.0  ;;  %7698 = vtanh.f32 %v3043_v10  ;;  %v2980_v6 = vld [vmem:[%s9150_s17 + $0xe0] sm:$0xff]  ;;  %v3557_v41 = vsel %vm588_vm0, %v3203_v55, 0.0 }
 0x2a3   : > { %3543 = vadd.xlane.f32.xlu0 %v3542_v13  ;;  %v9394_v44 = vpop.xlane.xlu1 %3342  ;;  %v3202_v13 = vmul.f32 %v8958_v27, %v9392_v4  ;;  %v9410_v25 = vpop.eup %7686  ;;  %v3015_v33 = vld [vmem:[%s9155_s18 + $0xe0] sm:$0xff]  ;;  %v3205_v10 = vmul.f32 %v8958_v27, %v9403_v49  ;;  %v2982_v49 = vld [vmem:[%s9150_s17 + $0xf0] sm:$0xff] }
 0x2a4   : > { %11954 = vst [vmem:[#allocation122_spill] sm:$0xff] %v9394_v44  ;;  %v9398_v62 = vpop.xlane.xlu0 %3339  ;;  %v3045_v44 = vsub.f32 %v2978_v0, %v3013_v30  ;;  %7700 = vtanh.f32 %v3046_v40  ;;  %v3017_v40 = vld [vmem:[%s9155_s18 + $0xf0] sm:$0xff] }
 0x2a5   : > { %11955 = vst [vmem:[#allocation123_spill] sm:$0xff] %v9398_v62  ;;  %v2981_v62 = vld [vmem:[%s9150_s17 + $0xe8] sm:$0xff]  ;;  %v9421_v30 = vpop.eup %7688 }
 0x2a6   : > { %3552 = vadd.xlane.f32.xlu1 %v3551_v46  ;;  %v3048_v0 = vsub.f32 %v2981_v62, %v3016_v15  ;;  %v3554_v46 = vsel %vm588_vm0, %v3202_v13, 0.0  ;;  %7702 = vtanh.f32 %v3045_v44  ;;  %v3563_v62 = vsel %vm588_vm0, %v3205_v10, 0.0 }
 0x2a7   : > { %3549 = vadd.xlane.f32.xlu0 %v3548_v7  ;;  %v9412_v28 = vpop.xlane.xlu1 %3348  ;;  %v3204_v7 = vmul.f32 %v8958_v27, %v9410_v25  ;;  %v9428_v4 = vpop.eup %7690  ;;  %v3207_v13 = vmul.f32 %v8958_v27, %v9421_v30 }
 0x2a8   : > { %11957 = vst [vmem:[#allocation125_spill] sm:$0xff] %v9412_v28  ;;  %v9416_v54 = vpop.xlane.xlu0 %3345  ;;  %v3047_v28 = vsub.f32 %v2980_v6, %v3015_v33  ;;  %7704 = vtanh.f32 %v3048_v0  ;;  %v3206_v33 = vmul.f32 %v8958_v27, %v9428_v4 }
 0x2a9   : > { %11958 = vst [vmem:[#allocation126_spill] sm:$0xff] %v9416_v54  ;;  %v2983_v54 = vld [vmem:[%s9150_s17 + $0xf8] sm:$0xff]  ;;  %v9439_v44 = vpop.eup %7692  ;;  %v3560_v6 = vsel %vm588_vm0, %v3204_v7, 0.0  ;;  %v3569_v0 = vsel %vm588_vm0, %v3207_v13, 0.0 }
 0x2aa   : > { %3558 = vadd.xlane.f32.xlu1 %v3557_v41  ;;  %v3050_v41 = vsub.f32 %v2983_v54, %v3018_v19  ;;  %11961 = vst [vmem:[#allocation129_spill] sm:$0xff] %v9439_v44  ;;  %7706 = vtanh.f32 %v3047_v28  ;;  %v3209_v19 = vmul.f32 %v8958_v27, %v9439_v44  ;;  %v3566_v7 = vsel %vm588_vm0, %v3206_v33, 0.0 }
 0x2ab   : > { %3555 = vadd.xlane.f32.xlu0 %v3554_v46  ;;  %v9430_v55 = vpop.xlane.xlu1 %3354  ;;  %v3049_v46 = vsub.f32 %v2982_v49, %v3017_v40 }
 0x2ac   : > { %11959 = vst [vmem:[#allocation127_spill] sm:$0xff] %v9430_v55  ;;  %v9434_v15 = vpop.xlane.xlu0 %3351  ;;  %v9444_v55 = vpop.eup %7694  ;;  %7708 = vtanh.f32 %v3050_v41  ;;  %v3575_v13 = vsel %vm588_vm0, %v3209_v19, 0.0 }
 0x2ad   : > { %11960 = vst [vmem:[#allocation128_spill] sm:$0xff] %v9434_v15  ;;  %v9453_v54 = vpop.eup %7696  ;;  %v3208_v49 = vmul.f32 %v8958_v27, %v9444_v55  ;;  %7710 = vtanh.f32 %v3049_v46 }
 0x2ae   : > { %3564 = vadd.xlane.f32.xlu1 %v3563_v62  ;;  %11964 = vst [vmem:[#allocation132_spill] sm:$0xff] %v9453_v54  ;;  %v3211_v41 = vmul.f32 %v8958_v27, %v9453_v54 }
 0x2af   : > { %3561 = vadd.xlane.f32.xlu0 %v3560_v6  ;;  %v9446_v15 = vpop.xlane.xlu1 %3360  ;;  %v9458_v28 = vpop.eup %7698  ;;  %v3572_v33 = vsel %vm588_vm0, %v3208_v49, 0.0 }
 0x2b0   : > { %11962 = vst [vmem:[#allocation130_spill] sm:$0xff] %v9446_v15  ;;  %v9448_v10 = vpop.xlane.xlu0 %3357  ;;  %v3210_v46 = vmul.f32 %v8958_v27, %v9458_v28  ;;  %v3581_v19 = vsel %vm588_vm0, %v3211_v41, 0.0 }
 0x2b1   : > { %11963 = vst [vmem:[#allocation131_spill] sm:$0xff] %v9448_v10  ;;  %v9467_v6 = vpop.eup %7700 }
 0x2b2   : > { %3570 = vadd.xlane.f32.xlu1 %v3569_v0  ;;  %11967 = vst [vmem:[#allocation135_spill] sm:$0xff] %v9467_v6  ;;  %v3578_v27 = vsel %vm588_vm0, %v3210_v46, 0.0 }
 0x2b3   : > { %3567 = vadd.xlane.f32.xlu0 %v3566_v7  ;;  %v9460_v40 = vpop.xlane.xlu1 %3366  ;;  %v9472_v0 = vpop.eup %7702 }
 0x2b4   : > { %11965 = vst [vmem:[#allocation133_spill] sm:$0xff] %v9460_v40  ;;  %v9462_v62 = vpop.xlane.xlu0 %3363 }
 0x2b5   : > { %11966 = vst [vmem:[#allocation134_spill] sm:$0xff] %v9462_v62  ;;  %v7717_v62 = vld [vmem:[%s11706_s5] ss:$0 sm:$0xff]  ;;  %v9483_v15 = vpop.eup %7704 }
 0x2b6   : > { %3576 = vadd.xlane.f32.xlu1 %v3575_v13  ;;  %v3213_v13 = vmul.f32 %v7717_v62, %v9467_v6  ;;  %v3212_v49 = vmul.f32 %v7717_v62, %v9472_v0  ;;  %v3215_v10 = vmul.f32 %v7717_v62, %v9483_v15 }
 0x2b7   : > { %3573 = vadd.xlane.f32.xlu0 %v3572_v33  ;;  %v9474_v7 = vpop.xlane.xlu1 %3372  ;;  %v9487_v33 = vpop.eup %7706 }
 0x2b8   : > { %11968 = vst [vmem:[#allocation136_spill] sm:$0xff] %v9474_v7  ;;  %v9476_v40 = vpop.xlane.xlu0 %3369  ;;  %v3587_v41 = vsel %vm588_vm0, %v3213_v13, 0.0  ;;  %v3214_v46 = vmul.f32 %v7717_v62, %v9487_v33 }
 0x2b9   : > { %11969 = vst [vmem:[#allocation137_spill] sm:$0xff] %v9476_v40  ;;  %v9495_v54 = vpop.eup %7708 }
 0x2ba   : > { %3582 = vadd.xlane.f32.xlu1 %v3581_v19  ;;  %11972 = vst [vmem:[#allocation140_spill] sm:$0xff] %v9495_v54  ;;  %v3584_v19 = vsel %vm588_vm0, %v3212_v49, 0.0  ;;  %v9499_v6 = vpop.eup %7710  ;;  %v3217_v13 = vmul.f32 %v7717_v62, %v9495_v54  ;;  %v9512_v49 = vld [vmem:[%s11709_s10] ss:$0 sm:$0xff] }
 0x2bb   : > { %3579 = vadd.xlane.f32.xlu0 %v3578_v27  ;;  %v9489_v7 = vpop.xlane.xlu1 %3378 }
 0x2bc   : > { %11970 = vst [vmem:[#allocation138_spill] sm:$0xff] %v9489_v7  ;;  %v9491_v40 = vpop.xlane.xlu0 %3375  ;;  %v3593_v7 = vsel %vm588_vm0, %v3215_v10, 0.0  ;;  %v3747_v10 = vmul.f32 %v8497_v47, %v9512_v49  ;;  %v3767_v47 = vmul.f32 %v8637_v48, %v9512_v49 }
 0x2bd   : > { %11971 = vst [vmem:[#allocation139_spill] sm:$0xff] %v9491_v40  ;;  %v3590_v40 = vsel %vm588_vm0, %v3214_v46, 0.0 }
 0x2be   : > { %3588 = vadd.xlane.f32.xlu1 %v3587_v41  ;;  %v3216_v41 = vmul.f32 %v7717_v62, %v9499_v6  ;;  %v3758_v62 = vmul.f32 %v8554_v29, %v9512_v49 }
 0x2bf   : > { %3585 = vadd.xlane.f32.xlu0 %v3584_v19  ;;  %v9501_v44 = vpop.xlane.xlu1 %3384 }
 0x2c0   : > { %11973 = vst [vmem:[#allocation141_spill] sm:$0xff] %v9501_v44  ;;  %v9503_v27 = vpop.xlane.xlu0 %3381 }
 0x2c1   : > { %11974 = vst [vmem:[#allocation142_spill] sm:$0xff] %v9503_v27  ;;  %v3599_v27 = vsel %vm588_vm0, %v3217_v13, 0.0  ;;  %v3908_v13 = vsel %vm588_vm0, %v3758_v62, 0.0 }
 0x2c2   : > { %3594 = vadd.xlane.f32.xlu1 %v3593_v7  ;;  %v3596_v7 = vsel %vm588_vm0, %v3216_v41, 0.0 }
 0x2c3   : > { %3591 = vadd.xlane.f32.xlu0 %v3590_v40  ;;  %v9514_v19 = vpop.xlane.xlu1 %3390  ;;  %v3875_v40 = vsel %vm588_vm0, %v3747_v10, 0.0  ;;  %v3935_v10 = vsel %vm588_vm0, %v3767_v47, 0.0 }
 0x2c4   : > { %11975 = vst [vmem:[#allocation143_spill] sm:$0xff] %v9514_v19  ;;  %v9516_v44 = vpop.xlane.xlu0 %3387  ;;  %v3748_v19 = vmul.f32 %v8507_v53, %v9512_v49  ;;  %v3769_v53 = vmul.f32 %v8655_v3, %v9512_v49 }
 0x2c5   : > { %11976 = vst [vmem:[#allocation144_spill] sm:$0xff] %v9516_v44 }
 0x2c6   : > { %3600 = vadd.xlane.f32.xlu1 %v3599_v27  ;;  %v3878_v41 = vsel %vm588_vm0, %v3748_v19, 0.0  ;;  %v3941_v19 = vsel %vm588_vm0, %v3769_v53, 0.0 }
 0x2c7   : > { %3597 = vadd.xlane.f32.xlu0 %v3596_v7  ;;  %v9524_v46 = vpop.xlane.xlu1 %3396  ;;  %v3749_v7 = vmul.f32 %v8493_v43, %v9512_v49  ;;  %v3771_v43 = vmul.f32 %v8669_v20, %v9512_v49 }
 0x2c8   : > { %11977 = vst [vmem:[#allocation145_spill] sm:$0xff] %v9524_v46  ;;  %v9526_v54 = vpop.xlane.xlu0 %3393 }
 0x2c9   : > { %11978 = vst [vmem:[#allocation146_spill] sm:$0xff] %v9526_v54 }
 0x2ca   : > { %3876 = vadd.xlane.f32.xlu1 %v3875_v40  ;;  %v3881_v40 = vsel %vm588_vm0, %v3749_v7, 0.0  ;;  %v3947_v7 = vsel %vm588_vm0, %v3771_v43, 0.0 }
 0x2cb   : > { %3909 = vadd.xlane.f32.xlu0 %v3908_v13  ;;  %v9534_v27 = vpop.xlane.xlu1 %3402  ;;  %v3750_v13 = vmul.f32 %v8503_v51, %v9512_v49  ;;  %v3773_v51 = vmul.f32 %v8683_v37, %v9512_v49 }
 0x2cc   : > { %11979 = vst [vmem:[#allocation147_spill] sm:$0xff] %v9534_v27  ;;  %v9536_v29 = vpop.xlane.xlu0 %3399 }
 0x2cd   : > { %11980 = vst [vmem:[#allocation148_spill] sm:$0xff] %v9536_v29 }
 0x2ce   : > { %3879 = vadd.xlane.f32.xlu1 %v3878_v41  ;;  %v3884_v41 = vsel %vm588_vm0, %v3750_v13, 0.0  ;;  %v3953_v13 = vsel %vm588_vm0, %v3773_v51, 0.0 }
 0x2cf   : > { %3936 = vadd.xlane.f32.xlu0 %v3935_v10  ;;  %v9544_v62 = vpop.xlane.xlu1 %3408  ;;  %v3751_v10 = vmul.f32 %v8519_v63, %v9512_v49  ;;  %v3775_v63 = vmul.f32 %v8697_v61, %v9512_v49 }
 0x2d0   : > { %11981 = vst [vmem:[#allocation149_spill] sm:$0xff] %v9544_v62  ;;  %v9546_v48 = vpop.xlane.xlu0 %3405  ;;  %v12016_v62 = vld [vmem:[#allocation13_spill] sm:$0xff] }
 0x2d1   : > { %11982 = vst [vmem:[#allocation150_spill] sm:$0xff] %v9546_v48 }
 0x2d2   : > { %3882 = vadd.xlane.f32.xlu1 %v3881_v40  ;;  %v3887_v40 = vsel %vm588_vm0, %v3751_v10, 0.0  ;;  %v3959_v10 = vsel %vm588_vm0, %v3775_v63, 0.0 }
 0x2d3   : > { %3942 = vadd.xlane.f32.xlu0 %v3941_v19  ;;  %v9554_v47 = vpop.xlane.xlu1 %3414  ;;  %v3752_v19 = vmul.f32 %v8512_v57, %v9512_v49  ;;  %v3777_v57 = vmul.f32 %v8711_v18, %v9512_v49 }
 0x2d4   : > { %v9556_v3 = vpop.xlane.xlu0 %3411 }
 0x2d6   : > { %3885 = vadd.xlane.f32.xlu1 %v3884_v41  ;;  %v3890_v41 = vsel %vm588_vm0, %v3752_v19, 0.0  ;;  %v3965_v19 = vsel %vm588_vm0, %v3777_v57, 0.0 }
 0x2d7   : > { %3948 = vadd.xlane.f32.xlu0 %v3947_v7  ;;  %v9564_v53 = vpop.xlane.xlu1 %3420  ;;  %v3753_v7 = vmul.f32 %v8533_v11, %v9512_v49  ;;  %v3779_v11 = vmul.f32 %v8725_v39, %v9512_v49 }
 0x2d8   : > { %v9566_v20 = vpop.xlane.xlu0 %3417 }
 0x2da   : > { %3888 = vadd.xlane.f32.xlu1 %v3887_v40  ;;  %v3893_v40 = vsel %vm588_vm0, %v3753_v7, 0.0  ;;  %v3971_v7 = vsel %vm588_vm0, %v3779_v11, 0.0 }
 0x2db   : > { %3954 = vadd.xlane.f32.xlu0 %v3953_v13  ;;  %v9574_v43 = vpop.xlane.xlu1 %3426  ;;  %v3754_v13 = vmul.f32 %v8526_v5, %v9512_v49  ;;  %v3781_v5 = vmul.f32 %v8739_v1, %v9512_v49 }
 0x2dc   : > { %11983 = vst [vmem:[#allocation151_spill] sm:$0xff] %v9574_v43  ;;  %v9576_v37 = vpop.xlane.xlu0 %3423 }
 0x2de   : > { %3891 = vadd.xlane.f32.xlu1 %v3890_v41  ;;  %v3896_v41 = vsel %vm588_vm0, %v3754_v13, 0.0  ;;  %v3977_v13 = vsel %vm588_vm0, %v3781_v5, 0.0 }
 0x2df   : > { %3960 = vadd.xlane.f32.xlu0 %v3959_v10  ;;  %v9584_v51 = vpop.xlane.xlu1 %3432  ;;  %v3755_v10 = vmul.f32 %v8547_v23, %v9512_v49  ;;  %v3783_v23 = vmul.f32 %v8753_v26, %v9512_v49 }
 0x2e0   : > { %11984 = vst [vmem:[#allocation152_spill] sm:$0xff] %v9584_v51  ;;  %v9586_v61 = vpop.xlane.xlu0 %3429 }
 0x2e1   : > { %11985 = vst [vmem:[#allocation153_spill] sm:$0xff] %v9586_v61  ;;  %v12080_v61 = vld [vmem:[#allocation36_spill] sm:$0xff] }
 0x2e2   : > { %3894 = vadd.xlane.f32.xlu1 %v3893_v40  ;;  %v3899_v40 = vsel %vm588_vm0, %v3755_v10, 0.0  ;;  %v3983_v10 = vsel %vm588_vm0, %v3783_v23, 0.0 }
 0x2e3   : > { %3966 = vadd.xlane.f32.xlu0 %v3965_v19  ;;  %v9594_v63 = vpop.xlane.xlu1 %3438  ;;  %v3756_v19 = vmul.f32 %v8540_v17, %v9512_v49  ;;  %v3785_v17 = vmul.f32 %v8767_v56, %v9512_v49 }
 0x2e4   : > { %11986 = vst [vmem:[#allocation154_spill] sm:$0xff] %v9594_v63  ;;  %v9596_v18 = vpop.xlane.xlu0 %3435 }
 0x2e5   : > { %11987 = vst [vmem:[#allocation155_spill] sm:$0xff] %v9596_v18 }
 0x2e6   : > { %3897 = vadd.xlane.f32.xlu1 %v3896_v41  ;;  %v3902_v41 = vsel %vm588_vm0, %v3756_v19, 0.0  ;;  %v3989_v19 = vsel %vm588_vm0, %v3785_v17, 0.0 }
 0x2e7   : > { %3972 = vadd.xlane.f32.xlu0 %v3971_v7  ;;  %v9604_v57 = vpop.xlane.xlu1 %3444  ;;  %v3757_v7 = vmul.f32 %v8561_v35, %v9512_v49  ;;  %v3787_v35 = vmul.f32 %v8781_v22, %v9512_v49 }
 0x2e8   : > { %11988 = vst [vmem:[#allocation156_spill] sm:$0xff] %v9604_v57  ;;  %v9606_v39 = vpop.xlane.xlu0 %3441  ;;  %v12041_v57 = vld [vmem:[#allocation20_spill] sm:$0xff] }
 0x2e9   : > { %11989 = vst [vmem:[#allocation157_spill] sm:$0xff] %v9606_v39  ;;  %v3792_v29 = vmul.f32 %v12041_v57, %v9512_v49  ;;  %v12046_v57 = vld [vmem:[#allocation61_spill] sm:$0xff] }
 0x2ea   : > { %3900 = vadd.xlane.f32.xlu1 %v3899_v40  ;;  %v3905_v40 = vsel %vm588_vm0, %v3757_v7, 0.0  ;;  %v3995_v7 = vsel %vm588_vm0, %v3787_v35, 0.0 }
 0x2eb   : > { %3978 = vadd.xlane.f32.xlu0 %v3977_v13  ;;  %v9614_v11 = vpop.xlane.xlu1 %3450  ;;  %v3759_v13 = vmul.f32 %v8575_v50, %v9512_v49  ;;  %v3789_v50 = vmul.f32 %v8795_v60, %v9512_v49 }
 0x2ec   : > { %11990 = vst [vmem:[#allocation158_spill] sm:$0xff] %v9614_v11  ;;  %v9616_v1 = vpop.xlane.xlu0 %3447  ;;  %v12020_v11 = vld [vmem:[#allocation14_spill] sm:$0xff] }
 0x2ed   : > { %11991 = vst [vmem:[#allocation159_spill] sm:$0xff] %v9616_v1  ;;  %v3780_v48 = vmul.f32 %v12020_v11, %v9512_v49  ;;  %v12025_v11 = vld [vmem:[#allocation39_spill] sm:$0xff] }
 0x2ee   : > { %3903 = vadd.xlane.f32.xlu1 %v3902_v41  ;;  %v3911_v41 = vsel %vm588_vm0, %v3759_v13, 0.0  ;;  %v4001_v13 = vsel %vm588_vm0, %v3789_v50, 0.0 }
 0x2ef   : > { %3984 = vadd.xlane.f32.xlu0 %v3983_v10  ;;  %v9624_v5 = vpop.xlane.xlu1 %3456  ;;  %v3760_v10 = vmul.f32 %v8568_v42, %v9512_v49  ;;  %v3791_v42 = vmul.f32 %v8809_v32, %v9512_v49 }
 0x2f0   : > { %11992 = vst [vmem:[#allocation160_spill] sm:$0xff] %v9624_v5  ;;  %v9626_v26 = vpop.xlane.xlu0 %3453 }
 0x2f1   : > { %11993 = vst [vmem:[#allocation161_spill] sm:$0xff] %v9626_v26 }
 0x2f2   : > { %3906 = vadd.xlane.f32.xlu1 %v3905_v40  ;;  %v3914_v40 = vsel %vm588_vm0, %v3760_v10, 0.0  ;;  %v4007_v10 = vsel %vm588_vm0, %v3791_v42, 0.0 }
 0x2f3   : > { %3990 = vadd.xlane.f32.xlu0 %v3989_v19  ;;  %v9634_v23 = vpop.xlane.xlu1 %3462  ;;  %v3761_v19 = vmul.f32 %v8589_v2, %v9512_v49  ;;  %v3793_v2 = vmul.f32 %v8823_v36, %v9512_v49 }
 0x2f4   : > { %v9636_v56 = vpop.xlane.xlu0 %3459 }
 0x2f6   : > { %3912 = vadd.xlane.f32.xlu1 %v3911_v41  ;;  %v3917_v41 = vsel %vm588_vm0, %v3761_v19, 0.0  ;;  %v4013_v19 = vsel %vm588_vm0, %v3793_v2, 0.0 }
 0x2f7   : > { %3996 = vadd.xlane.f32.xlu0 %v3995_v7  ;;  %v9644_v17 = vpop.xlane.xlu1 %3468  ;;  %v3762_v7 = vmul.f32 %v8582_v59, %v9512_v49  ;;  %v3795_v59 = vmul.f32 %v8841_v45, %v9512_v49 }
 0x2f8   : > { %v9646_v22 = vpop.xlane.xlu0 %3465 }
 0x2fa   : > { %3915 = vadd.xlane.f32.xlu1 %v3914_v40  ;;  %v3920_v40 = vsel %vm588_vm0, %v3762_v7, 0.0  ;;  %v4019_v7 = vsel %vm588_vm0, %v3795_v59, 0.0 }
 0x2fb   : > { %4002 = vadd.xlane.f32.xlu0 %v4001_v13  ;;  %v9654_v35 = vpop.xlane.xlu1 %3474  ;;  %v3763_v13 = vmul.f32 %v8607_v16, %v9512_v49  ;;  %v3797_v16 = vmul.f32 %v8855_v21, %v9512_v49 }
 0x2fc   : > { %11994 = vst [vmem:[#allocation162_spill] sm:$0xff] %v9654_v35  ;;  %v9656_v60 = vpop.xlane.xlu0 %3471 }
 0x2fe   : > { %3918 = vadd.xlane.f32.xlu1 %v3917_v41  ;;  %v3923_v41 = vsel %vm588_vm0, %v3763_v13, 0.0  ;;  %v4025_v13 = vsel %vm588_vm0, %v3797_v16, 0.0 }
 0x2ff   : > { %4008 = vadd.xlane.f32.xlu0 %v4007_v10  ;;  %v9664_v50 = vpop.xlane.xlu1 %3480  ;;  %v3764_v10 = vmul.f32 %v8600_v9, %v9512_v49  ;;  %v3799_v9 = vmul.f32 %v8871_v14, %v9512_v49 }
 0x300   : > { %11995 = vst [vmem:[#allocation163_spill] sm:$0xff] %v9664_v50  ;;  %v9666_v32 = vpop.xlane.xlu0 %3477 }
 0x301   : > { %11996 = vst [vmem:[#allocation164_spill] sm:$0xff] %v9666_v32 }
 0x302   : > { %3921 = vadd.xlane.f32.xlu1 %v3920_v40  ;;  %v3926_v40 = vsel %vm588_vm0, %v3764_v10, 0.0  ;;  %v4031_v10 = vsel %vm588_vm0, %v3799_v9, 0.0 }
 0x303   : > { %4014 = vadd.xlane.f32.xlu0 %v4013_v19  ;;  %v9674_v42 = vpop.xlane.xlu1 %3486  ;;  %v3765_v19 = vmul.f32 %v8621_v31, %v9512_v49  ;;  %v3801_v31 = vmul.f32 %v8889_v34, %v9512_v49 }
 0x304   : > { %11997 = vst [vmem:[#allocation165_spill] sm:$0xff] %v9674_v42  ;;  %v9676_v36 = vpop.xlane.xlu0 %3483 }
 0x305   : > { %11998 = vst [vmem:[#allocation166_spill] sm:$0xff] %v9676_v36 }
 0x306   : > { %3924 = vadd.xlane.f32.xlu1 %v3923_v41  ;;  %v3929_v41 = vsel %vm588_vm0, %v3765_v19, 0.0  ;;  %v4037_v19 = vsel %vm588_vm0, %v3801_v31, 0.0 }
 0x307   : > { %4020 = vadd.xlane.f32.xlu0 %v4019_v7  ;;  %v9684_v2 = vpop.xlane.xlu1 %3492  ;;  %v3766_v7 = vmul.f32 %v8614_v24, %v9512_v49  ;;  %v3803_v24 = vmul.f32 %v8903_v8, %v9512_v49 }
 0x308   : > { %11999 = vst [vmem:[#allocation167_spill] sm:$0xff] %v9684_v2  ;;  %v9686_v45 = vpop.xlane.xlu0 %3489 }
 0x309   : > { %12000 = vst [vmem:[#allocation168_spill] sm:$0xff] %v9686_v45 }
 0x30a   : > { %3927 = vadd.xlane.f32.xlu1 %v3926_v40  ;;  %v3932_v40 = vsel %vm588_vm0, %v3766_v7, 0.0  ;;  %v4043_v7 = vsel %vm588_vm0, %v3803_v24, 0.0 }
 0x30b   : > { %4026 = vadd.xlane.f32.xlu0 %v4025_v13  ;;  %v9694_v59 = vpop.xlane.xlu1 %3498  ;;  %v3768_v13 = vmul.f32 %v8630_v38, %v9512_v49  ;;  %v3805_v38 = vmul.f32 %v8917_v52, %v9512_v49 }
 0x30c   : > { %12001 = vst [vmem:[#allocation169_spill] sm:$0xff] %v9694_v59  ;;  %v9696_v21 = vpop.xlane.xlu0 %3495  ;;  %v3778_v59 = vmul.f32 %v12016_v62, %v9512_v49  ;;  %v12021_v62 = vld [vmem:[#allocation37_spill] sm:$0xff] }
 0x30d   : > { %12002 = vst [vmem:[#allocation170_spill] sm:$0xff] %v9696_v21 }
 0x30e   : > { %3930 = vadd.xlane.f32.xlu1 %v3929_v41  ;;  %v3938_v41 = vsel %vm588_vm0, %v3768_v13, 0.0  ;;  %v4049_v13 = vsel %vm588_vm0, %v3805_v38, 0.0 }
 0x30f   : > { %4032 = vadd.xlane.f32.xlu0 %v4031_v10  ;;  %v9704_v16 = vpop.xlane.xlu1 %3504  ;;  %v3770_v10 = vmul.f32 %v8644_v58, %v9512_v49  ;;  %v12005_v58 = vld [vmem:[#allocation29_spill] sm:$0xff] }
 0x310   : > { %12003 = vst [vmem:[#allocation171_spill] sm:$0xff] %v9704_v16  ;;  %v9706_v14 = vpop.xlane.xlu0 %3501  ;;  %v12008_v16 = vld [vmem:[#allocation11_spill] sm:$0xff] }
 0x311   : > { %12004 = vst [vmem:[#allocation172_spill] sm:$0xff] %v9706_v14  ;;  %v3774_v5 = vmul.f32 %v12008_v16, %v9512_v49  ;;  %v12012_v14 = vld [vmem:[#allocation12_spill] sm:$0xff]  ;;  %v12013_v16 = vld [vmem:[#allocation33_spill] sm:$0xff] }
 0x312   : > { %3933 = vadd.xlane.f32.xlu1 %v3932_v40  ;;  %v3944_v40 = vsel %vm588_vm0, %v3770_v10, 0.0  ;;  %v3776_v26 = vmul.f32 %v12012_v14, %v9512_v49  ;;  %v12017_v14 = vld [vmem:[#allocation35_spill] sm:$0xff] }
 0x313   : > { %4038 = vadd.xlane.f32.xlu0 %v4037_v19  ;;  %v9714_v9 = vpop.xlane.xlu1 %3510  ;;  %v3772_v19 = vmul.f32 %v8662_v12, %v9512_v49  ;;  %v12009_v12 = vld [vmem:[#allocation31_spill] sm:$0xff] }
 0x314   : > { %v9716_v34 = vpop.xlane.xlu0 %3507 }
 0x316   : > { %3939 = vadd.xlane.f32.xlu1 %v3938_v41  ;;  %v3807_v41 = vmul.f32 %v12005_v58, %v9512_v49 }
 0x317   : > { %4044 = vadd.xlane.f32.xlu0 %v4043_v7  ;;  %v9724_v31 = vpop.xlane.xlu1 %3516  ;;  %v3950_v7 = vsel %vm588_vm0, %v3772_v19, 0.0 }
 0x318   : > { %v9726_v8 = vpop.xlane.xlu0 %3513  ;;  %v4055_v10 = vsel %vm588_vm0, %v3807_v41, 0.0 }
 0x31a   : > { %3945 = vadd.xlane.f32.xlu1 %v3944_v40  ;;  %v3809_v40 = vmul.f32 %v12009_v12, %v9512_v49 }
 0x31b   : > { %4050 = vadd.xlane.f32.xlu0 %v4049_v13  ;;  %v9734_v24 = vpop.xlane.xlu1 %3522  ;;  %v3956_v13 = vsel %vm588_vm0, %v3774_v5, 0.0 }
 0x31c   : > { %12006 = vst [vmem:[#allocation29_spill] sm:$0xff] %v9734_v24  ;;  %v9736_v52 = vpop.xlane.xlu0 %3519  ;;  %v4061_v19 = vsel %vm588_vm0, %v3809_v40, 0.0 }
 0x31d   : > { %12007 = vst [vmem:[#allocation173_spill] sm:$0xff] %v9736_v52 }
 0x31e   : > { %3951 = vadd.xlane.f32.xlu1 %v3950_v7  ;;  %v3811_v7 = vmul.f32 %v12013_v16, %v9512_v49 }
 0x31f   : > { %4056 = vadd.xlane.f32.xlu0 %v4055_v10  ;;  %v9744_v38 = vpop.xlane.xlu1 %3528  ;;  %v3962_v10 = vsel %vm588_vm0, %v3776_v26, 0.0 }
 0x320   : > { %12010 = vst [vmem:[#allocation11_spill] sm:$0xff] %v9744_v38  ;;  %v9746_v58 = vpop.xlane.xlu0 %3525  ;;  %v4067_v5 = vsel %vm588_vm0, %v3811_v7, 0.0 }
 0x321   : > { %12011 = vst [vmem:[#allocation31_spill] sm:$0xff] %v9746_v58  ;;  %v12066_v58 = vld [vmem:[#allocation28_spill] sm:$0xff] }
 0x322   : > { %3957 = vadd.xlane.f32.xlu1 %v3956_v13  ;;  %v3813_v13 = vmul.f32 %v12017_v14, %v9512_v49 }
 0x323   : > { %4062 = vadd.xlane.f32.xlu0 %v4061_v19  ;;  %v9754_v41 = vpop.xlane.xlu1 %3534  ;;  %v3968_v19 = vsel %vm588_vm0, %v3778_v59, 0.0 }
 0x324   : > { %12014 = vst [vmem:[#allocation12_spill] sm:$0xff] %v9754_v41  ;;  %v9756_v12 = vpop.xlane.xlu0 %3531  ;;  %v4073_v26 = vsel %vm588_vm0, %v3813_v13, 0.0  ;;  %v12045_v41 = vld [vmem:[#allocation21_spill] sm:$0xff] }
 0x325   : > { %12015 = vst [vmem:[#allocation33_spill] sm:$0xff] %v9756_v12  ;;  %v3794_v45 = vmul.f32 %v12045_v41, %v9512_v49  ;;  %v12050_v41 = vld [vmem:[#allocation65_spill] sm:$0xff] }
 0x326   : > { %3963 = vadd.xlane.f32.xlu1 %v3962_v10  ;;  %v3815_v10 = vmul.f32 %v12021_v62, %v9512_v49 }
 0x327   : > { %4068 = vadd.xlane.f32.xlu0 %v4067_v5  ;;  %v9764_v40 = vpop.xlane.xlu1 %3540  ;;  %v3974_v5 = vsel %vm588_vm0, %v3780_v48, 0.0 }
 0x328   : > { %12018 = vst [vmem:[#allocation13_spill] sm:$0xff] %v9764_v40  ;;  %v9766_v16 = vpop.xlane.xlu0 %3537  ;;  %v12024_v40 = vld [vmem:[#allocation15_spill] sm:$0xff]  ;;  %v4079_v59 = vsel %vm588_vm0, %v3815_v10, 0.0 }
 0x329   : > { %12019 = vst [vmem:[#allocation35_spill] sm:$0xff] %v9766_v16  ;;  %v3782_v21 = vmul.f32 %v12024_v40, %v9512_v49  ;;  %v12029_v40 = vld [vmem:[#allocation41_spill] sm:$0xff] }
 0x32a   : > { %3969 = vadd.xlane.f32.xlu1 %v3968_v19  ;;  %v3817_v19 = vmul.f32 %v12025_v11, %v9512_v49 }
 0x32b   : > { %4074 = vadd.xlane.f32.xlu0 %v4073_v26  ;;  %v9774_v7 = vpop.xlane.xlu1 %3546  ;;  %v3980_v26 = vsel %vm588_vm0, %v3782_v21, 0.0 }
 0x32c   : > { %12022 = vst [vmem:[#allocation14_spill] sm:$0xff] %v9774_v7  ;;  %v9776_v14 = vpop.xlane.xlu0 %3543  ;;  %v12028_v7 = vld [vmem:[#allocation16_spill] sm:$0xff]  ;;  %v4085_v48 = vsel %vm588_vm0, %v3817_v19, 0.0 }
 0x32d   : > { %12023 = vst [vmem:[#allocation37_spill] sm:$0xff] %v9776_v14  ;;  %v3784_v14 = vmul.f32 %v12028_v7, %v9512_v49  ;;  %v12031_v7 = vld [vmem:[#allocation45_spill] sm:$0xff] }
 0x32e   : > { %3975 = vadd.xlane.f32.xlu1 %v3974_v5  ;;  %v3819_v5 = vmul.f32 %v12029_v40, %v9512_v49  ;;  %v7755_v40 = vmov 0  }
 0x32f   : > { %4080 = vadd.xlane.f32.xlu0 %v4079_v59  ;;  %v9784_v13 = vpop.xlane.xlu1 %3552  ;;  %v3986_v59 = vsel %vm588_vm0, %v3784_v14, 0.0  ;;  %7455 = vset.pattern.permute.xlu1 %v7755_v40  ;;  %v12033_v14 = vld [vmem:[#allocation18_spill] sm:$0xff] }
 0x330   : > { %12026 = vst [vmem:[#allocation15_spill] sm:$0xff] %v9784_v13  ;;  %v9786_v62 = vpop.xlane.xlu0 %3549  ;;  %v12030_v13 = vld [vmem:[#allocation17_spill] sm:$0xff]  ;;  %v4091_v21 = vsel %vm588_vm0, %v3819_v5, 0.0  ;;  %7454 = vset.pattern.permute.xlu0 %v7755_v40  ;;  %v3788_v27 = vmul.f32 %v12033_v14, %v9512_v49  ;;  %v12037_v40 = vld [vmem:[#allocation19_spill] sm:$0xff] }
 0x331   : > { %12027 = vst [vmem:[#allocation39_spill] sm:$0xff] %v9786_v62  ;;  %v3786_v62 = vmul.f32 %v12030_v13, %v9512_v49  ;;  %v12034_v5 = vld [vmem:[#allocation49_spill] sm:$0xff]  ;;  %v3790_v2 = vmul.f32 %v12037_v40, %v9512_v49 }
 0x332   : > { %3981 = vadd.xlane.f32.xlu1 %v3980_v26  ;;  %v3821_v26 = vmul.f32 %v12031_v7, %v9512_v49  ;;  %v3998_v16 = vsel %vm588_vm0, %v3788_v27, 0.0 }
 0x333   : > { %4086 = vadd.xlane.f32.xlu0 %v4085_v48  ;;  %v9794_v10 = vpop.xlane.xlu1 %3558  ;;  %v3992_v1 = vsel %vm588_vm0, %v3786_v62, 0.0 }
 0x334   : > { %v9796_v11 = vpop.xlane.xlu0 %3555  ;;  %v4097_v13 = vsel %vm588_vm0, %v3821_v26, 0.0 }
 0x336   : > { %3987 = vadd.xlane.f32.xlu1 %v3986_v59  ;;  %v3823_v59 = vmul.f32 %v12034_v5, %v9512_v49 }
 0x337   : > { %4092 = vadd.xlane.f32.xlu0 %v4091_v21  ;;  %v9804_v19 = vpop.xlane.xlu1 %3564 }
 0x338   : > { %12032 = vst [vmem:[#allocation16_spill] sm:$0xff] %v9804_v19  ;;  %v9806_v48 = vpop.xlane.xlu0 %3561  ;;  %v4103_v62 = vsel %vm588_vm0, %v3823_v59, 0.0 }
 0x33a   : > { %3993 = vadd.xlane.f32.xlu1 %v3992_v1  ;;  %v12038_v1 = vld [vmem:[#allocation53_spill] sm:$0xff] }
 0x33b   : > { %4098 = vadd.xlane.f32.xlu0 %v4097_v13  ;;  %v9814_v21 = vpop.xlane.xlu1 %3570  ;;  %v3825_v14 = vmul.f32 %v12038_v1, %v9512_v49  ;;  %v4004_v13 = vsel %vm588_vm0, %v3790_v2, 0.0 }
 0x33c   : > { %12035 = vst [vmem:[#allocation41_spill] sm:$0xff] %v9814_v21  ;;  %v9816_v7 = vpop.xlane.xlu0 %3567  ;;  %v12072_v21 = vld [vmem:[#allocation32_spill] sm:$0xff] }
 0x33d   : > { %12036 = vst [vmem:[#allocation17_spill] sm:$0xff] %v9816_v7  ;;  %v4109_v27 = vsel %vm588_vm0, %v3825_v14, 0.0 }
 0x33e   : > { %3999 = vadd.xlane.f32.xlu1 %v3998_v16  ;;  %v12042_v16 = vld [vmem:[#allocation57_spill] sm:$0xff] }
 0x33f   : > { %4104 = vadd.xlane.f32.xlu0 %v4103_v62  ;;  %v9824_v26 = vpop.xlane.xlu1 %3576  ;;  %v3827_v40 = vmul.f32 %v12042_v16, %v9512_v49  ;;  %v4010_v62 = vsel %vm588_vm0, %v3792_v29, 0.0 }
 0x340   : > { %12039 = vst [vmem:[#allocation45_spill] sm:$0xff] %v9824_v26  ;;  %v9826_v5 = vpop.xlane.xlu0 %3573 }
 0x341   : > { %12040 = vst [vmem:[#allocation18_spill] sm:$0xff] %v9826_v5  ;;  %v4115_v2 = vsel %vm588_vm0, %v3827_v40, 0.0  ;;  %v4261_v40 = vlaneseq }
 0x342   : > { %4005 = vadd.xlane.f32.xlu1 %v4004_v13  ;;  %v3829_v13 = vmul.f32 %v12046_v57, %v9512_v49 }
 0x343   : > { %4110 = vadd.xlane.f32.xlu0 %v4109_v27  ;;  %v9834_v59 = vpop.xlane.xlu1 %3582  ;;  %v4016_v27 = vsel %vm588_vm0, %v3794_v45, 0.0 }
 0x344   : > { %12043 = vst [vmem:[#allocation49_spill] sm:$0xff] %v9834_v59  ;;  %v9836_v1 = vpop.xlane.xlu0 %3579  ;;  %v12049_v59 = vld [vmem:[#allocation22_spill] sm:$0xff]  ;;  %v4121_v29 = vsel %vm588_vm0, %v3829_v13, 0.0 }
 0x345   : > { %12044 = vst [vmem:[#allocation19_spill] sm:$0xff] %v9836_v1  ;;  %v3796_v39 = vmul.f32 %v12049_v59, %v9512_v49 }
 0x346   : > { %4011 = vadd.xlane.f32.xlu1 %v4010_v62  ;;  %v3831_v62 = vmul.f32 %v12050_v41, %v9512_v49 }
 0x347   : > { %4116 = vadd.xlane.f32.xlu0 %v4115_v2  ;;  %v9844_v14 = vpop.xlane.xlu1 %3588  ;;  %v4022_v57 = vsel %vm588_vm0, %v3796_v39, 0.0 }
 0x348   : > { %12047 = vst [vmem:[#allocation53_spill] sm:$0xff] %v9844_v14  ;;  %v9846_v16 = vpop.xlane.xlu0 %3585  ;;  %v12053_v14 = vld [vmem:[#allocation23_spill] sm:$0xff]  ;;  %v4127_v59 = vsel %vm588_vm0, %v3831_v62, 0.0 }
 0x349   : > { %12048 = vst [vmem:[#allocation20_spill] sm:$0xff] %v9846_v16  ;;  %v3798_v45 = vmul.f32 %v12053_v14, %v9512_v49  ;;  %v9864_v16 = vand.u32 127, %v4261_v40  ;;  %v12058_v14 = vld [vmem:[#allocation24_spill] sm:$0xff] }
 0x34a   : > { %4017 = vadd.xlane.f32.xlu1 %v4016_v27  ;;  %v12054_v27 = vld [vmem:[#allocation69_spill] sm:$0xff] }
 0x34b   : > { %4122 = vadd.xlane.f32.xlu0 %v4121_v29  ;;  %v9854_v46 = vpop.xlane.xlu1 %3594  ;;  %v3833_v13 = vmul.f32 %v12054_v27, %v9512_v49  ;;  %v5073_v39 = vadd.s32 4294967288, %v9864_v16  ;;  %v12059_v27 = vld [vmem:[#allocation73_spill] sm:$0xff] }
 0x34c   : > { %12051 = vst [vmem:[#allocation57_spill] sm:$0xff] %v9854_v46  ;;  %v9856_v2 = vpop.xlane.xlu0 %3591  ;;  %v9870_v46 = vshrl.u32 %v4261_v40, 7  ;;  %v3835_v1 = vmul.f32 %v12059_v27, %v9512_v49  ;;  %v12061_v27 = vld [vmem:[#allocation77_spill] sm:$0xff] }
 0x34d   : > { %12052 = vst [vmem:[#allocation21_spill] sm:$0xff] %v9856_v2  ;;  %v4028_v2 = vsel %vm588_vm0, %v3798_v45, 0.0  ;;  %v4133_v62 = vsel %vm588_vm0, %v3833_v13, 0.0  ;;  %v5080_v45 = vadd.s32 4294967280, %v9864_v16  ;;  %v12060_v13 = vld [vmem:[#allocation25_spill] sm:$0xff]  ;;  %v3837_v12 = vmul.f32 %v12061_v27, %v9512_v49 }
 0x34e   : > { %4023 = vadd.xlane.f32.xlu1 %v4022_v57  ;;  %12057 = vst [vmem:[#allocation65_spill] sm:$0xff] %v9870_v46  ;;  %v3800_v57 = vmul.f32 %v12058_v14, %v9512_v49  ;;  %v3802_v14 = vmul.f32 %v12060_v13, %v9512_v49  ;;  %v5087_v13 = vadd.s32 4294967272, %v9864_v16 }
 0x34f   : > { %4128 = vadd.xlane.f32.xlu0 %v4127_v59  ;;  %v9866_v41 = vpop.xlane.xlu1 %3600  ;;  %v4145_v27 = vsel %vm588_vm0, %v3837_v12, 0.0  ;;  %v5094_v12 = vadd.s32 4294967264, %v9864_v16 }
 0x350   : > { %12055 = vst [vmem:[#allocation61_spill] sm:$0xff] %v9866_v41  ;;  %v9868_v29 = vpop.xlane.xlu0 %3597  ;;  %v9881_v41 = vsub.s32 %v9864_v16, %v9870_v46 }
 0x351   : > { %12056 = vst [vmem:[#allocation22_spill] sm:$0xff] %v9868_v29  ;;  %v9886_v29 = vsub.s32 %v5073_v39, %v9870_v46 }
 0x352   : > { %4029 = vadd.xlane.f32.xlu1 %v4028_v2  ;;  %v4034_v2 = vsel %vm588_vm0, %v3800_v57, 0.0  ;;  %v9900_v57 = vsub.s32 %v5080_v45, %v9870_v46 }
 0x353   : > { %4134 = vadd.xlane.f32.xlu0 %v4133_v62  ;;  %v3877_v59 = vpop.xlane.xlu1 %3876  ;;  %v4139_v62 = vsel %vm588_vm0, %v3835_v1, 0.0  ;;  %v12062_v1 = vld [vmem:[#allocation26_spill] sm:$0xff] }
 0x354   : > { %v9883_v40 = vpop.xlane.xlu0 %3909  ;;  %v5914_v63 = vrot.slane %v3877_v59, %v9881_v41  ;;  %v3804_v26 = vmul.f32 %v12062_v1, %v9512_v49  ;;  %v12063_v59 = vld [vmem:[#allocation81_spill] sm:$0xff] }
 0x356   : > { %4035 = vadd.xlane.f32.xlu1 %v4034_v2  ;;  %v4040_v2 = vsel %vm588_vm0, %v3802_v14, 0.0  ;;  %v9914_v14 = vsub.s32 %v5087_v13, %v9870_v46  ;;  %v4046_v1 = vsel %vm588_vm0, %v3804_v26, 0.0  ;;  %v5101_v26 = vadd.s32 4294967256, %v9864_v16 }
 0x357   : > { %4140 = vadd.xlane.f32.xlu0 %v4139_v62  ;;  %v3880_v42 = vpop.xlane.xlu1 %3879 }
 0x358   : > { %v5918_v39 = vrot.slane %v3880_v42, %v9886_v29  ;;  %v9897_v54 = vpop.xlane.xlu0 %3936  ;;  %v3839_v42 = vmul.f32 %v12063_v59, %v9512_v49  ;;  %v12065_v59 = vld [vmem:[#allocation85_spill] sm:$0xff] }
 0x35a   : > { %v5919_v62 = vsel %vm5078_vm1, %v5918_v39, %v5914_v63  ;;  %4041 = vadd.xlane.f32.xlu1 %v4040_v2  ;;  %v12064_v63 = vld [vmem:[#allocation27_spill] sm:$0xff] }
 0x35b   : > { %4146 = vadd.xlane.f32.xlu0 %v4145_v27  ;;  %v3883_v38 = vpop.xlane.xlu1 %3882  ;;  %v3806_v39 = vmul.f32 %v12064_v63, %v9512_v49  ;;  %v4151_v27 = vsel %vm588_vm0, %v3839_v42, 0.0 }
 0x35c   : > { %v5923_v45 = vrot.slane %v3883_v38, %v9900_v57  ;;  %v9911_v36 = vpop.xlane.xlu0 %3942  ;;  %v3841_v38 = vmul.f32 %v12065_v59, %v9512_v49 }
 0x35d   : > { %v4052_v63 = vsel %vm588_vm0, %v3806_v39, 0.0 }
 0x35e   : > { %v5924_v2 = vsel %vm5085_vm2, %v5923_v45, %v5919_v62  ;;  %4047 = vadd.xlane.f32.xlu1 %v4046_v1  ;;  %v3808_v62 = vmul.f32 %v12066_v58, %v9512_v49  ;;  %v9932_v45 = vsub.s32 %v5094_v12, %v9870_v46  ;;  %v4157_v1 = vsel %vm588_vm0, %v3841_v38, 0.0 }
 0x35f   : > { %4152 = vadd.xlane.f32.xlu0 %v4151_v27  ;;  %v3886_v18 = vpop.xlane.xlu1 %3885  ;;  %v12068_v27 = vld [vmem:[#allocation89_spill] sm:$0xff]  ;;  %v9942_v58 = vsub.s32 %v5101_v26, %v9870_v46  ;;  %v5108_v38 = vadd.s32 4294967248, %v9864_v16 }
 0x360   : > { %v5928_v13 = vrot.slane %v3886_v18, %v9914_v14  ;;  %v9925_v5 = vpop.xlane.xlu0 %3948  ;;  %12067 = vst [vmem:[#allocation23_spill] sm:$0xff] %v9932_v45  ;;  %v3843_v18 = vmul.f32 %v12068_v27, %v9512_v49  ;;  %v4058_v12 = vsel %vm588_vm0, %v3808_v62, 0.0  ;;  %v12071_v27 = vld [vmem:[#allocation93_spill] sm:$0xff]  ;;  %v5115_v62 = vadd.s32 4294967240, %v9864_v16 }
 0x361   : > { %12069 = vst [vmem:[#allocation69_spill] sm:$0xff] %v9942_v58 }
 0x362   : > { %v5929_v42 = vsel %vm5092_vm3, %v5928_v13, %v5924_v2  ;;  %4053 = vadd.xlane.f32.xlu1 %v4052_v63  ;;  %v12070_v2 = vld [vmem:[#allocation30_spill] sm:$0xff] }
 0x363   : > { %4158 = vadd.xlane.f32.xlu0 %v4157_v1  ;;  %v3889_v59 = vpop.xlane.xlu1 %3888  ;;  %v3810_v13 = vmul.f32 %v12070_v2, %v9512_v49  ;;  %v4163_v1 = vsel %vm588_vm0, %v3843_v18, 0.0 }
 0x364   : > { %v5933_v50 = vrot.slane %v3889_v59, %v9932_v45  ;;  %v9939_v39 = vpop.xlane.xlu0 %3954  ;;  %v3845_v59 = vmul.f32 %v12071_v27, %v9512_v49 }
 0x365   : > { %v4064_v2 = vsel %vm588_vm0, %v3810_v13, 0.0 }
 0x366   : > { %v5934_v63 = vsel %vm5099_vm4, %v5933_v50, %v5929_v42  ;;  %4059 = vadd.xlane.f32.xlu1 %v4058_v12  ;;  %v3812_v50 = vmul.f32 %v12072_v21, %v9512_v49  ;;  %v9960_v42 = vsub.s32 %v5108_v38, %v9870_v46  ;;  %v4169_v12 = vsel %vm588_vm0, %v3845_v59, 0.0 }
 0x367   : > { %4164 = vadd.xlane.f32.xlu0 %v4163_v1  ;;  %v3892_v51 = vpop.xlane.xlu1 %3891  ;;  %v12074_v1 = vld [vmem:[#allocation97_spill] sm:$0xff]  ;;  %v9970_v21 = vsub.s32 %v5115_v62, %v9870_v46  ;;  %v5122_v59 = vadd.s32 4294967232, %v9864_v16 }
 0x368   : > { %v5938_v26 = vrot.slane %v3892_v51, %v9942_v58  ;;  %v9953_v44 = vpop.xlane.xlu0 %3960  ;;  %12073 = vst [vmem:[#allocation24_spill] sm:$0xff] %v9960_v42  ;;  %v3847_v51 = vmul.f32 %v12074_v1, %v9512_v49  ;;  %v4070_v38 = vsel %vm588_vm0, %v3812_v50, 0.0  ;;  %v12078_v1 = vld [vmem:[#allocation101_spill] sm:$0xff]  ;;  %v5129_v50 = vadd.s32 4294967224, %v9864_v16 }
 0x369   : > { %12076 = vst [vmem:[#allocation25_spill] sm:$0xff] %v9970_v21 }
 0x36a   : > { %v5939_v18 = vsel %vm5106_vm5, %v5938_v26, %v5934_v63  ;;  %4065 = vadd.xlane.f32.xlu1 %v4064_v2  ;;  %v12077_v63 = vld [vmem:[#allocation34_spill] sm:$0xff] }
 0x36b   : > { %4170 = vadd.xlane.f32.xlu0 %v4169_v12  ;;  %v3895_v27 = vpop.xlane.xlu1 %3894  ;;  %v3814_v26 = vmul.f32 %v12077_v63, %v9512_v49  ;;  %v4175_v12 = vsel %vm588_vm0, %v3847_v51, 0.0 }
 0x36c   : > { %v5943_v24 = vrot.slane %v3895_v27, %v9960_v42  ;;  %v9967_v13 = vpop.xlane.xlu0 %3966  ;;  %v3849_v27 = vmul.f32 %v12078_v1, %v9512_v49 }
 0x36d   : > { %12075 = vst [vmem:[#allocation73_spill] sm:$0xff] %v9967_v13  ;;  %v4076_v63 = vsel %vm588_vm0, %v3814_v26, 0.0 }
 0x36e   : > { %v5944_v2 = vsel %vm5113_vm6, %v5943_v24, %v5939_v18  ;;  %4071 = vadd.xlane.f32.xlu1 %v4070_v38  ;;  %v3816_v24 = vmul.f32 %v12080_v61, %v9512_v49  ;;  %v9988_v18 = vsub.s32 %v5122_v59, %v9870_v46  ;;  %v4181_v38 = vsel %vm588_vm0, %v3849_v27, 0.0 }
 0x36f   : > { %4176 = vadd.xlane.f32.xlu0 %v4175_v12  ;;  %v3898_v13 = vpop.xlane.xlu1 %3897  ;;  %v12082_v12 = vld [vmem:[#allocation105_spill] sm:$0xff]  ;;  %v9998_v61 = vsub.s32 %v5129_v50, %v9870_v46  ;;  %v5143_v59 = vadd.s32 4294967208, %v9864_v16 }
 0x370   : > { %v5948_v62 = vrot.slane %v3898_v13, %v9970_v21  ;;  %v9981_v32 = vpop.xlane.xlu0 %3972  ;;  %12081 = vst [vmem:[#allocation26_spill] sm:$0xff] %v9988_v18  ;;  %v3851_v13 = vmul.f32 %v12082_v12, %v9512_v49 }
 0x371   : > { %12079 = vst [vmem:[#allocation77_spill] sm:$0xff] %v9981_v32  ;;  %12084 = vst [vmem:[#allocation27_spill] sm:$0xff] %v9998_v61 }
 0x372   : > { %v5949_v51 = vsel %vm11838_vm7, %v5948_v62, %v5944_v2  ;;  %4077 = vadd.xlane.f32.xlu1 %v4076_v63  ;;  %v4082_v2 = vsel %vm588_vm0, %v3816_v24, 0.0  ;;  %v12085_v62 = vld [vmem:[#allocation38_spill] sm:$0xff]  ;;  %v5136_v63 = vadd.s32 4294967216, %v9864_v16  ;;  %v4187_v12 = vsel %vm588_vm0, %v3851_v13, 0.0  ;;  %v12090_v13 = vld [vmem:[#allocation113_spill] sm:$0xff] }
 0x373   : > { %4182 = vadd.xlane.f32.xlu0 %v4181_v38  ;;  %v3901_v1 = vpop.xlane.xlu1 %3900  ;;  %v3818_v27 = vmul.f32 %v12085_v62, %v9512_v49  ;;  %v10013_v24 = vsub.s32 %v5143_v59, %v9870_v46 }
 0x374   : > { %v5953_v32 = vrot.slane %v3901_v1, %v9988_v18  ;;  %v9995_v26 = vpop.xlane.xlu0 %3978  ;;  %v12086_v1 = vld [vmem:[#allocation109_spill] sm:$0xff] }
 0x375   : > { %12083 = vst [vmem:[#allocation81_spill] sm:$0xff] %v9995_v26  ;;  %v3853_v26 = vmul.f32 %v12086_v1, %v9512_v49  ;;  %12088 = vst [vmem:[#allocation28_spill] sm:$0xff] %v10013_v24  ;;  %v4088_v62 = vsel %vm588_vm0, %v3818_v27, 0.0  ;;  %v10021_v1 = vsub.s32 %v5136_v63, %v9870_v46  ;;  %v5968_v63 = vrot.slane %v9883_v40, %v10013_v24 }
 0x376   : > { %v5954_v38 = vsel %vm5127_vm8, %v5953_v32, %v5949_v51  ;;  %4083 = vadd.xlane.f32.xlu1 %v4082_v2  ;;  %v12089_v32 = vld [vmem:[#allocation40_spill] sm:$0xff]  ;;  %v3855_v2 = vmul.f32 %v12090_v13, %v9512_v49 }
 0x377   : > { %4188 = vadd.xlane.f32.xlu0 %v4187_v12  ;;  %v3904_v50 = vpop.xlane.xlu1 %3903  ;;  %v3820_v51 = vmul.f32 %v12089_v32, %v9512_v49  ;;  %12091 = vst [vmem:[#allocation89_spill] sm:$0xff] %v10021_v1  ;;  %v5150_v12 = vadd.s32 4294967200, %v9864_v16  ;;  %v5157_v32 = vadd.s32 4294967192, %v9864_v16 }
 0x378   : > { %v5958_v7 = vrot.slane %v3904_v50, %v9998_v61  ;;  %v10010_v52 = vpop.xlane.xlu0 %3984 }
 0x379   : > { %12087 = vst [vmem:[#allocation85_spill] sm:$0xff] %v10010_v52  ;;  %v4193_v52 = vsel %vm588_vm0, %v3853_v26, 0.0  ;;  %v4094_v13 = vsel %vm588_vm0, %v3820_v51, 0.0  ;;  %v10036_v26 = vsub.s32 %v5150_v12, %v9870_v46  ;;  %v10047_v12 = vsub.s32 %v5157_v32, %v9870_v46 }
 0x37a   : > { %v5959_v50 = vsel %vm5134_vm9, %v5958_v7, %v5954_v38  ;;  %4089 = vadd.xlane.f32.xlu1 %v4088_v62  ;;  %v12093_v7 = vld [vmem:[#allocation44_spill] sm:$0xff]  ;;  %v4199_v62 = vsel %vm588_vm0, %v3855_v2, 0.0 }
 0x37b   : > { %4194 = vadd.xlane.f32.xlu0 %v4193_v52  ;;  %v3907_v59 = vpop.xlane.xlu1 %3906  ;;  %v3822_v38 = vmul.f32 %v12093_v7, %v9512_v49  ;;  %12094 = vst [vmem:[#allocation93_spill] sm:$0xff] %v10036_v26  ;;  %12097 = vst [vmem:[#allocation97_spill] sm:$0xff] %v10047_v12 }
 0x37c   : > { %v5963_v27 = vrot.slane %v3907_v59, %v10021_v1  ;;  %v10027_v35 = vpop.xlane.xlu0 %3990  ;;  %v12095_v59 = vld [vmem:[#allocation117_spill] sm:$0xff] }
 0x37d   : > { %12092 = vst [vmem:[#allocation30_spill] sm:$0xff] %v10027_v35  ;;  %v3857_v35 = vmul.f32 %v12095_v59, %v9512_v49 }
 0x37e   : > { %v5964_v52 = vsel %vm5141_vm10, %v5963_v27, %v5959_v50  ;;  %4095 = vadd.xlane.f32.xlu1 %v4094_v13  ;;  %v4100_v50 = vsel %vm588_vm0, %v3822_v38, 0.0  ;;  %v12098_v27 = vld [vmem:[#allocation48_spill] sm:$0xff]  ;;  %v5164_v13 = vadd.s32 4294967184, %v9864_v16  ;;  %v5171_v38 = vadd.s32 4294967176, %v9864_v16 }
 0x37f   : > { %4200 = vadd.xlane.f32.xlu0 %v4199_v62  ;;  %v3913_v43 = vpop.xlane.xlu1 %3912  ;;  %v5969_v40 = vsel %vm5148_vm11, %v5968_v63, %v5964_v52  ;;  %v3824_v2 = vmul.f32 %v12098_v27, %v9512_v49  ;;  %v4205_v62 = vsel %vm588_vm0, %v3857_v35, 0.0  ;;  %v12099_v63 = vld [vmem:[#allocation121_spill] sm:$0xff] }
 0x380   : > { %v5973_v51 = vrot.slane %v3913_v43, %v10036_v26  ;;  %v10044_v19 = vpop.xlane.xlu0 %3996  ;;  %v3859_v43 = vmul.f32 %v12099_v63, %v9512_v49 }
 0x381   : > { %12096 = vst [vmem:[#allocation32_spill] sm:$0xff] %v10044_v19  ;;  %v4106_v27 = vsel %vm588_vm0, %v3824_v2, 0.0  ;;  %v12101_v19 = vld [vmem:[#allocation52_spill] sm:$0xff] }
 0x382   : > { %v5974_v7 = vsel %vm5155_vm12, %v5973_v51, %v5969_v40  ;;  %4101 = vadd.xlane.f32.xlu1 %v4100_v50  ;;  %v3826_v40 = vmul.f32 %v12101_v19, %v9512_v49  ;;  %v10065_v51 = vsub.s32 %v5164_v13, %v9870_v46  ;;  %v4211_v50 = vsel %vm588_vm0, %v3859_v43, 0.0 }
 0x383   : > { %4206 = vadd.xlane.f32.xlu0 %v4205_v62  ;;  %v3916_v52 = vpop.xlane.xlu1 %3915  ;;  %v3861_v62 = vmul.f32 %v9410_v25, %v9512_v49  ;;  %v10075_v19 = vsub.s32 %v5171_v38, %v9870_v46 }
 0x384   : > { %v5978_v32 = vrot.slane %v3916_v52, %v10047_v12  ;;  %v10058_v59 = vpop.xlane.xlu0 %4002  ;;  %12102 = vst [vmem:[#allocation101_spill] sm:$0xff] %v10065_v51  ;;  %v4112_v13 = vsel %vm588_vm0, %v3826_v40, 0.0 }
 0x385   : > { %12100 = vst [vmem:[#allocation34_spill] sm:$0xff] %v10058_v59  ;;  %12104 = vst [vmem:[#allocation105_spill] sm:$0xff] %v10075_v19  ;;  %v4217_v25 = vsel %vm588_vm0, %v3861_v62, 0.0 }
 0x386   : > { %v5979_v35 = vsel %vm11841_vm13, %v5978_v32, %v5974_v7  ;;  %4107 = vadd.xlane.f32.xlu1 %v4106_v27  ;;  %v12105_v7 = vld [vmem:[#allocation56_spill] sm:$0xff]  ;;  %v3863_v32 = vmul.f32 %v9428_v4, %v9512_v49  ;;  %v3865_v4 = vmul.f32 %v9444_v55, %v9512_v49 }
 0x387   : > { %4212 = vadd.xlane.f32.xlu0 %v4211_v50  ;;  %v3919_v63 = vpop.xlane.xlu1 %3918  ;;  %v3828_v52 = vmul.f32 %v12105_v7, %v9512_v49 }
 0x388   : > { %v5983_v16 = vrot.slane %v3919_v63, %v10065_v51  ;;  %v10072_v2 = vpop.xlane.xlu0 %4008  ;;  %v12107_v63 = vld [vmem:[#allocation60_spill] sm:$0xff]  ;;  %v4223_v62 = vsel %vm588_vm0, %v3863_v32, 0.0 }
 0x389   : > { %12103 = vst [vmem:[#allocation36_spill] sm:$0xff] %v10072_v2  ;;  %v4118_v40 = vsel %vm588_vm0, %v3828_v52, 0.0  ;;  %v3830_v7 = vmul.f32 %v12107_v63, %v9512_v49  ;;  %v12110_v52 = vld [vmem:[#allocation64_spill] sm:$0xff]  ;;  %v4229_v63 = vsel %vm588_vm0, %v3865_v4, 0.0 }
 0x38a   : > { %v5984_v43 = vsel %vm5169_vm14, %v5983_v16, %v5979_v35  ;;  %4113 = vadd.xlane.f32.xlu1 %v4112_v13 }
 0x38b   : > { %4218 = vadd.xlane.f32.xlu0 %v4217_v25  ;;  %v3922_v27 = vpop.xlane.xlu1 %3921  ;;  %v4124_v25 = vsel %vm588_vm0, %v3830_v7, 0.0  ;;  %v12112_v7 = vld [vmem:[#allocation68_spill] sm:$0xff] }
 0x38c   : > { %v5988_v50 = vrot.slane %v3922_v27, %v10075_v19  ;;  %v10085_v38 = vpop.xlane.xlu0 %4014  ;;  %v3832_v27 = vmul.f32 %v12110_v52, %v9512_v49 }
 0x38d   : > { %12106 = vst [vmem:[#allocation38_spill] sm:$0xff] %v10085_v38 }
 0x38e   : > { %v10091_v35 = vsel %vm5176_vm15, %v5988_v50, %v5984_v43  ;;  %4119 = vadd.xlane.f32.xlu1 %v4118_v40  ;;  %v3867_v43 = vmul.f32 %v9458_v28, %v9512_v49  ;;  %v3869_v28 = vmul.f32 %v9472_v0, %v9512_v49 }
 0x38f   : > { %12108 = vst [vmem:[#allocation109_spill] sm:$0xff] %v10091_v35  ;;  %4224 = vadd.xlane.f32.xlu0 %v4223_v62  ;;  %v3925_v16 = vpop.xlane.xlu1 %3924  ;;  %v4130_v62 = vsel %vm588_vm0, %v3832_v27, 0.0  ;;  %v3834_v35 = vmul.f32 %v12112_v7, %v9512_v49  ;;  %v10122_v27 = vld [vmem:[%s11709_s10] ss:$0 sm:$0xff] }
 0x390   : > { %v10096_v13 = vpop.xlane.xlu0 %4020  ;;  %v5993_v50 = vrot.slane %v3925_v16, %v9881_v41  ;;  %v4235_v4 = vsel %vm588_vm0, %v3867_v43, 0.0  ;;  %v4241_v0 = vsel %vm588_vm0, %v3869_v28, 0.0  ;;  %v3871_v49 = vmul.f32 %v10122_v27, %v9487_v33 }
 0x391   : > { %12109 = vst [vmem:[#allocation40_spill] sm:$0xff] %v10096_v13  ;;  %v3873_v33 = vmul.f32 %v10122_v27, %v9499_v6 }
 0x392   : > { %4125 = vadd.xlane.f32.xlu1 %v4124_v25  ;;  %v4247_v28 = vsel %vm588_vm0, %v3871_v49, 0.0 }
 0x393   : > { %4230 = vadd.xlane.f32.xlu0 %v4229_v63  ;;  %v3928_v32 = vpop.xlane.xlu1 %3927  ;;  %v4253_v6 = vsel %vm588_vm0, %v3873_v33, 0.0 }
 0x394   : > { %v5997_v55 = vrot.slane %v3928_v32, %v9886_v29  ;;  %v10106_v40 = vpop.xlane.xlu0 %4026  ;;  %v4136_v32 = vsel %vm588_vm0, %v3834_v35, 0.0 }
 0x395   : > { %12111 = vst [vmem:[#allocation113_spill] sm:$0xff] %v10106_v40 }
 0x396   : > { %v5998_v25 = vsel %vm5078_vm1, %v5997_v55, %v5993_v50  ;;  %4131 = vadd.xlane.f32.xlu1 %v4130_v62  ;;  %v12114_v50 = vld [vmem:[#allocation72_spill] sm:$0xff] }
 0x397   : > { %4236 = vadd.xlane.f32.xlu0 %v4235_v4  ;;  %v3931_v52 = vpop.xlane.xlu1 %3930  ;;  %v3836_v55 = vmul.f32 %v10122_v27, %v12114_v50  ;;  %v6012_v4 = vrot.slane %v9897_v54, %v9932_v45  ;;  %v12116_v50 = vld [vmem:[#allocation76_spill] sm:$0xff] }
 0x398   : > { %v6002_v16 = vrot.slane %v3931_v52, %v9900_v57  ;;  %v10116_v63 = vpop.xlane.xlu0 %4032 }
 0x399   : > { %12113 = vst [vmem:[#allocation44_spill] sm:$0xff] %v10116_v63  ;;  %v4142_v52 = vsel %vm588_vm0, %v3836_v55, 0.0  ;;  %v6022_v55 = vrot.slane %v9911_v36, %v9960_v42  ;;  %v6032_v36 = vrot.slane %v9925_v5, %v9988_v18  ;;  %v12246_v18 = vld [vmem:[#allocation94_spill] sm:$0xff] }
 0x39a   : > { %v6003_v43 = vsel %vm5085_vm2, %v6002_v16, %v5998_v25  ;;  %4137 = vadd.xlane.f32.xlu1 %v4136_v32  ;;  %v3838_v25 = vmul.f32 %v10122_v27, %v12116_v50 }
 0x39b   : > { %4242 = vadd.xlane.f32.xlu0 %v4241_v0  ;;  %v3934_v62 = vpop.xlane.xlu1 %3933 }
 0x39c   : > { %v6007_v35 = vrot.slane %v3934_v62, %v9914_v14  ;;  %v10131_v7 = vpop.xlane.xlu0 %4038  ;;  %v4148_v50 = vsel %vm588_vm0, %v3838_v25, 0.0 }
 0x39d   : > { %12115 = vst [vmem:[#allocation117_spill] sm:$0xff] %v10131_v7 }
 0x39e   : > { %v6008_v16 = vsel %vm5092_vm3, %v6007_v35, %v6003_v43  ;;  %4143 = vadd.xlane.f32.xlu1 %v4142_v52  ;;  %v12118_v43 = vld [vmem:[#allocation80_spill] sm:$0xff] }
 0x39f   : > { %4248 = vadd.xlane.f32.xlu0 %v4247_v28  ;;  %v3940_v32 = vpop.xlane.xlu1 %3939  ;;  %v6013_v0 = vsel %vm5099_vm4, %v6012_v4, %v6008_v16  ;;  %v3840_v35 = vmul.f32 %v10122_v27, %v12118_v43 }
 0x3a0   : > { %v6017_v62 = vrot.slane %v3940_v32, %v9942_v58  ;;  %v10144_v54 = vpop.xlane.xlu0 %4044  ;;  %v12120_v32 = vld [vmem:[#allocation84_spill] sm:$0xff] }
 0x3a1   : > { %12117 = vst [vmem:[#allocation48_spill] sm:$0xff] %v10144_v54  ;;  %v4154_v25 = vsel %vm588_vm0, %v3840_v35, 0.0  ;;  %v3842_v43 = vmul.f32 %v10122_v27, %v12120_v32  ;;  %v6052_v32 = vrot.slane %v9953_v44, %v10036_v26 }
 0x3a2   : > { %v6018_v49 = vsel %vm5106_vm5, %v6017_v62, %v6013_v0  ;;  %4149 = vadd.xlane.f32.xlu1 %v4148_v50 }
 0x3a3   : > { %4254 = vadd.xlane.f32.xlu0 %v4253_v6  ;;  %v3946_v52 = vpop.xlane.xlu1 %3945  ;;  %v6023_v4 = vsel %vm5113_vm6, %v6022_v55, %v6018_v49  ;;  %v6042_v49 = vrot.slane %v9939_v39, %v10021_v1  ;;  %v4160_v5 = vsel %vm588_vm0, %v3842_v43, 0.0  ;;  %v12122_v6 = vld [vmem:[#allocation88_spill] sm:$0xff] }
 0x3a4   : > { %v6027_v16 = vrot.slane %v3946_v52, %v9970_v21  ;;  %v10155_v28 = vpop.xlane.xlu0 %4050  ;;  %v3844_v35 = vmul.f32 %v10122_v27, %v12122_v6 }
 0x3a5   : > { %12119 = vst [vmem:[#allocation121_spill] sm:$0xff] %v10155_v28 }
 0x3a6   : > { %v6028_v0 = vsel %vm11838_vm7, %v6027_v16, %v6023_v4  ;;  %4155 = vadd.xlane.f32.xlu1 %v4154_v25  ;;  %v4166_v39 = vsel %vm588_vm0, %v3844_v35, 0.0 }
 0x3a7   : > { %v3952_v33 = vpop.xlane.xlu1 %3951  ;;  %v6033_v62 = vsel %vm5127_vm8, %v6032_v36, %v6028_v0  ;;  %v12124_v0 = vld [vmem:[#allocation92_spill] sm:$0xff] }
 0x3a8   : > { %v6037_v55 = vrot.slane %v3952_v33, %v9998_v61  ;;  %v10165_v50 = vpop.xlane.xlu0 %4056  ;;  %v3846_v43 = vmul.f32 %v10122_v27, %v12124_v0  ;;  %v11795_v0 = vsub.s32 0, %v9870_v46 }
 0x3a9   : > { %12121 = vst [vmem:[#allocation52_spill] sm:$0xff] %v10165_v50  ;;  %v12153_v50 = vld [vmem:[#allocation129_spill] sm:$0xff] }
 0x3aa   : > { %v6038_v52 = vsel %vm5134_vm9, %v6037_v55, %v6033_v62  ;;  %4161 = vadd.xlane.f32.xlu1 %v4160_v5  ;;  %v4172_v6 = vsel %vm588_vm0, %v3846_v43, 0.0  ;;  %v6932_v43 = vld [vmem:[#allocation7] ss:$0 sm:$0xff] }
 0x3ab   : > { %v3958_v4 = vpop.xlane.xlu1 %3957  ;;  %v6043_v16 = vsel %vm5141_vm10, %v6042_v49, %v6038_v52  ;;  %v12126_v52 = vld [vmem:[#allocation96_spill] sm:$0xff] }
 0x3ac   : > { %v6047_v36 = vrot.slane %v3958_v4, %v10013_v24  ;;  %v10175_v25 = vpop.xlane.xlu0 %4062  ;;  %v3848_v44 = vmul.f32 %v10122_v27, %v12126_v52 }
 0x3ad   : > { %12123 = vst [vmem:[#allocation56_spill] sm:$0xff] %v10175_v25  ;;  %v12148_v25 = vld [vmem:[#allocation124_spill] sm:$0xff] }
 0x3ae   : > { %v6048_v33 = vsel %vm5148_vm11, %v6047_v36, %v6043_v16  ;;  %4167 = vadd.xlane.f32.xlu1 %v4166_v39  ;;  %v4178_v36 = vsel %vm588_vm0, %v3848_v44, 0.0 }
 0x3af   : > { %v3964_v62 = vpop.xlane.xlu1 %3963  ;;  %v6053_v55 = vsel %vm5155_vm12, %v6052_v32, %v6048_v33  ;;  %v12130_v32 = vld [vmem:[#allocation100_spill] sm:$0xff]  ;;  %v4259_v33 = vld [vmem:[%s11707_s7] sm:$0x3] }
 0x3b0   : > { %v6057_v49 = vrot.slane %v3964_v62, %v10047_v12  ;;  %v10185_v5 = vpop.xlane.xlu0 %4068  ;;  %v3850_v39 = vmul.f32 %v10122_v27, %v12130_v32  ;;  %v10213_v44 = vrot.slane %v4259_v33, %v11795_v0  ;;  %v12139_v0 = vld [vmem:[#allocation112_spill] sm:$0xff]  ;;  %v12240_v12 = vld [vmem:[#allocation82_spill] sm:$0xff] }
 0x3b1   : > { %12125 = vst [vmem:[#allocation60_spill] sm:$0xff] %v10185_v5  ;;  %v12145_v5 = vld [vmem:[#allocation120_spill] sm:$0xff] }
 0x3b2   : > { %v10191_v35 = vsel %vm11841_vm13, %v6057_v49, %v6053_v55  ;;  %4173 = vadd.xlane.f32.xlu1 %v4172_v6  ;;  %v4184_v49 = vsel %vm588_vm0, %v3850_v39, 0.0  ;;  %v12133_v6 = vld [vmem:[#allocation104_spill] sm:$0xff] }
 0x3b3   : > { %12127 = vst [vmem:[#allocation64_spill] sm:$0xff] %v10191_v35  ;;  %v10193_v4 = vpop.xlane.xlu1 %3969  ;;  %v3852_v52 = vmul.f32 %v10122_v27, %v12133_v6  ;;  %v12142_v35 = vld [vmem:[#allocation116_spill] sm:$0xff] }
 0x3b4   : > { %12128 = vst [vmem:[#allocation68_spill] sm:$0xff] %v10193_v4  ;;  %v10195_v16 = vpop.xlane.xlu0 %4074  ;;  %v12136_v4 = vld [vmem:[#allocation108_spill] sm:$0xff] }
 0x3b5   : > { %12129 = vst [vmem:[#allocation72_spill] sm:$0xff] %v10195_v16  ;;  %v4190_v16 = vsel %vm588_vm0, %v3852_v52, 0.0 }
 0x3b6   : > { %4179 = vadd.xlane.f32.xlu1 %v4178_v36 }
 0x3b7   : > { %v10204_v62 = vpop.xlane.xlu1 %3975 }
 0x3b8   : > { %12131 = vst [vmem:[#allocation76_spill] sm:$0xff] %v10204_v62  ;;  %v10206_v55 = vpop.xlane.xlu0 %4080 }
 0x3b9   : > { %12132 = vst [vmem:[#allocation80_spill] sm:$0xff] %v10206_v55  ;;  %3609 = vperm.xlu0 %7454, %v6932_v43   ;;  %v3854_v55 = vmul.f32 %v10122_v27, %v12136_v4 }
 0x3ba   : > { %4185 = vadd.xlane.f32.xlu1 %v4184_v49  ;;  %v3856_v49 = vmul.f32 %v10122_v27, %v12139_v0 }
 0x3bb   : > { %v10215_v36 = vpop.xlane.xlu1 %3981  ;;  %v4196_v6 = vsel %vm588_vm0, %v3854_v55, 0.0 }
 0x3bc   : > { %12134 = vst [vmem:[#allocation84_spill] sm:$0xff] %v10215_v36  ;;  %v10217_v32 = vpop.xlane.xlu0 %4086  ;;  %v4202_v4 = vsel %vm588_vm0, %v3856_v49, 0.0 }
 0x3bd   : > { %12135 = vst [vmem:[#allocation88_spill] sm:$0xff] %v10217_v32  ;;  %4270 = vbcast.lane.b32.xlu0 %v10213_v44, 256 }
 0x3be   : > { %4191 = vadd.xlane.f32.xlu1 %v4190_v16  ;;  %v3858_v16 = vmul.f32 %v10122_v27, %v12142_v35 }
 0x3bf   : > { %v10223_v39 = vpop.xlane.xlu1 %3987 }
 0x3c0   : > { %12137 = vst [vmem:[#allocation92_spill] sm:$0xff] %v10223_v39  ;;  %v10225_v43 = vpop.xlane.xlu0 %4092  ;;  %v4208_v0 = vsel %vm588_vm0, %v3858_v16, 0.0  ;;  %v12234_v39 = vld [vmem:[#allocation70_spill] sm:$0xff] }
 0x3c1   : > { %12138 = vst [vmem:[#allocation96_spill] sm:$0xff] %v10225_v43  ;;  %4282 = vbcast.lane.b32.xlu0 %v10213_v44, 280 }
 0x3c2   : > { %4197 = vadd.xlane.f32.xlu1 %v4196_v6  ;;  %v3860_v6 = vmul.f32 %v10122_v27, %v12145_v5 }
 0x3c3   : > { %v10231_v32 = vpop.xlane.xlu1 %3993 }
 0x3c4   : > { %12140 = vst [vmem:[#allocation100_spill] sm:$0xff] %v10231_v32  ;;  %v10233_v52 = vpop.xlane.xlu0 %4098  ;;  %v4214_v35 = vsel %vm588_vm0, %v3860_v6, 0.0 }
 0x3c5   : > { %12141 = vst [vmem:[#allocation104_spill] sm:$0xff] %v10233_v52  ;;  %4290 = vbcast.lane.b32.xlu0 %v10213_v44, 296 }
 0x3c6   : > { %4203 = vadd.xlane.f32.xlu1 %v4202_v4  ;;  %v3862_v4 = vmul.f32 %v10122_v27, %v12148_v25 }
 0x3c7   : > { %v10239_v43 = vpop.xlane.xlu1 %3999 }
 0x3c8   : > { %12143 = vst [vmem:[#allocation108_spill] sm:$0xff] %v10239_v43  ;;  %v10241_v55 = vpop.xlane.xlu0 %4104  ;;  %v4220_v5 = vsel %vm588_vm0, %v3862_v4, 0.0 }
 0x3c9   : > { %12144 = vst [vmem:[#allocation112_spill] sm:$0xff] %v10241_v55  ;;  %4298 = vbcast.lane.b32.xlu0 %v10213_v44, 312 }
 0x3ca   : > { %4209 = vadd.xlane.f32.xlu1 %v4208_v0  ;;  %v3864_v0 = vmul.f32 %v10122_v27, %v9421_v30 }
 0x3cb   : > { %v10247_v52 = vpop.xlane.xlu1 %4005 }
 0x3cc   : > { %12146 = vst [vmem:[#allocation116_spill] sm:$0xff] %v10247_v52  ;;  %v10249_v49 = vpop.xlane.xlu0 %4110  ;;  %v4226_v25 = vsel %vm588_vm0, %v3864_v0, 0.0 }
 0x3cd   : > { %12147 = vst [vmem:[#allocation120_spill] sm:$0xff] %v10249_v49  ;;  %4306 = vbcast.lane.b32.xlu0 %v10213_v44, 328 }
 0x3ce   : > { %4215 = vadd.xlane.f32.xlu1 %v4214_v35  ;;  %v3866_v35 = vmul.f32 %v10122_v27, %v12153_v50 }
 0x3cf   : > { %v10255_v55 = vpop.xlane.xlu1 %4011 }
 0x3d0   : > { %12149 = vst [vmem:[#allocation124_spill] sm:$0xff] %v10255_v55  ;;  %v10257_v16 = vpop.xlane.xlu0 %4116  ;;  %v12156_v55 = vld [vmem:[#allocation132_spill] sm:$0xff] }
 0x3d1   : > { %12150 = vst [vmem:[#allocation174_spill] sm:$0xff] %v10257_v16  ;;  %4314 = vbcast.lane.b32.xlu0 %v10213_v44, 344  ;;  %v4267_v16 = vsub.s32 1, %v9870_v46  ;;  %v12159_v46 = vld [vmem:[#allocation135_spill] sm:$0xff] }
 0x3d2   : > { %4221 = vadd.xlane.f32.xlu1 %v4220_v5  ;;  %v4232_v5 = vsel %vm588_vm0, %v3866_v35, 0.0  ;;  %v3870_v28 = vmul.f32 %v10122_v27, %v12159_v46 }
 0x3d3   : > { %v10263_v49 = vpop.xlane.xlu1 %4017  ;;  %v10280_v0 = vrot.slane %v4259_v33, %v4267_v16  ;;  %v3872_v16 = vmul.f32 %v10122_v27, %v9483_v15 }
 0x3d4   : > { %12151 = vst [vmem:[#allocation175_spill] sm:$0xff] %v10263_v49  ;;  %v10265_v6 = vpop.xlane.xlu0 %4122  ;;  %v3868_v49 = vmul.f32 %v10122_v27, %v12156_v55  ;;  %v4244_v33 = vsel %vm588_vm0, %v3870_v28, 0.0 }
 0x3d5   : > { %12152 = vst [vmem:[#allocation176_spill] sm:$0xff] %v10265_v6  ;;  %4322 = vbcast.lane.b32.xlu0 %v10213_v44, 360  ;;  %v4250_v46 = vsel %vm588_vm0, %v3872_v16, 0.0 }
 0x3d6   : > { %4227 = vadd.xlane.f32.xlu1 %v4226_v25  ;;  %v4238_v25 = vsel %vm588_vm0, %v3868_v49, 0.0 }
 0x3d7   : > { %v10272_v4 = vpop.xlane.xlu1 %4023 }
 0x3d8   : > { %12154 = vst [vmem:[#allocation129_spill] sm:$0xff] %v10272_v4  ;;  %v10274_v30 = vpop.xlane.xlu0 %4128 }
 0x3d9   : > { %12155 = vst [vmem:[#allocation177_spill] sm:$0xff] %v10274_v30  ;;  %4330 = vbcast.lane.b32.xlu0 %v10213_v44, 376 }
 0x3da   : > { %4233 = vadd.xlane.f32.xlu1 %v4232_v5 }
 0x3db   : > { %v10282_v50 = vpop.xlane.xlu1 %4029 }
 0x3dc   : > { %12157 = vst [vmem:[#allocation132_spill] sm:$0xff] %v10282_v50  ;;  %v10284_v6 = vpop.xlane.xlu0 %4134  ;;  %v12228_v50 = vld [vmem:[#allocation58_spill] sm:$0xff] }
 0x3dd   : > { %12158 = vst [vmem:[#allocation178_spill] sm:$0xff] %v10284_v6  ;;  %4337 = vbcast.lane.b32.xlu0 %v10280_v0, 264  ;;  %v12164_v6 = vld [vmem:[#allocation140_spill] sm:$0xff] }
 0x3de   : > { %4239 = vadd.xlane.f32.xlu1 %v4238_v25  ;;  %v3874_v25 = vmul.f32 %v10122_v27, %v12164_v6 }
 0x3df   : > { %v10290_v35 = vpop.xlane.xlu1 %4035 }
 0x3e0   : > { %12160 = vst [vmem:[#allocation135_spill] sm:$0xff] %v10290_v35  ;;  %v10292_v55 = vpop.xlane.xlu0 %4140  ;;  %v4256_v15 = vsel %vm588_vm0, %v3874_v25, 0.0  ;;  %vm11840_vm0 = vcmask 1041409  }
 0x3e1   : > { %12161 = vst [vmem:[#allocation179_spill] sm:$0xff] %v10292_v55  ;;  %4345 = vbcast.lane.b32.xlu0 %v10280_v0, 280 }
 0x3e2   : > { %4245 = vadd.xlane.f32.xlu1 %v4244_v33 }
 0x3e3   : > { %v10298_v5 = vpop.xlane.xlu1 %4041 }
 0x3e4   : > { %12162 = vst [vmem:[#allocation180_spill] sm:$0xff] %v10298_v5  ;;  %v10300_v49 = vpop.xlane.xlu0 %4146  ;;  %v12220_v5 = vld [vmem:[#allocation47_spill] sm:$0xff] }
 0x3e5   : > { %12163 = vst [vmem:[#allocation181_spill] sm:$0xff] %v10300_v49  ;;  %4353 = vbcast.lane.b32.xlu0 %v10280_v0, 296 }
 0x3e6   : > { %4251 = vadd.xlane.f32.xlu1 %v4250_v46 }
 0x3e7   : > { %v10306_v55 = vpop.xlane.xlu1 %4047 }
 0x3e8   : > { %12165 = vst [vmem:[#allocation140_spill] sm:$0xff] %v10306_v55  ;;  %v10308_v28 = vpop.xlane.xlu0 %4152 }
 0x3e9   : > { %12166 = vst [vmem:[#allocation182_spill] sm:$0xff] %v10308_v28  ;;  %4361 = vbcast.lane.b32.xlu0 %v10280_v0, 312 }
 0x3ea   : > { %4257 = vadd.xlane.f32.xlu1 %v4256_v15 }
 0x3eb   : > { %v10312_v33 = vpop.xlane.xlu1 %4053 }
 0x3ec   : > { %12167 = vst [vmem:[#allocation183_spill] sm:$0xff] %v10312_v33  ;;  %v10314_v49 = vpop.xlane.xlu0 %4158 }
 0x3ed   : > { %12168 = vst [vmem:[#allocation184_spill] sm:$0xff] %v10314_v49  ;;  %4369 = vbcast.lane.b32.xlu0 %v10280_v0, 328 }
 0x3ef   : > { %v10317_v16 = vpop.xlane.xlu1 %4059 }
 0x3f0   : > { %12169 = vst [vmem:[#allocation185_spill] sm:$0xff] %v10317_v16  ;;  %v10319_v27 = vpop.xlane.xlu0 %4164 }
 0x3f1   : > { %12170 = vst [vmem:[#allocation186_spill] sm:$0xff] %v10319_v27  ;;  %4377 = vbcast.lane.b32.xlu0 %v10280_v0, 344 }
 0x3f3   : > { %v10322_v6 = vpop.xlane.xlu1 %4065 }
 0x3f4   : > { %12171 = vst [vmem:[#allocation187_spill] sm:$0xff] %v10322_v6  ;;  %v10324_v46 = vpop.xlane.xlu0 %4170 }
 0x3f5   : > { %12172 = vst [vmem:[#allocation188_spill] sm:$0xff] %v10324_v46  ;;  %4385 = vbcast.lane.b32.xlu0 %v10280_v0, 360 }
 0x3f7   : > { %v10327_v25 = vpop.xlane.xlu1 %4071 }
 0x3f8   : > { %12173 = vst [vmem:[#allocation189_spill] sm:$0xff] %v10327_v25  ;;  %v10329_v15 = vpop.xlane.xlu0 %4176 }
 0x3f9   : > { %12174 = vst [vmem:[#allocation190_spill] sm:$0xff] %v10329_v15  ;;  %4393 = vbcast.lane.b32.xlu0 %v10280_v0, 376 }
 0x3fb   : > { %4274 = vbcast.lane.b32.xlu1 %v10213_v44, 264  ;;  %v10333_v49 = vpop.xlane.xlu1 %4077 }
 0x3fc   : > { %12175 = vst [vmem:[#allocation191_spill] sm:$0xff] %v10333_v49  ;;  %v10335_v16 = vpop.xlane.xlu0 %4182 }
 0x3fd   : > { %12176 = vst [vmem:[#allocation192_spill] sm:$0xff] %v10335_v16 }
 0x3ff   : > { %4278 = vbcast.lane.b32.xlu1 %v10213_v44, 272  ;;  %v10338_v33 = vpop.xlane.xlu1 %4083 }
 0x400   : > { %12177 = vst [vmem:[#allocation193_spill] sm:$0xff] %v10338_v33  ;;  %v10340_v6 = vpop.xlane.xlu0 %4188 }
 0x401   : > { %12178 = vst [vmem:[#allocation194_spill] sm:$0xff] %v10340_v6 }
 0x403   : > { %4286 = vbcast.lane.b32.xlu1 %v10213_v44, 288  ;;  %v10343_v28 = vpop.xlane.xlu1 %4089 }
 0x404   : > { %12179 = vst [vmem:[#allocation195_spill] sm:$0xff] %v10343_v28  ;;  %v10345_v55 = vpop.xlane.xlu0 %4194 }
 0x405   : > { %12180 = vst [vmem:[#allocation196_spill] sm:$0xff] %v10345_v55 }
 0x407   : > { %4294 = vbcast.lane.b32.xlu1 %v10213_v44, 304  ;;  %v10348_v15 = vpop.xlane.xlu1 %4095 }
 0x408   : > { %12181 = vst [vmem:[#allocation197_spill] sm:$0xff] %v10348_v15  ;;  %v10350_v46 = vpop.xlane.xlu0 %4200 }
 0x409   : > { %12182 = vst [vmem:[#allocation198_spill] sm:$0xff] %v10350_v46 }
 0x40b   : > { %4302 = vbcast.lane.b32.xlu1 %v10213_v44, 320  ;;  %v10353_v16 = vpop.xlane.xlu1 %4101 }
 0x40c   : > { %12183 = vst [vmem:[#allocation199_spill] sm:$0xff] %v10353_v16  ;;  %v10355_v49 = vpop.xlane.xlu0 %4206 }
 0x40d   : > { %12184 = vst [vmem:[#allocation200_spill] sm:$0xff] %v10355_v49 }
 0x40f   : > { %4310 = vbcast.lane.b32.xlu1 %v10213_v44, 336  ;;  %v10358_v6 = vpop.xlane.xlu1 %4107 }
 0x410   : > { %12185 = vst [vmem:[#allocation201_spill] sm:$0xff] %v10358_v6  ;;  %v10360_v33 = vpop.xlane.xlu0 %4212 }
 0x411   : > { %12186 = vst [vmem:[#allocation202_spill] sm:$0xff] %v10360_v33 }
 0x413   : > { %4318 = vbcast.lane.b32.xlu1 %v10213_v44, 352  ;;  %v10363_v55 = vpop.xlane.xlu1 %4113 }
 0x414   : > { %12187 = vst [vmem:[#allocation203_spill] sm:$0xff] %v10363_v55  ;;  %v10365_v28 = vpop.xlane.xlu0 %4218 }
 0x415   : > { %12188 = vst [vmem:[#allocation204_spill] sm:$0xff] %v10365_v28 }
 0x417   : > { %4326 = vbcast.lane.b32.xlu1 %v10213_v44, 368  ;;  %v10368_v46 = vpop.xlane.xlu1 %4119 }
 0x418   : > { %12189 = vst [vmem:[#allocation205_spill] sm:$0xff] %v10368_v46  ;;  %v10370_v15 = vpop.xlane.xlu0 %4224 }
 0x419   : > { %12190 = vst [vmem:[#allocation206_spill] sm:$0xff] %v10370_v15 }
 0x41b   : > { %4333 = vbcast.lane.b32.xlu1 %v10280_v0, 256  ;;  %v10373_v49 = vpop.xlane.xlu1 %4125 }
 0x41c   : > { %12191 = vst [vmem:[#allocation207_spill] sm:$0xff] %v10373_v49  ;;  %v10375_v16 = vpop.xlane.xlu0 %4230 }
 0x41d   : > { %12192 = vst [vmem:[#allocation208_spill] sm:$0xff] %v10375_v16 }
 0x41f   : > { %4341 = vbcast.lane.b32.xlu1 %v10280_v0, 272  ;;  %v10378_v6 = vpop.xlane.xlu1 %4131 }
 0x420   : > { %12193 = vst [vmem:[#allocation209_spill] sm:$0xff] %v10378_v6  ;;  %v10380_v33 = vpop.xlane.xlu0 %4236 }
 0x421   : > { %12194 = vst [vmem:[#allocation210_spill] sm:$0xff] %v10380_v33 }
 0x423   : > { %4349 = vbcast.lane.b32.xlu1 %v10280_v0, 288  ;;  %v10383_v55 = vpop.xlane.xlu1 %4137 }
 0x424   : > { %12195 = vst [vmem:[#allocation211_spill] sm:$0xff] %v10383_v55  ;;  %v10385_v44 = vpop.xlane.xlu0 %4242 }
 0x425   : > { %12196 = vst [vmem:[#allocation212_spill] sm:$0xff] %v10385_v44 }
 0x427   : > { %4357 = vbcast.lane.b32.xlu1 %v10280_v0, 304  ;;  %v10388_v15 = vpop.xlane.xlu1 %4143 }
 0x428   : > { %12197 = vst [vmem:[#allocation213_spill] sm:$0xff] %v10388_v15  ;;  %v10390_v28 = vpop.xlane.xlu0 %4248 }
 0x429   : > { %12198 = vst [vmem:[#allocation214_spill] sm:$0xff] %v10390_v28  ;;  %v12204_v28 = vld [vmem:[#allocation43_spill] sm:$0xff] }
 0x42b   : > { %4365 = vbcast.lane.b32.xlu1 %v10280_v0, 320  ;;  %v10393_v16 = vpop.xlane.xlu1 %4149 }
 0x42c   : > { %12199 = vst [vmem:[#allocation215_spill] sm:$0xff] %v10393_v16  ;;  %v10398_v33 = vpop.xlane.xlu0 %4254 }
 0x42d   : > { %12201 = vst [vmem:[#allocation217_spill] sm:$0xff] %v10398_v33 }
 0x42f   : > { %4373 = vbcast.lane.b32.xlu1 %v10280_v0, 336  ;;  %v10396_v6 = vpop.xlane.xlu1 %4155 }
 0x430   : > { %12200 = vst [vmem:[#allocation216_spill] sm:$0xff] %v10396_v6 }
 0x433   : > { %4381 = vbcast.lane.b32.xlu1 %v10280_v0, 352  ;;  %v10401_v55 = vpop.xlane.xlu1 %4161 }
 0x434   : > { %12202 = vst [vmem:[#allocation218_spill] sm:$0xff] %v10401_v55  ;;  %v10403_v44 = vpop.permute.xlu0 %3609 }
 0x435   : > { %v3612_v49 = vadd.f32 %v10403_v44, %v12204_v28 }
 0x437   : > { %4389 = vbcast.lane.b32.xlu1 %v10280_v0, 368  ;;  %v10406_v15 = vpop.xlane.xlu1 %4167 }
 0x438   : > { %12203 = vst [vmem:[#allocation219_spill] sm:$0xff] %v10406_v15  ;;  %v10410_v16 = vpop.permute.xlu0 %4270 }
 0x439   : > { %v4427_v27 = vmul.f32 %v10410_v16, %v3612_v49 }
 0x43b   : > { %v10413_v6 = vpop.xlane.xlu1 %4173  ;;  %4684 = vperm.xlu1 %7455, %v4427_v27  }
 0x43c   : > { %12205 = vst [vmem:[#allocation43_spill] sm:$0xff] %v10413_v6  ;;  %v10431_v49 = vpop.permute.xlu0 %4282 }
 0x43f   : > { %v10415_v33 = vpop.xlane.xlu1 %4179 }
 0x440   : > { %12206 = vst [vmem:[#allocation220_spill] sm:$0xff] %v10415_v33  ;;  %v10435_v27 = vpop.permute.xlu0 %4290 }
 0x443   : > { %v10417_v30 = vpop.xlane.xlu1 %4185 }
 0x444   : > { %12207 = vst [vmem:[#allocation221_spill] sm:$0xff] %v10417_v30 }
 0x447   : > { %v10419_v55 = vpop.xlane.xlu1 %4191 }
 0x448   : > { %12208 = vst [vmem:[#allocation222_spill] sm:$0xff] %v10419_v55  ;;  %v10441_v55 = vpop.permute.xlu0 %4298 }
 0x44b   : > { %v10421_v46 = vpop.xlane.xlu1 %4197 }
 0x44c   : > { %12209 = vst [vmem:[#allocation223_spill] sm:$0xff] %v10421_v46 }
 0x44f   : > { %v10423_v0 = vpop.xlane.xlu1 %4203 }
 0x450   : > { %12210 = vst [vmem:[#allocation224_spill] sm:$0xff] %v10423_v0  ;;  %v10445_v0 = vpop.permute.xlu0 %4306 }
 0x453   : > { %v10425_v15 = vpop.xlane.xlu1 %4209 }
 0x454   : > { %12211 = vst [vmem:[#allocation225_spill] sm:$0xff] %v10425_v15 }
 0x457   : > { %v10427_v28 = vpop.xlane.xlu1 %4215 }
 0x458   : > { %12212 = vst [vmem:[#allocation226_spill] sm:$0xff] %v10427_v28 }
 0x45b   : > { %v10429_v25 = vpop.xlane.xlu1 %4221 }
 0x45c   : > { %12213 = vst [vmem:[#allocation227_spill] sm:$0xff] %v10429_v25  ;;  %v10451_v25 = vpop.permute.xlu0 %4314 }
 0x45f   : > { %v10433_v6 = vpop.xlane.xlu1 %4227 }
 0x460   : > { %12214 = vst [vmem:[#allocation228_spill] sm:$0xff] %v10433_v6  ;;  %v3613_v6 = vadd.f32 %v10403_v44, %v12220_v5  ;;  %v10462_v63 = vpop.permute.xlu0 %4322  ;;  %v12223_v5 = vld [vmem:[#allocation51_spill] sm:$0xff] }
 0x463   : > { %v10437_v33 = vpop.xlane.xlu1 %4233 }
 0x464   : > { %12215 = vst [vmem:[#allocation229_spill] sm:$0xff] %v10437_v33  ;;  %v10476_v59 = vpop.permute.xlu0 %4330 }
 0x467   : > { %v10439_v30 = vpop.xlane.xlu1 %4239 }
 0x468   : > { %12216 = vst [vmem:[#allocation230_spill] sm:$0xff] %v10439_v30  ;;  %v12221_v30 = vld [vmem:[#allocation42_spill] sm:$0xff] }
 0x469   : > { %v3614_v54 = vadd.f32 %v10403_v44, %v12221_v30 }
 0x46b   : > { %v10443_v46 = vpop.xlane.xlu1 %4245 }
 0x46c   : > { %12217 = vst [vmem:[#allocation231_spill] sm:$0xff] %v10443_v46  ;;  %v12222_v46 = vld [vmem:[#allocation46_spill] sm:$0xff] }
 0x46d   : > { %v3615_v7 = vadd.f32 %v10403_v44, %v12222_v46 }
 0x46f   : > { %v10447_v15 = vpop.xlane.xlu1 %4251  ;;  %v4430_v38 = vmul.f32 %v10431_v49, %v3615_v7 }
 0x470   : > { %12218 = vst [vmem:[#allocation232_spill] sm:$0xff] %v10447_v15 }
 0x473   : > { %v10449_v28 = vpop.xlane.xlu1 %4257 }
 0x474   : > { %12219 = vst [vmem:[#allocation233_spill] sm:$0xff] %v10449_v28 }
 0x477   : > { %v10455_v35 = vpop.permute.xlu1 %4274 }
 0x478   : > { %v4428_v33 = vmul.f32 %v10455_v35, %v3613_v6  ;;  %v3616_v6 = vadd.f32 %v10403_v44, %v12223_v5 }
 0x47a   : > { %4687 = vperm.xlu0 %7454, %v4428_v33   ;;  %v12224_v33 = vld [vmem:[#allocation50_spill] sm:$0xff] }
 0x47b   : > { %v10464_v15 = vpop.permute.xlu1 %4278  ;;  %v3617_v2 = vadd.f32 %v10403_v44, %v12224_v33 }
 0x47c   : > { %v4429_v28 = vmul.f32 %v10464_v15, %v3614_v54  ;;  %v12225_v54 = vld [vmem:[#allocation55_spill] sm:$0xff] }
 0x47d   : > { %v4432_v52 = vmul.f32 %v10435_v27, %v3617_v2  ;;  %v3618_v7 = vadd.f32 %v10403_v44, %v12225_v54 }
 0x47e   : > { %4690 = vperm.xlu1 %7455, %v4429_v28   ;;  %4693 = vperm.xlu0 %7454, %v4430_v38   ;;  %v12226_v38 = vld [vmem:[#allocation54_spill] sm:$0xff] }
 0x47f   : > { %v10472_v30 = vpop.permute.xlu1 %4286  ;;  %v3619_v28 = vadd.f32 %v10403_v44, %v12226_v38 }
 0x480   : > { %v4431_v46 = vmul.f32 %v10472_v30, %v3616_v6  ;;  %v12227_v6 = vld [vmem:[#allocation59_spill] sm:$0xff] }
 0x481   : > { %v4434_v40 = vmul.f32 %v10441_v55, %v3619_v28  ;;  %v3620_v2 = vadd.f32 %v10403_v44, %v12227_v6 }
 0x482   : > { %4696 = vperm.xlu1 %7455, %v4431_v46   ;;  %4699 = vperm.xlu0 %7454, %v4432_v52   ;;  %v3621_v52 = vadd.f32 %v10403_v44, %v12228_v50  ;;  %v10490_v46 = vpop.permute.xlu0 %4337 }
 0x483   : > { %v10482_v5 = vpop.permute.xlu1 %4294 }
 0x484   : > { %v4433_v33 = vmul.f32 %v10482_v5, %v3618_v7  ;;  %v4436_v43 = vmul.f32 %v10445_v0, %v3621_v52  ;;  %v12229_v7 = vld [vmem:[#allocation63_spill] sm:$0xff] }
 0x485   : > { %v3622_v28 = vadd.f32 %v10403_v44, %v12229_v7 }
 0x486   : > { %4702 = vperm.xlu1 %7455, %v4433_v33   ;;  %4705 = vperm.xlu0 %7454, %v4434_v40   ;;  %v12230_v40 = vld [vmem:[#allocation62_spill] sm:$0xff]  ;;  %v10504_v4 = vpop.permute.xlu0 %4345 }
 0x487   : > { %v10492_v54 = vpop.permute.xlu1 %4302  ;;  %v3623_v33 = vadd.f32 %v10403_v44, %v12230_v40 }
 0x488   : > { %v4435_v38 = vmul.f32 %v10492_v54, %v3620_v2  ;;  %v12231_v2 = vld [vmem:[#allocation67_spill] sm:$0xff] }
 0x489   : > { %v4438_v13 = vmul.f32 %v10451_v25, %v3623_v33  ;;  %v3624_v52 = vadd.f32 %v10403_v44, %v12231_v2 }
 0x48a   : > { %4708 = vperm.xlu1 %7455, %v4435_v38   ;;  %4711 = vperm.xlu0 %7454, %v4436_v43   ;;  %v12232_v43 = vld [vmem:[#allocation66_spill] sm:$0xff] }
 0x48b   : > { %v10500_v6 = vpop.permute.xlu1 %4310  ;;  %v3625_v38 = vadd.f32 %v10403_v44, %v12232_v43 }
 0x48c   : > { %v4437_v50 = vmul.f32 %v10500_v6, %v3622_v28  ;;  %v12233_v28 = vld [vmem:[#allocation71_spill] sm:$0xff] }
 0x48d   : > { %v4440_v32 = vmul.f32 %v10462_v63, %v3625_v38  ;;  %v3626_v33 = vadd.f32 %v10403_v44, %v12233_v28 }
 0x48e   : > { %4714 = vperm.xlu1 %7455, %v4437_v50   ;;  %4717 = vperm.xlu0 %7454, %v4438_v13   ;;  %v3627_v13 = vadd.f32 %v10403_v44, %v12234_v39  ;;  %v10518_v50 = vpop.permute.xlu0 %4353 }
 0x48f   : > { %v10510_v7 = vpop.permute.xlu1 %4318 }
 0x490   : > { %v4439_v40 = vmul.f32 %v10510_v7, %v3624_v52  ;;  %v4442_v36 = vmul.f32 %v10476_v59, %v3627_v13  ;;  %v12235_v52 = vld [vmem:[#allocation75_spill] sm:$0xff] }
 0x491   : > { %v3628_v38 = vadd.f32 %v10403_v44, %v12235_v52 }
 0x492   : > { %4720 = vperm.xlu1 %7455, %v4439_v40   ;;  %4723 = vperm.xlu0 %7454, %v4440_v32   ;;  %v12236_v32 = vld [vmem:[#allocation74_spill] sm:$0xff]  ;;  %v10532_v19 = vpop.permute.xlu0 %4361 }
 0x493   : > { %v10520_v2 = vpop.permute.xlu1 %4326  ;;  %v3629_v40 = vadd.f32 %v10403_v44, %v12236_v32 }
 0x494   : > { %v4441_v43 = vmul.f32 %v10520_v2, %v3626_v33  ;;  %v12237_v33 = vld [vmem:[#allocation79_spill] sm:$0xff] }
 0x495   : > { %v4444_v62 = vmul.f32 %v10490_v46, %v3629_v40  ;;  %v3630_v13 = vadd.f32 %v10403_v44, %v12237_v33 }
 0x496   : > { %4726 = vperm.xlu1 %7455, %v4441_v43   ;;  %4729 = vperm.xlu0 %7454, %v4442_v36   ;;  %v12238_v36 = vld [vmem:[#allocation78_spill] sm:$0xff] }
 0x497   : > { %v10528_v28 = vpop.permute.xlu1 %4333  ;;  %v3631_v43 = vadd.f32 %v10403_v44, %v12238_v36 }
 0x498   : > { %v4443_v39 = vmul.f32 %v10528_v28, %v3628_v38  ;;  %v12239_v38 = vld [vmem:[#allocation83_spill] sm:$0xff] }
 0x499   : > { %v4446_v51 = vmul.f32 %v10504_v4, %v3631_v43  ;;  %v3632_v40 = vadd.f32 %v10403_v44, %v12239_v38 }
 0x49a   : > { %4732 = vperm.xlu1 %7455, %v4443_v39   ;;  %4735 = vperm.xlu0 %7454, %v4444_v62   ;;  %v3633_v62 = vadd.f32 %v10403_v44, %v12240_v12  ;;  %v10546_v39 = vpop.permute.xlu0 %4369 }
 0x49b   : > { %v10538_v52 = vpop.permute.xlu1 %4341 }
 0x49c   : > { %v4445_v32 = vmul.f32 %v10538_v52, %v3630_v13  ;;  %v4448_v26 = vmul.f32 %v10518_v50, %v3633_v62  ;;  %v12241_v13 = vld [vmem:[#allocation87_spill] sm:$0xff] }
 0x49d   : > { %v3634_v43 = vadd.f32 %v10403_v44, %v12241_v13 }
 0x49e   : > { %4738 = vperm.xlu1 %7455, %v4445_v32   ;;  %4741 = vperm.xlu0 %7454, %v4446_v51   ;;  %v12242_v51 = vld [vmem:[#allocation86_spill] sm:$0xff]  ;;  %v10560_v1 = vpop.permute.xlu0 %4377 }
 0x49f   : > { %v10548_v33 = vpop.permute.xlu1 %4349  ;;  %v3635_v32 = vadd.f32 %v10403_v44, %v12242_v51 }
 0x4a0   : > { %v4447_v36 = vmul.f32 %v10548_v33, %v3632_v40  ;;  %v12243_v40 = vld [vmem:[#allocation91_spill] sm:$0xff] }
 0x4a1   : > { %v4450_v24 = vmul.f32 %v10532_v19, %v3635_v32  ;;  %v3636_v62 = vadd.f32 %v10403_v44, %v12243_v40 }
 0x4a2   : > { %4744 = vperm.xlu1 %7455, %v4447_v36   ;;  %4747 = vperm.xlu0 %7454, %v4448_v26   ;;  %v12244_v26 = vld [vmem:[#allocation90_spill] sm:$0xff] }
 0x4a3   : > { %v10556_v38 = vpop.permute.xlu1 %4357  ;;  %v3637_v36 = vadd.f32 %v10403_v44, %v12244_v26 }
 0x4a4   : > { %v4449_v12 = vmul.f32 %v10556_v38, %v3634_v43  ;;  %v12245_v43 = vld [vmem:[#allocation95_spill] sm:$0xff] }
 0x4a5   : > { %v4452_v61 = vmul.f32 %v10546_v39, %v3637_v36  ;;  %v3638_v32 = vadd.f32 %v10403_v44, %v12245_v43 }
 0x4a6   : > { %4750 = vperm.xlu1 %7455, %v4449_v12   ;;  %4753 = vperm.xlu0 %7454, %v4450_v24   ;;  %v3639_v24 = vadd.f32 %v10403_v44, %v12246_v18  ;;  %v10574_v12 = vpop.permute.xlu0 %4385 }
 0x4a7   : > { %v10566_v13 = vpop.permute.xlu1 %4365  ;;  %12247 = vst [vmem:[#allocation47_spill] sm:$0xff] %v10574_v12 }
 0x4a8   : > { %v4451_v51 = vmul.f32 %v10566_v13, %v3636_v62  ;;  %v4454_v21 = vmul.f32 %v10560_v1, %v3639_v24  ;;  %v12248_v62 = vld [vmem:[#allocation99_spill] sm:$0xff] }
 0x4a9   : > { %v3640_v36 = vadd.f32 %v10403_v44, %v12248_v62 }
 0x4aa   : > { %4756 = vperm.xlu1 %7455, %v4451_v51   ;;  %4759 = vperm.xlu0 %7454, %v4452_v61   ;;  %v12249_v61 = vld [vmem:[#allocation98_spill] sm:$0xff]  ;;  %v10588_v58 = vpop.permute.xlu0 %4393 }
 0x4ab   : > { %v10576_v40 = vpop.permute.xlu1 %4373  ;;  %v3641_v51 = vadd.f32 %v10403_v44, %v12249_v61 }
 0x4ac   : > { %v4453_v26 = vmul.f32 %v10576_v40, %v3638_v32  ;;  %v12251_v32 = vld [vmem:[#allocation103_spill] sm:$0xff] }
 0x4ad   : > { %v4456_v42 = vmul.f32 %v10574_v12, %v3641_v51  ;;  %v3642_v24 = vadd.f32 %v10403_v44, %v12251_v32  ;;  %v12254_v12 = vld [vmem:[#allocation106_spill] sm:$0xff] }
 0x4ae   : > { %4762 = vperm.xlu1 %7455, %v4453_v26   ;;  %4765 = vperm.xlu0 %7454, %v4454_v21   ;;  %v12252_v21 = vld [vmem:[#allocation102_spill] sm:$0xff] }
 0x4af   : > { %v10584_v43 = vpop.permute.xlu1 %4381  ;;  %v3643_v26 = vadd.f32 %v10403_v44, %v12252_v21  ;;  %v12255_v21 = vld [vmem:[#allocation111_spill] sm:$0xff] }
 0x4b0   : > { %12250 = vst [vmem:[#allocation42_spill] sm:$0xff] %v10584_v43  ;;  %v4455_v18 = vmul.f32 %v10584_v43, %v3640_v36  ;;  %v12253_v36 = vld [vmem:[#allocation107_spill] sm:$0xff]  ;;  %v3646_v43 = vadd.f32 %v10403_v44, %v12255_v21 }
 0x4b1   : > { %v4458_v45 = vmul.f32 %v10588_v58, %v3643_v26  ;;  %v3644_v51 = vadd.f32 %v10403_v44, %v12253_v36  ;;  %v12257_v36 = vld [vmem:[#allocation115_spill] sm:$0xff] }
 0x4b2   : > { %4768 = vperm.xlu1 %7455, %v4455_v18   ;;  %4771 = vperm.xlu0 %7454, %v4456_v42   ;;  %v3645_v42 = vadd.f32 %v10403_v44, %v12254_v12  ;;  %v3648_v12 = vadd.f32 %v10403_v44, %v12257_v36  ;;  %v12259_v21 = vld [vmem:[#allocation119_spill] sm:$0xff] }
 0x4b3   : > { %v10594_v62 = vpop.permute.xlu1 %4389  ;;  %v4459_v18 = vmul.f32 %v10410_v16, %v3644_v51  ;;  %v12258_v51 = vld [vmem:[#allocation114_spill] sm:$0xff]  ;;  %v12261_v36 = vld [vmem:[#allocation123_spill] sm:$0xff] }
 0x4b4   : > { %v4457_v61 = vmul.f32 %v10594_v62, %v3642_v24  ;;  %v4460_v32 = vmul.f32 %v10455_v35, %v3645_v42  ;;  %v12256_v24 = vld [vmem:[#allocation110_spill] sm:$0xff]  ;;  %v3649_v42 = vadd.f32 %v10403_v44, %v12258_v51  ;;  %v3652_v51 = vadd.f32 %v10403_v44, %v12261_v36  ;;  %v12265_v36 = vld [vmem:[#allocation128_spill] sm:$0xff] }
 0x4b5   : > { %v3647_v26 = vadd.f32 %v10403_v44, %v12256_v24  ;;  %v3650_v24 = vadd.f32 %v10403_v44, %v12259_v21  ;;  %v12263_v21 = vld [vmem:[#allocation126_spill] sm:$0xff] }
 0x4b6   : > { %4774 = vperm.xlu1 %7455, %v4457_v61   ;;  %4777 = vperm.xlu0 %7454, %v4458_v45   ;;  %v4461_v45 = vmul.f32 %v10464_v15, %v3646_v43  ;;  %v12260_v43 = vld [vmem:[#allocation118_spill] sm:$0xff] }
 0x4b7   : > { %v4462_v61 = vmul.f32 %v10431_v49, %v3647_v26  ;;  %v3651_v26 = vadd.f32 %v10403_v44, %v12260_v43  ;;  %v3654_v43 = vadd.f32 %v10403_v44, %v12263_v21  ;;  %v12267_v21 = vld [vmem:[#allocation131_spill] sm:$0xff] }
 0x4ba   : > { %4780 = vperm.xlu1 %7455, %v4459_v18   ;;  %4783 = vperm.xlu0 %7454, %v4460_v32   ;;  %v4463_v18 = vmul.f32 %v10472_v30, %v3648_v12  ;;  %v4464_v32 = vmul.f32 %v10435_v27, %v3649_v42  ;;  %v12262_v12 = vld [vmem:[#allocation122_spill] sm:$0xff] }
 0x4bb   : > { %v3653_v42 = vadd.f32 %v10403_v44, %v12262_v12  ;;  %v3656_v12 = vadd.f32 %v10403_v44, %v12265_v36  ;;  %v12269_v36 = vld [vmem:[#allocation134_spill] sm:$0xff] }
 0x4be   : > { %4786 = vperm.xlu1 %7455, %v4461_v45   ;;  %4789 = vperm.xlu0 %7454, %v4462_v61   ;;  %v4465_v45 = vmul.f32 %v10482_v5, %v3650_v24  ;;  %v4466_v61 = vmul.f32 %v10441_v55, %v3651_v26  ;;  %v12264_v24 = vld [vmem:[#allocation125_spill] sm:$0xff] }
 0x4bf   : > { %v3655_v26 = vadd.f32 %v10403_v44, %v12264_v24  ;;  %v3658_v24 = vadd.f32 %v10403_v44, %v12267_v21  ;;  %v12271_v21 = vld [vmem:[#allocation137_spill] sm:$0xff] }
 0x4c2   : > { %4792 = vperm.xlu1 %7455, %v4463_v18   ;;  %4795 = vperm.xlu0 %7454, %v4464_v32   ;;  %v4467_v18 = vmul.f32 %v10492_v54, %v3652_v51  ;;  %v4468_v32 = vmul.f32 %v10445_v0, %v3653_v42  ;;  %v12266_v51 = vld [vmem:[#allocation127_spill] sm:$0xff] }
 0x4c3   : > { %v3657_v42 = vadd.f32 %v10403_v44, %v12266_v51  ;;  %v3660_v51 = vadd.f32 %v10403_v44, %v12269_v36  ;;  %v3692_v36 = vadd.f32 %v10403_v44, %v9636_v56  ;;  %v3694_v56 = vadd.f32 %v10403_v44, %v9646_v22 }
 0x4c4   : > { %v3725_v22 = vadd.f32 %v10403_v44, %v9794_v10  ;;  %v3695_v10 = vadd.f32 %v10403_v44, %v9644_v17 }
 0x4c6   : > { %4798 = vperm.xlu1 %7455, %v4465_v45   ;;  %4801 = vperm.xlu0 %7454, %v4466_v61   ;;  %v4469_v45 = vmul.f32 %v10500_v6, %v3654_v43  ;;  %v4470_v61 = vmul.f32 %v10451_v25, %v3655_v26  ;;  %v12268_v43 = vld [vmem:[#allocation130_spill] sm:$0xff] }
 0x4c7   : > { %v3659_v26 = vadd.f32 %v10403_v44, %v12268_v43  ;;  %v3662_v43 = vadd.f32 %v10403_v44, %v12271_v21 }
 0x4ca   : > { %4804 = vperm.xlu1 %7455, %v4467_v18   ;;  %4807 = vperm.xlu0 %7454, %v4468_v32   ;;  %v4471_v18 = vmul.f32 %v10510_v7, %v3656_v12  ;;  %v4472_v32 = vmul.f32 %v10462_v63, %v3657_v42  ;;  %v12270_v12 = vld [vmem:[#allocation133_spill] sm:$0xff] }
 0x4cb   : > { %v3661_v42 = vadd.f32 %v10403_v44, %v12270_v12  ;;  %v4507_v12 = vmul.f32 %v10528_v28, %v3692_v36 }
 0x4ce   : > { %4810 = vperm.xlu1 %7455, %v4469_v45   ;;  %4813 = vperm.xlu0 %7454, %v4470_v61   ;;  %v4473_v45 = vmul.f32 %v10520_v2, %v3658_v24  ;;  %v4474_v61 = vmul.f32 %v10476_v59, %v3659_v26  ;;  %v3676_v24 = vadd.f32 %v10403_v44, %v9556_v3 }
 0x4cf   : > { %v4477_v26 = vmul.f32 %v10538_v52, %v3662_v43  ;;  %v3693_v3 = vadd.f32 %v10403_v44, %v9634_v23  ;;  %v3708_v23 = vadd.f32 %v10403_v44, %v9716_v34  ;;  %v12273_v34 = vld [vmem:[#allocation139_spill] sm:$0xff] }
 0x4d2   : > { %4816 = vperm.xlu1 %7455, %v4471_v18   ;;  %4819 = vperm.xlu0 %7454, %v4472_v32   ;;  %v4475_v18 = vmul.f32 %v10528_v28, %v3660_v51  ;;  %v4476_v32 = vmul.f32 %v10490_v46, %v3661_v42  ;;  %v12272_v42 = vld [vmem:[#allocation136_spill] sm:$0xff] }
 0x4d6   : > { %4822 = vperm.xlu1 %7455, %v4473_v45   ;;  %4825 = vperm.xlu0 %7454, %v4474_v61   ;;  %v4491_v45 = vmul.f32 %v10410_v16, %v3676_v24  ;;  %v3677_v61 = vadd.f32 %v10403_v44, %v9554_v47  ;;  %v3678_v47 = vadd.f32 %v10403_v44, %v9566_v20 }
 0x4d7   : > { %v4509_v24 = vmul.f32 %v10538_v52, %v3694_v56  ;;  %v3724_v20 = vadd.f32 %v10403_v44, %v9796_v11  ;;  %v10694_v11 = vpop.permute.xlu1 %4684 }
 0x4d8   : > { %v4492_v51 = vmul.f32 %v10455_v35, %v3677_v61  ;;  %v4493_v43 = vmul.f32 %v10464_v15, %v3678_v47 }
 0x4d9   : > { %v4539_v36 = vmul.f32 %v10528_v28, %v3724_v20  ;;  %v4510_v28 = vmul.f32 %v10504_v4, %v3695_v10 }
 0x4da   : > { %4828 = vperm.xlu1 %7455, %v4475_v18   ;;  %4831 = vperm.xlu0 %7454, %v4476_v32   ;;  %v3663_v18 = vadd.f32 %v10403_v44, %v12272_v42  ;;  %v4508_v32 = vmul.f32 %v10490_v46, %v3693_v3 }
 0x4dc   : > { %v4478_v21 = vmul.f32 %v10504_v4, %v3663_v18 }
 0x4de   : > { %4834 = vperm.xlu1 %7455, %v4477_v26   ;;  %4876 = vperm.xlu0 %7454, %v4491_v45   ;;  %v3709_v26 = vadd.f32 %v10403_v44, %v9714_v9  ;;  %v4523_v45 = vmul.f32 %v10410_v16, %v3708_v23  ;;  %v3664_v9 = vadd.f32 %v10403_v44, %v12273_v34 }
 0x4e0   : > { %v4524_v61 = vmul.f32 %v10455_v35, %v3709_v26  ;;  %v3679_v35 = vadd.f32 %v10403_v44, %v9564_v53  ;;  %v4479_v16 = vmul.f32 %v10548_v33, %v3664_v9  ;;  %v12277_v9 = vld [vmem:[#allocation151_spill] sm:$0xff] }
 0x4e2   : > { %4879 = vperm.xlu1 %7455, %v4492_v51   ;;  %4924 = vperm.xlu0 %7454, %v4507_v12   ;;  %v4540_v51 = vmul.f32 %v10490_v46, %v3725_v22  ;;  %v4494_v12 = vmul.f32 %v10431_v49, %v3679_v35  ;;  %v3710_v46 = vadd.f32 %v10403_v44, %v9726_v8 }
 0x4e3   : > { %v3681_v35 = vadd.f32 %v10403_v44, %v12277_v9 }
 0x4e4   : > { %v4525_v53 = vmul.f32 %v10464_v15, %v3710_v46  ;;  %v3680_v15 = vadd.f32 %v10403_v44, %v9576_v37  ;;  %v12280_v46 = vld [vmem:[#allocation173_spill] sm:$0xff] }
 0x4e6   : > { %4927 = vperm.xlu1 %7455, %v4508_v32   ;;  %4837 = vperm.xlu0 %7454, %v4478_v21   ;;  %v3726_v32 = vadd.f32 %v10403_v44, %v9806_v48  ;;  %v12274_v21 = vld [vmem:[#allocation138_spill] sm:$0xff]  ;;  %v4495_v48 = vmul.f32 %v10472_v30, %v3680_v15  ;;  %v12284_v15 = vld [vmem:[#allocation141_spill] sm:$0xff] }
 0x4e7   : > { %v3665_v47 = vadd.f32 %v10403_v44, %v12274_v21 }
 0x4e8   : > { %v4541_v17 = vmul.f32 %v10538_v52, %v3726_v32 }
 0x4e9   : > { %v4480_v8 = vmul.f32 %v10518_v50, %v3665_v47 }
 0x4ea   : > { %4882 = vperm.xlu1 %7455, %v4493_v43   ;;  %4930 = vperm.xlu0 %7454, %v4509_v24   ;;  %v3696_v24 = vadd.f32 %v10403_v44, %v9656_v60 }
 0x4ec   : > { %v4511_v23 = vmul.f32 %v10548_v33, %v3696_v24  ;;  %v3667_v24 = vadd.f32 %v10403_v44, %v12284_v15 }
 0x4ee   : > { %4972 = vperm.xlu1 %7455, %v4523_v45   ;;  %4975 = vperm.xlu0 %7454, %v4524_v61   ;;  %v3711_v45 = vadd.f32 %v10403_v44, %v9724_v31  ;;  %v12275_v61 = vld [vmem:[#allocation16_spill] sm:$0xff] }
 0x4ef   : > { %v3727_v20 = vadd.f32 %v10403_v44, %v12275_v61 }
 0x4f0   : > { %v4526_v37 = vmul.f32 %v10431_v49, %v3711_v45 }
 0x4f1   : > { %v4542_v60 = vmul.f32 %v10504_v4, %v3727_v20  ;;  %v12279_v4 = vld [vmem:[#allocation162_spill] sm:$0xff] }
 0x4f2   : > { %5020 = vperm.xlu1 %7455, %v4539_v36   ;;  %5023 = vperm.xlu0 %7454, %v4540_v51   ;;  %v12276_v51 = vld [vmem:[#allocation142_spill] sm:$0xff]  ;;  %v3697_v10 = vadd.f32 %v10403_v44, %v12279_v4 }
 0x4f3   : > { %v3666_v34 = vadd.f32 %v10403_v44, %v12276_v51 }
 0x4f5   : > { %v10696_v3 = vpop.permute.xlu0 %4687  ;;  %v4481_v31 = vmul.f32 %v10556_v38, %v3666_v34 }
 0x4f6   : > { %4840 = vperm.xlu1 %7455, %v4479_v16   ;;  %4885 = vperm.xlu0 %7454, %v4494_v12   ;;  %v4496_v16 = vmul.f32 %v10435_v27, %v3681_v35  ;;  %v12289_v35 = vld [vmem:[#allocation29_spill] sm:$0xff] }
 0x4f9   : > { %v10704_v42 = vpop.permute.xlu1 %4690  ;;  %v10706_v18 = vpop.permute.xlu0 %4693 }
 0x4fa   : > { %4933 = vperm.xlu1 %7455, %v4510_v28   ;;  %4978 = vperm.xlu0 %7454, %v4525_v53   ;;  %v3712_v28 = vadd.f32 %v10403_v44, %v12280_v46  ;;  %v4512_v53 = vmul.f32 %v10518_v50, %v3697_v10 }
 0x4fc   : > { %v4527_v32 = vmul.f32 %v10472_v30, %v3712_v28  ;;  %v12287_v30 = vld [vmem:[#allocation153_spill] sm:$0xff] }
 0x4fd   : > { %v10714_v56 = vpop.permute.xlu1 %4696  ;;  %v10716_v43 = vpop.permute.xlu0 %4699  ;;  %v3682_v20 = vadd.f32 %v10403_v44, %v12287_v30 }
 0x4fe   : > { %5026 = vperm.xlu1 %7455, %v4541_v17   ;;  %4843 = vperm.xlu0 %7454, %v4480_v8   ;;  %v12283_v17 = vld [vmem:[#allocation17_spill] sm:$0xff] }
 0x4ff   : > { %v3728_v8 = vadd.f32 %v10403_v44, %v12283_v17  ;;  %v4497_v51 = vmul.f32 %v10482_v5, %v3682_v20  ;;  %v12294_v20 = vld [vmem:[#allocation31_spill] sm:$0xff] }
 0x501   : > { %v10724_v26 = vpop.permute.xlu1 %4702  ;;  %v10726_v52 = vpop.permute.xlu0 %4705 }
 0x502   : > { %4888 = vperm.xlu1 %7455, %v4495_v48   ;;  %4936 = vperm.xlu0 %7454, %v4511_v23   ;;  %v4543_v48 = vmul.f32 %v10548_v33, %v3728_v8  ;;  %v4482_v23 = vmul.f32 %v10532_v19, %v3667_v24  ;;  %v12292_v8 = vld [vmem:[#allocation152_spill] sm:$0xff] }
 0x503   : > { %v3683_v15 = vadd.f32 %v10403_v44, %v12292_v8 }
 0x505   : > { %v10734_v22 = vpop.permute.xlu1 %4708  ;;  %v10736_v36 = vpop.permute.xlu0 %4711 }
 0x506   : > { %4981 = vperm.xlu1 %7455, %v4526_v37   ;;  %5029 = vperm.xlu0 %7454, %v4542_v60   ;;  %v12288_v37 = vld [vmem:[#allocation164_spill] sm:$0xff] }
 0x507   : > { %v3698_v60 = vadd.f32 %v10403_v44, %v12288_v37  ;;  %v3714_v37 = vadd.f32 %v10403_v44, %v12294_v20 }
 0x509   : > { %v10744_v12 = vpop.permute.xlu1 %4714  ;;  %v10746_v49 = vpop.permute.xlu0 %4717  ;;  %v4513_v34 = vmul.f32 %v10556_v38, %v3698_v60 }
 0x50a   : > { %12278 = vst [vmem:[#allocation46_spill] sm:$0xff] %v10746_v49  ;;  %4846 = vperm.xlu1 %7455, %v4481_v31   ;;  %4891 = vperm.xlu0 %7454, %v4496_v16   ;;  %v3713_v31 = vadd.f32 %v10403_v44, %v12289_v35  ;;  %v12290_v16 = vld [vmem:[#allocation41_spill] sm:$0xff] }
 0x50b   : > { %v3729_v4 = vadd.f32 %v10403_v44, %v12290_v16  ;;  %v12333_v49 = vld [vmem:[#allocation93_spill] sm:$0xff] }
 0x50c   : > { %v4528_v10 = vmul.f32 %v10435_v27, %v3713_v31  ;;  %v12295_v31 = vld [vmem:[#allocation18_spill] sm:$0xff] }
 0x50d   : > { %v10754_v21 = vpop.permute.xlu1 %4720  ;;  %v10756_v47 = vpop.permute.xlu0 %4723  ;;  %v4544_v46 = vmul.f32 %v10518_v50, %v3729_v4  ;;  %v12293_v50 = vld [vmem:[#allocation163_spill] sm:$0xff]  ;;  %v3730_v16 = vadd.f32 %v10403_v44, %v12295_v31 }
 0x50e   : > { %12281 = vst [vmem:[#allocation51_spill] sm:$0xff] %v10754_v21  ;;  %12282 = vst [vmem:[#allocation50_spill] sm:$0xff] %v10756_v47  ;;  %4939 = vperm.xlu1 %7455, %v4512_v53   ;;  %4984 = vperm.xlu0 %7454, %v4527_v32   ;;  %v12291_v32 = vld [vmem:[#allocation144_spill] sm:$0xff]  ;;  %v3699_v30 = vadd.f32 %v10403_v44, %v12293_v50  ;;  %v12296_v4 = vld [vmem:[#allocation143_spill] sm:$0xff] }
 0x50f   : > { %v3668_v17 = vadd.f32 %v10403_v44, %v12291_v32  ;;  %v12320_v47 = vld [vmem:[#allocation25_spill] sm:$0xff] }
 0x510   : > { %v4514_v60 = vmul.f32 %v10532_v19, %v3699_v30 }
 0x511   : > { %v10764_v45 = vpop.permute.xlu1 %4726  ;;  %v10766_v61 = vpop.permute.xlu0 %4729  ;;  %v4483_v24 = vmul.f32 %v10566_v13, %v3668_v17 }
 0x512   : > { %12285 = vst [vmem:[#allocation55_spill] sm:$0xff] %v10764_v45  ;;  %12286 = vst [vmem:[#allocation54_spill] sm:$0xff] %v10766_v61  ;;  %5032 = vperm.xlu1 %7455, %v4543_v48   ;;  %4849 = vperm.xlu0 %7454, %v4482_v23   ;;  %v4498_v48 = vmul.f32 %v10441_v55, %v3683_v15 }
 0x515   : > { %v10774_v9 = vpop.permute.xlu1 %4732  ;;  %v10776_v33 = vpop.permute.xlu0 %4735 }
 0x516   : > { %4894 = vperm.xlu1 %7455, %v4497_v51   ;;  %4942 = vperm.xlu0 %7454, %v4513_v34   ;;  %v4529_v51 = vmul.f32 %v10482_v5, %v3714_v37  ;;  %v12297_v5 = vld [vmem:[#allocation155_spill] sm:$0xff] }
 0x517   : > { %v3684_v15 = vadd.f32 %v10403_v44, %v12297_v5  ;;  %v12300_v37 = vld [vmem:[#allocation11_spill] sm:$0xff] }
 0x519   : > { %v10784_v28 = vpop.permute.xlu1 %4738  ;;  %v10786_v53 = vpop.permute.xlu0 %4741  ;;  %v4499_v50 = vmul.f32 %v10492_v54, %v3684_v15  ;;  %v12305_v15 = vld [vmem:[#allocation154_spill] sm:$0xff] }
 0x51a   : > { %4987 = vperm.xlu1 %7455, %v4528_v10   ;;  %5035 = vperm.xlu0 %7454, %v4544_v46   ;;  %v3669_v10 = vadd.f32 %v10403_v44, %v12296_v4  ;;  %v4545_v46 = vmul.f32 %v10556_v38, %v3730_v16 }
 0x51c   : > { %v4484_v32 = vmul.f32 %v10546_v39, %v3669_v10 }
 0x51d   : > { %v10794_v23 = vpop.permute.xlu1 %4744  ;;  %v10796_v27 = vpop.permute.xlu0 %4747 }
 0x51e   : > { %4852 = vperm.xlu1 %7455, %v4483_v24   ;;  %4897 = vperm.xlu0 %7454, %v4498_v48   ;;  %v12298_v24 = vld [vmem:[#allocation166_spill] sm:$0xff] }
 0x51f   : > { %v3700_v48 = vadd.f32 %v10403_v44, %v12298_v24  ;;  %v3685_v24 = vadd.f32 %v10403_v44, %v12305_v15 }
 0x521   : > { %v10804_v34 = vpop.permute.xlu1 %4750  ;;  %v10806_v35 = vpop.permute.xlu0 %4753  ;;  %v4515_v30 = vmul.f32 %v10566_v13, %v3700_v48 }
 0x522   : > { %4945 = vperm.xlu1 %7455, %v4514_v60   ;;  %4990 = vperm.xlu0 %7454, %v4529_v51   ;;  %v3715_v60 = vadd.f32 %v10403_v44, %v12300_v37  ;;  %v12301_v51 = vld [vmem:[#allocation45_spill] sm:$0xff] }
 0x523   : > { %v3731_v31 = vadd.f32 %v10403_v44, %v12301_v51 }
 0x524   : > { %v4530_v16 = vmul.f32 %v10441_v55, %v3715_v60  ;;  %v12309_v60 = vld [vmem:[#allocation33_spill] sm:$0xff] }
 0x525   : > { %v10814_v17 = vpop.permute.xlu1 %4756  ;;  %v10816_v8 = vpop.permute.xlu0 %4759  ;;  %v4546_v4 = vmul.f32 %v10532_v19, %v3731_v31  ;;  %v12308_v19 = vld [vmem:[#allocation165_spill] sm:$0xff]  ;;  %v3716_v51 = vadd.f32 %v10403_v44, %v12309_v60 }
 0x526   : > { %5038 = vperm.xlu1 %7455, %v4545_v46   ;;  %4855 = vperm.xlu0 %7454, %v4484_v32   ;;  %v12304_v32 = vld [vmem:[#allocation146_spill] sm:$0xff]  ;;  %v3701_v37 = vadd.f32 %v10403_v44, %v12308_v19 }
 0x527   : > { %v3670_v5 = vadd.f32 %v10403_v44, %v12304_v32 }
 0x528   : > { %v4516_v31 = vmul.f32 %v10546_v39, %v3701_v37 }
 0x529   : > { %v10824_v20 = vpop.permute.xlu1 %4762  ;;  %v10826_v38 = vpop.permute.xlu0 %4765  ;;  %v4485_v48 = vmul.f32 %v10576_v40, %v3670_v5  ;;  %v12310_v5 = vld [vmem:[#allocation19_spill] sm:$0xff] }
 0x52a   : > { %12299 = vst [vmem:[#allocation59_spill] sm:$0xff] %v10826_v38  ;;  %4900 = vperm.xlu1 %7455, %v4499_v50   ;;  %4948 = vperm.xlu0 %7454, %v4515_v30   ;;  %v4500_v50 = vmul.f32 %v10445_v0, %v3685_v24  ;;  %v3732_v15 = vadd.f32 %v10403_v44, %v12310_v5  ;;  %v12311_v24 = vld [vmem:[#allocation145_spill] sm:$0xff]  ;;  %v12313_v5 = vld [vmem:[#allocation168_spill] sm:$0xff] }
 0x52b   : > { %v12328_v38 = vld [vmem:[#allocation89_spill] sm:$0xff] }
 0x52c   : > { %v4547_v60 = vmul.f32 %v10566_v13, %v3732_v15 }
 0x52d   : > { %v10834_v10 = vpop.permute.xlu1 %4768  ;;  %v10836_v46 = vpop.permute.xlu0 %4771 }
 0x52e   : > { %12302 = vst [vmem:[#allocation58_spill] sm:$0xff] %v10834_v10  ;;  %12303 = vst [vmem:[#allocation63_spill] sm:$0xff] %v10836_v46  ;;  %4993 = vperm.xlu1 %7455, %v4530_v16   ;;  %5041 = vperm.xlu0 %7454, %v4546_v4   ;;  %v4531_v16 = vmul.f32 %v10492_v54, %v3716_v51  ;;  %v12316_v46 = vld [vmem:[#allocation69_spill] sm:$0xff] }
 0x531   : > { %v10844_v30 = vpop.permute.xlu1 %4774  ;;  %v10846_v55 = vpop.permute.xlu0 %4777 }
 0x532   : > { %12306 = vst [vmem:[#allocation62_spill] sm:$0xff] %v10844_v30  ;;  %12307 = vst [vmem:[#allocation67_spill] sm:$0xff] %v10846_v55  ;;  %4858 = vperm.xlu1 %7455, %v4485_v48   ;;  %4903 = vperm.xlu0 %7454, %v4500_v50   ;;  %v3671_v48 = vadd.f32 %v10403_v44, %v12311_v24  ;;  %v3702_v24 = vadd.f32 %v10403_v44, %v12313_v5  ;;  %v12315_v30 = vld [vmem:[#allocation23_spill] sm:$0xff] }
 0x534   : > { %v4486_v37 = vmul.f32 %v10560_v1, %v3671_v48  ;;  %v4517_v48 = vmul.f32 %v10576_v40, %v3702_v24 }
 0x535   : > { %v4781_v4 = vpop.permute.xlu1 %4780  ;;  %v4784_v32 = vpop.permute.xlu0 %4783 }
 0x536   : > { %4951 = vperm.xlu1 %7455, %v4516_v31   ;;  %4996 = vperm.xlu0 %7454, %v4531_v16   ;;  %v5260_v50 = vrot.slane %v4781_v4, %v9881_v41  ;;  %v5264_v19 = vrot.slane %v4784_v32, %v9886_v29  ;;  %v12312_v31 = vld [vmem:[#allocation157_spill] sm:$0xff] }
 0x537   : > { %v3686_v16 = vadd.f32 %v10403_v44, %v12312_v31 }
 0x538   : > { %v5265_v4 = vsel %vm5078_vm1, %v5264_v19, %v5260_v50  ;;  %v12317_v50 = vld [vmem:[#allocation49_spill] sm:$0xff] }
 0x539   : > { %v4787_v55 = vpop.permute.xlu1 %4786  ;;  %v4790_v54 = vpop.permute.xlu0 %4789  ;;  %v4501_v15 = vmul.f32 %v10500_v6, %v3686_v16  ;;  %v3733_v19 = vadd.f32 %v10403_v44, %v12317_v50 }
 0x53a   : > { %v5269_v51 = vrot.slane %v4787_v55, %v9900_v57  ;;  %5044 = vperm.xlu1 %7455, %v4547_v60   ;;  %4861 = vperm.xlu0 %7454, %v4486_v37   ;;  %v5274_v32 = vrot.slane %v4790_v54, %v9914_v14  ;;  %v12314_v60 = vld [vmem:[#allocation12_spill] sm:$0xff] }
 0x53b   : > { %v3717_v37 = vadd.f32 %v10403_v44, %v12314_v60  ;;  %v4548_v5 = vmul.f32 %v10546_v39, %v3733_v19 }
 0x53c   : > { %v5270_v13 = vsel %vm5085_vm2, %v5269_v51, %v5265_v4 }
 0x53d   : > { %v4793_v61 = vpop.permute.xlu1 %4792  ;;  %v4796_v55 = vpop.permute.xlu0 %4795  ;;  %v5275_v54 = vsel %vm5092_vm3, %v5274_v32, %v5270_v13  ;;  %v4532_v16 = vmul.f32 %v10445_v0, %v3717_v37  ;;  %v12321_v32 = vld [vmem:[#allocation156_spill] sm:$0xff]  ;;  %v12322_v37 = vld [vmem:[#allocation42_spill] sm:$0xff] }
 0x53e   : > { %v5279_v31 = vrot.slane %v4793_v61, %v12315_v30  ;;  %v5284_v45 = vrot.slane %v4796_v55, %v12316_v46  ;;  %4906 = vperm.xlu1 %7455, %v4501_v15   ;;  %4954 = vperm.xlu0 %7454, %v4517_v48   ;;  %v12318_v61 = vld [vmem:[#allocation148_spill] sm:$0xff]  ;;  %v3687_v13 = vadd.f32 %v10403_v44, %v12321_v32 }
 0x53f   : > { %v3672_v55 = vadd.f32 %v10403_v44, %v12318_v61  ;;  %v12319_v15 = vld [vmem:[#allocation24_spill] sm:$0xff]  ;;  %v12326_v61 = vld [vmem:[#allocation35_spill] sm:$0xff] }
 0x540   : > { %v5280_v51 = vsel %vm5099_vm4, %v5279_v31, %v5275_v54  ;;  %v12323_v54 = vld [vmem:[#allocation167_spill] sm:$0xff] }
 0x541   : > { %v5285_v24 = vsel %vm5106_vm5, %v5284_v45, %v5280_v51  ;;  %v4799_v4 = vpop.permute.xlu1 %4798  ;;  %v4802_v60 = vpop.permute.xlu0 %4801  ;;  %v4487_v39 = vmul.f32 %v12322_v37, %v3672_v55  ;;  %v4502_v45 = vmul.f32 %v10451_v25, %v3687_v13  ;;  %v3703_v51 = vadd.f32 %v10403_v44, %v12323_v54  ;;  %v12327_v54 = vld [vmem:[#allocation20_spill] sm:$0xff] }
 0x542   : > { %v5289_v48 = vrot.slane %v4799_v4, %v12319_v15  ;;  %v5294_v10 = vrot.slane %v4802_v60, %v12320_v47  ;;  %4999 = vperm.xlu1 %7455, %v4532_v16   ;;  %5047 = vperm.xlu0 %7454, %v4548_v5   ;;  %v12324_v4 = vld [vmem:[#allocation26_spill] sm:$0xff]  ;;  %v12325_v16 = vld [vmem:[#allocation27_spill] sm:$0xff] }
 0x544   : > { %v5290_v0 = vsel %vm5113_vm6, %v5289_v48, %v5285_v24  ;;  %v3718_v24 = vadd.f32 %v10403_v44, %v12326_v61  ;;  %v4518_v48 = vmul.f32 %v10560_v1, %v3703_v51  ;;  %v12330_v61 = vld [vmem:[#allocation147_spill] sm:$0xff] }
 0x545   : > { %v5295_v31 = vsel %vm11838_vm7, %v5294_v10, %v5290_v0  ;;  %v4805_v50 = vpop.permute.xlu1 %4804  ;;  %v4808_v19 = vpop.permute.xlu0 %4807 }
 0x546   : > { %v5299_v60 = vrot.slane %v4805_v50, %v12324_v4  ;;  %v5304_v5 = vrot.slane %v4808_v19, %v12325_v16  ;;  %4864 = vperm.xlu1 %7455, %v4487_v39   ;;  %4909 = vperm.xlu0 %7454, %v4502_v45   ;;  %v4533_v10 = vmul.f32 %v10500_v6, %v3718_v24  ;;  %v12329_v39 = vld [vmem:[#allocation28_spill] sm:$0xff] }
 0x547   : > { %v3734_v50 = vadd.f32 %v10403_v44, %v12327_v54  ;;  %v12332_v54 = vld [vmem:[#allocation159_spill] sm:$0xff] }
 0x548   : > { %v5300_v55 = vsel %vm5127_vm8, %v5299_v60, %v5295_v31  ;;  %v3673_v31 = vadd.f32 %v10403_v44, %v12330_v61  ;;  %v12331_v60 = vld [vmem:[#allocation47_spill] sm:$0xff]  ;;  %v12335_v61 = vld [vmem:[#allocation170_spill] sm:$0xff] }
 0x549   : > { %v5305_v32 = vsel %vm5134_vm9, %v5304_v5, %v5300_v55  ;;  %v4811_v13 = vpop.permute.xlu1 %4810  ;;  %v4814_v0 = vpop.permute.xlu0 %4813  ;;  %v4549_v6 = vmul.f32 %v10576_v40, %v3734_v50 }
 0x54a   : > { %v5309_v19 = vrot.slane %v4811_v13, %v12328_v38  ;;  %v5314_v45 = vrot.slane %v4814_v0, %v12329_v39  ;;  %4957 = vperm.xlu1 %7455, %v4518_v48   ;;  %5002 = vperm.xlu0 %7454, %v4533_v10   ;;  %v4488_v5 = vmul.f32 %v12331_v60, %v3673_v31  ;;  %v12334_v48 = vld [vmem:[#allocation97_spill] sm:$0xff] }
 0x54b   : > { %v3688_v13 = vadd.f32 %v10403_v44, %v12332_v54  ;;  %v12336_v54 = vld [vmem:[#allocation13_spill] sm:$0xff] }
 0x54c   : > { %v5310_v51 = vsel %vm5141_vm10, %v5309_v19, %v5305_v32  ;;  %v3704_v32 = vadd.f32 %v10403_v44, %v12335_v61  ;;  %v12339_v61 = vld [vmem:[#allocation53_spill] sm:$0xff] }
 0x54d   : > { %v5315_v24 = vsel %vm5148_vm11, %v5314_v45, %v5310_v51  ;;  %v4817_v55 = vpop.permute.xlu1 %4816  ;;  %v4820_v21 = vpop.permute.xlu0 %4819  ;;  %v4503_v50 = vmul.f32 %v10510_v7, %v3688_v13 }
 0x54e   : > { %v5319_v0 = vrot.slane %v4817_v55, %v12333_v49  ;;  %v5324_v10 = vrot.slane %v4820_v21, %v12334_v48  ;;  %5050 = vperm.xlu1 %7455, %v4549_v6   ;;  %4867 = vperm.xlu0 %7454, %v4488_v5   ;;  %v4519_v19 = vmul.f32 %v12322_v37, %v3704_v32  ;;  %v12337_v49 = vld [vmem:[#allocation101_spill] sm:$0xff]  ;;  %v12340_v48 = vld [vmem:[#allocation150_spill] sm:$0xff] }
 0x54f   : > { %v3719_v55 = vadd.f32 %v10403_v44, %v12336_v54  ;;  %v12338_v6 = vld [vmem:[#allocation105_spill] sm:$0xff] }
 0x550   : > { %v5320_v40 = vsel %vm5155_vm12, %v5319_v0, %v5315_v24  ;;  %v3735_v24 = vadd.f32 %v10403_v44, %v12339_v61 }
 0x551   : > { %v5325_v45 = vsel %vm11841_vm13, %v5324_v10, %v5320_v40  ;;  %v4823_v31 = vpop.permute.xlu1 %4822  ;;  %v4826_v51 = vpop.permute.xlu0 %4825  ;;  %v4534_v0 = vmul.f32 %v10451_v25, %v3719_v55 }
 0x552   : > { %v5329_v21 = vrot.slane %v4823_v31, %v12337_v49  ;;  %v5334_v5 = vrot.slane %v4826_v51, %v12338_v6  ;;  %4912 = vperm.xlu1 %7455, %v4503_v50   ;;  %4960 = vperm.xlu0 %7454, %v4519_v19   ;;  %v4550_v10 = vmul.f32 %v10560_v1, %v3735_v24  ;;  %v12341_v51 = vld [vmem:[#allocation158_spill] sm:$0xff] }
 0x553   : > { %v3674_v31 = vadd.f32 %v10403_v44, %v12340_v48  ;;  %v12342_v48 = vld [vmem:[#allocation169_spill] sm:$0xff] }
 0x554   : > { %v5330_v13 = vsel %vm5169_vm14, %v5329_v21, %v5325_v45  ;;  %v3689_v45 = vadd.f32 %v10403_v44, %v12341_v51  ;;  %v3705_v24 = vadd.f32 %v10403_v44, %v12342_v48 }
 0x555   : > { %v10933_v32 = vsel %vm5176_vm15, %v5334_v5, %v5330_v13  ;;  %v4829_v40 = vpop.permute.xlu1 %4828  ;;  %v4832_v54 = vpop.permute.xlu0 %4831  ;;  %v4489_v1 = vmul.f32 %v10594_v62, %v3674_v31  ;;  %v12343_v13 = vld [vmem:[#allocation37_spill] sm:$0xff] }
 0x556   : > { %v5339_v50 = vrot.slane %v4829_v40, %v9881_v41  ;;  %v5343_v19 = vrot.slane %v4832_v54, %v9886_v29  ;;  %5005 = vperm.xlu1 %7455, %v4534_v0   ;;  %5053 = vperm.xlu0 %7454, %v4550_v10   ;;  %v4504_v55 = vmul.f32 %v10462_v63, %v3689_v45 }
 0x557   : > { %v3720_v0 = vadd.f32 %v10403_v44, %v12343_v13  ;;  %v4520_v40 = vmul.f32 %v12331_v60, %v3705_v24  ;;  %v12346_v13 = vld [vmem:[#allocation161_spill] sm:$0xff] }
 0x558   : > { %v5344_v25 = vsel %vm5078_vm1, %v5343_v19, %v5339_v50  ;;  %v12344_v19 = vld [vmem:[#allocation21_spill] sm:$0xff] }
 0x559   : > { %v4835_v21 = vpop.permute.xlu1 %4834  ;;  %v4877_v5 = vpop.permute.xlu0 %4876  ;;  %v4535_v54 = vmul.f32 %v10510_v7, %v3720_v0  ;;  %v3736_v51 = vadd.f32 %v10403_v44, %v12344_v19  ;;  %v3690_v0 = vadd.f32 %v10403_v44, %v12346_v13  ;;  %v12347_v19 = vld [vmem:[#allocation172_spill] sm:$0xff]  ;;  %v12348_v13 = vld [vmem:[#allocation14_spill] sm:$0xff] }
 0x55a   : > { %v5348_v61 = vrot.slane %v4835_v21, %v9900_v57  ;;  %4870 = vperm.xlu1 %7455, %v4489_v1   ;;  %4915 = vperm.xlu0 %7454, %v4504_v55   ;;  %v5418_v45 = vrot.slane %v4877_v5, %v9881_v41  ;;  %v12345_v55 = vld [vmem:[#allocation149_spill] sm:$0xff]  ;;  %v3706_v5 = vadd.f32 %v10403_v44, %v12347_v19 }
 0x55b   : > { %v3675_v21 = vadd.f32 %v10403_v44, %v12345_v55  ;;  %v3721_v19 = vadd.f32 %v10403_v44, %v12348_v13 }
 0x55c   : > { %v5349_v10 = vsel %vm5085_vm2, %v5348_v61, %v5344_v25  ;;  %v4551_v61 = vmul.f32 %v12322_v37, %v3736_v51 }
 0x55d   : > { %v4880_v31 = vpop.permute.xlu1 %4879  ;;  %v4925_v50 = vpop.permute.xlu0 %4924  ;;  %v4490_v7 = vmul.f32 %v10588_v58, %v3675_v21 }
 0x55e   : > { %v5422_v1 = vrot.slane %v4880_v31, %v9886_v29  ;;  %4963 = vperm.xlu1 %7455, %v4520_v40   ;;  %5008 = vperm.xlu0 %7454, %v4535_v54   ;;  %v5497_v40 = vrot.slane %v4925_v50, %v9881_v41 }
 0x560   : > { %v5423_v25 = vsel %vm5078_vm1, %v5422_v1, %v5418_v45  ;;  %v4505_v45 = vmul.f32 %v10520_v2, %v3690_v0  ;;  %v4521_v1 = vmul.f32 %v10594_v62, %v3706_v5  ;;  %v4536_v0 = vmul.f32 %v10462_v63, %v3721_v19 }
 0x561   : > { %v4928_v48 = vpop.permute.xlu1 %4927  ;;  %v4838_v24 = vpop.permute.xlu0 %4837 }
 0x562   : > { %v5501_v54 = vrot.slane %v4928_v48, %v9886_v29  ;;  %v5353_v31 = vrot.slane %v4838_v24, %v9914_v14  ;;  %5056 = vperm.xlu1 %7455, %v4551_v61   ;;  %4873 = vperm.xlu0 %7454, %v4490_v7   ;;  %v12349_v61 = vld [vmem:[#allocation57_spill] sm:$0xff] }
 0x563   : > { %v3737_v7 = vadd.f32 %v10403_v44, %v12349_v61 }
 0x564   : > { %v5502_v37 = vsel %vm5078_vm1, %v5501_v54, %v5497_v40  ;;  %v5354_v51 = vsel %vm5092_vm3, %v5353_v31, %v5349_v10  ;;  %v12350_v31 = vld [vmem:[#allocation160_spill] sm:$0xff] }
 0x565   : > { %v4883_v55 = vpop.permute.xlu1 %4882  ;;  %v4931_v21 = vpop.permute.xlu0 %4930  ;;  %v4552_v5 = vmul.f32 %v12331_v60, %v3737_v7 }
 0x566   : > { %v5427_v50 = vrot.slane %v4883_v55, %v9900_v57  ;;  %v5506_v48 = vrot.slane %v4931_v21, %v9900_v57  ;;  %4918 = vperm.xlu1 %7455, %v4505_v45   ;;  %4966 = vperm.xlu0 %7454, %v4521_v1   ;;  %v3691_v55 = vadd.f32 %v10403_v44, %v12350_v31  ;;  %v12351_v1 = vld [vmem:[#allocation171_spill] sm:$0xff] }
 0x568   : > { %v5428_v10 = vsel %vm5085_vm2, %v5427_v50, %v5423_v25  ;;  %v5507_v24 = vsel %vm5085_vm2, %v5506_v48, %v5502_v37  ;;  %v3707_v25 = vadd.f32 %v10403_v44, %v12351_v1  ;;  %v4506_v63 = vmul.f32 %v10476_v59, %v3691_v55  ;;  %v12352_v50 = vld [vmem:[#allocation39_spill] sm:$0xff] }
 0x569   : > { %v4973_v40 = vpop.permute.xlu1 %4972  ;;  %v4976_v54 = vpop.permute.xlu0 %4975  ;;  %v3722_v48 = vadd.f32 %v10403_v44, %v12352_v50 }
 0x56a   : > { %v5576_v21 = vrot.slane %v4973_v40, %v9881_v41  ;;  %v5580_v45 = vrot.slane %v4976_v54, %v9886_v29  ;;  %5011 = vperm.xlu1 %7455, %v4536_v0   ;;  %5059 = vperm.xlu0 %7454, %v4552_v5   ;;  %v4522_v60 = vmul.f32 %v10588_v58, %v3707_v25  ;;  %v12353_v0 = vld [vmem:[#allocation22_spill] sm:$0xff] }
 0x56b   : > { %v3738_v5 = vadd.f32 %v10403_v44, %v12353_v0  ;;  %v4537_v54 = vmul.f32 %v10520_v2, %v3722_v48 }
 0x56c   : > { %v5581_v37 = vsel %vm5078_vm1, %v5580_v45, %v5576_v21  ;;  %v12354_v45 = vld [vmem:[#allocation15_spill] sm:$0xff] }
 0x56d   : > { %v5021_v13 = vpop.permute.xlu1 %5020  ;;  %v5024_v19 = vpop.permute.xlu0 %5023  ;;  %v4553_v31 = vmul.f32 %v10594_v62, %v3738_v5  ;;  %v3723_v1 = vadd.f32 %v10403_v44, %v12354_v45 }
 0x56e   : > { %v5655_v61 = vrot.slane %v5021_v13, %v9881_v41  ;;  %v5659_v7 = vrot.slane %v5024_v19, %v9886_v29  ;;  %4921 = vperm.xlu1 %7455, %v4506_v63   ;;  %4969 = vperm.xlu0 %7454, %v4522_v60   ;;  %v12355_v63 = vld [vmem:[#allocation61_spill] sm:$0xff] }
 0x56f   : > { %v3739_v60 = vadd.f32 %v10403_v44, %v12355_v63  ;;  %v4538_v62 = vmul.f32 %v10476_v59, %v3723_v1 }
 0x570   : > { %v5660_v40 = vsel %vm5078_vm1, %v5659_v7, %v5655_v61 }
 0x571   : > { %v4841_v55 = vpop.permute.xlu1 %4840  ;;  %v4886_v21 = vpop.permute.xlu0 %4885  ;;  %v4554_v50 = vmul.f32 %v10588_v58, %v3739_v60 }
 0x572   : > { %v5358_v25 = vrot.slane %v4841_v55, %v12315_v30  ;;  %v5432_v13 = vrot.slane %v4886_v21, %v9914_v14  ;;  %5014 = vperm.xlu1 %7455, %v4537_v54   ;;  %5062 = vperm.xlu0 %7454, %v4553_v31  }
 0x574   : > { %v5359_v19 = vsel %vm5099_vm4, %v5358_v25, %v5354_v51  ;;  %v5433_v2 = vsel %vm5092_vm3, %v5432_v13, %v5428_v10 }
 0x575   : > { %v4934_v48 = vpop.permute.xlu1 %4933  ;;  %v4979_v61 = vpop.permute.xlu0 %4978 }
 0x576   : > { %v5511_v7 = vrot.slane %v4934_v48, %v9914_v14  ;;  %v5585_v0 = vrot.slane %v4979_v61, %v9900_v57  ;;  %5017 = vperm.xlu1 %7455, %v4538_v62   ;;  %5065 = vperm.xlu0 %7454, %v4554_v50  }
 0x578   : > { %v5512_v5 = vsel %vm5092_vm3, %v5511_v7, %v5507_v24  ;;  %v5586_v44 = vsel %vm5085_vm2, %v5585_v0, %v5581_v37 }
 0x579   : > { %v5027_v54 = vpop.permute.xlu1 %5026  ;;  %v4844_v51 = vpop.permute.xlu0 %4843 }
 0x57a   : > { %v5664_v10 = vrot.slane %v5027_v54, %v9900_v57  ;;  %v5363_v59 = vrot.slane %v4844_v51, %v12316_v46 }
 0x57c   : > { %v5665_v58 = vsel %vm5085_vm2, %v5664_v10, %v5660_v40  ;;  %v5364_v31 = vsel %vm5106_vm5, %v5363_v59, %v5359_v19 }
 0x57d   : > { %v4889_v55 = vpop.permute.xlu1 %4888  ;;  %v4937_v21 = vpop.permute.xlu0 %4936 }
 0x57e   : > { %v5437_v45 = vrot.slane %v4889_v55, %v12315_v30  ;;  %v5516_v1 = vrot.slane %v4937_v21, %v12315_v30 }
 0x580   : > { %v5438_v24 = vsel %vm5099_vm4, %v5437_v45, %v5433_v2  ;;  %v5517_v37 = vsel %vm5099_vm4, %v5516_v1, %v5512_v5 }
 0x581   : > { %v4982_v25 = vpop.permute.xlu1 %4981  ;;  %v5030_v13 = vpop.permute.xlu0 %5029 }
 0x582   : > { %v5590_v63 = vrot.slane %v4982_v25, %v9914_v14  ;;  %v5669_v60 = vrot.slane %v5030_v13, %v9914_v14 }
 0x584   : > { %v5591_v40 = vsel %vm5092_vm3, %v5590_v63, %v5586_v44  ;;  %v5670_v19 = vsel %vm5092_vm3, %v5669_v60, %v5665_v58 }
 0x585   : > { %v4847_v62 = vpop.permute.xlu1 %4846  ;;  %v4892_v50 = vpop.permute.xlu0 %4891 }
 0x586   : > { %v5368_v48 = vrot.slane %v4847_v62, %v12319_v15  ;;  %v5442_v61 = vrot.slane %v4892_v50, %v12316_v46 }
 0x588   : > { %v5369_v2 = vsel %vm5113_vm6, %v5368_v48, %v5364_v31  ;;  %v5443_v7 = vsel %vm5106_vm5, %v5442_v61, %v5438_v24 }
 0x589   : > { %v4940_v0 = vpop.permute.xlu1 %4939  ;;  %v4985_v5 = vpop.permute.xlu0 %4984 }
 0x58a   : > { %v5521_v54 = vrot.slane %v4940_v0, %v12316_v46  ;;  %v5595_v51 = vrot.slane %v4985_v5, %v12315_v30 }
 0x58c   : > { %v5522_v44 = vsel %vm5106_vm5, %v5521_v54, %v5517_v37  ;;  %v5596_v10 = vsel %vm5099_vm4, %v5595_v51, %v5591_v40 }
 0x58d   : > { %v5033_v59 = vpop.permute.xlu1 %5032  ;;  %v4850_v58 = vpop.permute.xlu0 %4849 }
 0x58e   : > { %v5674_v55 = vrot.slane %v5033_v59, %v12315_v30  ;;  %v5373_v21 = vrot.slane %v4850_v58, %v12320_v47 }
 0x590   : > { %v5675_v31 = vsel %vm5099_vm4, %v5674_v55, %v5670_v19  ;;  %v5374_v45 = vsel %vm11838_vm7, %v5373_v21, %v5369_v2 }
 0x591   : > { %v4895_v1 = vpop.permute.xlu1 %4894  ;;  %v4943_v24 = vpop.permute.xlu0 %4942 }
 0x592   : > { %v5447_v25 = vrot.slane %v4895_v1, %v12319_v15  ;;  %v5526_v13 = vrot.slane %v4943_v24, %v12319_v15 }
 0x594   : > { %v5448_v37 = vsel %vm5113_vm6, %v5447_v25, %v5443_v7  ;;  %v5527_v63 = vsel %vm5113_vm6, %v5526_v13, %v5522_v44 }
 0x595   : > { %v4988_v60 = vpop.permute.xlu1 %4987  ;;  %v5036_v40 = vpop.permute.xlu0 %5035 }
 0x596   : > { %v5600_v62 = vrot.slane %v4988_v60, %v12316_v46  ;;  %v5679_v50 = vrot.slane %v5036_v40, %v12316_v46 }
 0x598   : > { %v5601_v19 = vsel %vm5106_vm5, %v5600_v62, %v5596_v10  ;;  %v5680_v48 = vsel %vm5106_vm5, %v5679_v50, %v5675_v31 }
 0x599   : > { %v4853_v61 = vpop.permute.xlu1 %4852  ;;  %v4898_v2 = vpop.permute.xlu0 %4897 }
 0x59a   : > { %v5378_v0 = vrot.slane %v4853_v61, %v12324_v4  ;;  %v5452_v5 = vrot.slane %v4898_v2, %v12320_v47 }
 0x59c   : > { %v5379_v7 = vsel %vm5127_vm8, %v5378_v0, %v5374_v45  ;;  %v5453_v54 = vsel %vm11838_vm7, %v5452_v5, %v5448_v37 }
 0x59d   : > { %v4946_v51 = vpop.permute.xlu1 %4945  ;;  %v4991_v44 = vpop.permute.xlu0 %4990 }
 0x59e   : > { %v5531_v59 = vrot.slane %v4946_v51, %v12320_v47  ;;  %v5605_v58 = vrot.slane %v4991_v44, %v12319_v15 }
 0x5a0   : > { %v5532_v10 = vsel %vm11838_vm7, %v5531_v59, %v5527_v63  ;;  %v5606_v55 = vsel %vm5113_vm6, %v5605_v58, %v5601_v19 }
 0x5a1   : > { %v5039_v21 = vpop.permute.xlu1 %5038  ;;  %v4856_v31 = vpop.permute.xlu0 %4855 }
 0x5a2   : > { %v5684_v1 = vrot.slane %v5039_v21, %v12319_v15  ;;  %v5383_v24 = vrot.slane %v4856_v31, %v12325_v16  ;;  %v5077_v31 = vrot.slane %v10696_v3, %v9886_v29 }
 0x5a4   : > { %v5685_v45 = vsel %vm5113_vm6, %v5684_v1, %v5680_v48  ;;  %v11058_v25 = vsel %vm5134_vm9, %v5383_v24, %v5379_v7  ;;  %v5084_v1 = vrot.slane %v10704_v42, %v9900_v57  ;;  %v5181_v24 = vrot.slane %v10774_v9, %v9881_v41 }
 0x5a5   : > { %v4901_v13 = vpop.permute.xlu1 %4900  ;;  %v4949_v37 = vpop.permute.xlu0 %4948  ;;  %v5091_v42 = vrot.slane %v10706_v18, %v9914_v14 }
 0x5a6   : > { %v5457_v60 = vrot.slane %v4901_v13, %v12324_v4  ;;  %v5536_v40 = vrot.slane %v4949_v37, %v12324_v4 }
 0x5a8   : > { %v11063_v63 = vsel %vm5127_vm8, %v5457_v60, %v5453_v54  ;;  %v11066_v62 = vsel %vm5127_vm8, %v5536_v40, %v5532_v10  ;;  %v5072_v60 = vrot.slane %v10694_v11, %v9881_v41  ;;  %v5190_v40 = vrot.slane %v10784_v28, %v9900_v57 }
 0x5a9   : > { %v4994_v50 = vpop.permute.xlu1 %4993  ;;  %v5042_v19 = vpop.permute.xlu0 %5041 }
 0x5aa   : > { %v5610_v61 = vrot.slane %v4994_v50, %v12320_v47  ;;  %v5689_v48 = vrot.slane %v5042_v19, %v12320_v47  ;;  %v5079_v3 = vsel %vm5078_vm1, %v5077_v31, %v5072_v60  ;;  %v5195_v19 = vrot.slane %v10786_v53, %v9914_v14 }
 0x5ab   : > { %v5086_v9 = vsel %vm5085_vm2, %v5084_v1, %v5079_v3  ;;  %v5105_v31 = vrot.slane %v10716_v43, %v12316_v46  ;;  %v5112_v1 = vrot.slane %v10724_v26, %v12319_v15  ;;  %v5119_v3 = vrot.slane %v10726_v52, %v12320_v47 }
 0x5ac   : > { %v11071_v2 = vsel %vm11838_vm7, %v5610_v61, %v5606_v55  ;;  %v11074_v0 = vsel %vm11838_vm7, %v5689_v48, %v5685_v45  ;;  %v5185_v45 = vrot.slane %v10776_v33, %v9886_v29  ;;  %v5098_v33 = vrot.slane %v10714_v56, %v12315_v30 }
 0x5ad   : > { %v11076_v5 = vpop.permute.xlu1 %4858  ;;  %v11078_v7 = vpop.permute.xlu0 %4903  ;;  %v5200_v48 = vrot.slane %v10794_v23, %v12315_v30  ;;  %v5093_v18 = vsel %vm5092_vm3, %v5091_v42, %v5086_v9  ;;  %v5126_v42 = vrot.slane %v10734_v22, %v12324_v4  ;;  %v5215_v9 = vrot.slane %v10806_v35, %v12320_v47 }
 0x5ae   : > { %v5186_v50 = vsel %vm5078_vm1, %v5185_v45, %v5181_v24  ;;  %v5100_v56 = vsel %vm5099_vm4, %v5098_v33, %v5093_v18  ;;  %v5205_v24 = vrot.slane %v10796_v27, %v12316_v46  ;;  %v5225_v18 = vrot.slane %v10816_v8, %v12325_v16 }
 0x5af   : > { %v5191_v28 = vsel %vm5085_vm2, %v5190_v40, %v5186_v50  ;;  %v5210_v40 = vrot.slane %v10804_v34, %v12319_v15  ;;  %v5107_v43 = vsel %vm5106_vm5, %v5105_v31, %v5100_v56 }
 0x5b0   : > { %v5196_v53 = vsel %vm5092_vm3, %v5195_v19, %v5191_v28  ;;  %v5114_v26 = vsel %vm5113_vm6, %v5112_v1, %v5107_v43  ;;  %v5220_v19 = vrot.slane %v10814_v17, %v12324_v4  ;;  %v5133_v28 = vrot.slane %v10736_v36, %v12325_v16 }
 0x5b1   : > { %v11080_v54 = vpop.permute.xlu1 %4951  ;;  %v11082_v51 = vpop.permute.xlu0 %4996  ;;  %v5201_v23 = vsel %vm5099_vm4, %v5200_v48, %v5196_v53  ;;  %v5121_v52 = vsel %vm11838_vm7, %v5119_v3, %v5114_v26  ;;  %v5140_v48 = vrot.slane %v10744_v12, %v12328_v38  ;;  %v5230_v1 = vrot.slane %v10824_v20, %v12328_v38  ;;  %v12356_v53 = vld [vmem:[#allocation46_spill] sm:$0xff]  ;;  %v12359_v3 = vld [vmem:[#allocation59_spill] sm:$0xff] }
 0x5b2   : > { %v5206_v27 = vsel %vm5106_vm5, %v5205_v24, %v5201_v23  ;;  %v5128_v22 = vsel %vm5127_vm8, %v5126_v42, %v5121_v52  ;;  %v5147_v24 = vrot.slane %v12356_v53, %v12329_v39  ;;  %v12357_v23 = vld [vmem:[#allocation93_spill] sm:$0xff]  ;;  %v5235_v26 = vrot.slane %v12359_v3, %v12329_v39 }
 0x5b3   : > { %v5211_v34 = vsel %vm5113_vm6, %v5210_v40, %v5206_v27  ;;  %v5135_v36 = vsel %vm5134_vm9, %v5133_v28, %v5128_v22  ;;  %v12358_v40 = vld [vmem:[#allocation51_spill] sm:$0xff]  ;;  %v12361_v52 = vld [vmem:[#allocation97_spill] sm:$0xff]  ;;  %v12362_v28 = vld [vmem:[#allocation50_spill] sm:$0xff] }
 0x5b4   : > { %v5216_v35 = vsel %vm11838_vm7, %v5215_v9, %v5211_v34  ;;  %v5142_v12 = vsel %vm5141_vm10, %v5140_v48, %v5135_v36  ;;  %v5154_v43 = vrot.slane %v12358_v40, %v12357_v23  ;;  %v12360_v9 = vld [vmem:[#allocation58_spill] sm:$0xff]  ;;  %v5161_v22 = vrot.slane %v12362_v28, %v12361_v52  ;;  %v12364_v36 = vld [vmem:[#allocation63_spill] sm:$0xff] }
 0x5b5   : > { %v11084_v44 = vpop.permute.xlu1 %5044  ;;  %v11086_v59 = vpop.permute.xlu0 %4861  ;;  %v5221_v17 = vsel %vm5127_vm8, %v5220_v19, %v5216_v35  ;;  %v5240_v34 = vrot.slane %v12360_v9, %v12357_v23  ;;  %v5149_v19 = vsel %vm5148_vm11, %v5147_v24, %v5142_v12  ;;  %v12363_v35 = vld [vmem:[#allocation55_spill] sm:$0xff]  ;;  %v5245_v53 = vrot.slane %v12364_v36, %v12361_v52  ;;  %v12365_v24 = vld [vmem:[#allocation62_spill] sm:$0xff] }
 0x5b6   : > { %v5226_v8 = vsel %vm5134_vm9, %v5225_v18, %v5221_v17  ;;  %v5156_v48 = vsel %vm5155_vm12, %v5154_v43, %v5149_v19  ;;  %v5168_v18 = vrot.slane %v12363_v35, %v12337_v49  ;;  %v5250_v12 = vrot.slane %v12365_v24, %v12337_v49  ;;  %v12366_v43 = vld [vmem:[#allocation54_spill] sm:$0xff] }
 0x5b7   : > { %v5231_v20 = vsel %vm5141_vm10, %v5230_v1, %v5226_v8  ;;  %v5163_v3 = vsel %vm11841_vm13, %v5161_v22, %v5156_v48  ;;  %v5175_v9 = vrot.slane %v12366_v43, %v12338_v6  ;;  %v5462_v22 = vrot.slane %v11078_v7, %v12325_v16 }
 0x5b8   : > { %v5236_v17 = vsel %vm5148_vm11, %v5235_v26, %v5231_v20  ;;  %v5170_v19 = vsel %vm5169_vm14, %v5168_v18, %v5163_v3  ;;  %v12367_v20 = vld [vmem:[#allocation67_spill] sm:$0xff]  ;;  %v5541_v48 = vrot.slane %v11080_v54, %v12325_v16  ;;  %v5615_v18 = vrot.slane %v11082_v51, %v12324_v4 }
 0x5b9   : > { %v11088_v58 = vpop.permute.xlu1 %4906  ;;  %v11090_v10 = vpop.permute.xlu0 %4954  ;;  %v5241_v8 = vsel %vm5155_vm12, %v5240_v34, %v5236_v17  ;;  %v5255_v28 = vrot.slane %v12367_v20, %v12338_v6  ;;  %v5388_v17 = vrot.slane %v11076_v5, %v12328_v38  ;;  %v5393_v24 = vrot.slane %v11086_v59, %v12329_v39 }
 0x5ba   : > { %v5246_v26 = vsel %vm11841_vm13, %v5245_v53, %v5241_v8  ;;  %v5694_v53 = vrot.slane %v11084_v44, %v12324_v4  ;;  %v5177_v8 = vsel %vm5176_vm15, %v5175_v9, %v5170_v19  ;;  %v5467_v54 = vrot.slane %v11088_v58, %v12328_v38 }
 0x5bb   : > { %v5251_v34 = vsel %vm5169_vm14, %v5250_v12, %v5246_v26  ;;  %v5732_v7 = vsel %vm11840_vm0, %v10933_v32, %v5177_v8  ;;  %v5389_v51 = vsel %vm5141_vm10, %v5388_v17, %v11058_v25  ;;  %v5463_v44 = vsel %vm5134_vm9, %v5462_v22, %v11063_v63 }
 0x5bc   : > { %v5256_v5 = vsel %vm5176_vm15, %v5255_v28, %v5251_v34  ;;  %v5546_v43 = vrot.slane %v11090_v10, %v12328_v38  ;;  %v5542_v32 = vsel %vm5134_vm9, %v5541_v48, %v11066_v62  ;;  %v5616_v58 = vsel %vm5127_vm8, %v5615_v18, %v11071_v2 }
 0x5bd   : > { %v11092_v55 = vpop.permute.xlu1 %4999  ;;  %v11094_v21 = vpop.permute.xlu0 %5047  ;;  %v5695_v9 = vsel %vm5127_vm8, %v5694_v53, %v11074_v0  ;;  %v5394_v63 = vsel %vm5148_vm11, %v5393_v24, %v5389_v51  ;;  %vm11839_vm7 = vcmask 1042434   ;;  %v5468_v2 = vsel %vm5141_vm10, %v5467_v54, %v5463_v44 }
 0x5be   : > { %v5699_v17 = vrot.slane %v11094_v21, %v12325_v16 }
 0x5c1   : > { %v11104_v13 = vpop.permute.xlu1 %4864  ;;  %v11106_v37 = vpop.permute.xlu0 %4909 }
 0x5c2   : > { %v5398_v59 = vrot.slane %v11104_v13, %v12357_v23  ;;  %v5472_v10 = vrot.slane %v11106_v37, %v12329_v39  ;;  %v5547_v37 = vsel %vm5141_vm10, %v5546_v43, %v5542_v32 }
 0x5c4   : > { %v5473_v22 = vsel %vm5148_vm11, %v5472_v10, %v5468_v2 }
 0x5c5   : > { %v11121_v61 = vpop.permute.xlu1 %4957  ;;  %v11123_v11 = vpop.permute.xlu0 %5002 }
 0x5c6   : > { %v5551_v13 = vrot.slane %v11121_v61, %v12329_v39  ;;  %v5399_v61 = vsel %vm5155_vm12, %v5398_v59, %v5394_v63 }
 0x5c8   : > { %v5552_v48 = vsel %vm5148_vm11, %v5551_v13, %v5547_v37 }
 0x5c9   : > { %v11137_v45 = vpop.permute.xlu1 %5050  ;;  %v11139_v60 = vpop.permute.xlu0 %4867 }
 0x5ca   : > { %v5403_v25 = vrot.slane %v11139_v60, %v12361_v52  ;;  %v5704_v51 = vrot.slane %v11137_v45, %v12328_v38 }
 0x5cc   : > { %v5404_v34 = vsel %vm11841_vm13, %v5403_v25, %v5399_v61 }
 0x5cd   : > { %v11153_v33 = vpop.permute.xlu1 %4912  ;;  %v11155_v50 = vpop.permute.xlu0 %4960 }
 0x5ce   : > { %v5477_v0 = vrot.slane %v11153_v33, %v12357_v23  ;;  %v5556_v60 = vrot.slane %v11155_v50, %v12357_v23  ;;  %v5620_v33 = vrot.slane %v11092_v55, %v12325_v16 }
 0x5d0   : > { %v5478_v55 = vsel %vm5155_vm12, %v5477_v0, %v5473_v22  ;;  %v5557_v18 = vsel %vm5155_vm12, %v5556_v60, %v5552_v48 }
 0x5d1   : > { %v11169_v31 = vpop.permute.xlu1 %5005  ;;  %v11171_v56 = vpop.permute.xlu0 %5053 }
 0x5d2   : > { %v5709_v59 = vrot.slane %v11171_v56, %v12329_v39  ;;  %v5621_v56 = vsel %vm5134_vm9, %v5620_v33, %v5616_v58 }
 0x5d5   : > { %v11185_v42 = vpop.permute.xlu1 %4870  ;;  %v11187_v27 = vpop.permute.xlu0 %4915 }
 0x5d6   : > { %v5408_v62 = vrot.slane %v11185_v42, %v12337_v49  ;;  %v5482_v42 = vrot.slane %v11187_v27, %v12361_v52 }
 0x5d8   : > { %v5409_v27 = vsel %vm5169_vm14, %v5408_v62, %v5404_v34  ;;  %v5483_v54 = vsel %vm11841_vm13, %v5482_v42, %v5478_v55 }
 0x5d9   : > { %v11201_v40 = vpop.permute.xlu1 %4963  ;;  %v11203_v1 = vpop.permute.xlu0 %5008 }
 0x5da   : > { %v5561_v28 = vrot.slane %v11201_v40, %v12361_v52  ;;  %v5625_v40 = vrot.slane %v11123_v11, %v12328_v38  ;;  %v5630_v11 = vrot.slane %v11169_v31, %v12329_v39  ;;  %v5635_v10 = vrot.slane %v11203_v1, %v12357_v23 }
 0x5dc   : > { %v5562_v21 = vsel %vm11841_vm13, %v5561_v28, %v5557_v18 }
 0x5dd   : > { %v11215_v35 = vpop.permute.xlu1 %5056  ;;  %v4874_v36 = vpop.permute.xlu0 %4873 }
 0x5de   : > { %v5413_v19 = vrot.slane %v4874_v36, %v12338_v6  ;;  %v5714_v45 = vrot.slane %v11215_v35, %v12357_v23 }
 0x5e0   : > { %v5414_v53 = vsel %vm5176_vm15, %v5413_v19, %v5409_v27  ;;  %v5626_v19 = vsel %vm5141_vm10, %v5625_v40, %v5621_v56 }
 0x5e1   : > { %v4919_v12 = vpop.permute.xlu1 %4918  ;;  %v4967_v3 = vpop.permute.xlu0 %4966  ;;  %v5737_v32 = vsel %vm11840_vm0, %v5414_v53, %v5256_v5  ;;  %v5700_v5 = vsel %vm5134_vm9, %v5699_v17, %v5695_v9  ;;  %v5631_v37 = vsel %vm5148_vm11, %v5630_v11, %v5626_v19  ;;  %vm5735_vm0 = vcmask 1043459   ;;  %v6934_v53 = vld [vmem:[#allocation8] ss:$0 sm:$0xff]  ;;  %v12368_v19 = vld [vmem:[#allocation76_spill] sm:$0xff] }
 0x5e2   : > { %v5487_v50 = vrot.slane %v4919_v12, %v12337_v49  ;;  %v5566_v36 = vrot.slane %v4967_v3, %v12337_v49  ;;  %v5705_v1 = vsel %vm5141_vm10, %v5704_v51, %v5700_v5  ;;  %v5636_v58 = vsel %vm5155_vm12, %v5635_v10, %v5631_v37 }
 0x5e3   : > { %v5710_v61 = vsel %vm5148_vm11, %v5709_v59, %v5705_v1  ;;  %v6076_v1 = vrot.slane %v12368_v19, %v9886_v29  ;;  %v12388_v19 = vld [vmem:[#allocation44_spill] sm:$0xff] }
 0x5e4   : > { %v5488_v44 = vsel %vm5169_vm14, %v5487_v50, %v5483_v54  ;;  %v5567_v43 = vsel %vm5169_vm14, %v5566_v36, %v5562_v21  ;;  %v5715_v9 = vsel %vm5155_vm12, %v5714_v45, %v5710_v61  ;;  %v12370_v61 = vld [vmem:[#allocation84_spill] sm:$0xff] }
 0x5e5   : > { %v5012_v26 = vpop.permute.xlu1 %5011  ;;  %v5060_v20 = vpop.permute.xlu0 %5059 }
 0x5e6   : > { %v5640_v0 = vrot.slane %v5012_v26, %v12361_v52  ;;  %v5719_v60 = vrot.slane %v5060_v20, %v12361_v52 }
 0x5e8   : > { %v5641_v20 = vsel %vm11841_vm13, %v5640_v0, %v5636_v58  ;;  %v5720_v28 = vsel %vm11841_vm13, %v5719_v60, %v5715_v9  ;;  %vm5758_vm13 = vcmask 3072   ;;  %v6567_v60 = vld [vmem:[#allocation9] sm:$0x1]  ;;  %v6086_v58 = vrot.slane %v12370_v61, %v9914_v14  ;;  %v12371_v9 = vld [vmem:[#allocation81_spill] sm:$0xff]  ;;  %v12390_v61 = vld [vmem:[#allocation48_spill] sm:$0xff] }
 0x5e9   : > { %v4922_v8 = vpop.permute.xlu1 %4921  ;;  %v4970_v24 = vpop.permute.xlu0 %4969 }
 0x5ea   : > { %v5492_v12 = vrot.slane %v4922_v8, %v12338_v6  ;;  %v5571_v3 = vrot.slane %v4970_v24, %v12338_v6  ;;  %v5756_v8 = vld [vmem:[%s11708_s9] sm:$0xf] }
 0x5ec   : > { %v5493_v25 = vsel %vm5176_vm15, %v5492_v12, %v5488_v44  ;;  %v5572_v63 = vsel %vm5176_vm15, %v5571_v3, %v5567_v43 }
 0x5ed   : > { %v5734_v31 = vsel %vm11839_vm7, %v5493_v25, %v5732_v7  ;;  %v5738_v13 = vsel %vm11839_vm7, %v5572_v63, %v5737_v32  ;;  %v5015_v62 = vpop.permute.xlu1 %5014  ;;  %v5063_v2 = vpop.permute.xlu0 %5062  ;;  %vm5742_vm7 = vcmask 1043456  }
 0x5ee   : > { %v5645_v35 = vrot.slane %v5015_v62, %v12337_v49  ;;  %v5724_v7 = vrot.slane %v5063_v2, %v12337_v49 }
 0x5f0   : > { %v5646_v50 = vsel %vm5169_vm14, %v5645_v35, %v5641_v20  ;;  %v5725_v36 = vsel %vm5169_vm14, %v5724_v7, %v5720_v28  ;;  %v12369_v35 = vld [vmem:[#allocation77_spill] sm:$0xff]  ;;  %v12372_v28 = vld [vmem:[#allocation92_spill] sm:$0xff] }
 0x5f1   : > { %v5018_v42 = vpop.permute.xlu1 %5017  ;;  %v5066_v26 = vpop.permute.xlu0 %5065  ;;  %v6072_v7 = vrot.slane %v12369_v35, %v9881_v41 }
 0x5f2   : > { %v5650_v33 = vrot.slane %v5018_v42, %v12338_v6  ;;  %v5729_v34 = vrot.slane %v5066_v26, %v12338_v6  ;;  %v6081_v42 = vrot.slane %v12371_v9, %v9900_v57 }
 0x5f3   : > { %v6077_v37 = vsel %vm5078_vm1, %v6076_v1, %v6072_v7  ;;  %v6170_v1 = vrot.slane %v12388_v19, %v12315_v30  ;;  %v12389_v7 = vld [vmem:[#allocation117_spill] sm:$0xff]  ;;  %v12407_v19 = vld [vmem:[#allocation120_spill] sm:$0xff] }
 0x5f4   : > { %v5651_v17 = vsel %vm5176_vm15, %v5650_v33, %v5646_v50  ;;  %v5730_v22 = vsel %vm5176_vm15, %v5729_v34, %v5725_v36  ;;  %v6082_v26 = vsel %vm5085_vm2, %v6081_v42, %v6077_v37  ;;  %v6096_v33 = vrot.slane %v12372_v28, %v12316_v46  ;;  %v12373_v34 = vld [vmem:[#allocation85_spill] sm:$0xff]  ;;  %v12391_v42 = vld [vmem:[#allocation135_spill] sm:$0xff] }
 0x5f5   : > { %v5736_v48 = vsel %vm5735_vm0, %v5651_v17, %v5734_v31  ;;  %v5739_v27 = vsel %vm5735_vm0, %v5730_v22, %v5738_v13  ;;  %v6087_v20 = vsel %vm5092_vm3, %v6086_v58, %v6082_v26  ;;  %v6091_v50 = vrot.slane %v12373_v34, %v12315_v30  ;;  %v12374_v22 = vld [vmem:[#allocation100_spill] sm:$0xff] }
 0x5f6   : > { %v5743_v40 = vsel %vm5742_vm7, %v5736_v48, 0.0  ;;  %v5744_v55 = vsel %vm5742_vm7, %v5739_v27, 0.0  ;;  %v6106_v48 = vrot.slane %v12374_v22, %v12320_v47  ;;  %v12375_v27 = vld [vmem:[#allocation30_spill] sm:$0xff]  ;;  %v6180_v37 = vrot.slane %v12389_v7, %v12319_v15  ;;  %v12395_v22 = vld [vmem:[#allocation60_spill] sm:$0xff] }
 0x5f7   : > { %v5745_v18 = vadd.f32 %v5744_v55, %v5743_v40  ;;  %v6092_v36 = vsel %vm5099_vm4, %v6091_v50, %v6087_v20  ;;  %v6101_v40 = vrot.slane %v12375_v27, %v12319_v15  ;;  %v12376_v55 = vld [vmem:[#allocation129_spill] sm:$0xff]  ;;  %v6190_v58 = vrot.slane %v12390_v61, %v12324_v4  ;;  %v12394_v50 = vld [vmem:[#allocation56_spill] sm:$0xff]  ;;  %v12409_v7 = vld [vmem:[#allocation174_spill] sm:$0xff] }
 0x5f8   : > { %v6097_v17 = vsel %vm5106_vm5, %v6096_v33, %v6092_v36  ;;  %v6175_v26 = vrot.slane %v12391_v42, %v12316_v46  ;;  %v12392_v20 = vld [vmem:[#allocation121_spill] sm:$0xff]  ;;  %v12393_v33 = vld [vmem:[#allocation52_spill] sm:$0xff]  ;;  %v6309_v61 = vrot.slane %v12409_v7, %v9881_v41  ;;  %v12418_v7 = vld [vmem:[#allocation186_spill] sm:$0xff] }
 0x5f9   : > { %5746 = vadd.xlane.f32.xlu1 %v5745_v18  ;;  %v6155_v18 = vrot.slane %v12376_v55, %v9886_v29  ;;  %v6200_v28 = vrot.slane %v12392_v20, %v12328_v38  ;;  %v6210_v34 = vrot.slane %v12393_v33, %v12357_v23  ;;  %v12396_v27 = vld [vmem:[#allocation64_spill] sm:$0xff]  ;;  %v12444_v20 = vld [vmem:[#allocation197_spill] sm:$0xff] }
 0x5fa   : > { %v12426_v36 = vld [vmem:[#allocation188_spill] sm:$0xff] }
 0x682   : > { %v5747_v24 = vpop.xlane.xlu1 %5746 }
 0x683   : > { %v5755_v54 = vadd.f32 %v6934_v53, %v5747_v24  ;;  %v6102_v53 = vsel %vm5113_vm6, %v6101_v40, %v6097_v17 }
 0x685   : > { %v5757_v21 = vsub.f32 %v5755_v54, %v5756_v8  ;;  %v12377_v8 = vld [vmem:[#allocation40_spill] sm:$0xff] }
 0x686   : > { %v6151_v24 = vrot.slane %v12377_v8, %v9881_v41  ;;  %v12398_v8 = vld [vmem:[#allocation68_spill] sm:$0xff] }
 0x687   : > { %v5759_v12 = vsel %vm5758_vm13, %v5757_v21, -inf }
 0x688   : > { %v5760_v3 = vrot.slane %v5759_v12, 4 }
 0x68a   : > { %v5761_v51 = vmax.f32 %v5759_v12, %v5760_v3  ;;  %v12380_v3 = vld [vmem:[#allocation32_spill] sm:$0xff] }
 0x68c   : > { %v5762_v11 = vrot.slane %v5761_v51, 2 }
 0x68e   : > { %v5763_v44 = vmax.f32 %v5761_v51, %v5762_v11  ;;  %v6111_v51 = vrot.slane %v12380_v3, %v12324_v4  ;;  %v6156_v11 = vsel %vm5078_vm1, %v6155_v18, %v6151_v24  ;;  %v12397_v18 = vld [vmem:[#allocation124_spill] sm:$0xff] }
 0x690   : > { %v5764_v43 = vrot.slane %v5763_v44, 1 }
 0x692   : > { %v5765_v59 = vmax.f32 %v5763_v44, %v5764_v43  ;;  %v12381_v44 = vld [vmem:[#allocation132_spill] sm:$0xff] }
 0x693   : > { %v6165_v43 = vrot.slane %v12381_v44, %v9914_v14 }
 0x694   : > { %v5766_v32 = vsub.f32 %v5757_v21, %v5765_v59  ;;  %v12379_v21 = vld [vmem:[#allocation108_spill] sm:$0xff]  ;;  %v12382_v59 = vld [vmem:[#allocation113_spill] sm:$0xff] }
 0x695   : > { %v6116_v12 = vrot.slane %v12379_v21, %v12325_v16 }
 0x696   : > { %v5767_v25 = vmul.f32 1.442695, %v5766_v32  ;;  %v6160_v32 = vrot.slane %v12382_v59, %v9900_v57 }
 0x698   : > { %7712 = vpow2.f32 %v5767_v25  ;;  %v6161_v35 = vsel %vm5085_vm2, %v6160_v32, %v6156_v11  ;;  %v12401_v11 = vld [vmem:[#allocation88_spill] sm:$0xff] }
 0x699   : > { %v6166_v9 = vsel %vm5092_vm3, %v6165_v43, %v6161_v35  ;;  %v6259_v44 = vrot.slane %v12401_v11, %v12319_v15  ;;  %v12402_v43 = vld [vmem:[#allocation96_spill] sm:$0xff] }
 0x69a   : > { %v6269_v59 = vrot.slane %v12402_v43, %v12324_v4  ;;  %v12455_v43 = vld [vmem:[#allocation215_spill] sm:$0xff] }
 0x6a5   : > { %v7713_v63 = vpop.eup %7712 }
 0x6a6   : > { %v5769_v10 = vsel %vm5758_vm13, %v7713_v63, 0.0 }
 0x6a7   : > { %v5770_v45 = vrot.slane %v5769_v10, 4 }
 0x6a9   : > { %v5771_v31 = vadd.f32 %v5770_v45, %v5769_v10  ;;  %v12384_v45 = vld [vmem:[#allocation34_spill] sm:$0xff] }
 0x6ab   : > { %v5772_v13 = vrot.slane %v5771_v31, 2 }
 0x6ad   : > { %v5773_v62 = vadd.f32 %v5772_v13, %v5771_v31  ;;  %v6121_v31 = vrot.slane %v12384_v45, %v12328_v38 }
 0x6af   : > { %v5774_v2 = vrot.slane %v5773_v62, 1 }
 0x6b1   : > { %v5775_v56 = vadd.f32 %v5774_v2, %v5773_v62  ;;  %v12385_v62 = vld [vmem:[#allocation116_spill] sm:$0xff] }
 0x6b2   : > { %v6126_v2 = vrot.slane %v12385_v62, %v12329_v39 }
 0x6b3   : > { %7714 = vrcp.f32 %v5775_v56  ;;  %v12386_v56 = vld [vmem:[#allocation36_spill] sm:$0xff] }
 0x6c0   : > { %v7715_v5 = vpop.eup %7714 }
 0x6c1   : > { %v5777_v0 = vmul.f32 %v7715_v5, %v7713_v63  ;;  %v12383_v63 = vld [vmem:[#allocation73_spill] sm:$0xff]  ;;  %v6131_v5 = vrot.slane %v12386_v56, %v12357_v23 }
 0x6c2   : > { %v6062_v10 = vrot.slane %v12383_v63, %v12337_v49 }
 0x6c3   : > { %5780 = vperm.xlu0 %7454, %v5777_v0   ;;  %6603 = vst.msk [vmem:[%s487_s8] sm:$0xf] %vm5758_vm13, %v5777_v0  ;;  %vm12378_vm13 = vcmask 523712   ;;  %v12387_v0 = vld [vmem:[#allocation38_spill] sm:$0xff] }
 0x6c4   : > { %v6107_v54 = vsel %vm12378_vm13, %v6106_v48, %v6102_v53  ;;  %v6230_v48 = vrot.slane %v12395_v22, %v9881_v41  ;;  %v11410_v40 = vsel %vm5169_vm14, %v6062_v10, %v12396_v27  ;;  %v6136_v53 = vrot.slane %v12397_v18, %v12361_v52  ;;  %v12404_v10 = vld [vmem:[#allocation104_spill] sm:$0xff]  ;;  %v12412_v22 = vld [vmem:[#allocation219_spill] sm:$0xff] }
 0x6c5   : > { %v6112_v25 = vsel %vm5127_vm8, %v6111_v51, %v6107_v54  ;;  %v12399_v54 = vld [vmem:[#allocation72_spill] sm:$0xff]  ;;  %v6171_v51 = vsel %vm5099_vm4, %v6170_v1, %v6166_v9  ;;  %v6279_v45 = vrot.slane %v12404_v10, %v12328_v38  ;;  %vm12408_vm13 = vcmask 917312   ;;  %v12410_v9 = vld [vmem:[#allocation205_spill] sm:$0xff] }
 0x6c6   : > { %v6117_v13 = vsel %vm5134_vm9, %v6116_v12, %v6112_v25  ;;  %v6239_v21 = vrot.slane %v12399_v54, %v9900_v57  ;;  %v12400_v12 = vld [vmem:[#allocation80_spill] sm:$0xff]  ;;  %v6176_v32 = vsel %vm5106_vm5, %v6175_v26, %v6171_v51  ;;  %v6313_v42 = vrot.slane %v12410_v9, %v9886_v29  ;;  %v12411_v26 = vld [vmem:[#allocation175_spill] sm:$0xff] }
 0x6c7   : > { %6570 = vperm.xlu0 %7454, %v6567_v60   ;;  %v6122_v17 = vsel %vm5141_vm10, %v6121_v31, %v6117_v13  ;;  %v6249_v3 = vrot.slane %v12400_v12, %v12315_v30  ;;  %v12403_v25 = vld [vmem:[#allocation180_spill] sm:$0xff]  ;;  %v6392_v27 = vrot.slane %v12412_v22, %v9886_v29  ;;  %v12415_v12 = vld [vmem:[#allocation177_spill] sm:$0xff]  ;;  %v12419_v9 = vld [vmem:[#allocation191_spill] sm:$0xff]  ;;  %v6397_v60 = vrot.slane %v12426_v36, %v9900_v57 }
 0x6c8   : > { %v6127_v55 = vsel %vm5148_vm11, %v6126_v2, %v6122_v17  ;;  %v6185_v63 = vrot.slane %v12403_v25, %v12320_v47  ;;  %v12405_v31 = vld [vmem:[#allocation112_spill] sm:$0xff]  ;;  %v12406_v2 = vld [vmem:[#allocation189_spill] sm:$0xff]  ;;  %v6328_v51 = vrot.slane %v12415_v12, %v12315_v30  ;;  %v12416_v25 = vld [vmem:[#allocation178_spill] sm:$0xff]  ;;  %v6244_v22 = vrot.slane %v12419_v9, %v9914_v14 }
 0x6c9   : > { %v6289_v13 = vrot.slane %v12405_v31, %v12357_v23  ;;  %v6132_v62 = vsel %vm5155_vm12, %v6131_v5, %v6127_v55  ;;  %v6234_v56 = vrot.slane %v12406_v2, %v9886_v29  ;;  %v6181_v5 = vsel %vm5113_vm6, %v6180_v37, %v6176_v32  ;;  %v12413_v55 = vld [vmem:[#allocation226_spill] sm:$0xff]  ;;  %v12422_v12 = vld [vmem:[#allocation181_spill] sm:$0xff] }
 0x6ca   : > { %v11439_v35 = vsel %vm12408_vm13, %v6136_v53, %v6132_v62  ;;  %v6471_v18 = vrot.slane %v12413_v55, %v9886_v29  ;;  %v12414_v53 = vld [vmem:[#allocation176_spill] sm:$0xff]  ;;  %v6338_v62 = vrot.slane %v12416_v25, %v12319_v15  ;;  %vm12417_vm13 = vcmask 523712   ;;  %v12420_v29 = vld [vmem:[#allocation202_spill] sm:$0xff] }
 0x6cb   : > { %v6318_v54 = vrot.slane %v12414_v53, %v9900_v57  ;;  %v6186_v2 = vsel %vm12417_vm13, %v6185_v63, %v6181_v5  ;;  %v6388_v37 = vrot.slane %v12418_v7, %v9881_v41  ;;  %v6235_v32 = vsel %vm5078_vm1, %v6234_v56, %v6230_v48  ;;  %v12421_v53 = vld [vmem:[#allocation179_spill] sm:$0xff] }
 0x6cc   : > { %v6467_v55 = vrot.slane %v12420_v29, %v9881_v41  ;;  %v6348_v24 = vrot.slane %v12421_v53, %v12324_v4  ;;  %v6358_v1 = vrot.slane %v12422_v12, %v12328_v38  ;;  %v6314_v25 = vsel %vm5078_vm1, %v6313_v42, %v6309_v61  ;;  %v12423_v63 = vld [vmem:[#allocation207_spill] sm:$0xff]  ;;  %v12427_v42 = vld [vmem:[#allocation204_spill] sm:$0xff] }
 0x6cd   : > { %v6323_v5 = vrot.slane %v12423_v63, %v9914_v14  ;;  %v6393_v7 = vsel %vm5078_vm1, %v6392_v27, %v6388_v37  ;;  %v12424_v48 = vld [vmem:[#allocation43_spill] sm:$0xff]  ;;  %v6191_v17 = vsel %vm5127_vm8, %v6190_v58, %v6186_v2  ;;  %v6240_v61 = vsel %vm5085_vm2, %v6239_v21, %v6235_v32  ;;  %v12428_v27 = vld [vmem:[#allocation140_spill] sm:$0xff]  ;;  %v12430_v2 = vld [vmem:[#allocation209_spill] sm:$0xff] }
 0x6ce   : > { %v6402_v56 = vrot.slane %v12424_v48, %v9914_v14  ;;  %v6472_v9 = vsel %vm5078_vm1, %v6471_v18, %v6467_v55  ;;  %v12425_v41 = vld [vmem:[#allocation227_spill] sm:$0xff]  ;;  %v6476_v63 = vrot.slane %v12427_v42, %v9900_v57  ;;  %v6195_v37 = vrot.slane %v12428_v27, %v12325_v16  ;;  %v12429_v18 = vld [vmem:[#allocation193_spill] sm:$0xff]  ;;  %vm12443_vm1 = vmmov %vm12417_vm13 }
 0x6cf   : > { %v6481_v29 = vrot.slane %v12425_v41, %v9914_v14  ;;  %v6245_v48 = vsel %vm5092_vm3, %v6244_v22, %v6240_v61  ;;  %v6254_v55 = vrot.slane %v12429_v18, %v12316_v46  ;;  %v6319_v14 = vsel %vm5085_vm2, %v6318_v54, %v6314_v25  ;;  %v12431_v41 = vld [vmem:[#allocation220_spill] sm:$0xff]  ;;  %v12433_v54 = vld [vmem:[#allocation182_spill] sm:$0xff] }
 0x6d0   : > { %v6324_v58 = vsel %vm5092_vm3, %v6323_v5, %v6319_v14  ;;  %v6333_v36 = vrot.slane %v12430_v2, %v12316_v46  ;;  %v6398_v21 = vsel %vm5085_vm2, %v6397_v60, %v6393_v7  ;;  %v6477_v32 = vsel %vm5085_vm2, %v6476_v63, %v6472_v9  ;;  %v12432_v61 = vld [vmem:[#allocation228_spill] sm:$0xff]  ;;  %v12434_v5 = vld [vmem:[#allocation190_spill] sm:$0xff]  ;;  %vm12445_vm2 = vmmov %vm12443_vm1 }
 0x6d1   : > { %v6403_v57 = vsel %vm5092_vm3, %v6402_v56, %v6398_v21  ;;  %v6412_v42 = vrot.slane %v12431_v41, %v12316_v46  ;;  %v6482_v22 = vsel %vm5092_vm3, %v6481_v29, %v6477_v32  ;;  %v6491_v27 = vrot.slane %v12432_v61, %v12316_v46  ;;  %v12435_v7 = vld [vmem:[#allocation206_spill] sm:$0xff]  ;;  %v12436_v29 = vld [vmem:[#allocation195_spill] sm:$0xff]  ;;  %vm12447_vm3 = vmmov %vm12443_vm1 }
 0x6d2   : > { %v6368_v25 = vrot.slane %v12433_v54, %v12357_v23  ;;  %v6407_v18 = vrot.slane %v12434_v5, %v12315_v30  ;;  %v6250_v60 = vsel %vm5099_vm4, %v6249_v3, %v6245_v48  ;;  %v6486_v9 = vrot.slane %v12435_v7, %v12315_v30  ;;  %v12437_v21 = vld [vmem:[#allocation211_spill] sm:$0xff]  ;;  %v12446_v7 = vld [vmem:[#allocation213_spill] sm:$0xff] }
 0x6d3   : > { %v6196_v56 = vsel %vm5134_vm9, %v6195_v37, %v6191_v17  ;;  %v6255_v63 = vsel %vm5106_vm5, %v6254_v55, %v6250_v60  ;;  %v6264_v14 = vrot.slane %v12436_v29, %v12320_v47  ;;  %v6329_v46 = vsel %vm5099_vm4, %v6328_v51, %v6324_v58  ;;  %v12438_v17 = vld [vmem:[#allocation221_spill] sm:$0xff]  ;;  %v12440_v58 = vld [vmem:[#allocation192_spill] sm:$0xff] }
 0x6d4   : > { %v6334_v2 = vsel %vm5106_vm5, %v6333_v36, %v6329_v46  ;;  %v6343_v32 = vrot.slane %v12437_v21, %v12320_v47  ;;  %v6408_v41 = vsel %vm5099_vm4, %v6407_v18, %v6403_v57  ;;  %v6487_v3 = vsel %vm5099_vm4, %v6486_v9, %v6482_v22  ;;  %v12439_v55 = vld [vmem:[#allocation229_spill] sm:$0xff]  ;;  %vm12449_vm4 = vmmov %vm12443_vm1  ;;  %v12452_v21 = vld [vmem:[#allocation194_spill] sm:$0xff] }
 0x6d5   : > { %v6413_v30 = vsel %vm5106_vm5, %v6412_v42, %v6408_v41  ;;  %v6422_v37 = vrot.slane %v12438_v17, %v12320_v47  ;;  %v6492_v48 = vsel %vm5106_vm5, %v6491_v27, %v6487_v3  ;;  %v6501_v61 = vrot.slane %v12439_v55, %v12320_v47  ;;  %v12441_v42 = vld [vmem:[#allocation208_spill] sm:$0xff]  ;;  %v12442_v27 = vld [vmem:[#allocation183_spill] sm:$0xff]  ;;  %v12453_v3 = vld [vmem:[#allocation210_spill] sm:$0xff] }
 0x6d6   : > { %v6201_v51 = vsel %vm5141_vm10, %v6200_v28, %v6196_v56  ;;  %v6417_v36 = vrot.slane %v12440_v58, %v12319_v15  ;;  %v6260_v57 = vsel %vm5113_vm6, %v6259_v44, %v6255_v63  ;;  %v6496_v22 = vrot.slane %v12441_v42, %v12319_v15  ;;  %v12448_v56 = vld [vmem:[#allocation222_spill] sm:$0xff] }
 0x6d7   : > { %v6205_v5 = vrot.slane %v12442_v27, %v12329_v39  ;;  %v6265_v47 = vsel %vm12443_vm1, %v6264_v14, %v6260_v57  ;;  %v6274_v18 = vrot.slane %v12444_v20, %v12325_v16  ;;  %v6339_v28 = vsel %vm5113_vm6, %v6338_v62, %v6334_v2  ;;  %v12450_v14 = vld [vmem:[#allocation230_spill] sm:$0xff]  ;;  %v12451_v62 = vld [vmem:[#allocation184_spill] sm:$0xff]  ;;  %v12456_v57 = vld [vmem:[#allocation223_spill] sm:$0xff] }
 0x6d8   : > { %v6344_v60 = vsel %vm12445_vm2, %v6343_v32, %v6339_v28  ;;  %v6353_v11 = vrot.slane %v12446_v7, %v12325_v16  ;;  %v6418_v44 = vsel %vm5113_vm6, %v6417_v36, %v6413_v30  ;;  %v6497_v9 = vsel %vm5113_vm6, %v6496_v22, %v6492_v48  ;;  %v12461_v7 = vld [vmem:[#allocation201_spill] sm:$0xff] }
 0x6d9   : > { %v6423_v15 = vsel %vm12447_vm3, %v6422_v37, %v6418_v44  ;;  %v6432_v63 = vrot.slane %v12448_v56, %v12325_v16  ;;  %v6502_v29 = vsel %vm12449_vm4, %v6501_v61, %v6497_v9  ;;  %v6511_v46 = vrot.slane %v12450_v14, %v12325_v16  ;;  %v12454_v16 = vld [vmem:[#allocation199_spill] sm:$0xff]  ;;  %v12462_v44 = vld [vmem:[#allocation216_spill] sm:$0xff]  ;;  %v12466_v14 = vld [vmem:[#allocation198_spill] sm:$0xff] }
 0x6da   : > { %v6378_v2 = vrot.slane %v12451_v62, %v12337_v49  ;;  %v6427_v32 = vrot.slane %v12452_v21, %v12324_v4  ;;  %v6270_v41 = vsel %vm5127_vm8, %v6269_v59, %v6265_v47  ;;  %v6506_v30 = vrot.slane %v12453_v3, %v12324_v4  ;;  %v12457_v4 = vld [vmem:[#allocation231_spill] sm:$0xff]  ;;  %v12463_v56 = vld [vmem:[#allocation224_spill] sm:$0xff]  ;;  %v12467_v21 = vld [vmem:[#allocation214_spill] sm:$0xff] }
 0x6db   : > { %v6206_v17 = vsel %vm5148_vm11, %v6205_v5, %v6201_v51  ;;  %v6275_v37 = vsel %vm5134_vm9, %v6274_v18, %v6270_v41  ;;  %v6284_v48 = vrot.slane %v12454_v16, %v12329_v39  ;;  %v6349_v55 = vsel %vm5127_vm8, %v6348_v24, %v6344_v60  ;;  %v12458_v24 = vld [vmem:[#allocation185_spill] sm:$0xff]  ;;  %v12459_v5 = vld [vmem:[#allocation196_spill] sm:$0xff]  ;;  %v12468_v41 = vld [vmem:[#allocation187_spill] sm:$0xff] }
 0x6dc   : > { %v6354_v61 = vsel %vm5134_vm9, %v6353_v11, %v6349_v55  ;;  %v6363_v59 = vrot.slane %v12455_v43, %v12329_v39  ;;  %v6428_v58 = vsel %vm5127_vm8, %v6427_v32, %v6423_v15  ;;  %v6507_v36 = vsel %vm5127_vm8, %v6506_v30, %v6502_v29  ;;  %v12460_v18 = vld [vmem:[#allocation212_spill] sm:$0xff]  ;;  %v12474_v43 = vld [vmem:[#allocation225_spill] sm:$0xff] }
 0x6dd   : > { %v6433_v51 = vsel %vm5134_vm9, %v6432_v63, %v6428_v58  ;;  %v6442_v42 = vrot.slane %v12456_v57, %v12329_v39  ;;  %v6512_v22 = vsel %vm5134_vm9, %v6511_v46, %v6507_v36  ;;  %v6521_v53 = vrot.slane %v12457_v4, %v12329_v39  ;;  %v12480_v4 = vld [vmem:[#allocation217_spill] sm:$0xff] }
 0x6de   : > { %v6215_v27 = vrot.slane %v12458_v24, %v12361_v52  ;;  %v6437_v47 = vrot.slane %v12459_v5, %v12328_v38  ;;  %v6280_v20 = vsel %vm5141_vm10, %v6279_v45, %v6275_v37  ;;  %v6516_v28 = vrot.slane %v12460_v18, %v12328_v38  ;;  %v12464_v38 = vld [vmem:[#allocation232_spill] sm:$0xff] }
 0x6df   : > { %v6211_v60 = vsel %vm5155_vm12, %v6210_v34, %v6206_v17  ;;  %v6285_v39 = vsel %vm5148_vm11, %v6284_v48, %v6280_v20  ;;  %v6294_v11 = vrot.slane %v12461_v7, %v12361_v52  ;;  %v6359_v10 = vsel %vm5141_vm10, %v6358_v1, %v6354_v61 }
 0x6e0   : > { %v6364_v45 = vsel %vm5148_vm11, %v6363_v59, %v6359_v10  ;;  %v6373_v9 = vrot.slane %v12462_v44, %v12361_v52  ;;  %v6438_v15 = vsel %vm5141_vm10, %v6437_v47, %v6433_v51  ;;  %v6517_v33 = vsel %vm5141_vm10, %v6516_v28, %v6512_v22 }
 0x6e1   : > { %v6443_v34 = vsel %vm5148_vm11, %v6442_v42, %v6438_v15  ;;  %v6452_v63 = vrot.slane %v12463_v56, %v12361_v52  ;;  %v6522_v29 = vsel %vm5148_vm11, %v6521_v53, %v6517_v33  ;;  %v6531_v12 = vrot.slane %v12464_v38, %v12361_v52  ;;  %v12470_v52 = vld [vmem:[#allocation203_spill] sm:$0xff]  ;;  %v12479_v42 = vld [vmem:[#allocation200_spill] sm:$0xff] }
 0x6e2   : > { %vm12465_vm5 = vcmask 917312   ;;  %v6447_v46 = vrot.slane %v12466_v14, %v12357_v23  ;;  %v6290_v62 = vsel %vm5155_vm12, %v6289_v13, %v6285_v39  ;;  %v6526_v32 = vrot.slane %v12467_v21, %v12357_v23  ;;  %v12472_v13 = vld [vmem:[#allocation218_spill] sm:$0xff]  ;;  %v12476_v23 = vld [vmem:[#allocation233_spill] sm:$0xff] }
 0x6e3   : > { %v6216_v1 = vsel %vm12465_vm5, %v6215_v27, %v6211_v60  ;;  %v6225_v3 = vrot.slane %v12468_v41, %v12338_v6  ;;  %vm12469_vm6 = vmmov %vm12465_vm5  ;;  %v6304_v17 = vrot.slane %v12470_v52, %v12338_v6  ;;  %v6369_v37 = vsel %vm5155_vm12, %v6368_v25, %v6364_v45  ;;  %v12484_v39 = vld [vmem:[#allocation109_spill] sm:$0xff]  ;;  %v6935_v14 = vld.sshfl [vmem:[%s11710_s12] sm:$0x33 pattern:$0x76325410] }
 0x6e4   : > { %v6295_v30 = vsel %vm12469_vm6, %v6294_v11, %v6290_v62  ;;  %vm12471_vm8 = vmmov %vm12465_vm5  ;;  %v6383_v16 = vrot.slane %v12472_v13, %v12338_v6  ;;  %v6448_v48 = vsel %vm5155_vm12, %v6447_v46, %v6443_v34  ;;  %v6527_v55 = vsel %vm5155_vm12, %v6526_v32, %v6522_v29 }
 0x6e5   : > { %v6374_v31 = vsel %vm12471_vm8, %v6373_v9, %v6369_v37  ;;  %vm12473_vm9 = vmmov %vm12465_vm5  ;;  %v6462_v59 = vrot.slane %v12474_v43, %v12338_v6  ;;  %v6541_v54 = vrot.slane %v12476_v23, %v12338_v6  ;;  %v12477_v25 = vrot.slane %v12387_v0, %v12337_v49  ;;  %v6599_v43 = vld [vmem:[%s11711_s13] sm:$0x3] }
 0x6e6   : > { %v6453_v61 = vsel %vm12473_vm9, %v6452_v63, %v6448_v48  ;;  %vm12475_vm10 = vmmov %vm12465_vm5  ;;  %v12478_v51 = vrot.slane %v12394_v50, %v12337_v49  ;;  %v6457_v22 = vrot.slane %v12479_v42, %v12337_v49  ;;  %v6536_v53 = vrot.slane %v12480_v4, %v12337_v49 }
 0x6e7   : > { %v6532_v58 = vsel %vm12475_vm10, %v6531_v12, %v6527_v55  ;;  %v6142_v36 = vsel %vm5169_vm14, %v12477_v25, %v11439_v35  ;;  %v12481_v24 = vrot.slane %v12411_v26, %v12338_v6  ;;  %v12482_v35 = vrot.slane %v12407_v19, %v12337_v49 }
 0x6e8   : > { %v6221_v57 = vsel %vm5169_vm14, %v12478_v51, %v6216_v1  ;;  %v6379_v5 = vsel %vm5169_vm14, %v6378_v2, %v6374_v31  ;;  %v6458_v18 = vsel %vm5169_vm14, %v6457_v22, %v6453_v61  ;;  %v6537_v28 = vsel %vm5169_vm14, %v6536_v53, %v6532_v58 }
 0x6e9   : > { %v6147_v27 = vsel %vm5176_vm15, %v12481_v24, %v6142_v36  ;;  %v6226_v0 = vsel %vm5176_vm15, %v6225_v3, %v6221_v57  ;;  %v6300_v50 = vsel %vm5169_vm14, %v12482_v35, %v6295_v30  ;;  %v6384_v20 = vsel %vm5176_vm15, %v6383_v16, %v6379_v5  ;;  %v12489_v30 = vld [vmem:[#allocation65_spill] sm:$0xff] }
 0x6ea   : > { %v6305_v47 = vsel %vm5176_vm15, %v6304_v17, %v6300_v50  ;;  %v12483_v26 = vrot.slane %v12398_v8, %v12338_v6  ;;  %v6463_v49 = vsel %vm5176_vm15, %v6462_v59, %v6458_v18  ;;  %v6542_v19 = vsel %vm5176_vm15, %v6541_v54, %v6537_v28 }
 0x6eb   : > { %vm12485_vm11 = vcmask 1041409   ;;  %vm12487_vm13 = vcmask 1042434   ;;  %v6588_v3 = vcombine.high %v6935_v14, %v6935_v14  ;;  %v12490_v52 = vsub.s32 0, %v12489_v30 }
 0x6ec   : > { %v6068_v60 = vsel %vm5176_vm15, %v12483_v26, %v11410_v40  ;;  %v6543_v2 = vsel %vm12485_vm11, %v6147_v27, %v12484_v39  ;;  %vm12486_vm12 = vmmov %vm12485_vm11  ;;  %vm6601_vm14 = vcmask 1024  }
 0x6ed   : > { %v6546_v7 = vsel %vm12486_vm12, %v6226_v0, %v6068_v60  ;;  %v6544_v11 = vsel %vm12487_vm13, %v6305_v47, %v6543_v2  ;;  %vm12488_vm1 = vmmov %vm12487_vm13 }
 0x6ee   : > { %v6547_v10 = vsel %vm12488_vm1, %v6384_v20, %v6546_v7  ;;  %v6545_v45 = vsel %vm5735_vm0, %v6463_v49, %v6544_v11 }
 0x6ef   : > { %v6548_v44 = vsel %vm5735_vm0, %v6542_v19, %v6547_v10 }
 0x73e   : > { %v5781_v6 = vpop.permute.xlu0 %5780 }
 0x73f   : > { %v6551_v8 = vmul.f32 %v6545_v45, %v5781_v6  ;;  %v6552_v40 = vmul.f32 %v6548_v44, %v5781_v6 }
 0x741   : > { %v6553_v9 = vsel %vm5742_vm7, %v6551_v8, 0.0  ;;  %v6560_v15 = vsel %vm5742_vm7, %v6552_v40, 0.0  ;;  %vm6593_vm7 = vcmask 1041408  }
 0x742   : > { %v6554_v33 = vrot.slane %v6553_v9, 4  ;;  %v6561_v34 = vrot.slane %v6560_v15, 4  ;;  %v6571_v46 = vpop.permute.xlu0 %6570 }
 0x743   : > { %v6576_v17 = vrot.slane %v6571_v46, %v12490_v52 }
 0x744   : > { %v6555_v56 = vadd.f32 %v6554_v33, %v6553_v9  ;;  %v6562_v63 = vadd.f32 %v6561_v34, %v6560_v15 }
 0x746   : > { %v6556_v29 = vrot.slane %v6555_v56, 2  ;;  %v6563_v38 = vrot.slane %v6562_v63, 2 }
 0x748   : > { %v6557_v12 = vadd.f32 %v6556_v29, %v6555_v56  ;;  %v6564_v1 = vadd.f32 %v6563_v38, %v6562_v63 }
 0x74a   : > { %v6558_v62 = vrot.slane %v6557_v12, 1  ;;  %v6565_v21 = vrot.slane %v6564_v1, 1 }
 0x74c   : > { %v6559_v32 = vadd.f32 %v6558_v62, %v6557_v12  ;;  %v6566_v41 = vadd.f32 %v6565_v21, %v6564_v1 }
 0x74e   : > { %v6577_v37 = vadd.f32 %v6576_v17, %v6559_v32  ;;  %v6578_v31 = vadd.f32 %v6576_v17, %v6566_v41 }
 0x750   : > { %v6591_v13 = vmul.f32 %v6935_v14, %v6577_v37  ;;  %v6592_v16 = vmul.f32 %v6588_v3, %v6578_v31 }
 0x752   : > { %v6594_v48 = vsel %vm6593_vm7, %v6591_v13, 0.0  ;;  %v6595_v55 = vsel %vm6593_vm7, %v6592_v16, 0.0 }
 0x753   : > { %v6596_v61 = vadd.f32 %v6595_v55, %v6594_v48 }
 0x755   : > { %6597 = vadd.xlane.f32.xlu0 %v6596_v61 }
 0x7de   : > { %v6598_v59 = vpop.xlane.xlu0 %6597 }
 0x7df   : > { %v6600_v58 = vadd.f32 %v6599_v43, %v6598_v59 }
 0x7e1   : > { %6602 = vst.msk [vmem:[%s483_s22] sm:$0x3] %vm6601_vm14, %v6600_v58 }
 0x7e2 PF: > { %s42_s11 = sadd.s32 1, %s7751_s11  }
 0x7e3   : > { %p39_p0 = scmp.ge.s32.totalorder %s42_s11, 4  }
 0x7e5   :  { %41 = sbr.rel (!%p39_p0) target bundleno = 27 (0x1b), region = 121 }

</bundles_post_ra>
